<compile_context>
chip_gen: v7x
topology: tpu7x:2x2x1
jax: 0.10.0
libtpu: 0.0.40
codegen_flags: <defaults>
</compile_context>

<pallas_src>
import functools

import jax
import jax.numpy as jnp
from jax import lax
from jax.experimental import pallas as pl
from jax.experimental.pallas import tpu as pltpu


MATMUL_DTYPE = jnp.bfloat16  # MXU operand dtype (f32 accumulate everywhere)


# ---------------------------------------------------------------------------
# Kernel 1: fused qkv 1x1 conv  +  depthwise 3x3 conv (padding=1, groups=3c)
# ---------------------------------------------------------------------------
def _qkv_dwconv_kernel(x_ref, wq_ref, bq_ref, wd_ref, bd_ref, q_ref, k_ref, v_ref,
                       pad_ref):
    # x_ref  : (H, W, Cin)                      (batch dim squeezed by the BlockSpec)
    # wq_ref : (3, Cin, C), bq_ref: (3, 1, C)   -- 1x1 conv weights, chunk-major (q,k,v)
    # wd_ref : (3, 3, 3, C), bd_ref: (3, 1, C)  -- depthwise 3x3 weights, chunk-major
    # q/k/v_ref: (H, W, C)  bf16 outputs
    # pad_ref: (H+2, W+2, C) f32 VMEM scratch (zero border = implicit conv padding)
    H, W, cin = x_ref.shape
    C = q_ref.shape[-1]

    x2d = x_ref[...].reshape(H * W, cin).astype(MATMUL_DTYPE)
    out_refs = (q_ref, k_ref, v_ref)

    # Zero the whole padded scratch once per grid step; only the interior gets
    # rewritten per chunk, the border stays zero (the conv's zero padding).
    pad_ref[...] = jnp.zeros_like(pad_ref)

    for j in range(3):  # q, k, v chunks (static unroll)
        # pointwise conv on the MXU (bf16 operands, f32 accumulate)
        y = jnp.dot(x2d, wq_ref[j].astype(MATMUL_DTYPE),
                    preferred_element_type=jnp.float32)
        y = (y + bq_ref[j]).reshape(H, W, C)

        # stage the pointwise result into the interior of the padded scratch
        pad_ref[1:H + 1, 1:W + 1, :] = y

        # depthwise 3x3: accumulate the 9 shifted taps at the value level and
        # store the finished tile once (single unmasked full-tile store).
        wdj = wd_ref[j]  # (3, 3, C)
        acc = jnp.zeros((H, W, C), jnp.float32) + bd_ref[j].reshape(1, 1, C)
        for dy in range(3):
            for dx in range(3):
                acc = acc + pad_ref[dy:dy + H, dx:dx + W, :] * wdj[dy, dx, :]
        out_refs[j][...] = acc.astype(out_refs[j].dtype)


def qkv_dwconv(x_nhwc, wq, bq, wd, bd):
    # TODO(synk): for very large resolutions, tile over H with a 2-row halo
    # (manual DMA / pl.ANY) instead of one whole image per grid step.
    b, h, w, cin = x_nhwc.shape
    c = wq.shape[-1]
    out_sds = jax.ShapeDtypeStruct((b, h, w, c), MATMUL_DTYPE)
    out_spec = pl.BlockSpec((pl.Squeezed(), h, w, c), lambda i: (i, 0, 0, 0))
    return pl.pallas_call(
        _qkv_dwconv_kernel,
        out_shape=(out_sds, out_sds, out_sds),
        grid_spec=pltpu.PrefetchScalarGridSpec(
            num_scalar_prefetch=0,
            grid=(b,),
            in_specs=[
                pl.BlockSpec((pl.Squeezed(), h, w, cin), lambda i: (i, 0, 0, 0)),
                pl.BlockSpec((3, cin, c), lambda i: (0, 0, 0)),
                pl.BlockSpec((3, 1, c), lambda i: (0, 0, 0)),
                pl.BlockSpec((3, 3, 3, c), lambda i: (0, 0, 0, 0)),
                pl.BlockSpec((3, 1, c), lambda i: (0, 0, 0)),
            ],
            out_specs=(out_spec, out_spec, out_spec),
            scratch_shapes=[pltpu.VMEM((h + 2, w + 2, c), jnp.float32)],
        ),
        compiler_params=pltpu.CompilerParams(
            dimension_semantics=("parallel",),
            vmem_limit_bytes=48 * 1024 * 1024,
        ),
    )(x_nhwc, wq, bq, wd, bd)


# ---------------------------------------------------------------------------
# Kernel 2 (pass 1): all-heads Gram + post-matmul L2 normalization + softmax
# ---------------------------------------------------------------------------
def _attn_gram_softmax_kernel(q_ref, k_ref, temp_ref, bias_ref, attn_ref,
                              g_acc, sq_acc, sk_acc):
    # q_ref/k_ref: (hw_tile, c) channels-last bf16; temp_ref: (c, 1); bias_ref: (c, c)
    # attn_ref: (c, c); scratch: g_acc (c, c), sq_acc (c, 1), sk_acc (1, c)  (all f32)
    si = pl.program_id(1)

    @pl.when(si == 0)
    def _():
        g_acc[...] = jnp.zeros_like(g_acc)
        sq_acc[...] = jnp.zeros_like(sq_acc)
        sk_acc[...] = jnp.zeros_like(sk_acc)

    q = q_ref[...]                       # bf16
    k = k_ref[...]                       # bf16
    qf = q.astype(jnp.float32)
    kf = k.astype(jnp.float32)
    ones_col = jnp.ones((q.shape[0], 1), jnp.float32)
    dn = (((0,), (0,)), ((), ()))  # contract over the hw (sublane) dim, no transposes

    # Gram over this hw chunk (bf16 operands, f32 accumulate on the MXU).
    g_acc[...] += lax.dot_general(q, k, dn, preferred_element_type=jnp.float32)
    # Per-channel sum-of-squares, reduced in f32, produced directly in the
    # column / row layouts needed for the final scaling.
    sq_acc[...] += lax.dot_general(qf * qf, ones_col, dn,
                                   preferred_element_type=jnp.float32)   # (c, 1)
    sk_acc[...] += lax.dot_general(ones_col, kf * kf, dn,
                                   preferred_element_type=jnp.float32)   # (1, c)

    @pl.when(si == pl.num_programs(1) - 1)
    def _():
        # F.normalize(x, dim=-1): x / max(||x||, 1e-12)  ==  x * rsqrt(max(||x||^2, 1e-24))
        eps2 = jnp.float32(1e-24)
        inv_q = lax.rsqrt(jnp.maximum(sq_acc[...], eps2))   # (c, 1)
        inv_k = lax.rsqrt(jnp.maximum(sk_acc[...], eps2))   # (1, c)
        # L2 normalization commutes with the matmul; temperature is per q-row's head;
        # bias_ref holds 0 on same-head blocks and -1e30 elsewhere (per-head softmax).
        logits = g_acc[...] * (inv_q * temp_ref[...]) * inv_k + bias_ref[...]
        m = jnp.max(logits, axis=-1, keepdims=True)
        e = jnp.exp(logits - m)
        denom = jnp.sum(e, axis=-1, keepdims=True)
        attn_ref[...] = (e * pl.reciprocal(denom, approx=True)).astype(attn_ref.dtype)


# ---------------------------------------------------------------------------
# Kernel 3 (pass 2): out = attn @ v, hw-tiled, lane-dense (c, hw) output
# ---------------------------------------------------------------------------
def _attn_apply_kernel(attn_ref, v_ref, o_ref):
    # attn_ref: (c, c) f32; v_ref: (hw_tile, c) bf16; o_ref: (c, hw_tile) f32
    o_ref[...] = lax.dot_general(
        attn_ref[...].astype(MATMUL_DTYPE),
        v_ref[...],
        dimension_numbers=(((1,), (1,)), ((), ())),
        preferred_element_type=jnp.float32,
    ).astype(o_ref.dtype)


def _pick_hw_tile(hw):
    for t in (4096, 2048, 1024, 512, 256, 128):
        if hw % t == 0:
            return t
    return hw


def channel_attention(q, k, v, temp_col, head_bias):
    # q, k, v: (b, hw, c) channels-last bf16; temp_col: (c, 1); head_bias: (c, c)
    b, hw, c = q.shape
    hw_tile = _pick_hw_tile(hw)
    n_hw = hw // hw_tile
    qk_spec = pl.BlockSpec((pl.Squeezed(), hw_tile, c), lambda bi, si: (bi, si, 0))

    attn = pl.pallas_call(
        _attn_gram_softmax_kernel,
        out_shape=jax.ShapeDtypeStruct((b, c, c), jnp.float32),
        grid_spec=pltpu.PrefetchScalarGridSpec(
            num_scalar_prefetch=0,
            grid=(b, n_hw),
            in_specs=[
                qk_spec,
                qk_spec,
                pl.BlockSpec((c, 1), lambda bi, si: (0, 0)),
                pl.BlockSpec((c, c), lambda bi, si: (0, 0)),
            ],
            out_specs=pl.BlockSpec((pl.Squeezed(), c, c), lambda bi, si: (bi, 0, 0)),
            scratch_shapes=[
                pltpu.VMEM((c, c), jnp.float32),
                pltpu.VMEM((c, 1), jnp.float32),
                pltpu.VMEM((1, c), jnp.float32),
            ],
        ),
        compiler_params=pltpu.CompilerParams(
            dimension_semantics=("parallel", "arbitrary")),
    )(q, k, temp_col, head_bias)

    out = pl.pallas_call(
        _attn_apply_kernel,
        out_shape=jax.ShapeDtypeStruct((b, c, hw), jnp.float32),
        grid_spec=pltpu.PrefetchScalarGridSpec(
            num_scalar_prefetch=0,
            grid=(b, n_hw),
            in_specs=[
                pl.BlockSpec((pl.Squeezed(), c, c), lambda bi, si: (bi, 0, 0)),
                pl.BlockSpec((pl.Squeezed(), hw_tile, c), lambda bi, si: (bi, si, 0)),
            ],
            out_specs=pl.BlockSpec((pl.Squeezed(), c, hw_tile),
                                   lambda bi, si: (bi, 0, si)),
        ),
        compiler_params=pltpu.CompilerParams(
            dimension_semantics=("parallel", "parallel")),
    )(attn, v)
    return out


# ---------------------------------------------------------------------------
# full forward pass
# ---------------------------------------------------------------------------
def attention_forward(x, params, num_heads):
    b, c, h, w = x.shape
    ch = c // num_heads
    hw = h * w

    x_nhwc = jnp.transpose(x, (0, 2, 3, 1)).astype(jnp.float32)  # NCHW -> NHWC

    q4, k4, v4 = qkv_dwconv(x_nhwc, params["qkv_w"], params["qkv_b"],
                            params["dw_w"], params["dw_b"])
    # channels-last, flattened spatial (free reshapes, no relayout)
    q = q4.reshape(b, hw, c)
    k = k4.reshape(b, hw, c)
    v = v4.reshape(b, hw, c)

    # per-channel (head-expanded) temperature column and block-diagonal head-mask bias
    temp_col = jnp.repeat(params["temperature"], ch).reshape(c, 1).astype(jnp.float32)
    head_ids = jnp.repeat(jnp.arange(num_heads, dtype=jnp.int32), ch)
    head_bias = jnp.where(head_ids[:, None] == head_ids[None, :],
                          0.0, -1e30).astype(jnp.float32)

    out = channel_attention(q, k, v, temp_col, head_bias)   # (b, c, hw)
    # 'b (head c) (h w)' -> 'b head c (h w)': pure reshape, no data movement
    return out.reshape(b, num_heads, ch, hw)


def init_params(key, dim, num_heads):
    k1, k2, k3, k4 = jax.random.split(key, 4)
    return {
        # nn.Parameter(torch.ones(num_heads, 1, 1)) -> stored flat (num_heads,)
        "temperature": jnp.ones((num_heads,), jnp.float32),
        # Conv2d(dim, 3*dim, 1) weight (3c, c, 1, 1) stored chunk-major as (3, c_in, c_out):
        #   qkv_w[j, i, o] == torch_weight[j*dim + o, i, 0, 0]
        "qkv_w": 0.1 * jax.random.normal(k1, (3, dim, dim), jnp.float32),
        "qkv_b": 0.1 * jax.random.normal(k2, (3, 1, dim), jnp.float32),
        # Conv2d(3c, 3c, 3, padding=1, groups=3c) weight (3c, 1, 3, 3) stored (3, 3, 3, c):
        #   dw_w[j, dy, dx, o] == torch_weight[j*dim + o, 0, dy, dx]
        "dw_w": 0.1 * jax.random.normal(k3, (3, 3, 3, dim), jnp.float32),
        "dw_b": 0.1 * jax.random.normal(k4, (3, 1, dim), jnp.float32),
        # project_out (Conv2d(dim, dim, 1)) is unused by forward(), so not created.
    }


def _reference_forward(x, params, num_heads):
    # Pure-JAX (f32) mirror of the PyTorch forward pass, for validation.
    b, c, h, w = x.shape
    ch = c // num_heads
    x_nhwc = jnp.transpose(x, (0, 2, 3, 1)).astype(jnp.float32)
    chunks = []
    for j in range(3):
        y = jnp.einsum("bhwi,io->bhwo", x_nhwc, params["qkv_w"][j]) + params["qkv_b"][j][0]
        yp = jnp.pad(y, ((0, 0), (1, 1), (1, 1), (0, 0)))
        acc = jnp.zeros_like(y)
        for dy in range(3):
            for dx in range(3):
                acc = acc + yp[:, dy:dy + h, dx:dx + w, :] * params["dw_w"][j, dy, dx, :]
        chunks.append(acc + params["dw_b"][j][0])

    def to_heads(t):  # b h w c -> b head ch (h w)
        return jnp.transpose(t, (0, 3, 1, 2)).reshape(b, num_heads, ch, h * w)

    q, k, v = (to_heads(t) for t in chunks)
    eps = 1e-12
    q = q / jnp.maximum(jnp.sqrt(jnp.sum(q * q, -1, keepdims=True)), eps)
    k = k / jnp.maximum(jnp.sqrt(jnp.sum(k * k, -1, keepdims=True)), eps)
    attn = jnp.einsum("bncs,bnds->bncd", q, k) * params["temperature"].reshape(
        1, num_heads, 1, 1)
    attn = jax.nn.softmax(attn, axis=-1)
    return jnp.einsum("bncd,bnds->bncs", attn, v)


if __name__ == "__main__":
    key = jax.random.PRNGKey(0)
    kx, kp = jax.random.split(key)

    b, dim, num_heads, h, w = 2, 8, 2, 16, 16
    x = jax.random.normal(kx, (b, dim, h, w), jnp.float32)
    params = init_params(kp, dim, num_heads)

    fwd = jax.jit(functools.partial(attention_forward, num_heads=num_heads))
    out = fwd(x, params)
    jax.block_until_ready(out)

    assert out.shape == (b, num_heads, dim // num_heads, h * w), out.shape
    assert bool(jnp.all(jnp.isfinite(out)))

    # Validate against the pure-JAX f32 reference (bf16 MXU operands / bf16 qkv
    # staging -> loose tolerance).
    ref = _reference_forward(x, params, num_heads)
    max_err = float(jnp.max(jnp.abs(out - ref)))
    assert max_err < 5e-2, f"max abs error {max_err}"

    print("KERNEL_OK")
</pallas_src>

<mosaic_0001>
module attributes {stable_mosaic.version = 11 : i64} {
  func.func @_qkv_dwconv_kernel(%arg0: i32, %arg1: memref<1x16x16x8xf32, #tpu.memory_space<vmem>>, %arg2: memref<3x8x8xf32, #tpu.memory_space<vmem>>, %arg3: memref<3x1x8xf32, #tpu.memory_space<vmem>>, %arg4: memref<3x3x3x8xf32, #tpu.memory_space<vmem>>, %arg5: memref<3x1x8xf32, #tpu.memory_space<vmem>>, %arg6: memref<1x16x16x8xbf16, #tpu.memory_space<vmem>>, %arg7: memref<1x16x16x8xbf16, #tpu.memory_space<vmem>>, %arg8: memref<1x16x16x8xbf16, #tpu.memory_space<vmem>>, %arg9: memref<18x18x8xf32, #tpu.memory_space<vmem>>) attributes {dimension_semantics = [#tpu.dimension_semantics<parallel>], iteration_bounds = array<i64: 2>, scalar_prefetch = 0 : i64, scratch_operands = 1 : i64, tpu.core_type = #tpu.core_type<tc>, window_params = [{transform_indices = @transform_0, window_bounds = array<i64: 1, 16, 16, 8>}, {pipeline_mode = #tpu.pipeline_mode<synchronous>, transform_indices = @transform_1, window_bounds = array<i64: 3, 8, 8>}, {pipeline_mode = #tpu.pipeline_mode<synchronous>, transform_indices = @transform_2, window_bounds = array<i64: 3, 1, 8>}, {pipeline_mode = #tpu.pipeline_mode<synchronous>, transform_indices = @transform_3, window_bounds = array<i64: 3, 3, 3, 8>}, {pipeline_mode = #tpu.pipeline_mode<synchronous>, transform_indices = @transform_4, window_bounds = array<i64: 3, 1, 8>}, {transform_indices = @transform_5, window_bounds = array<i64: 1, 16, 16, 8>}, {transform_indices = @transform_6, window_bounds = array<i64: 1, 16, 16, 8>}, {transform_indices = @transform_7, window_bounds = array<i64: 1, 16, 16, 8>}]} {
    %c0 = arith.constant 0 : index
    %c0_0 = arith.constant 0 : index
    %c0_1 = arith.constant 0 : index
    %c0_2 = arith.constant 0 : index
    %0 = vector.load %arg1[%c0, %c0_0, %c0_1, %c0_2] : memref<1x16x16x8xf32, #tpu.memory_space<vmem>>, vector<1x16x16x8xf32>
    %1 = vector.shape_cast %0 : vector<1x16x16x8xf32> to vector<16x16x8xf32>
    %2 = vector.shape_cast %1 : vector<16x16x8xf32> to vector<256x8xf32>
    %3 = arith.truncf %2 : vector<256x8xf32> to vector<256x8xbf16>
    %cst = arith.constant 0.000000e+00 : f32
    %4 = vector.broadcast %cst : f32 to vector<18x18x8xf32>
    %c0_3 = arith.constant 0 : index
    %c0_4 = arith.constant 0 : index
    %c0_5 = arith.constant 0 : index
    %5 = vector.load %arg9[%c0_3, %c0_4, %c0_5] : memref<18x18x8xf32, #tpu.memory_space<vmem>>, vector<18x18x8xf32>
    tpu.vector_store %arg9[%c0_3, %c0_4, %c0_5], %4 {strides = array<i32>} : memref<18x18x8xf32, #tpu.memory_space<vmem>>, vector<18x18x8xf32>,
    %c0_6 = arith.constant 0 : index
    %c0_7 = arith.constant 0 : index
    %c0_8 = arith.constant 0 : index
    %6 = vector.load %arg2[%c0_6, %c0_7, %c0_8] : memref<3x8x8xf32, #tpu.memory_space<vmem>>, vector<1x8x8xf32>
    %7 = vector.shape_cast %6 : vector<1x8x8xf32> to vector<8x8xf32>
    %8 = arith.truncf %7 : vector<8x8xf32> to vector<8x8xbf16>
    %cst_9 = arith.constant dense<0.000000e+00> : vector<256x8xf32>
    %9 = tpu.matmul %3, %8, %cst_9 {dimension_numbers = #tpu.dot_dimension_numbers<[1], [0], [0], [1], [0, 0, 1, 1], [], []>} : vector<256x8xbf16>, vector<8x8xbf16>, vector<256x8xf32> -> vector<256x8xf32>
    %c0_10 = arith.constant 0 : index
    %c0_11 = arith.constant 0 : index
    %c0_12 = arith.constant 0 : index
    %10 = vector.load %arg3[%c0_10, %c0_11, %c0_12] : memref<3x1x8xf32, #tpu.memory_space<vmem>>, vector<1x1x8xf32>
    %11 = vector.shape_cast %10 : vector<1x1x8xf32> to vector<1x8xf32>
    %12 = vector.broadcast %11 : vector<1x8xf32> to vector<256x8xf32>
    %13 = arith.addf %9, %12 : vector<256x8xf32>
    %14 = vector.shape_cast %13 : vector<256x8xf32> to vector<16x16x8xf32>
    %c1 = arith.constant 1 : index
    %c1_13 = arith.constant 1 : index
    %c0_14 = arith.constant 0 : index
    %15 = vector.load %arg9[%c1, %c1_13, %c0_14] : memref<18x18x8xf32, #tpu.memory_space<vmem>>, vector<16x16x8xf32>
    tpu.vector_store %arg9[%c1, %c1_13, %c0_14], %14 {strides = array<i32>} : memref<18x18x8xf32, #tpu.memory_space<vmem>>, vector<16x16x8xf32>,
    %c0_15 = arith.constant 0 : index
    %c0_16 = arith.constant 0 : index
    %c0_17 = arith.constant 0 : index
    %c0_18 = arith.constant 0 : index
    %16 = vector.load %arg4[%c0_15, %c0_16, %c0_17, %c0_18] : memref<3x3x3x8xf32, #tpu.memory_space<vmem>>, vector<1x3x3x8xf32>
    %17 = vector.shape_cast %16 : vector<1x3x3x8xf32> to vector<3x3x8xf32>
    %cst_19 = arith.constant 0.000000e+00 : f32
    %18 = vector.broadcast %cst_19 : f32 to vector<16x16x8xf32>
    %c0_20 = arith.constant 0 : index
    %c0_21 = arith.constant 0 : index
    %c0_22 = arith.constant 0 : index
    %19 = vector.load %arg5[%c0_20, %c0_21, %c0_22] : memref<3x1x8xf32, #tpu.memory_space<vmem>>, vector<1x1x8xf32>
    %20 = vector.shape_cast %19 : vector<1x1x8xf32> to vector<1x8xf32>
    %21 = vector.shape_cast %20 : vector<1x8xf32> to vector<1x1x8xf32>
    %22 = vector.broadcast %21 : vector<1x1x8xf32> to vector<16x16x8xf32>
    %23 = arith.addf %18, %22 : vector<16x16x8xf32>
    %c0_23 = arith.constant 0 : index
    %c0_24 = arith.constant 0 : index
    %c0_25 = arith.constant 0 : index
    %24 = vector.load %arg9[%c0_23, %c0_24, %c0_25] : memref<18x18x8xf32, #tpu.memory_space<vmem>>, vector<16x16x8xf32>
    %25 = vector.extract_strided_slice %17 {offsets = [0, 0, 0], sizes = [1, 1, 8], strides = [1, 1, 1]} : vector<3x3x8xf32> to vector<1x1x8xf32>
    %26 = vector.shape_cast %25 : vector<1x1x8xf32> to vector<8xf32>
    %27 = vector.shape_cast %26 : vector<8xf32> to vector<1x1x8xf32>
    %28 = vector.broadcast %27 : vector<1x1x8xf32> to vector<16x16x8xf32>
    %29 = arith.mulf %24, %28 : vector<16x16x8xf32>
    %30 = arith.addf %23, %29 : vector<16x16x8xf32>
    %c0_26 = arith.constant 0 : index
    %c1_27 = arith.constant 1 : index
    %c0_28 = arith.constant 0 : index
    %31 = vector.load %arg9[%c0_26, %c1_27, %c0_28] : memref<18x18x8xf32, #tpu.memory_space<vmem>>, vector<16x16x8xf32>
    %32 = vector.extract_strided_slice %17 {offsets = [0, 1, 0], sizes = [1, 1, 8], strides = [1, 1, 1]} : vector<3x3x8xf32> to vector<1x1x8xf32>
    %33 = vector.shape_cast %32 : vector<1x1x8xf32> to vector<8xf32>
    %34 = vector.shape_cast %33 : vector<8xf32> to vector<1x1x8xf32>
    %35 = vector.broadcast %34 : vector<1x1x8xf32> to vector<16x16x8xf32>
    %36 = arith.mulf %31, %35 : vector<16x16x8xf32>
    %37 = arith.addf %30, %36 : vector<16x16x8xf32>
    %c0_29 = arith.constant 0 : index
    %c2 = arith.constant 2 : index
    %c0_30 = arith.constant 0 : index
    %38 = vector.load %arg9[%c0_29, %c2, %c0_30] : memref<18x18x8xf32, #tpu.memory_space<vmem>>, vector<16x16x8xf32>
    %39 = vector.extract_strided_slice %17 {offsets = [0, 2, 0], sizes = [1, 1, 8], strides = [1, 1, 1]} : vector<3x3x8xf32> to vector<1x1x8xf32>
    %40 = vector.shape_cast %39 : vector<1x1x8xf32> to vector<8xf32>
    %41 = vector.shape_cast %40 : vector<8xf32> to vector<1x1x8xf32>
    %42 = vector.broadcast %41 : vector<1x1x8xf32> to vector<16x16x8xf32>
    %43 = arith.mulf %38, %42 : vector<16x16x8xf32>
    %44 = arith.addf %37, %43 : vector<16x16x8xf32>
    %c1_31 = arith.constant 1 : index
    %c0_32 = arith.constant 0 : index
    %c0_33 = arith.constant 0 : index
    %45 = vector.load %arg9[%c1_31, %c0_32, %c0_33] : memref<18x18x8xf32, #tpu.memory_space<vmem>>, vector<16x16x8xf32>
    %46 = vector.extract_strided_slice %17 {offsets = [1, 0, 0], sizes = [1, 1, 8], strides = [1, 1, 1]} : vector<3x3x8xf32> to vector<1x1x8xf32>
    %47 = vector.shape_cast %46 : vector<1x1x8xf32> to vector<8xf32>
    %48 = vector.shape_cast %47 : vector<8xf32> to vector<1x1x8xf32>
    %49 = vector.broadcast %48 : vector<1x1x8xf32> to vector<16x16x8xf32>
    %50 = arith.mulf %45, %49 : vector<16x16x8xf32>
    %51 = arith.addf %44, %50 : vector<16x16x8xf32>
    %c1_34 = arith.constant 1 : index
    %c1_35 = arith.constant 1 : index
    %c0_36 = arith.constant 0 : index
    %52 = vector.load %arg9[%c1_34, %c1_35, %c0_36] : memref<18x18x8xf32, #tpu.memory_space<vmem>>, vector<16x16x8xf32>
    %53 = vector.extract_strided_slice %17 {offsets = [1, 1, 0], sizes = [1, 1, 8], strides = [1, 1, 1]} : vector<3x3x8xf32> to vector<1x1x8xf32>
    %54 = vector.shape_cast %53 : vector<1x1x8xf32> to vector<8xf32>
    %55 = vector.shape_cast %54 : vector<8xf32> to vector<1x1x8xf32>
    %56 = vector.broadcast %55 : vector<1x1x8xf32> to vector<16x16x8xf32>
    %57 = arith.mulf %52, %56 : vector<16x16x8xf32>
    %58 = arith.addf %51, %57 : vector<16x16x8xf32>
    %c1_37 = arith.constant 1 : index
    %c2_38 = arith.constant 2 : index
    %c0_39 = arith.constant 0 : index
    %59 = vector.load %arg9[%c1_37, %c2_38, %c0_39] : memref<18x18x8xf32, #tpu.memory_space<vmem>>, vector<16x16x8xf32>
    %60 = vector.extract_strided_slice %17 {offsets = [1, 2, 0], sizes = [1, 1, 8], strides = [1, 1, 1]} : vector<3x3x8xf32> to vector<1x1x8xf32>
    %61 = vector.shape_cast %60 : vector<1x1x8xf32> to vector<8xf32>
    %62 = vector.shape_cast %61 : vector<8xf32> to vector<1x1x8xf32>
    %63 = vector.broadcast %62 : vector<1x1x8xf32> to vector<16x16x8xf32>
    %64 = arith.mulf %59, %63 : vector<16x16x8xf32>
    %65 = arith.addf %58, %64 : vector<16x16x8xf32>
    %c2_40 = arith.constant 2 : index
    %c0_41 = arith.constant 0 : index
    %c0_42 = arith.constant 0 : index
    %66 = vector.load %arg9[%c2_40, %c0_41, %c0_42] : memref<18x18x8xf32, #tpu.memory_space<vmem>>, vector<16x16x8xf32>
    %67 = vector.extract_strided_slice %17 {offsets = [2, 0, 0], sizes = [1, 1, 8], strides = [1, 1, 1]} : vector<3x3x8xf32> to vector<1x1x8xf32>
    %68 = vector.shape_cast %67 : vector<1x1x8xf32> to vector<8xf32>
    %69 = vector.shape_cast %68 : vector<8xf32> to vector<1x1x8xf32>
    %70 = vector.broadcast %69 : vector<1x1x8xf32> to vector<16x16x8xf32>
    %71 = arith.mulf %66, %70 : vector<16x16x8xf32>
    %72 = arith.addf %65, %71 : vector<16x16x8xf32>
    %c2_43 = arith.constant 2 : index
    %c1_44 = arith.constant 1 : index
    %c0_45 = arith.constant 0 : index
    %73 = vector.load %arg9[%c2_43, %c1_44, %c0_45] : memref<18x18x8xf32, #tpu.memory_space<vmem>>, vector<16x16x8xf32>
    %74 = vector.extract_strided_slice %17 {offsets = [2, 1, 0], sizes = [1, 1, 8], strides = [1, 1, 1]} : vector<3x3x8xf32> to vector<1x1x8xf32>
    %75 = vector.shape_cast %74 : vector<1x1x8xf32> to vector<8xf32>
    %76 = vector.shape_cast %75 : vector<8xf32> to vector<1x1x8xf32>
    %77 = vector.broadcast %76 : vector<1x1x8xf32> to vector<16x16x8xf32>
    %78 = arith.mulf %73, %77 : vector<16x16x8xf32>
    %79 = arith.addf %72, %78 : vector<16x16x8xf32>
    %c2_46 = arith.constant 2 : index
    %c2_47 = arith.constant 2 : index
    %c0_48 = arith.constant 0 : index
    %80 = vector.load %arg9[%c2_46, %c2_47, %c0_48] : memref<18x18x8xf32, #tpu.memory_space<vmem>>, vector<16x16x8xf32>
    %81 = vector.extract_strided_slice %17 {offsets = [2, 2, 0], sizes = [1, 1, 8], strides = [1, 1, 1]} : vector<3x3x8xf32> to vector<1x1x8xf32>
    %82 = vector.shape_cast %81 : vector<1x1x8xf32> to vector<8xf32>
    %83 = vector.shape_cast %82 : vector<8xf32> to vector<1x1x8xf32>
    %84 = vector.broadcast %83 : vector<1x1x8xf32> to vector<16x16x8xf32>
    %85 = arith.mulf %80, %84 : vector<16x16x8xf32>
    %86 = arith.addf %79, %85 : vector<16x16x8xf32>
    %87 = arith.truncf %86 : vector<16x16x8xf32> to vector<16x16x8xbf16>
    %c0_49 = arith.constant 0 : index
    %c0_50 = arith.constant 0 : index
    %c0_51 = arith.constant 0 : index
    %c0_52 = arith.constant 0 : index
    %88 = vector.load %arg6[%c0_49, %c0_50, %c0_51, %c0_52] : memref<1x16x16x8xbf16, #tpu.memory_space<vmem>>, vector<1x16x16x8xbf16>
    %89 = vector.shape_cast %88 : vector<1x16x16x8xbf16> to vector<16x16x8xbf16>
    %90 = vector.shape_cast %87 : vector<16x16x8xbf16> to vector<1x16x16x8xbf16>
    tpu.vector_store %arg6[%c0_49, %c0_50, %c0_51, %c0_52], %90 {strides = array<i32>} : memref<1x16x16x8xbf16, #tpu.memory_space<vmem>>, vector<1x16x16x8xbf16>,
    %c1_53 = arith.constant 1 : index
    %c0_54 = arith.constant 0 : index
    %c0_55 = arith.constant 0 : index
    %91 = vector.load %arg2[%c1_53, %c0_54, %c0_55] : memref<3x8x8xf32, #tpu.memory_space<vmem>>, vector<1x8x8xf32>
    %92 = vector.shape_cast %91 : vector<1x8x8xf32> to vector<8x8xf32>
    %93 = arith.truncf %92 : vector<8x8xf32> to vector<8x8xbf16>
    %cst_56 = arith.constant dense<0.000000e+00> : vector<256x8xf32>
    %94 = tpu.matmul %3, %93, %cst_56 {dimension_numbers = #tpu.dot_dimension_numbers<[1], [0], [0], [1], [0, 0, 1, 1], [], []>} : vector<256x8xbf16>, vector<8x8xbf16>, vector<256x8xf32> -> vector<256x8xf32>
    %c1_57 = arith.constant 1 : index
    %c0_58 = arith.constant 0 : index
    %c0_59 = arith.constant 0 : index
    %95 = vector.load %arg3[%c1_57, %c0_58, %c0_59] : memref<3x1x8xf32, #tpu.memory_space<vmem>>, vector<1x1x8xf32>
    %96 = vector.shape_cast %95 : vector<1x1x8xf32> to vector<1x8xf32>
    %97 = vector.broadcast %96 : vector<1x8xf32> to vector<256x8xf32>
    %98 = arith.addf %94, %97 : vector<256x8xf32>
    %99 = vector.shape_cast %98 : vector<256x8xf32> to vector<16x16x8xf32>
    %c1_60 = arith.constant 1 : index
    %c1_61 = arith.constant 1 : index
    %c0_62 = arith.constant 0 : index
    %100 = vector.load %arg9[%c1_60, %c1_61, %c0_62] : memref<18x18x8xf32, #tpu.memory_space<vmem>>, vector<16x16x8xf32>
    tpu.vector_store %arg9[%c1_60, %c1_61, %c0_62], %99 {strides = array<i32>} : memref<18x18x8xf32, #tpu.memory_space<vmem>>, vector<16x16x8xf32>,
    %c1_63 = arith.constant 1 : index
    %c0_64 = arith.constant 0 : index
    %c0_65 = arith.constant 0 : index
    %c0_66 = arith.constant 0 : index
    %101 = vector.load %arg4[%c1_63, %c0_64, %c0_65, %c0_66] : memref<3x3x3x8xf32, #tpu.memory_space<vmem>>, vector<1x3x3x8xf32>
    %102 = vector.shape_cast %101 : vector<1x3x3x8xf32> to vector<3x3x8xf32>
    %cst_67 = arith.constant 0.000000e+00 : f32
    %103 = vector.broadcast %cst_67 : f32 to vector<16x16x8xf32>
    %c1_68 = arith.constant 1 : index
    %c0_69 = arith.constant 0 : index
    %c0_70 = arith.constant 0 : index
    %104 = vector.load %arg5[%c1_68, %c0_69, %c0_70] : memref<3x1x8xf32, #tpu.memory_space<vmem>>, vector<1x1x8xf32>
    %105 = vector.shape_cast %104 : vector<1x1x8xf32> to vector<1x8xf32>
    %106 = vector.shape_cast %105 : vector<1x8xf32> to vector<1x1x8xf32>
    %107 = vector.broadcast %106 : vector<1x1x8xf32> to vector<16x16x8xf32>
    %108 = arith.addf %103, %107 : vector<16x16x8xf32>
    %c0_71 = arith.constant 0 : index
    %c0_72 = arith.constant 0 : index
    %c0_73 = arith.constant 0 : index
    %109 = vector.load %arg9[%c0_71, %c0_72, %c0_73] : memref<18x18x8xf32, #tpu.memory_space<vmem>>, vector<16x16x8xf32>
    %110 = vector.extract_strided_slice %102 {offsets = [0, 0, 0], sizes = [1, 1, 8], strides = [1, 1, 1]} : vector<3x3x8xf32> to vector<1x1x8xf32>
    %111 = vector.shape_cast %110 : vector<1x1x8xf32> to vector<8xf32>
    %112 = vector.shape_cast %111 : vector<8xf32> to vector<1x1x8xf32>
    %113 = vector.broadcast %112 : vector<1x1x8xf32> to vector<16x16x8xf32>
    %114 = arith.mulf %109, %113 : vector<16x16x8xf32>
    %115 = arith.addf %108, %114 : vector<16x16x8xf32>
    %c0_74 = arith.constant 0 : index
    %c1_75 = arith.constant 1 : index
    %c0_76 = arith.constant 0 : index
    %116 = vector.load %arg9[%c0_74, %c1_75, %c0_76] : memref<18x18x8xf32, #tpu.memory_space<vmem>>, vector<16x16x8xf32>
    %117 = vector.extract_strided_slice %102 {offsets = [0, 1, 0], sizes = [1, 1, 8], strides = [1, 1, 1]} : vector<3x3x8xf32> to vector<1x1x8xf32>
    %118 = vector.shape_cast %117 : vector<1x1x8xf32> to vector<8xf32>
    %119 = vector.shape_cast %118 : vector<8xf32> to vector<1x1x8xf32>
    %120 = vector.broadcast %119 : vector<1x1x8xf32> to vector<16x16x8xf32>
    %121 = arith.mulf %116, %120 : vector<16x16x8xf32>
    %122 = arith.addf %115, %121 : vector<16x16x8xf32>
    %c0_77 = arith.constant 0 : index
    %c2_78 = arith.constant 2 : index
    %c0_79 = arith.constant 0 : index
    %123 = vector.load %arg9[%c0_77, %c2_78, %c0_79] : memref<18x18x8xf32, #tpu.memory_space<vmem>>, vector<16x16x8xf32>
    %124 = vector.extract_strided_slice %102 {offsets = [0, 2, 0], sizes = [1, 1, 8], strides = [1, 1, 1]} : vector<3x3x8xf32> to vector<1x1x8xf32>
    %125 = vector.shape_cast %124 : vector<1x1x8xf32> to vector<8xf32>
    %126 = vector.shape_cast %125 : vector<8xf32> to vector<1x1x8xf32>
    %127 = vector.broadcast %126 : vector<1x1x8xf32> to vector<16x16x8xf32>
    %128 = arith.mulf %123, %127 : vector<16x16x8xf32>
    %129 = arith.addf %122, %128 : vector<16x16x8xf32>
    %c1_80 = arith.constant 1 : index
    %c0_81 = arith.constant 0 : index
    %c0_82 = arith.constant 0 : index
    %130 = vector.load %arg9[%c1_80, %c0_81, %c0_82] : memref<18x18x8xf32, #tpu.memory_space<vmem>>, vector<16x16x8xf32>
    %131 = vector.extract_strided_slice %102 {offsets = [1, 0, 0], sizes = [1, 1, 8], strides = [1, 1, 1]} : vector<3x3x8xf32> to vector<1x1x8xf32>
    %132 = vector.shape_cast %131 : vector<1x1x8xf32> to vector<8xf32>
    %133 = vector.shape_cast %132 : vector<8xf32> to vector<1x1x8xf32>
    %134 = vector.broadcast %133 : vector<1x1x8xf32> to vector<16x16x8xf32>
    %135 = arith.mulf %130, %134 : vector<16x16x8xf32>
    %136 = arith.addf %129, %135 : vector<16x16x8xf32>
    %c1_83 = arith.constant 1 : index
    %c1_84 = arith.constant 1 : index
    %c0_85 = arith.constant 0 : index
    %137 = vector.load %arg9[%c1_83, %c1_84, %c0_85] : memref<18x18x8xf32, #tpu.memory_space<vmem>>, vector<16x16x8xf32>
    %138 = vector.extract_strided_slice %102 {offsets = [1, 1, 0], sizes = [1, 1, 8], strides = [1, 1, 1]} : vector<3x3x8xf32> to vector<1x1x8xf32>
    %139 = vector.shape_cast %138 : vector<1x1x8xf32> to vector<8xf32>
    %140 = vector.shape_cast %139 : vector<8xf32> to vector<1x1x8xf32>
    %141 = vector.broadcast %140 : vector<1x1x8xf32> to vector<16x16x8xf32>
    %142 = arith.mulf %137, %141 : vector<16x16x8xf32>
    %143 = arith.addf %136, %142 : vector<16x16x8xf32>
    %c1_86 = arith.constant 1 : index
    %c2_87 = arith.constant 2 : index
    %c0_88 = arith.constant 0 : index
    %144 = vector.load %arg9[%c1_86, %c2_87, %c0_88] : memref<18x18x8xf32, #tpu.memory_space<vmem>>, vector<16x16x8xf32>
    %145 = vector.extract_strided_slice %102 {offsets = [1, 2, 0], sizes = [1, 1, 8], strides = [1, 1, 1]} : vector<3x3x8xf32> to vector<1x1x8xf32>
    %146 = vector.shape_cast %145 : vector<1x1x8xf32> to vector<8xf32>
    %147 = vector.shape_cast %146 : vector<8xf32> to vector<1x1x8xf32>
    %148 = vector.broadcast %147 : vector<1x1x8xf32> to vector<16x16x8xf32>
    %149 = arith.mulf %144, %148 : vector<16x16x8xf32>
    %150 = arith.addf %143, %149 : vector<16x16x8xf32>
    %c2_89 = arith.constant 2 : index
    %c0_90 = arith.constant 0 : index
    %c0_91 = arith.constant 0 : index
    %151 = vector.load %arg9[%c2_89, %c0_90, %c0_91] : memref<18x18x8xf32, #tpu.memory_space<vmem>>, vector<16x16x8xf32>
    %152 = vector.extract_strided_slice %102 {offsets = [2, 0, 0], sizes = [1, 1, 8], strides = [1, 1, 1]} : vector<3x3x8xf32> to vector<1x1x8xf32>
    %153 = vector.shape_cast %152 : vector<1x1x8xf32> to vector<8xf32>
    %154 = vector.shape_cast %153 : vector<8xf32> to vector<1x1x8xf32>
    %155 = vector.broadcast %154 : vector<1x1x8xf32> to vector<16x16x8xf32>
    %156 = arith.mulf %151, %155 : vector<16x16x8xf32>
    %157 = arith.addf %150, %156 : vector<16x16x8xf32>
    %c2_92 = arith.constant 2 : index
    %c1_93 = arith.constant 1 : index
    %c0_94 = arith.constant 0 : index
    %158 = vector.load %arg9[%c2_92, %c1_93, %c0_94] : memref<18x18x8xf32, #tpu.memory_space<vmem>>, vector<16x16x8xf32>
    %159 = vector.extract_strided_slice %102 {offsets = [2, 1, 0], sizes = [1, 1, 8], strides = [1, 1, 1]} : vector<3x3x8xf32> to vector<1x1x8xf32>
    %160 = vector.shape_cast %159 : vector<1x1x8xf32> to vector<8xf32>
    %161 = vector.shape_cast %160 : vector<8xf32> to vector<1x1x8xf32>
    %162 = vector.broadcast %161 : vector<1x1x8xf32> to vector<16x16x8xf32>
    %163 = arith.mulf %158, %162 : vector<16x16x8xf32>
    %164 = arith.addf %157, %163 : vector<16x16x8xf32>
    %c2_95 = arith.constant 2 : index
    %c2_96 = arith.constant 2 : index
    %c0_97 = arith.constant 0 : index
    %165 = vector.load %arg9[%c2_95, %c2_96, %c0_97] : memref<18x18x8xf32, #tpu.memory_space<vmem>>, vector<16x16x8xf32>
    %166 = vector.extract_strided_slice %102 {offsets = [2, 2, 0], sizes = [1, 1, 8], strides = [1, 1, 1]} : vector<3x3x8xf32> to vector<1x1x8xf32>
    %167 = vector.shape_cast %166 : vector<1x1x8xf32> to vector<8xf32>
    %168 = vector.shape_cast %167 : vector<8xf32> to vector<1x1x8xf32>
    %169 = vector.broadcast %168 : vector<1x1x8xf32> to vector<16x16x8xf32>
    %170 = arith.mulf %165, %169 : vector<16x16x8xf32>
    %171 = arith.addf %164, %170 : vector<16x16x8xf32>
    %172 = arith.truncf %171 : vector<16x16x8xf32> to vector<16x16x8xbf16>
    %c0_98 = arith.constant 0 : index
    %c0_99 = arith.constant 0 : index
    %c0_100 = arith.constant 0 : index
    %c0_101 = arith.constant 0 : index
    %173 = vector.load %arg7[%c0_98, %c0_99, %c0_100, %c0_101] : memref<1x16x16x8xbf16, #tpu.memory_space<vmem>>, vector<1x16x16x8xbf16>
    %174 = vector.shape_cast %173 : vector<1x16x16x8xbf16> to vector<16x16x8xbf16>
    %175 = vector.shape_cast %172 : vector<16x16x8xbf16> to vector<1x16x16x8xbf16>
    tpu.vector_store %arg7[%c0_98, %c0_99, %c0_100, %c0_101], %175 {strides = array<i32>} : memref<1x16x16x8xbf16, #tpu.memory_space<vmem>>, vector<1x16x16x8xbf16>,
    %c2_102 = arith.constant 2 : index
    %c0_103 = arith.constant 0 : index
    %c0_104 = arith.constant 0 : index
    %176 = vector.load %arg2[%c2_102, %c0_103, %c0_104] : memref<3x8x8xf32, #tpu.memory_space<vmem>>, vector<1x8x8xf32>
    %177 = vector.shape_cast %176 : vector<1x8x8xf32> to vector<8x8xf32>
    %178 = arith.truncf %177 : vector<8x8xf32> to vector<8x8xbf16>
    %cst_105 = arith.constant dense<0.000000e+00> : vector<256x8xf32>
    %179 = tpu.matmul %3, %178, %cst_105 {dimension_numbers = #tpu.dot_dimension_numbers<[1], [0], [0], [1], [0, 0, 1, 1], [], []>} : vector<256x8xbf16>, vector<8x8xbf16>, vector<256x8xf32> -> vector<256x8xf32>
    %c2_106 = arith.constant 2 : index
    %c0_107 = arith.constant 0 : index
    %c0_108 = arith.constant 0 : index
    %180 = vector.load %arg3[%c2_106, %c0_107, %c0_108] : memref<3x1x8xf32, #tpu.memory_space<vmem>>, vector<1x1x8xf32>
    %181 = vector.shape_cast %180 : vector<1x1x8xf32> to vector<1x8xf32>
    %182 = vector.broadcast %181 : vector<1x8xf32> to vector<256x8xf32>
    %183 = arith.addf %179, %182 : vector<256x8xf32>
    %184 = vector.shape_cast %183 : vector<256x8xf32> to vector<16x16x8xf32>
    %c1_109 = arith.constant 1 : index
    %c1_110 = arith.constant 1 : index
    %c0_111 = arith.constant 0 : index
    %185 = vector.load %arg9[%c1_109, %c1_110, %c0_111] : memref<18x18x8xf32, #tpu.memory_space<vmem>>, vector<16x16x8xf32>
    tpu.vector_store %arg9[%c1_109, %c1_110, %c0_111], %184 {strides = array<i32>} : memref<18x18x8xf32, #tpu.memory_space<vmem>>, vector<16x16x8xf32>,
    %c2_112 = arith.constant 2 : index
    %c0_113 = arith.constant 0 : index
    %c0_114 = arith.constant 0 : index
    %c0_115 = arith.constant 0 : index
    %186 = vector.load %arg4[%c2_112, %c0_113, %c0_114, %c0_115] : memref<3x3x3x8xf32, #tpu.memory_space<vmem>>, vector<1x3x3x8xf32>
    %187 = vector.shape_cast %186 : vector<1x3x3x8xf32> to vector<3x3x8xf32>
    %cst_116 = arith.constant 0.000000e+00 : f32
    %188 = vector.broadcast %cst_116 : f32 to vector<16x16x8xf32>
    %c2_117 = arith.constant 2 : index
    %c0_118 = arith.constant 0 : index
    %c0_119 = arith.constant 0 : index
    %189 = vector.load %arg5[%c2_117, %c0_118, %c0_119] : memref<3x1x8xf32, #tpu.memory_space<vmem>>, vector<1x1x8xf32>
    %190 = vector.shape_cast %189 : vector<1x1x8xf32> to vector<1x8xf32>
    %191 = vector.shape_cast %190 : vector<1x8xf32> to vector<1x1x8xf32>
    %192 = vector.broadcast %191 : vector<1x1x8xf32> to vector<16x16x8xf32>
    %193 = arith.addf %188, %192 : vector<16x16x8xf32>
    %c0_120 = arith.constant 0 : index
    %c0_121 = arith.constant 0 : index
    %c0_122 = arith.constant 0 : index
    %194 = vector.load %arg9[%c0_120, %c0_121, %c0_122] : memref<18x18x8xf32, #tpu.memory_space<vmem>>, vector<16x16x8xf32>
    %195 = vector.extract_strided_slice %187 {offsets = [0, 0, 0], sizes = [1, 1, 8], strides = [1, 1, 1]} : vector<3x3x8xf32> to vector<1x1x8xf32>
    %196 = vector.shape_cast %195 : vector<1x1x8xf32> to vector<8xf32>
    %197 = vector.shape_cast %196 : vector<8xf32> to vector<1x1x8xf32>
    %198 = vector.broadcast %197 : vector<1x1x8xf32> to vector<16x16x8xf32>
    %199 = arith.mulf %194, %198 : vector<16x16x8xf32>
    %200 = arith.addf %193, %199 : vector<16x16x8xf32>
    %c0_123 = arith.constant 0 : index
    %c1_124 = arith.constant 1 : index
    %c0_125 = arith.constant 0 : index
    %201 = vector.load %arg9[%c0_123, %c1_124, %c0_125] : memref<18x18x8xf32, #tpu.memory_space<vmem>>, vector<16x16x8xf32>
    %202 = vector.extract_strided_slice %187 {offsets = [0, 1, 0], sizes = [1, 1, 8], strides = [1, 1, 1]} : vector<3x3x8xf32> to vector<1x1x8xf32>
    %203 = vector.shape_cast %202 : vector<1x1x8xf32> to vector<8xf32>
    %204 = vector.shape_cast %203 : vector<8xf32> to vector<1x1x8xf32>
    %205 = vector.broadcast %204 : vector<1x1x8xf32> to vector<16x16x8xf32>
    %206 = arith.mulf %201, %205 : vector<16x16x8xf32>
    %207 = arith.addf %200, %206 : vector<16x16x8xf32>
    %c0_126 = arith.constant 0 : index
    %c2_127 = arith.constant 2 : index
    %c0_128 = arith.constant 0 : index
    %208 = vector.load %arg9[%c0_126, %c2_127, %c0_128] : memref<18x18x8xf32, #tpu.memory_space<vmem>>, vector<16x16x8xf32>
    %209 = vector.extract_strided_slice %187 {offsets = [0, 2, 0], sizes = [1, 1, 8], strides = [1, 1, 1]} : vector<3x3x8xf32> to vector<1x1x8xf32>
    %210 = vector.shape_cast %209 : vector<1x1x8xf32> to vector<8xf32>
    %211 = vector.shape_cast %210 : vector<8xf32> to vector<1x1x8xf32>
    %212 = vector.broadcast %211 : vector<1x1x8xf32> to vector<16x16x8xf32>
    %213 = arith.mulf %208, %212 : vector<16x16x8xf32>
    %214 = arith.addf %207, %213 : vector<16x16x8xf32>
    %c1_129 = arith.constant 1 : index
    %c0_130 = arith.constant 0 : index
    %c0_131 = arith.constant 0 : index
    %215 = vector.load %arg9[%c1_129, %c0_130, %c0_131] : memref<18x18x8xf32, #tpu.memory_space<vmem>>, vector<16x16x8xf32>
    %216 = vector.extract_strided_slice %187 {offsets = [1, 0, 0], sizes = [1, 1, 8], strides = [1, 1, 1]} : vector<3x3x8xf32> to vector<1x1x8xf32>
    %217 = vector.shape_cast %216 : vector<1x1x8xf32> to vector<8xf32>
    %218 = vector.shape_cast %217 : vector<8xf32> to vector<1x1x8xf32>
    %219 = vector.broadcast %218 : vector<1x1x8xf32> to vector<16x16x8xf32>
    %220 = arith.mulf %215, %219 : vector<16x16x8xf32>
    %221 = arith.addf %214, %220 : vector<16x16x8xf32>
    %c1_132 = arith.constant 1 : index
    %c1_133 = arith.constant 1 : index
    %c0_134 = arith.constant 0 : index
    %222 = vector.load %arg9[%c1_132, %c1_133, %c0_134] : memref<18x18x8xf32, #tpu.memory_space<vmem>>, vector<16x16x8xf32>
    %223 = vector.extract_strided_slice %187 {offsets = [1, 1, 0], sizes = [1, 1, 8], strides = [1, 1, 1]} : vector<3x3x8xf32> to vector<1x1x8xf32>
    %224 = vector.shape_cast %223 : vector<1x1x8xf32> to vector<8xf32>
    %225 = vector.shape_cast %224 : vector<8xf32> to vector<1x1x8xf32>
    %226 = vector.broadcast %225 : vector<1x1x8xf32> to vector<16x16x8xf32>
    %227 = arith.mulf %222, %226 : vector<16x16x8xf32>
    %228 = arith.addf %221, %227 : vector<16x16x8xf32>
    %c1_135 = arith.constant 1 : index
    %c2_136 = arith.constant 2 : index
    %c0_137 = arith.constant 0 : index
    %229 = vector.load %arg9[%c1_135, %c2_136, %c0_137] : memref<18x18x8xf32, #tpu.memory_space<vmem>>, vector<16x16x8xf32>
    %230 = vector.extract_strided_slice %187 {offsets = [1, 2, 0], sizes = [1, 1, 8], strides = [1, 1, 1]} : vector<3x3x8xf32> to vector<1x1x8xf32>
    %231 = vector.shape_cast %230 : vector<1x1x8xf32> to vector<8xf32>
    %232 = vector.shape_cast %231 : vector<8xf32> to vector<1x1x8xf32>
    %233 = vector.broadcast %232 : vector<1x1x8xf32> to vector<16x16x8xf32>
    %234 = arith.mulf %229, %233 : vector<16x16x8xf32>
    %235 = arith.addf %228, %234 : vector<16x16x8xf32>
    %c2_138 = arith.constant 2 : index
    %c0_139 = arith.constant 0 : index
    %c0_140 = arith.constant 0 : index
    %236 = vector.load %arg9[%c2_138, %c0_139, %c0_140] : memref<18x18x8xf32, #tpu.memory_space<vmem>>, vector<16x16x8xf32>
    %237 = vector.extract_strided_slice %187 {offsets = [2, 0, 0], sizes = [1, 1, 8], strides = [1, 1, 1]} : vector<3x3x8xf32> to vector<1x1x8xf32>
    %238 = vector.shape_cast %237 : vector<1x1x8xf32> to vector<8xf32>
    %239 = vector.shape_cast %238 : vector<8xf32> to vector<1x1x8xf32>
    %240 = vector.broadcast %239 : vector<1x1x8xf32> to vector<16x16x8xf32>
    %241 = arith.mulf %236, %240 : vector<16x16x8xf32>
    %242 = arith.addf %235, %241 : vector<16x16x8xf32>
    %c2_141 = arith.constant 2 : index
    %c1_142 = arith.constant 1 : index
    %c0_143 = arith.constant 0 : index
    %243 = vector.load %arg9[%c2_141, %c1_142, %c0_143] : memref<18x18x8xf32, #tpu.memory_space<vmem>>, vector<16x16x8xf32>
    %244 = vector.extract_strided_slice %187 {offsets = [2, 1, 0], sizes = [1, 1, 8], strides = [1, 1, 1]} : vector<3x3x8xf32> to vector<1x1x8xf32>
    %245 = vector.shape_cast %244 : vector<1x1x8xf32> to vector<8xf32>
    %246 = vector.shape_cast %245 : vector<8xf32> to vector<1x1x8xf32>
    %247 = vector.broadcast %246 : vector<1x1x8xf32> to vector<16x16x8xf32>
    %248 = arith.mulf %243, %247 : vector<16x16x8xf32>
    %249 = arith.addf %242, %248 : vector<16x16x8xf32>
    %c2_144 = arith.constant 2 : index
    %c2_145 = arith.constant 2 : index
    %c0_146 = arith.constant 0 : index
    %250 = vector.load %arg9[%c2_144, %c2_145, %c0_146] : memref<18x18x8xf32, #tpu.memory_space<vmem>>, vector<16x16x8xf32>
    %251 = vector.extract_strided_slice %187 {offsets = [2, 2, 0], sizes = [1, 1, 8], strides = [1, 1, 1]} : vector<3x3x8xf32> to vector<1x1x8xf32>
    %252 = vector.shape_cast %251 : vector<1x1x8xf32> to vector<8xf32>
    %253 = vector.shape_cast %252 : vector<8xf32> to vector<1x1x8xf32>
    %254 = vector.broadcast %253 : vector<1x1x8xf32> to vector<16x16x8xf32>
    %255 = arith.mulf %250, %254 : vector<16x16x8xf32>
    %256 = arith.addf %249, %255 : vector<16x16x8xf32>
    %257 = arith.truncf %256 : vector<16x16x8xf32> to vector<16x16x8xbf16>
    %c0_147 = arith.constant 0 : index
    %c0_148 = arith.constant 0 : index
    %c0_149 = arith.constant 0 : index
    %c0_150 = arith.constant 0 : index
    %258 = vector.load %arg8[%c0_147, %c0_148, %c0_149, %c0_150] : memref<1x16x16x8xbf16, #tpu.memory_space<vmem>>, vector<1x16x16x8xbf16>
    %259 = vector.shape_cast %258 : vector<1x16x16x8xbf16> to vector<16x16x8xbf16>
    %260 = vector.shape_cast %257 : vector<16x16x8xbf16> to vector<1x16x16x8xbf16>
    tpu.vector_store %arg8[%c0_147, %c0_148, %c0_149, %c0_150], %260 {strides = array<i32>} : memref<1x16x16x8xbf16, #tpu.memory_space<vmem>>, vector<1x16x16x8xbf16>,
    return
  }
  func.func @transform_0(%arg0: i32) -> (i32, i32, i32, i32) {
    %c0_i32 = arith.constant 0 : i32
    %c0_i32_0 = arith.constant 0 : i32
    %c0_i32_1 = arith.constant 0 : i32
    %c0_i32_2 = arith.constant 0 : i32
    return %arg0, %c0_i32, %c0_i32_0, %c0_i32_1 : i32, i32, i32, i32
  }
  func.func @transform_1(%arg0: i32) -> (i32, i32, i32) {
    %c0_i32 = arith.constant 0 : i32
    %c0_i32_0 = arith.constant 0 : i32
    %c0_i32_1 = arith.constant 0 : i32
    %c0_i32_2 = arith.constant 0 : i32
    return %c0_i32, %c0_i32_0, %c0_i32_1 : i32, i32, i32
  }
  func.func @transform_2(%arg0: i32) -> (i32, i32, i32) {
    %c0_i32 = arith.constant 0 : i32
    %c0_i32_0 = arith.constant 0 : i32
    %c0_i32_1 = arith.constant 0 : i32
    %c0_i32_2 = arith.constant 0 : i32
    return %c0_i32, %c0_i32_0, %c0_i32_1 : i32, i32, i32
  }
  func.func @transform_3(%arg0: i32) -> (i32, i32, i32, i32) {
    %c0_i32 = arith.constant 0 : i32
    %c0_i32_0 = arith.constant 0 : i32
    %c0_i32_1 = arith.constant 0 : i32
    %c0_i32_2 = arith.constant 0 : i32
    %c0_i32_3 = arith.constant 0 : i32
    return %c0_i32, %c0_i32_0, %c0_i32_1, %c0_i32_2 : i32, i32, i32, i32
  }
  func.func @transform_4(%arg0: i32) -> (i32, i32, i32) {
    %c0_i32 = arith.constant 0 : i32
    %c0_i32_0 = arith.constant 0 : i32
    %c0_i32_1 = arith.constant 0 : i32
    %c0_i32_2 = arith.constant 0 : i32
    return %c0_i32, %c0_i32_0, %c0_i32_1 : i32, i32, i32
  }
  func.func @transform_5(%arg0: i32) -> (i32, i32, i32, i32) {
    %c0_i32 = arith.constant 0 : i32
    %c0_i32_0 = arith.constant 0 : i32
    %c0_i32_1 = arith.constant 0 : i32
    %c0_i32_2 = arith.constant 0 : i32
    return %arg0, %c0_i32, %c0_i32_0, %c0_i32_1 : i32, i32, i32, i32
  }
  func.func @transform_6(%arg0: i32) -> (i32, i32, i32, i32) {
    %c0_i32 = arith.constant 0 : i32
    %c0_i32_0 = arith.constant 0 : i32
    %c0_i32_1 = arith.constant 0 : i32
    %c0_i32_2 = arith.constant 0 : i32
    return %arg0, %c0_i32, %c0_i32_0, %c0_i32_1 : i32, i32, i32, i32
  }
  func.func @transform_7(%arg0: i32) -> (i32, i32, i32, i32) {
    %c0_i32 = arith.constant 0 : i32
    %c0_i32_0 = arith.constant 0 : i32
    %c0_i32_1 = arith.constant 0 : i32
    %c0_i32_2 = arith.constant 0 : i32
    return %arg0, %c0_i32, %c0_i32_0, %c0_i32_1 : i32, i32, i32, i32
  }
}

module attributes {stable_mosaic.version = 11 : i64} {
  func.func @_attn_apply_kernel(%arg0: i32, %arg1: i32, %arg2: memref<1x8x8xf32, #tpu.memory_space<vmem>>, %arg3: memref<1x256x8xbf16, #tpu.memory_space<vmem>>, %arg4: memref<1x8x256xf32, #tpu.memory_space<vmem>>) attributes {dimension_semantics = [#tpu.dimension_semantics<parallel>, #tpu.dimension_semantics<parallel>], iteration_bounds = array<i64: 2, 1>, scalar_prefetch = 0 : i64, scratch_operands = 0 : i64, tpu.core_type = #tpu.core_type<tc>, window_params = [{transform_indices = @transform_0, window_bounds = array<i64: 1, 8, 8>}, {transform_indices = @transform_1, window_bounds = array<i64: 1, 256, 8>}, {transform_indices = @transform_2, window_bounds = array<i64: 1, 8, 256>}]} {
    %c0 = arith.constant 0 : index
    %c0_0 = arith.constant 0 : index
    %c0_1 = arith.constant 0 : index
    %0 = vector.load %arg2[%c0, %c0_0, %c0_1] : memref<1x8x8xf32, #tpu.memory_space<vmem>>, vector<1x8x8xf32>
    %1 = vector.shape_cast %0 : vector<1x8x8xf32> to vector<8x8xf32>
    %2 = arith.truncf %1 : vector<8x8xf32> to vector<8x8xbf16>
    %c0_2 = arith.constant 0 : index
    %c0_3 = arith.constant 0 : index
    %c0_4 = arith.constant 0 : index
    %3 = vector.load %arg3[%c0_2, %c0_3, %c0_4] : memref<1x256x8xbf16, #tpu.memory_space<vmem>>, vector<1x256x8xbf16>
    %4 = vector.shape_cast %3 : vector<1x256x8xbf16> to vector<256x8xbf16>
    %cst = arith.constant dense<0.000000e+00> : vector<8x256xf32>
    %5 = tpu.matmul %2, %4, %cst {dimension_numbers = #tpu.dot_dimension_numbers<[1], [1], [0], [0], [0, 0, 1, 0], [], []>} : vector<8x8xbf16>, vector<256x8xbf16>, vector<8x256xf32> -> vector<8x256xf32>
    %c0_5 = arith.constant 0 : index
    %c0_6 = arith.constant 0 : index
    %c0_7 = arith.constant 0 : index
    %6 = vector.load %arg4[%c0_5, %c0_6, %c0_7] : memref<1x8x256xf32, #tpu.memory_space<vmem>>, vector<1x8x256xf32>
    %7 = vector.shape_cast %6 : vector<1x8x256xf32> to vector<8x256xf32>
    %8 = vector.shape_cast %5 : vector<8x256xf32> to vector<1x8x256xf32>
    tpu.vector_store %arg4[%c0_5, %c0_6, %c0_7], %8 {strides = array<i32>} : memref<1x8x256xf32, #tpu.memory_space<vmem>>, vector<1x8x256xf32>,
    return
  }
  func.func @transform_0(%arg0: i32, %arg1: i32) -> (i32, i32, i32) {
    %c0_i32 = arith.constant 0 : i32
    %c0_i32_0 = arith.constant 0 : i32
    %c0_i32_1 = arith.constant 0 : i32
    return %arg0, %c0_i32, %c0_i32_0 : i32, i32, i32
  }
  func.func @transform_1(%arg0: i32, %arg1: i32) -> (i32, i32, i32) {
    %c0_i32 = arith.constant 0 : i32
    %c0_i32_0 = arith.constant 0 : i32
    return %arg0, %arg1, %c0_i32 : i32, i32, i32
  }
  func.func @transform_2(%arg0: i32, %arg1: i32) -> (i32, i32, i32) {
    %c0_i32 = arith.constant 0 : i32
    %c0_i32_0 = arith.constant 0 : i32
    return %arg0, %c0_i32, %arg1 : i32, i32, i32
  }
}

module attributes {stable_mosaic.version = 11 : i64} {
  func.func @_attn_gram_softmax_kernel(%arg0: i32, %arg1: i32, %arg2: memref<1x256x8xbf16, #tpu.memory_space<vmem>>, %arg3: memref<1x256x8xbf16, #tpu.memory_space<vmem>>, %arg4: memref<8x1xf32, #tpu.memory_space<vmem>>, %arg5: memref<8x8xf32, #tpu.memory_space<vmem>>, %arg6: memref<1x8x8xf32, #tpu.memory_space<vmem>>, %arg7: memref<8x8xf32, #tpu.memory_space<vmem>>, %arg8: memref<8x1xf32, #tpu.memory_space<vmem>>, %arg9: memref<1x8xf32, #tpu.memory_space<vmem>>) attributes {dimension_semantics = [#tpu.dimension_semantics<parallel>, #tpu.dimension_semantics<arbitrary>], iteration_bounds = array<i64: 2, 1>, scalar_prefetch = 0 : i64, scratch_operands = 3 : i64, tpu.core_type = #tpu.core_type<tc>, window_params = [{transform_indices = @transform_0, window_bounds = array<i64: 1, 256, 8>}, {transform_indices = @transform_1, window_bounds = array<i64: 1, 256, 8>}, {pipeline_mode = #tpu.pipeline_mode<synchronous>, transform_indices = @transform_2, window_bounds = array<i64: 8, 1>}, {pipeline_mode = #tpu.pipeline_mode<synchronous>, transform_indices = @transform_3, window_bounds = array<i64: 8, 8>}, {transform_indices = @transform_4, window_bounds = array<i64: 1, 8, 8>}]} {
    %c0_i32 = arith.constant 0 : i32
    %0 = arith.cmpi eq, %arg1, %c0_i32 : i32
    %1 = arith.extui %0 : i1 to i32
    %c0_i32_0 = arith.constant 0 : i32
    %2 = arith.cmpi ne, %1, %c0_i32_0 : i32
    scf.if %2 {
      %cst_23 = arith.constant 0.000000e+00 : f32
      %27 = vector.broadcast %cst_23 : f32 to vector<8x8xf32>
      %c0_24 = arith.constant 0 : index
      %c0_25 = arith.constant 0 : index
      %28 = vector.load %arg7[%c0_24, %c0_25] : memref<8x8xf32, #tpu.memory_space<vmem>>, vector<8x8xf32>
      tpu.vector_store %arg7[%c0_24, %c0_25], %27 {strides = array<i32>} : memref<8x8xf32, #tpu.memory_space<vmem>>, vector<8x8xf32>,
      %cst_26 = arith.constant 0.000000e+00 : f32
      %29 = vector.broadcast %cst_26 : f32 to vector<8x1xf32>
      %c0_27 = arith.constant 0 : index
      %c0_28 = arith.constant 0 : index
      %30 = vector.load %arg8[%c0_27, %c0_28] : memref<8x1xf32, #tpu.memory_space<vmem>>, vector<8x1xf32>
      tpu.vector_store %arg8[%c0_27, %c0_28], %29 {strides = array<i32>} : memref<8x1xf32, #tpu.memory_space<vmem>>, vector<8x1xf32>,
      %cst_29 = arith.constant 0.000000e+00 : f32
      %31 = vector.broadcast %cst_29 : f32 to vector<1x8xf32>
      %c0_30 = arith.constant 0 : index
      %c0_31 = arith.constant 0 : index
      %32 = vector.load %arg9[%c0_30, %c0_31] : memref<1x8xf32, #tpu.memory_space<vmem>>, vector<1x8xf32>
      tpu.vector_store %arg9[%c0_30, %c0_31], %31 {strides = array<i32>} : memref<1x8xf32, #tpu.memory_space<vmem>>, vector<1x8xf32>,
    } else {
    }
    %c0 = arith.constant 0 : index
    %c0_1 = arith.constant 0 : index
    %c0_2 = arith.constant 0 : index
    %3 = vector.load %arg2[%c0, %c0_1, %c0_2] : memref<1x256x8xbf16, #tpu.memory_space<vmem>>, vector<1x256x8xbf16>
    %4 = vector.shape_cast %3 : vector<1x256x8xbf16> to vector<256x8xbf16>
    %c0_3 = arith.constant 0 : index
    %c0_4 = arith.constant 0 : index
    %c0_5 = arith.constant 0 : index
    %5 = vector.load %arg3[%c0_3, %c0_4, %c0_5] : memref<1x256x8xbf16, #tpu.memory_space<vmem>>, vector<1x256x8xbf16>
    %6 = vector.shape_cast %5 : vector<1x256x8xbf16> to vector<256x8xbf16>
    %7 = arith.extf %4 : vector<256x8xbf16> to vector<256x8xf32>
    %8 = arith.extf %6 : vector<256x8xbf16> to vector<256x8xf32>
    %cst = arith.constant 1.000000e+00 : f32
    %9 = vector.broadcast %cst : f32 to vector<256x1xf32>
    %c0_6 = arith.constant 0 : index
    %c0_7 = arith.constant 0 : index
    %10 = vector.load %arg7[%c0_6, %c0_7] : memref<8x8xf32, #tpu.memory_space<vmem>>, vector<8x8xf32>
    %cst_8 = arith.constant dense<0.000000e+00> : vector<8x8xf32>
    %11 = tpu.matmul %4, %6, %cst_8 {dimension_numbers = #tpu.dot_dimension_numbers<[0], [0], [1], [1], [0, 1, 1, 1], [], []>} : vector<256x8xbf16>, vector<256x8xbf16>, vector<8x8xf32> -> vector<8x8xf32>
    %12 = arith.addf %10, %11 : vector<8x8xf32>
    %c0_9 = arith.constant 0 : index
    %c0_10 = arith.constant 0 : index
    %13 = vector.load %arg7[%c0_9, %c0_10] : memref<8x8xf32, #tpu.memory_space<vmem>>, vector<8x8xf32>
    tpu.vector_store %arg7[%c0_9, %c0_10], %12 {strides = array<i32>} : memref<8x8xf32, #tpu.memory_space<vmem>>, vector<8x8xf32>,
    %c0_11 = arith.constant 0 : index
    %c0_12 = arith.constant 0 : index
    %14 = vector.load %arg8[%c0_11, %c0_12] : memref<8x1xf32, #tpu.memory_space<vmem>>, vector<8x1xf32>
    %15 = arith.mulf %7, %7 : vector<256x8xf32>
    %cst_13 = arith.constant dense<0.000000e+00> : vector<8x1xf32>
    %16 = tpu.matmul %15, %9, %cst_13 {dimension_numbers = #tpu.dot_dimension_numbers<[0], [0], [1], [1], [0, 1, 1, 1], [], []>} : vector<256x8xf32>, vector<256x1xf32>, vector<8x1xf32> -> vector<8x1xf32>
    %17 = arith.addf %14, %16 : vector<8x1xf32>
    %c0_14 = arith.constant 0 : index
    %c0_15 = arith.constant 0 : index
    %18 = vector.load %arg8[%c0_14, %c0_15] : memref<8x1xf32, #tpu.memory_space<vmem>>, vector<8x1xf32>
    tpu.vector_store %arg8[%c0_14, %c0_15], %17 {strides = array<i32>} : memref<8x1xf32, #tpu.memory_space<vmem>>, vector<8x1xf32>,
    %c0_16 = arith.constant 0 : index
    %c0_17 = arith.constant 0 : index
    %19 = vector.load %arg9[%c0_16, %c0_17] : memref<1x8xf32, #tpu.memory_space<vmem>>, vector<1x8xf32>
    %20 = arith.mulf %8, %8 : vector<256x8xf32>
    %cst_18 = arith.constant dense<0.000000e+00> : vector<1x8xf32>
    %21 = tpu.matmul %9, %20, %cst_18 {dimension_numbers = #tpu.dot_dimension_numbers<[0], [0], [1], [1], [0, 1, 1, 1], [], []>} : vector<256x1xf32>, vector<256x8xf32>, vector<1x8xf32> -> vector<1x8xf32>
    %22 = arith.addf %19, %21 : vector<1x8xf32>
    %c0_19 = arith.constant 0 : index
    %c0_20 = arith.constant 0 : index
    %23 = vector.load %arg9[%c0_19, %c0_20] : memref<1x8xf32, #tpu.memory_space<vmem>>, vector<1x8xf32>
    tpu.vector_store %arg9[%c0_19, %c0_20], %22 {strides = array<i32>} : memref<1x8xf32, #tpu.memory_space<vmem>>, vector<1x8xf32>,
    %c0_i32_21 = arith.constant 0 : i32
    %24 = arith.cmpi eq, %arg1, %c0_i32_21 : i32
    %25 = arith.extui %24 : i1 to i32
    %c0_i32_22 = arith.constant 0 : i32
    %26 = arith.cmpi ne, %25, %c0_i32_22 : i32
    scf.if %26 {
      %c0_23 = arith.constant 0 : index
      %c0_24 = arith.constant 0 : index
      %27 = vector.load %arg8[%c0_23, %c0_24] : memref<8x1xf32, #tpu.memory_space<vmem>>, vector<8x1xf32>
      %cst_25 = arith.constant 1.000000e-24 : f32
      %28 = vector.broadcast %cst_25 : f32 to vector<8x1xf32>
      %29 = arith.maximumf %27, %28 : vector<8x1xf32>
      %30 = math.rsqrt %29 : vector<8x1xf32>
      %c0_26 = arith.constant 0 : index
      %c0_27 = arith.constant 0 : index
      %31 = vector.load %arg9[%c0_26, %c0_27] : memref<1x8xf32, #tpu.memory_space<vmem>>, vector<1x8xf32>
      %cst_28 = arith.constant 1.000000e-24 : f32
      %32 = vector.broadcast %cst_28 : f32 to vector<1x8xf32>
      %33 = arith.maximumf %31, %32 : vector<1x8xf32>
      %34 = math.rsqrt %33 : vector<1x8xf32>
      %c0_29 = arith.constant 0 : index
      %c0_30 = arith.constant 0 : index
      %35 = vector.load %arg7[%c0_29, %c0_30] : memref<8x8xf32, #tpu.memory_space<vmem>>, vector<8x8xf32>
      %c0_31 = arith.constant 0 : index
      %c0_32 = arith.constant 0 : index
      %36 = vector.load %arg4[%c0_31, %c0_32] : memref<8x1xf32, #tpu.memory_space<vmem>>, vector<8x1xf32>
      %37 = arith.mulf %30, %36 : vector<8x1xf32>
      %38 = vector.broadcast %37 : vector<8x1xf32> to vector<8x8xf32>
      %39 = arith.mulf %35, %38 : vector<8x8xf32>
      %40 = vector.broadcast %34 : vector<1x8xf32> to vector<8x8xf32>
      %41 = arith.mulf %39, %40 : vector<8x8xf32>
      %c0_33 = arith.constant 0 : index
      %c0_34 = arith.constant 0 : index
      %42 = vector.load %arg5[%c0_33, %c0_34] : memref<8x8xf32, #tpu.memory_space<vmem>>, vector<8x8xf32>
      %43 = arith.addf %41, %42 : vector<8x8xf32>
      %cst_35 = arith.constant dense<0xFF800000> : vector<8xf32>
      %44 = vector.multi_reduction <maximumf>, %43, %cst_35 [1] : vector<8x8xf32> to vector<8xf32>
      %45 = vector.shape_cast %44 : vector<8xf32> to vector<8x1xf32>
      %46 = vector.broadcast %45 : vector<8x1xf32> to vector<8x8xf32>
      %47 = arith.subf %43, %46 : vector<8x8xf32>
      %48 = math.exp %47 : vector<8x8xf32>
      %cst_36 = arith.constant dense<0.000000e+00> : vector<8xf32>
      %49 = vector.multi_reduction <add>, %48, %cst_36 [1] : vector<8x8xf32> to vector<8xf32>
      %50 = vector.shape_cast %49 : vector<8xf32> to vector<8x1xf32>
      %51 = tpu.reciprocal %50 {approx = true} : vector<8x1xf32> -> vector<8x1xf32>
      %52 = vector.broadcast %51 : vector<8x1xf32> to vector<8x8xf32>
      %53 = arith.mulf %48, %52 : vector<8x8xf32>
      %c0_37 = arith.constant 0 : index
      %c0_38 = arith.constant 0 : index
      %c0_39 = arith.constant 0 : index
      %54 = vector.load %arg6[%c0_37, %c0_38, %c0_39] : memref<1x8x8xf32, #tpu.memory_space<vmem>>, vector<1x8x8xf32>
      %55 = vector.shape_cast %54 : vector<1x8x8xf32> to vector<8x8xf32>
      %56 = vector.shape_cast %53 : vector<8x8xf32> to vector<1x8x8xf32>
      tpu.vector_store %arg6[%c0_37, %c0_38, %c0_39], %56 {strides = array<i32>} : memref<1x8x8xf32, #tpu.memory_space<vmem>>, vector<1x8x8xf32>,
    } else {
    }
    return
  }
  func.func @transform_0(%arg0: i32, %arg1: i32) -> (i32, i32, i32) {
    %c0_i32 = arith.constant 0 : i32
    %c0_i32_0 = arith.constant 0 : i32
    return %arg0, %arg1, %c0_i32 : i32, i32, i32
  }
  func.func @transform_1(%arg0: i32, %arg1: i32) -> (i32, i32, i32) {
    %c0_i32 = arith.constant 0 : i32
    %c0_i32_0 = arith.constant 0 : i32
    return %arg0, %arg1, %c0_i32 : i32, i32, i32
  }
  func.func @transform_2(%arg0: i32, %arg1: i32) -> (i32, i32) {
    %c0_i32 = arith.constant 0 : i32
    %c0_i32_0 = arith.constant 0 : i32
    %c0_i32_1 = arith.constant 0 : i32
    return %c0_i32, %c0_i32_0 : i32, i32
  }
  func.func @transform_3(%arg0: i32, %arg1: i32) -> (i32, i32) {
    %c0_i32 = arith.constant 0 : i32
    %c0_i32_0 = arith.constant 0 : i32
    %c0_i32_1 = arith.constant 0 : i32
    return %c0_i32, %c0_i32_0 : i32, i32
  }
  func.func @transform_4(%arg0: i32, %arg1: i32) -> (i32, i32, i32) {
    %c0_i32 = arith.constant 0 : i32
    %c0_i32_0 = arith.constant 0 : i32
    %c0_i32_1 = arith.constant 0 : i32
    return %arg0, %c0_i32, %c0_i32_0 : i32, i32, i32
  }
}

</mosaic_0001>

<bundles_post_ra>
// kernel: eq.8
= control target key start
LH: loop header
LB: loop body
LE: loop exit
PB: predicated region body
PF: predicated region fallthrough
CT: control target
= control target key end

     0   :  { %vm7_vm0 = vcmask 31744   ;;  %vm13_vm1 = vcmask 64544   ;;  %s39_s0 = inlined_call_operand.vmem [shape: s32[2,4], index: 0, kind: input, shape index: {}]   ;;  %s40_s1 = inlined_call_operand.vmem [shape: s32[8], index: 1, kind: output, shape index: {}]  }
   0x1   :  { %v4_v0 = vld [vmem:[%s39_s0] sm:$0x3]  ;;  %s22_s0 = smov 4  }
   0x2   :  { %5 = vst [vmem:[#allocation1] sm:$0x3] %v4_v0 }
   0x9   :  { %v10_v1 = vld [vmem:[#allocation1 + $0x1] sm:$0x1]   ;;  %v6_v2 = vld [vmem:[#allocation1] sm:$0x1]  }
   0xa   :  { %11 = vrot.lane.b32.xlu0 %v10_v1, %s22_s0  ;;  %8 = vst.msk [vmem:[#allocation0] sm:$0x1] %vm7_vm0, %v6_v2  }
  0x7c   :  { %v12_v3 = vpop.permute.xlu0 %11  }
  0x7d   :  { %14 = vst.msk [vmem:[#allocation0] sm:$0x1] %vm13_vm1, %v12_v3  }
  0x84   :  { %v18_v4 = vld [vmem:[#allocation0] sm:$0x1] }
  0x85   :  { %20 = vst [vmem:[%s40_s1] sm:$0x1] %v18_v4 }

// kernel: attention_forward.5
= control target key start
LH: loop header
LB: loop body
LE: loop exit
PB: predicated region body
PF: predicated region fallthrough
CT: control target
= control target key end

     0   :  { %s645_s9 = smov 0   ;;  %s647_s10 = smov 0   ;;  %s722_s0 = inlined_call_operand.vmem [shape: f32[2,8,8], index: 0, kind: input, shape index: {}]   ;;  %s723_s1 = inlined_call_operand.vmem [shape: bf16[2,256,8], index: 1, kind: input, shape index: {}]   ;;  %s724_s2 = inlined_call_operand.vmem [shape: f32[2,8,256], index: 2, kind: output, shape index: {}]  }
   0x1   :  { %s649_s11 = smov 0  }
   0x2 LB: > { %s24_s12 = sadd.s32 1, %s624_s10  ;;  %p513_p0 = scmp.ge.s32.totalorder %s628_s11, 1  ;;  %s628_s11 = sphi %s649_s11, %s12_s11   ;;  %s624_s10 = sphi %s647_s10, %s726_s10   ;;  %s620_s9 = sphi %s645_s9, %s725_s9  }
   0x3   : > { %p26_p1 = scmp.ge.s32.totalorder %s24_s12, 2  ;;  %p142_p2 = scmp.lt.s32.totalorder %s628_s11, 3 }
   0x5   : > { %s728_s12 = smov (%p26_p1, %s24_s12), 0  ;;  %p143_p3 = pnand %p513_p0, %p142_p2 }
   0x6   : > { %p176_p4 = scmp.lt.s32.totalorder (!%p143_p3), %s620_s9, 1  ;;  %vm315_vm0 = vcmask (!%p143_p3), 64512  }
   0x7   : > { %146 = sbr.rel (%p143_p3) target bundleno = 298 (0x12a), region = 28 }
   0xe   : > { %s730_s9 = smov (!%p176_p4, %s620_s9), 1 }
   0xf   : > { %s538_s13 = sshll.u32 %s730_s9, 7  ;;  %s514_s17 = sshll.u32 %s730_s9, 3 }
  0x10   : > { %s669_s16 = scalar_lea.vmem %s723_s1, %s538_s13  ;;  %s179_s20 = scalar_lea.vmem %s722_s0, %s514_s17 }
  0x11   : > { %v590_v0 = vld [vmem:[%s669_s16 + $0x40] sm:$0xff]   ;;  %v592_v2 = vld [vmem:[%s669_s16 + $0x48] sm:$0xff]   ;;  %v594_v6 = vld [vmem:[%s669_s16 + $0x50] sm:$0xff]   ;;  %s539_s21 = sshll.u32 %s730_s9, 4 }
  0x12   : > { %v591_v1 = vld [vmem:[%s669_s16] sm:$0xff]   ;;  %558 = vmatprep.subr.msk.bf16.mxu0 %vm315_vm0, %v590_v0  ;;  %v593_v4 = vld [vmem:[%s669_s16 + $0x8] sm:$0xff]   ;;  %v595_v7 = vld [vmem:[%s669_s16 + $0x10] sm:$0xff]   ;;  %s198_s24 = scalar_lea.vmem %s724_s2, %s539_s21 }
  0x13   : > { %v320_v3 = vsel %vm315_vm0, %v591_v1, 0  ;;  %v323_v5 = vsel %vm315_vm0, %v593_v4, 0  ;;  %v201_v8 = vld [vmem:[%s179_s20] sm:$0xff]  ;;  %v326_v9 = vsel %vm315_vm0, %v595_v7, 0  ;;  %v596_v10 = vld [vmem:[%s669_s16 + $0x58] sm:$0xff]   ;;  %v600_v17 = vld [vmem:[%s669_s16 + $0x68] sm:$0xff]  }
  0x14   : > { %541 = vmatpush3.bf16.xpose.msra.mxu0 %v320_v3  ;;  %v202_v11 = vpack.c.bf16 %v201_v8, %v201_v8  ;;  %v597_v12 = vld [vmem:[%s669_s16 + $0x18] sm:$0xff]   ;;  %v598_v14 = vld [vmem:[%s669_s16 + $0x60] sm:$0xff]   ;;  %v601_v18 = vld [vmem:[%s669_s16 + $0x28] sm:$0xff]  }
  0x15   : > { %559 = vmatprep.subr.msk.bf16.mxu0 %vm315_vm0, %v592_v2  ;;  %v329_v13 = vsel %vm315_vm0, %v597_v12, 0  ;;  %v599_v15 = vld [vmem:[%s669_s16 + $0x20] sm:$0xff]   ;;  %v335_v19 = vsel %vm315_vm0, %v601_v18, 0  ;;  %v602_v20 = vld [vmem:[%s669_s16 + $0x70] sm:$0xff]   ;;  %v604_v23 = vld [vmem:[%s669_s16 + $0x78] sm:$0xff]  }
  0x16   : > { %556 = vmatprep.mubr.msk.bf16.mxu0 %vm315_vm0, %v202_v11  ;;  %v332_v16 = vsel %vm315_vm0, %v599_v15, 0  ;;  %v603_v21 = vld [vmem:[%s669_s16 + $0x30] sm:$0xff]   ;;  %v605_v24 = vld [vmem:[%s669_s16 + $0x38] sm:$0xff]  }
  0x17   : > { %v338_v22 = vsel %vm315_vm0, %v603_v21, 0  ;;  %v341_v25 = vsel %vm315_vm0, %v605_v24, 0 }
  0x1c   : > { %543 = vmatpush3.bf16.xpose.msra.mxu0 %v323_v5 }
  0x1d   : > { %560 = vmatprep.subr.msk.bf16.mxu0 %vm315_vm0, %v594_v6 }
  0x24   : > { %545 = vmatpush3.bf16.xpose.msra.mxu0 %v326_v9 }
  0x25   : > { %561 = vmatprep.subr.msk.bf16.mxu0 %vm315_vm0, %v596_v10 }
  0x2c   : > { %547 = vmatpush3.bf16.xpose.msra.mxu0 %v329_v13 }
  0x2d   : > { %562 = vmatprep.subr.msk.bf16.mxu0 %vm315_vm0, %v598_v14 }
  0x34   : > { %549 = vmatpush3.bf16.xpose.msra.mxu0 %v332_v16 }
  0x35   : > { %563 = vmatprep.subr.msk.bf16.mxu0 %vm315_vm0, %v600_v17 }
  0x3c   : > { %551 = vmatpush3.bf16.xpose.msra.mxu0 %v335_v19 }
  0x3d   : > { %564 = vmatprep.subr.msk.bf16.mxu0 %vm315_vm0, %v602_v20 }
  0x44   : > { %553 = vmatpush3.bf16.xpose.msra.mxu0 %v338_v22 }
  0x45   : > { %565 = vmatprep.subr.msk.bf16.mxu0 %vm315_vm0, %v604_v23 }
  0x4c   : > { %555 = vmatpush3.bf16.xpose.msra.mxu0 %v341_v25 }
  0x53   : > { %557 = vmatmul.mubr.msk.bf16.vlgmr.msra.gmra.mrb[0].mxu0 %vm315_vm0, %v202_v11 }
 0x126   : > { %v401_v26 = vpop.f32.mrb[0].mxu0 }
 0x127   : > { %408 = vst [vmem:[%s198_s24] sm:$0xff] %v401_v26  ;;  %v403_v27 = vpop.f32.mrb[1].mxu0 }
 0x128   : > { %409 = vst [vmem:[%s198_s24 + $0x8] sm:$0xff] %v403_v27  ;;  %v405_v28 = vpop.f32.mrb[2].mxu0 }
 0x129   : > { %v406_v29 = vpop.f32.mrb[3].mxu0 }
 0x12a PF: > { %s12_s11 = sadd.s32 1, %s628_s11   ;;  %s725_s9 = smov %s624_s10 }
 0x12b   : > { %p9_p5 = scmp.ge.s32.totalorder %s12_s11, 4   ;;  %s726_s10 = smov %s728_s12 }
 0x12d   :  { %11 = sbr.rel (!%p9_p5) target bundleno = 2 (0x2), region = 61 }

// kernel: attention_forward.4
= control target key start
LH: loop header
LB: loop body
LE: loop exit
PB: predicated region body
PF: predicated region fallthrough
CT: control target
= control target key end

     0   :  { %s1477_s15 = smov 0   ;;  %s1479_s16 = smov 0   ;;  %s1701_s0 = inlined_call_operand.vmem [shape: bf16[2,256,8], index: 0, kind: input, shape index: {}]   ;;  %s1702_s1 = inlined_call_operand.vmem [shape: bf16[2,256,8], index: 1, kind: input, shape index: {}]   ;;  %s1703_s2 = inlined_call_operand.vmem [shape: f32[8,1], index: 2, kind: input, shape index: {}]   ;;  %s1704_s3 = inlined_call_operand.vmem [shape: f32[8,8], index: 3, kind: input, shape index: {}]   ;;  %s1705_s4 = inlined_call_operand.vmem [shape: f32[2,8,8], index: 4, kind: output, shape index: {}]  }
   0x1   :  { %s1481_s17 = smov 0  }
   0x2 LB: > { %s26_s18 = sadd.s32 1, %s1442_s16  ;;  %p1103_p0 = scmp.ge.s32.totalorder %s1446_s17, 1  ;;  %s1446_s17 = sphi %s1481_s17, %s14_s17   ;;  %s1442_s16 = sphi %s1479_s16, %s1707_s16   ;;  %s1438_s15 = sphi %s1477_s15, %s1706_s15  }
   0x3   : > { %p28_p1 = scmp.ge.s32.totalorder %s26_s18, 2  ;;  %p198_p2 = scmp.lt.s32.totalorder %s1446_s17, 3 }
   0x5   : > { %s1709_s18 = smov (%p28_p1, %s26_s18), 0  ;;  %p199_p3 = pnand %p1103_p0, %p198_p2 }
   0x6   : > { %p237_p4 = scmp.lt.s32.totalorder (!%p199_p3), %s1438_s15, 1  ;;  %v1448_v0 = vmov (!%p199_p3), 1.0|1.0   ;;  %vm267_vm0 = vcmask (!%p199_p3), 7168   ;;  %vm265_vm1 = vcmask (!%p199_p3), 64512   ;;  %vm269_vm2 = vcmask (!%p199_p3), 57344  }
   0x7   : > { %202 = sbr.rel (%p199_p3) target bundleno = 846 (0x34e), region = 36  ;;  %1237 = vmatprep.subr.bf16.mxu1 (!%p199_p3), %v1448_v0 }
   0x8   : > { %1238 = vmatpush3.bf16.msra.mxu1 (!%p199_p3), %v1448_v0 }
   0x9   : > { %1239 = vmatprep.subr.bf16.mxu1 (!%p199_p3), %v1448_v0 }
   0xc   : > { %1240 = vmatpush3.bf16.msra.mxu1 (!%p199_p3), %v1448_v0 }
   0xd   : > { %1241 = vmatprep.subr.bf16.mxu1 (!%p199_p3), %v1448_v0 }
   0xe   : > { %s1711_s15 = smov (!%p237_p4, %s1438_s15), 1 }
   0xf   : > { %s1143_s19 = sshll.u32 %s1711_s15, 7  ;;  %s1108_s30 = sshll.u32 %s1711_s15, 3 }
  0x10   : > { %s1506_s22 = scalar_lea.vmem %s1701_s0, %s1143_s19  ;;  %1242 = vmatpush3.bf16.msra.mxu1 %v1448_v0  ;;  %s1546_s25 = scalar_lea.vmem %s1702_s1, %s1143_s19 }
  0x11   : > { %v1509_v1 = vld [vmem:[%s1506_s22] sm:$0xff]   ;;  %v1513_v3 = vld [vmem:[%s1506_s22 + $0x8] sm:$0xff]   ;;  %1243 = vmatprep.subr.bf16.mxu1 %v1448_v0  ;;  %v1525_v21 = vld [vmem:[%s1506_s22 + $0x10] sm:$0xff]   ;;  %s259_s7 = scalar_lea.vmem %s1705_s4, %s1108_s30 }
  0x12   : > { %v287_v2 = vld [vmem:[%s1506_s22 + $0x40] sm:$0xff]   ;;  %v335_v4 = vunpack.c.l.bf16 %v1509_v1  ;;  %v336_v6 = vunpack.c.h.bf16 %v1509_v1  ;;  %v289_v8 = vld [vmem:[%s1506_s22 + $0x48] sm:$0xff]   ;;  %v337_v9 = vunpack.c.l.bf16 %v1513_v3  ;;  %v338_v16 = vunpack.c.h.bf16 %v1513_v3  ;;  %v291_v22 = vld [vmem:[%s1506_s22 + $0x50] sm:$0xff]  }
  0x13   : > { %v351_v5 = vunpack.c.l.bf16 %v287_v2  ;;  %v352_v7 = vunpack.c.h.bf16 %v287_v2  ;;  %v353_v10 = vunpack.c.l.bf16 %v289_v8  ;;  %v354_v17 = vunpack.c.h.bf16 %v289_v8  ;;  %v1535_v33 = vld [vmem:[%s1506_s22 + $0x18] sm:$0xff]   ;;  %512 = vxpose.xlu1.c.b16.start [1/8] (narrow) %v287_v2, 16  ;;  %v1552_v41 = vld [vmem:[%s1546_s25 + $0x40] sm:$0xff]   ;;  %v1563_v49 = vld [vmem:[%s1546_s25 + $0x48] sm:$0xff]  }
  0x14   : > { %v668_v11 = vmul.f32 %v335_v4, %v335_v4  ;;  %v669_v13 = vmul.f32 %v336_v6, %v336_v6  ;;  %v670_v19 = vmul.f32 %v337_v9, %v337_v9  ;;  %1244 = vmatpush3.bf16.msra.mxu1 %v1448_v0  ;;  %v671_v23 = vmul.f32 %v338_v16, %v338_v16  ;;  %v293_v34 = vld [vmem:[%s1506_s22 + $0x58] sm:$0xff]   ;;  %v1555_v46 = vld [vmem:[%s1506_s22 + $0x20] sm:$0xff]   ;;  %v1567_v52 = vld [vmem:[%s1546_s25 + $0x8] sm:$0xff]  }
  0x15   : > { %v684_v12 = vmul.f32 %v351_v5, %v351_v5  ;;  %v685_v14 = vmul.f32 %v352_v7, %v352_v7  ;;  %v686_v20 = vmul.f32 %v353_v10, %v353_v10  ;;  %1245 = vmatprep.subr.bf16.mxu1 %v1448_v0  ;;  %v687_v24 = vmul.f32 %v354_v17, %v354_v17  ;;  %v1558_v47 = vld [vmem:[%s1546_s25] sm:$0xff]   ;;  %v1570_v53 = vld [vmem:[%s1546_s25 + $0x50] sm:$0xff]   ;;  %v1579_v59 = vld [vmem:[%s1546_s25 + $0x58] sm:$0xff]  }
  0x16   : > { %v339_v26 = vunpack.c.l.bf16 %v1525_v21  ;;  %v355_v27 = vunpack.c.l.bf16 %v291_v22  ;;  %v340_v31 = vunpack.c.h.bf16 %v1525_v21  ;;  %v356_v32 = vunpack.c.h.bf16 %v291_v22  ;;  %v295_v48 = vld [vmem:[%s1506_s22 + $0x60] sm:$0xff]   ;;  %1145 = vmatprep.subr.bf16.mxu0 %v1552_v41  ;;  %v1576_v57 = vld [vmem:[%s1546_s25 + $0x10] sm:$0xff]   ;;  %v297_v2 = vld [vmem:[%s1506_s22 + $0x68] sm:$0xff]  }
  0x17   : > { %v1313_v15 = vpack.i.bf16 %v668_v11, %v684_v12  ;;  %v1315_v18 = vpack.i.bf16 %v669_v13, %v685_v14  ;;  %v1317_v25 = vpack.i.bf16 %v670_v19, %v686_v20  ;;  %v1319_v28 = vpack.i.bf16 %v671_v23, %v687_v24  ;;  %513 = vxpose.xlu1.c.b16.cont [2/8] (narrow) %v289_v8, 16  ;;  %v1589_v4 = vld [vmem:[%s1546_s25 + $0x18] sm:$0xff]   ;;  %v1593_v6 = vld [vmem:[%s1546_s25 + $0x60] sm:$0xff]   ;;  %v1602_v13 = vld [vmem:[%s1546_s25 + $0x68] sm:$0xff]  }
  0x18   : > { %1246 = vmatpush3.bf16.msra.mxu1 %v1448_v0  ;;  %v672_v29 = vmul.f32 %v339_v26, %v339_v26  ;;  %v688_v30 = vmul.f32 %v355_v27, %v355_v27  ;;  %v341_v35 = vunpack.c.l.bf16 %v1535_v33  ;;  %v357_v36 = vunpack.c.l.bf16 %v293_v34  ;;  %1146 = vmatpush3.bf16.msra.mxu0 %v1558_v47  ;;  %v1598_v11 = vld [vmem:[%s1546_s25 + $0x20] sm:$0xff]   ;;  %v299_v19 = vld [vmem:[%s1506_s22 + $0x70] sm:$0xff]   ;;  %v1611_v20 = vld [vmem:[%s1546_s25 + $0x28] sm:$0xff]  }
  0x19   : > { %1314 = vxpose.xlu0.b32.start [1/16] (narrow) %v1313_v15, 8  ;;  %1247 = vmatprep.subr.bf16.mxu1 %v1448_v0  ;;  %v673_v38 = vmul.f32 %v340_v31, %v340_v31  ;;  %v689_v39 = vmul.f32 %v356_v32, %v356_v32  ;;  %v342_v40 = vunpack.c.h.bf16 %v1535_v33  ;;  %v358_v45 = vunpack.c.h.bf16 %v293_v34  ;;  %v1615_v23 = vld [vmem:[%s1546_s25 + $0x70] sm:$0xff]  }
  0x1a   : > { %v1321_v37 = vpack.i.bf16 %v672_v29, %v688_v30  ;;  %v674_v43 = vmul.f32 %v341_v35, %v341_v35  ;;  %v690_v44 = vmul.f32 %v357_v36, %v357_v36  ;;  %v343_v51 = vunpack.c.l.bf16 %v1555_v46  ;;  %1147 = vmatprep.subr.bf16.mxu0 %v1563_v49  ;;  %v1623_v31 = vld [vmem:[%s1546_s25 + $0x30] sm:$0xff]  }
  0x1b   : > { %v1323_v42 = vpack.i.bf16 %v673_v38, %v689_v39  ;;  %v675_v50 = vmul.f32 %v342_v40, %v342_v40  ;;  %v691_v55 = vmul.f32 %v358_v45, %v358_v45  ;;  %v359_v56 = vunpack.c.l.bf16 %v295_v48  ;;  %514 = vxpose.xlu1.c.b16.cont [3/8] (narrow) %v291_v22, 16  ;;  %v285_v39 = vld [vmem:[%s1506_s22 + $0x38] sm:$0xff]  }
  0x1c   : > { %1248 = vmatpush3.bf16.msra.mxu1 %v1448_v0  ;;  %v1325_v54 = vpack.i.bf16 %v674_v43, %v690_v44  ;;  %v676_v58 = vmul.f32 %v343_v51, %v343_v51  ;;  %v344_v62 = vunpack.c.h.bf16 %v1555_v46  ;;  %v360_v63 = vunpack.c.h.bf16 %v295_v48  ;;  %1148 = vmatpush3.bf16.msra.mxu0 %v1567_v52 }
  0x1d   : > { %1316 = vxpose.xlu0.b32.cont [2/16] (narrow) %v1315_v18, 8  ;;  %1249 = vmatprep.subr.bf16.mxu1 %v1448_v0  ;;  %v1327_v60 = vpack.i.bf16 %v675_v50, %v691_v55  ;;  %v692_v61 = vmul.f32 %v359_v56, %v359_v56  ;;  %v361_v10 = vunpack.c.l.bf16 %v297_v2  ;;  %v362_v17 = vunpack.c.h.bf16 %v297_v2  ;;  %v1605_v18 = vld [vmem:[%s1506_s22 + $0x30] sm:$0xff]  }
  0x1e   : > { %1149 = vmatprep.subr.bf16.mxu0 %v1570_v53  ;;  %v677_v8 = vmul.f32 %v344_v62, %v344_v62  ;;  %v693_v9 = vmul.f32 %v360_v63, %v360_v63  ;;  %v347_v22 = vunpack.c.l.bf16 %v1605_v18  ;;  %v363_v27 = vunpack.c.l.bf16 %v299_v19 }
  0x1f   : > { %515 = vxpose.xlu1.c.b16.cont [4/8] (narrow) %v293_v34, 16  ;;  %v1329_v7 = vpack.i.bf16 %v676_v58, %v692_v61  ;;  %v694_v16 = vmul.f32 %v361_v10, %v361_v10  ;;  %v695_v26 = vmul.f32 %v362_v17, %v362_v17  ;;  %v383_v29 = vunpack.c.l.bf16 %v1552_v41  ;;  %v1626_v34 = vld [vmem:[%s1546_s25 + $0x78] sm:$0xff]  }
  0x20   : > { %1250 = vmatpush3.bf16.msra.mxu1 %v1448_v0  ;;  %1150 = vmatpush3.bf16.msra.mxu0 %v1576_v57  ;;  %v1331_v14 = vpack.i.bf16 %v677_v8, %v693_v9  ;;  %v384_v30 = vunpack.c.h.bf16 %v1552_v41  ;;  %v680_v32 = vmul.f32 %v347_v22, %v347_v22  ;;  %v696_v36 = vmul.f32 %v363_v27, %v363_v27 }
  0x21   : > { %1318 = vxpose.xlu0.b32.cont [3/16] (narrow) %v1317_v25, 8  ;;  %1251 = vmatprep.subr.bf16.mxu1 %v1448_v0  ;;  %v364_v38 = vunpack.c.h.bf16 %v299_v19  ;;  %v854_v40 = vmul.f32 %v383_v29, %v383_v29  ;;  %v349_v43 = vunpack.c.l.bf16 %v285_v39  ;;  %v386_v8 = vunpack.c.h.bf16 %v1563_v49 }
  0x22   : > { %1151 = vmatprep.subr.bf16.mxu0 %v1579_v59  ;;  %v855_v41 = vmul.f32 %v384_v30, %v384_v30  ;;  %v1337_v44 = vpack.i.bf16 %v680_v32, %v696_v36  ;;  %v371_v22 = vunpack.c.l.bf16 %v1576_v57  ;;  %v391_v36 = vunpack.c.l.bf16 %v1593_v6 }
  0x23   : > { %516 = vxpose.xlu1.c.b16.cont [5/8] (narrow) %v295_v48, 16  ;;  %v697_v48 = vmul.f32 %v364_v38, %v364_v38  ;;  %v682_v56 = vmul.f32 %v349_v43, %v349_v43 }
  0x24   : > { %1252 = vmatpush3.bf16.msra.mxu1 %v1448_v0  ;;  %v1583_v0 = vld [vmem:[%s1506_s22 + $0x28] sm:$0xff]   ;;  %1152 = vmatpush3.bf16.msra.mxu0 %v1589_v4  ;;  %v1253_v51 = vpack.c.bf16 %v855_v41, %v854_v40  ;;  %v842_v30 = vmul.f32 %v371_v22, %v371_v22  ;;  %v375_v41 = vunpack.c.l.bf16 %v1598_v11 }
  0x25   : > { %1320 = vxpose.xlu0.b32.cont [4/16] (narrow) %v1319_v28, 8  ;;  %v345_v5 = vunpack.c.l.bf16 %v1583_v0  ;;  %v346_v12 = vunpack.c.h.bf16 %v1583_v0  ;;  %1153 = vmatprep.subr.bf16.mxu0 %v1593_v6  ;;  %v301_v28 = vld [vmem:[%s1506_s22 + $0x78] sm:$0xff]  }
  0x26   : > { %v365_v50 = vunpack.c.l.bf16 %v301_v28 }
  0x27   : > { %v678_v15 = vmul.f32 %v345_v5, %v345_v5  ;;  %517 = vxpose.xlu1.c.b16.cont [6/8] (narrow) %v297_v2, 16  ;;  %v679_v25 = vmul.f32 %v346_v12, %v346_v12  ;;  %v1449_v2 = vmov 1.0   ;;  %v368_v5 = vunpack.c.h.bf16 %v1558_v47 }
  0x28   : > { %1154 = vmatpush3.bf16.msra.mxu0 %v1598_v11  ;;  %v698_v58 = vmul.f32 %v365_v50, %v365_v50  ;;  %v369_v12 = vunpack.c.l.bf16 %v1567_v52 }
  0x29   : > { %1322 = vxpose.xlu0.b32.cont [5/16] (narrow) %v1321_v37, 8  ;;  %v1333_v24 = vpack.i.bf16 %v678_v15, %v694_v16  ;;  %1155 = vmatprep.subr.bf16.mxu0 %v1602_v13  ;;  %v1335_v35 = vpack.i.bf16 %v679_v25, %v695_v26  ;;  %v348_v37 = vunpack.c.h.bf16 %v1605_v18  ;;  %v839_v10 = vmul.f32 %v368_v5, %v368_v5 }
  0x2a   : > { %v1341_v61 = vpack.i.bf16 %v682_v56, %v698_v58  ;;  %v387_v15 = vunpack.c.l.bf16 %v1570_v53  ;;  %v388_v16 = vunpack.c.h.bf16 %v1570_v53  ;;  %v372_v25 = vunpack.c.h.bf16 %v1576_v57 }
  0x2b   : > { %518 = vxpose.xlu1.c.b16.cont [7/8] (narrow) %v299_v19, 16  ;;  %v681_v45 = vmul.f32 %v348_v37, %v348_v37  ;;  %v390_v26 = vunpack.c.h.bf16 %v1579_v59  ;;  %v373_v53 = vunpack.c.l.bf16 %v1589_v4  ;;  %v392_v57 = vunpack.c.h.bf16 %v1593_v6 }
  0x2c   : > { %1156 = vmatpush3.bf16.msra.mxu0 %v1611_v20  ;;  %v843_v32 = vmul.f32 %v372_v25, %v372_v25  ;;  %v378_v58 = vunpack.c.h.bf16 %v1611_v20 }
  0x2d   : > { %1324 = vxpose.xlu0.b32.cont [6/16] (narrow) %v1323_v42, 8  ;;  %1157 = vmatprep.subr.bf16.mxu0 %v1615_v23  ;;  %v1633_v42 = vld [vmem:[%s1546_s25 + $0x38] sm:$0xff]   ;;  %v1339_v55 = vpack.i.bf16 %v681_v45, %v697_v48  ;;  %v844_v40 = vmul.f32 %v373_v53, %v373_v53  ;;  %v393_v45 = vunpack.c.l.bf16 %v1602_v13  ;;  %v394_v48 = vunpack.c.h.bf16 %v1602_v13 }
  0x2e   : > { %v863_v6 = vmul.f32 %v392_v57, %v392_v57  ;;  %v985_v57 = vld [vmem:[%s1703_s2] sm:$0xff] }
  0x2f   : > { %519 = vxpose.xlu1.c.b16.end [8/8] (narrow) %v301_v28, 16  ;;  %v865_v13 = vmul.f32 %v394_v48, %v394_v48  ;;  %v994_v48 = vlaneseq }
  0x30   : > { %1158 = vmatpush3.bf16.msra.mxu0 %v1623_v31 }
  0x31   : > { %1326 = vxpose.xlu0.b32.cont [7/16] (narrow) %v1325_v54, 8  ;;  %1159 = vmatprep.subr.bf16.mxu0 %v1626_v34  ;;  %v350_v54 = vunpack.c.h.bf16 %v285_v39 }
  0x33   : > { %496 = vxpose.xlu1.c.b16.start [1/8] (narrow) %v1509_v1, 16  ;;  %v683_v62 = vmul.f32 %v350_v54, %v350_v54  ;;  %v846_v54 = vmul.f32 %v375_v41, %v375_v41 }
  0x34   : > { %1160 = vmatpush3.bf16.msra.mxu0 %v1633_v42 }
  0x35   : > { %1328 = vxpose.xlu0.b32.cont [8/16] (narrow) %v1327_v60, 8  ;;  %v366_v60 = vunpack.c.h.bf16 %v301_v28  ;;  %1254 = vmatprep.subr.bf16.mxu0 %v1253_v51  ;;  %v858_v28 = vmul.f32 %v387_v15, %v387_v15  ;;  %v862_v51 = vmul.f32 %v391_v36, %v391_v36 }
  0x37   : > { %497 = vxpose.xlu1.c.b16.cont [2/8] (narrow) %v1513_v3, 16  ;;  %v699_v63 = vmul.f32 %v366_v60, %v366_v60  ;;  %v395_v60 = vunpack.c.l.bf16 %v1615_v23 }
  0x39   : > { %1330 = vxpose.xlu0.b32.cont [9/16] (narrow) %v1329_v7, 8  ;;  %v1343_v1 = vpack.i.bf16 %v683_v62, %v699_v63  ;;  %v385_v7 = vunpack.c.l.bf16 %v1563_v49  ;;  %v389_v49 = vunpack.c.l.bf16 %v1579_v59  ;;  %v1269_v62 = vpack.c.bf16 %v863_v6, %v862_v51 }
  0x3a   : > { %v864_v63 = vmul.f32 %v393_v45, %v393_v45  ;;  %v866_v5 = vmul.f32 %v395_v60, %v395_v60  ;;  %v1000_v60 = vld [vmem:[%s1704_s3] sm:$0xff] }
  0x3b   : > { %498 = vxpose.xlu1.c.b16.cont [3/8] (narrow) %v1525_v21, 16  ;;  %v856_v17 = vmul.f32 %v385_v7, %v385_v7  ;;  %v860_v59 = vmul.f32 %v389_v49, %v389_v49 }
  0x3d   : > { %1332 = vxpose.xlu0.b32.cont [10/16] (narrow) %v1331_v14, 8  ;;  %v370_v14 = vunpack.c.h.bf16 %v1567_v52  ;;  %v859_v52 = vmul.f32 %v388_v16, %v388_v16 }
  0x3f   : > { %499 = vxpose.xlu1.c.b16.cont [4/8] (narrow) %v1535_v33, 16  ;;  %v1261_v38 = vpack.c.bf16 %v859_v52, %v858_v28 }
  0x41   : > { %1334 = vxpose.xlu0.b32.cont [11/16] (narrow) %v1333_v24, 8  ;;  %v841_v24 = vmul.f32 %v370_v14, %v370_v14 }
  0x43   : > { %500 = vxpose.xlu1.c.b16.cont [5/8] (narrow) %v1555_v46, 16 }
  0x45   : > { %1336 = vxpose.xlu0.b32.cont [12/16] (narrow) %v1335_v35, 8  ;;  %v374_v35 = vunpack.c.h.bf16 %v1589_v4  ;;  %v1263_v4 = vpack.c.bf16 %v843_v32, %v842_v30 }
  0x47   : > { %501 = vxpose.xlu1.c.b16.cont [6/8] (narrow) %v1583_v0, 16  ;;  %v367_v0 = vunpack.c.l.bf16 %v1558_v47  ;;  %v840_v47 = vmul.f32 %v369_v12, %v369_v12  ;;  %v845_v43 = vmul.f32 %v374_v35, %v374_v35 }
  0x49   : > { %1338 = vxpose.xlu0.b32.cont [13/16] (narrow) %v1337_v44, 8  ;;  %v838_v9 = vmul.f32 %v367_v0, %v367_v0  ;;  %v1259_v37 = vpack.c.bf16 %v841_v24, %v840_v47  ;;  %v376_v44 = vunpack.c.h.bf16 %v1598_v11  ;;  %v1267_v11 = vpack.c.bf16 %v845_v43, %v844_v40 }
  0x4a   : > { %v1273_v0 = vpack.c.bf16 %v865_v13, %v864_v63  ;;  %v1451_v47 = vmov 0  }
  0x4b   : > { %502 = vxpose.xlu1.c.b16.cont [7/8] (narrow) %v1605_v18, 16  ;;  %v857_v18 = vmul.f32 %v386_v8, %v386_v8  ;;  %v1255_v19 = vpack.c.bf16 %v839_v10, %v838_v9  ;;  %v847_v56 = vmul.f32 %v376_v44, %v376_v44  ;;  %v381_v9 = vunpack.c.l.bf16 %v1633_v42 }
  0x4c   : > { %v382_v10 = vunpack.c.h.bf16 %v1633_v42  ;;  %v1450_v42 = vmov 0.0  }
  0x4d   : > { %1340 = vxpose.xlu0.b32.cont [14/16] (narrow) %v1339_v55, 8  ;;  %v1257_v27 = vpack.c.bf16 %v857_v18, %v856_v17  ;;  %v377_v55 = vunpack.c.l.bf16 %v1611_v20  ;;  %v1271_v20 = vpack.c.bf16 %v847_v56, %v846_v54  ;;  %v852_v16 = vmul.f32 %v381_v9, %v381_v9  ;;  %268 = vst.msk [vmem:[#allocation3] sm:$0xff] %vm267_vm0, %v1450_v42 }
  0x4e   : > { %v853_v17 = vmul.f32 %v382_v10, %v382_v10  ;;  %266 = vst.msk [vmem:[#allocation2] sm:$0xff] %vm265_vm1, %v1450_v42 }
  0x4f   : > { %503 = vxpose.xlu1.c.b16.end [8/8] (narrow) %v285_v39, 16  ;;  %v861_v39 = vmul.f32 %v390_v26, %v390_v26  ;;  %270 = vst.msk [vmem:[#allocation4] sm:$0x1] %vm269_vm2, %v1450_v42 }
  0x51   : > { %1342 = vxpose.xlu0.b32.cont [15/16] (narrow) %v1341_v61, 8  ;;  %v1265_v50 = vpack.c.bf16 %v861_v39, %v860_v59  ;;  %v396_v61 = vunpack.c.h.bf16 %v1615_v23 }
  0x53   : > { %v867_v23 = vmul.f32 %v396_v61, %v396_v61  ;;  %1350 = vset.pattern.permute.xlu1 %v1451_v47 }
  0x54   : > { %v667_v25 = vld [vmem:[#allocation3] sm:$0xff] }
  0x55   : > { %1344 = vxpose.xlu0.b32.end [16/16] (narrow) %v1343_v1, 8  ;;  %v848_v1 = vmul.f32 %v377_v55, %v377_v55  ;;  %v399_v30 = vld [vmem:[#allocation2] sm:$0xff] }
  0x56   : > { %v837_v40 = vld [vmem:[#allocation4] sm:$0x1] }
  0x59   : > { %870 = vxpose.xlu0.b32.start [1/16] (narrow) %v1449_v2, 8 }
  0x5d   : > { %871 = vxpose.xlu0.b32.cont [2/16] (narrow) %v1449_v2, 8 }
  0x61   : > { %872 = vxpose.xlu0.b32.cont [3/16] (narrow) %v1449_v2, 8 }
  0x65   : > { %873 = vxpose.xlu0.b32.cont [4/16] (narrow) %v1449_v2, 8 }
  0x69   : > { %874 = vxpose.xlu0.b32.cont [5/16] (narrow) %v1449_v2, 8 }
  0x6d   : > { %875 = vxpose.xlu0.b32.cont [6/16] (narrow) %v1449_v2, 8 }
  0x71   : > { %876 = vxpose.xlu0.b32.cont [7/16] (narrow) %v1449_v2, 8 }
  0x75   : > { %877 = vxpose.xlu0.b32.cont [8/16] (narrow) %v1449_v2, 8 }
  0x79   : > { %878 = vxpose.xlu0.b32.cont [9/16] (narrow) %v1449_v2, 8  ;;  %v520_v3 = vpop.trf.xlu1 }
  0x7a   : > { %656 = vmatprep.mubr.bf16.mxu0 %v520_v3  ;;  %v849_v3 = vmul.f32 %v378_v58, %v378_v58 }
  0x7c   : > { %v1275_v12 = vpack.c.bf16 %v849_v3, %v848_v1 }
  0x7d   : > { %879 = vxpose.xlu0.b32.cont [10/16] (narrow) %v1449_v2, 8 }
  0x81   : > { %880 = vxpose.xlu0.b32.cont [11/16] (narrow) %v1449_v2, 8 }
  0x85   : > { %881 = vxpose.xlu0.b32.cont [12/16] (narrow) %v1449_v2, 8 }
  0x89   : > { %882 = vxpose.xlu0.b32.cont [13/16] (narrow) %v1449_v2, 8 }
  0x8d   : > { %883 = vxpose.xlu0.b32.cont [14/16] (narrow) %v1449_v2, 8 }
  0x91   : > { %884 = vxpose.xlu0.b32.cont [15/16] (narrow) %v1449_v2, 8 }
  0x95   : > { %885 = vxpose.xlu0.b32.end [16/16] (narrow) %v1449_v2, 8  ;;  %v379_v2 = vunpack.c.l.bf16 %v1623_v31 }
  0x97   : > { %v850_v7 = vmul.f32 %v379_v2, %v379_v2 }
  0x99   : > { %v1345_v21 = vpop.trf.xlu0  ;;  %v504_v29 = vpop.trf.xlu1 }
  0x9a   : > { %v1346_v33 = vunpack.i.l.bf16 %v1345_v21  ;;  %v1349_v46 = vunpack.i.h.bf16 %v1345_v21  ;;  %657 = vmatmul.mubr.bf16.vlgmr.msra.gmra.mrb[0].mxu0 %v504_v29  ;;  %v380_v21 = vunpack.c.h.bf16 %v1623_v31  ;;  %v1277_v31 = vpack.c.bf16 %v867_v23, %v866_v5 }
  0x9b   : > { %1256 = vmatpush3.bf16.msra.mxu0 %v1255_v19  ;;  %v1283_v19 = vpack.c.bf16 %v853_v17, %v852_v16 }
  0x9c   : > { %828 = vmatprep.mubr.f32.mxu1 %v1346_v33  ;;  %1258 = vmatprep.subr.bf16.mxu0 %v1257_v27  ;;  %v397_v33 = vunpack.c.l.bf16 %v1626_v34  ;;  %v851_v8 = vmul.f32 %v380_v21, %v380_v21 }
  0x9d   : > { %829 = vmatmul.mubr.f32.vlgmr.msra.gmra.mrb[0].mxu1 %v1349_v46  ;;  %v398_v46 = vunpack.c.h.bf16 %v1626_v34 }
  0x9e   : > { %v868_v14 = vmul.f32 %v397_v33, %v397_v33  ;;  %v1279_v34 = vpack.c.bf16 %v851_v8, %v850_v7 }
  0x9f   : > { %1260 = vmatpush3.bf16.msra.mxu0 %v1259_v37  ;;  %v869_v15 = vmul.f32 %v398_v46, %v398_v46 }
  0xa0   : > { %1262 = vmatprep.subr.bf16.mxu0 %v1261_v38 }
  0xa1   : > { %v1281_v18 = vpack.c.bf16 %v869_v15, %v868_v14 }
  0xa3   : > { %1264 = vmatpush3.bf16.msra.mxu0 %v1263_v4 }
  0xa4   : > { %1266 = vmatprep.subr.bf16.mxu0 %v1265_v50  ;;  %v995_v50 = vshrl.u32 %v994_v48, 7 }
  0xa6   : > { %v996_v51 = vsub.s32 0, %v995_v50 }
  0xa7   : > { %1268 = vmatpush3.bf16.msra.mxu0 %v1267_v11 }
  0xa8   : > { %1270 = vmatprep.subr.bf16.mxu0 %v1269_v62 }
  0xab   : > { %1272 = vmatpush3.bf16.msra.mxu0 %v1271_v20 }
  0xac   : > { %1274 = vmatprep.subr.bf16.mxu0 %v1273_v0 }
  0xaf   : > { %1276 = vmatpush3.bf16.msra.mxu0 %v1275_v12 }
  0xb0   : > { %1278 = vmatprep.subr.bf16.mxu0 %v1277_v31 }
  0xb3   : > { %1280 = vmatpush3.bf16.msra.mxu0 %v1279_v34 }
  0xb4   : > { %1282 = vmatprep.subr.bf16.mxu0 %v1281_v18 }
  0xb7   : > { %1284 = vmatpush3.bf16.msra.mxu0 %v1283_v19 }
  0xbe   : > { %1351 = vset.pattern.permute.xlu0 %v1451_v47 }
  0xd9   : > { %v886_v22 = vpop.trf.xlu0 }
  0xda   : > { %966 = vmatprep.mubr.f32.mxu0 %v886_v22 }
  0xdb   : > { %967 = vmatmul.mubr.f32.vlgmr.msra.gmra.mrb[4].mxu0 %v886_v22 }
 0x16d   : > { %v1161_v29 = vpop.f32.mrb[0].mxu0 }
 0x16e   : > { %v1162_v53 = vpop.f32.mrb[1].mxu0 }
 0x16f   : > { %v1163_v32 = vadd.f32 %v1162_v53, %v1161_v29  ;;  %v1164_v35 = vpop.f32.mrb[2].mxu0 }
 0x170   : > { %v1199_v24 = vpop.f32.mrb[0].mxu1  ;;  %v1165_v36 = vpop.f32.mrb[3].mxu0 }
 0x171   : > { %v1200_v49 = vpop.f32.mrb[1].mxu1  ;;  %v664_v37 = vadd.f32 %v1163_v32, %v399_v30 }
 0x172   : > { %v1201_v26 = vadd.f32 %v1200_v49, %v1199_v24 }
 0x173   : > { %666 = vst.msk [vmem:[#allocation2] sm:$0xff] %vm265_vm1, %v664_v37 }
 0x174   : > { %v834_v27 = vadd.f32 %v1201_v26, %v667_v25 }
 0x176   : > { %836 = vst.msk [vmem:[#allocation3] sm:$0xff] %vm267_vm0, %v834_v27 }
 0x17a   : > { %v984_v54 = vld [vmem:[#allocation2] sm:$0xff] }
 0x17d   : > { %v978_v28 = vld [vmem:[#allocation3] sm:$0xff] }
 0x17e   : > { %v979_v52 = vmax.f32 %v978_v28, 1e-24 }
 0x180   : > { %1416 = vrsqrt.f32 %v979_v52 }
 0x18a   : > { %v1417_v38 = vpop.eup %1416 }
 0x18b   : > { %v986_v59 = vmul.f32 %v1417_v38, %v985_v57 }
 0x18d   : > { %989 = vperm.xlu1 %1350, %v986_v59  }
 0x1ae   : > { %v1234_v39 = vpop.f32.mrb[4].mxu0 }
 0x1af   : > { %v1235_v41 = vpop.f32.mrb[5].mxu0 }
 0x1b0   : > { %v1236_v43 = vadd.f32 %v1235_v41, %v1234_v39 }
 0x1b2   : > { %v972_v44 = vadd.f32 %v1236_v43, %v837_v40 }
 0x1b4   : > { %974 = vst.msk [vmem:[#allocation4] sm:$0x1] %vm269_vm2, %v972_v44 }
 0x1bb   : > { %v981_v45 = vld [vmem:[#allocation4] sm:$0x1] }
 0x1bc   : > { %v982_v4 = vmax.f32 %v981_v45, 1e-24 }
 0x1be   : > { %1418 = vrsqrt.f32 %v982_v4 }
 0x1c8   : > { %v1419_v6 = vpop.eup %1418 }
 0x1c9   : > { %v997_v56 = vrot.slane %v1419_v6, %v996_v51 }
 0x20c   : > { %v990_v55 = vpop.permute.xlu1 %989 }
 0x20d   : > { %v992_v58 = vmul.f32 %v990_v55, %v984_v54 }
 0x20f   : > { %v999_v11 = vmul.f32 %v997_v56, %v992_v58 }
 0x211   : > { %v1001_v61 = vadd.f32 %v1000_v60, %v999_v11 }
 0x213   : > { %v1002_v62 = vsel %vm265_vm1, %v1001_v61, -inf }
 0x214   : > { %1003 = vmax.xlane.f32.xlu1 %v1002_v62 }
 0x2a1   : > { %v1004_v63 = vpop.xlane.xlu1 %1003 }
 0x2a2   : > { %v1005_v13 = vsub.f32 %v1001_v61, %v1004_v63 }
 0x2a4   : > { %v1006_v1 = vmul.f32 1.442695, %v1005_v13 }
 0x2a6   : > { %1420 = vpow2.f32 %v1006_v1 }
 0x2b0   : > { %v1421_v2 = vpop.eup %1420 }
 0x2b1   : > { %v1008_v3 = vsel %vm265_vm1, %v1421_v2, 0.0 }
 0x2b2   : > { %1009 = vadd.xlane.f32.xlu1 %v1008_v3 }
 0x33f   : > { %v1010_v21 = vpop.xlane.xlu1 %1009 }
 0x340   : > { %1422 = vrcp.f32 %v1010_v21 }
 0x34a   : > { %v1423_v33 = vpop.eup %1422 }
 0x34b   : > { %v1012_v20 = vmul.f32 %v1423_v33, %v1421_v2 }
 0x34d   : > { %1013 = vst.msk [vmem:[%s259_s7] sm:$0xff] %vm265_vm1, %v1012_v20 }
 0x34e PF: > { %s14_s17 = sadd.s32 1, %s1446_s17   ;;  %s1706_s15 = smov %s1442_s16 }
 0x34f   : > { %p11_p5 = scmp.ge.s32.totalorder %s14_s17, 4   ;;  %s1707_s16 = smov %s1709_s18 }
 0x351   :  { %13 = sbr.rel (!%p11_p5) target bundleno = 2 (0x2), region = 77 }

// kernel: attention_forward.3
= control target key start
LH: loop header
LB: loop body
LE: loop exit
PB: predicated region body
PF: predicated region fallthrough
CT: control target
= control target key end

     0   :  { %s4928_s24 = smov 0   ;;  %s8387_s0 = inlined_call_operand.vmem [shape: f32[2,16,16,8], index: 0, kind: input, shape index: {}]   ;;  %s8388_s1 = inlined_call_operand.vmem [shape: f32[3,8,8], index: 1, kind: input, shape index: {}]   ;;  %s8389_s2 = inlined_call_operand.vmem [shape: f32[3,1,8], index: 2, kind: input, shape index: {}]   ;;  %s8390_s3 = inlined_call_operand.vmem [shape: f32[3,3,3,8], index: 3, kind: input, shape index: {}]   ;;  %s8391_s4 = inlined_call_operand.vmem [shape: f32[3,1,8], index: 4, kind: input, shape index: {}]   ;;  %s8392_s5 = inlined_call_operand.vmem [shape: bf16[2,16,16,8], index: 5, kind: output, shape index: {0}]   ;;  %s8393_s6 = inlined_call_operand.vmem [shape: bf16[2,16,16,8], index: 6, kind: output, shape index: {1}]   ;;  %s8394_s7 = inlined_call_operand.vmem [shape: bf16[2,16,16,8], index: 7, kind: output, shape index: {2}]  }
   0x1 LB: > { %s4418_s25 = sadd.s32 4294967295, %s4885_s24   ;;  %p4422_p0 = scmp.ge.s32.totalorder %s4885_s24, 1  ;;  %s4885_s24 = sphi %s4928_s24, %s18_s24  }
   0x2   : > { %p242_p1 = scmp.lt.s32.totalorder %s4885_s24, 3 }
   0x4   : > { %p243_p2 = pnand %p4422_p0, %p242_p1 }
   0x6   : > { %246 = sbr.rel (%p243_p2) target bundleno = 759 (0x2f7), region = 40 }
   0xd   : > { %v409_v0 = vld [vmem:[%s8388_s1] sm:$0xff]  ;;  %vm466_vm0 = vcmask 1043456   ;;  %p284_p3 = scmp.lt.s32.totalorder %s4418_s25, 1  ;;  %vm353_vm1 = vcmask 64512   ;;  %v4481_v1 = vld [vmem:[%s8388_s1 + $0x8] sm:$0xff]  ;;  %v4537_v2 = vld [vmem:[%s8388_s1 + $0x10] sm:$0xff]  ;;  %v707_v58 = vlaneseq }
   0xe   : > { %v410_v3 = vpack.c.bf16 %v409_v0, %v409_v0  ;;  %v4945_v4 = vpack.c.bf16 %v4481_v1, %v4481_v1  ;;  %v3019_v5 = vpack.c.bf16 %v4537_v2, %v4537_v2  ;;  %v4887_v6 = vmov 0.0   ;;  %v4556_v63 = vld [vmem:[%s8390_s3 + $0x18] sm:$0x7] }
   0xf   : > { %s8949_s25 = smov (!%p284_p3, %s4418_s25), 1  ;;  %361 = vst.msk [vmem:[#allocation2 + $0x30] sm:$0xff] %vm353_vm1, %v4887_v6  ;;  %362 = vst.msk [vmem:[#allocation2 + $0x38] sm:$0xff] %vm353_vm1, %v4887_v6  ;;  %vm356_vm2 = vcmask 58368   ;;  %v708_v59 = vshrl.u32 %v707_v58, 7  ;;  %vm1704_vm3 = vcmask 60416  }
  0x10   : > { %354 = vst.msk [vmem:[#allocation2] sm:$0xff] %vm353_vm1, %v4887_v6  ;;  %355 = vst.msk [vmem:[#allocation2 + $0x8] sm:$0xff] %vm353_vm1, %v4887_v6  ;;  %4851 = vmatprep.subr.msk.bf16.mxu1 %vm466_vm0, %v410_v3  ;;  %4850 = vmatprep.subr.msk.bf16.mxu0 %vm466_vm0, %v410_v3  ;;  %v468_v7 = vsel %vm466_vm0, %v410_v3, 0  ;;  %s4595_s9 = sshll.u32 %s8949_s25, 8  ;;  %v3029_v20 = vsel %vm466_vm0, %v3019_v5, 0  ;;  %v1749_v22 = vsel %vm466_vm0, %v4945_v4, 0 }
  0x11   : > { %358 = vst.msk [vmem:[#allocation2 + $0x18] sm:$0xff] %vm353_vm1, %v4887_v6  ;;  %359 = vst.msk [vmem:[#allocation2 + $0x20] sm:$0xff] %vm353_vm1, %v4887_v6  ;;  %4849 = vmatpush3.bf16.msra.mxu1 %v468_v7  ;;  %4747 = vmatpush3.bf16.msra.mxu0 %v468_v7  ;;  %s5028_s12 = scalar_lea.vmem %s8387_s0, %s4595_s9  ;;  %v5177_v60 = vsub.s32 0, %v708_v59  ;;  %v5179_v61 = vsub.s32 1, %v708_v59  ;;  %v5181_v62 = vsub.s32 2, %v708_v59  ;;  %s5479_s29 = sshll.u32 %s8949_s25, 7 }
  0x12   : > { %364 = vst.msk [vmem:[#allocation2 + $0x48] sm:$0xff] %vm353_vm1, %v4887_v6  ;;  %365 = vst.msk [vmem:[#allocation2 + $0x50] sm:$0xff] %vm353_vm1, %v4887_v6  ;;  %4852 = vmatprep.subr.msk.bf16.mxu1 %vm466_vm0, %v4945_v4  ;;  %4853 = vmatprep.subr.msk.bf16.mxu0 %vm466_vm0, %v3019_v5  ;;  %v305_v8 = vld [vmem:[%s5028_s12] sm:$0xff]  ;;  %v306_v9 = vld [vmem:[%s5028_s12 + $0x8] sm:$0xff]  ;;  %s5502_s8 = scalar_lea.vmem %s8392_s5, %s5479_s29  ;;  %s6735_s13 = scalar_lea.vmem %s8394_s7, %s5479_s29 }
  0x13   : > { %367 = vst.msk [vmem:[#allocation2 + $0x60] sm:$0xff] %vm353_vm1, %v4887_v6  ;;  %368 = vst.msk [vmem:[#allocation2 + $0x68] sm:$0xff] %vm353_vm1, %v4887_v6  ;;  %v321_v10 = vld [vmem:[%s5028_s12 + $0x80] sm:$0xff]  ;;  %v5036_v11 = vpack.c.bf16 %v306_v9, %v305_v8  ;;  %v322_v12 = vld [vmem:[%s5028_s12 + $0x88] sm:$0xff]  ;;  %v5187_v0 = vrot.slane %v4556_v63, %v5177_v60  ;;  %v5190_v1 = vrot.slane %v4556_v63, %v5179_v61 }
  0x14   : > { %370 = vst.msk [vmem:[#allocation2 + $0x78] sm:$0xff] %vm353_vm1, %v4887_v6  ;;  %371 = vst.msk [vmem:[#allocation2 + $0x80] sm:$0xff] %vm353_vm1, %v4887_v6  ;;  %v307_v13 = vld [vmem:[%s5028_s12 + $0x10] sm:$0xff]  ;;  %v308_v14 = vld [vmem:[%s5028_s12 + $0x18] sm:$0xff]  ;;  %v5041_v15 = vpack.c.bf16 %v322_v12, %v321_v10  ;;  %v5193_v2 = vrot.slane %v4556_v63, %v5181_v62 }
  0x15   : > { %373 = vst.msk [vmem:[#allocation2 + $0x90] sm:$0xff] %vm353_vm1, %v4887_v6  ;;  %374 = vst.msk [vmem:[#allocation2 + $0x98] sm:$0xff] %vm353_vm1, %v4887_v6  ;;  %v5043_v16 = vpack.c.bf16 %v308_v14, %v307_v13  ;;  %v323_v17 = vld [vmem:[%s5028_s12 + $0x90] sm:$0xff]  ;;  %v324_v18 = vld [vmem:[%s5028_s12 + $0x98] sm:$0xff]  ;;  %4748 = vmatprep.mubr.msk.bf16.mxu0 %vm353_vm1, %v5036_v11 }
  0x16   : > { %376 = vst.msk [vmem:[#allocation2 + $0xa8] sm:$0xff] %vm353_vm1, %v4887_v6  ;;  %377 = vst.msk [vmem:[#allocation2 + $0xb0] sm:$0xff] %vm353_vm1, %v4887_v6  ;;  %v309_v19 = vld [vmem:[%s5028_s12 + $0x20] sm:$0xff]  ;;  %v5051_v21 = vpack.c.bf16 %v324_v18, %v323_v17  ;;  %v310_v23 = vld [vmem:[%s5028_s12 + $0x28] sm:$0xff]  ;;  %4764 = vmatprep.mubr.msk.bf16.mxu1 %vm353_vm1, %v5041_v15 }
  0x17   : > { %379 = vst.msk [vmem:[#allocation2 + $0xc0] sm:$0xff] %vm353_vm1, %v4887_v6  ;;  %380 = vst.msk [vmem:[#allocation2 + $0xc8] sm:$0xff] %vm353_vm1, %v4887_v6  ;;  %v325_v24 = vld [vmem:[%s5028_s12 + $0xa0] sm:$0xff]  ;;  %v326_v25 = vld [vmem:[%s5028_s12 + $0xa8] sm:$0xff]  ;;  %4749 = vmatmul.mubr.msk.bf16.vlgmr.msra.gmra.mrb[0].mxu0 %vm353_vm1, %v5043_v16  ;;  %v339_v26 = vpack.c.bf16 %v310_v23, %v309_v19 }
  0x18   : > { %382 = vst.msk [vmem:[#allocation2 + $0xd8] sm:$0xff] %vm353_vm1, %v4887_v6  ;;  %383 = vst.msk [vmem:[#allocation2 + $0xe0] sm:$0xff] %vm353_vm1, %v4887_v6  ;;  %v5062_v27 = vpack.c.bf16 %v326_v25, %v325_v24  ;;  %4765 = vmatmul.mubr.msk.bf16.vlgmr.msra.gmra.mrb[0].mxu1 %vm353_vm1, %v5051_v21  ;;  %v311_v28 = vld [vmem:[%s5028_s12 + $0x30] sm:$0xff]  ;;  %v312_v29 = vld [vmem:[%s5028_s12 + $0x38] sm:$0xff]  ;;  %4815 = vmatpush3.bf16.msra.mxu0 %v3029_v20 }
  0x19   : > { %385 = vst.msk [vmem:[#allocation2 + $0xf0] sm:$0xff] %vm353_vm1, %v4887_v6  ;;  %386 = vst.msk [vmem:[#allocation2 + $0xf8] sm:$0xff] %vm353_vm1, %v4887_v6  ;;  %v327_v30 = vld [vmem:[%s5028_s12 + $0xb0] sm:$0xff]  ;;  %4781 = vmatpush3.bf16.msra.mxu1 %v1749_v22  ;;  %4752 = vmatprep.mubr.msk.bf16.mxu0 %vm353_vm1, %v339_v26  ;;  %v328_v31 = vld [vmem:[%s5028_s12 + $0xb8] sm:$0xff]  ;;  %v340_v36 = vpack.c.bf16 %v312_v29, %v311_v28 }
  0x1a   : > { %388 = vst.msk [vmem:[#allocation2 + $0x108] sm:$0xff] %vm353_vm1, %v4887_v6  ;;  %389 = vst.msk [vmem:[#allocation2 + $0x110] sm:$0xff] %vm353_vm1, %v4887_v6  ;;  %v313_v32 = vld [vmem:[%s5028_s12 + $0x40] sm:$0xff]  ;;  %v314_v33 = vld [vmem:[%s5028_s12 + $0x48] sm:$0xff]  ;;  %4768 = vmatprep.mubr.msk.bf16.mxu1 %vm353_vm1, %v5062_v27  ;;  %v348_v37 = vpack.c.bf16 %v328_v31, %v327_v30 }
  0x1b   : > { %391 = vst.msk [vmem:[#allocation2 + $0x120] sm:$0xff] %vm353_vm1, %v4887_v6  ;;  %392 = vst.msk [vmem:[#allocation2 + $0x128] sm:$0xff] %vm353_vm1, %v4887_v6  ;;  %v329_v34 = vld [vmem:[%s5028_s12 + $0xc0] sm:$0xff]  ;;  %v330_v35 = vld [vmem:[%s5028_s12 + $0xc8] sm:$0xff]  ;;  %v341_v38 = vpack.c.bf16 %v314_v33, %v313_v32 }
  0x1c   : > { %394 = vst.msk [vmem:[#allocation2 + $0x138] sm:$0xff] %vm353_vm1, %v4887_v6  ;;  %395 = vst.msk [vmem:[#allocation2 + $0x140] sm:$0xff] %vm353_vm1, %v4887_v6  ;;  %v349_v39 = vpack.c.bf16 %v330_v35, %v329_v34  ;;  %v315_v40 = vld [vmem:[%s5028_s12 + $0x50] sm:$0xff]  ;;  %v316_v41 = vld [vmem:[%s5028_s12 + $0x58] sm:$0xff] }
  0x1d   : > { %397 = vst.msk [vmem:[#allocation2 + $0x150] sm:$0xff] %vm353_vm1, %v4887_v6  ;;  %398 = vst.msk [vmem:[#allocation2 + $0x158] sm:$0xff] %vm353_vm1, %v4887_v6  ;;  %v331_v42 = vld [vmem:[%s5028_s12 + $0xd0] sm:$0xff]  ;;  %v332_v43 = vld [vmem:[%s5028_s12 + $0xd8] sm:$0xff]  ;;  %v342_v48 = vpack.c.bf16 %v316_v41, %v315_v40 }
  0x1e   : > { %400 = vst.msk [vmem:[#allocation2 + $0x168] sm:$0xff] %vm353_vm1, %v4887_v6  ;;  %401 = vst.msk [vmem:[#allocation2 + $0x170] sm:$0xff] %vm353_vm1, %v4887_v6  ;;  %v317_v44 = vld [vmem:[%s5028_s12 + $0x60] sm:$0xff]  ;;  %v318_v45 = vld [vmem:[%s5028_s12 + $0x68] sm:$0xff]  ;;  %v350_v49 = vpack.c.bf16 %v332_v43, %v331_v42 }
  0x1f   : > { %403 = vst.msk [vmem:[#allocation2 + $0x180] sm:$0xff] %vm353_vm1, %v4887_v6  ;;  %404 = vst.msk [vmem:[#allocation2 + $0x188] sm:$0xff] %vm353_vm1, %v4887_v6  ;;  %4753 = vmatmul.mubr.msk.bf16.gmra.mrb[4].mxu0 %vm353_vm1, %v340_v36  ;;  %v333_v46 = vld [vmem:[%s5028_s12 + $0xe0] sm:$0xff]  ;;  %v334_v47 = vld [vmem:[%s5028_s12 + $0xe8] sm:$0xff]  ;;  %v343_v50 = vpack.c.bf16 %v318_v45, %v317_v44 }
  0x20   : > { %406 = vst.msk [vmem:[#allocation2 + $0x198] sm:$0xff] %vm353_vm1, %v4887_v6  ;;  %407 = vst.msk [vmem:[#allocation2 + $0x1a0] sm:$0xff] %vm353_vm1, %v4887_v6  ;;  %4769 = vmatmul.mubr.msk.bf16.gmra.mrb[4].mxu1 %vm353_vm1, %v348_v37  ;;  %4756 = vmatprep.mubr.msk.bf16.mxu0 %vm353_vm1, %v341_v38  ;;  %v351_v51 = vpack.c.bf16 %v334_v47, %v333_v46  ;;  %v319_v52 = vld [vmem:[%s5028_s12 + $0x70] sm:$0xff]  ;;  %v320_v53 = vld [vmem:[%s5028_s12 + $0x78] sm:$0xff] }
  0x21   : > { %4772 = vmatprep.mubr.msk.bf16.mxu1 %vm353_vm1, %v349_v39  ;;  %v335_v54 = vld [vmem:[%s5028_s12 + $0xf0] sm:$0xff]  ;;  %v336_v55 = vld [vmem:[%s5028_s12 + $0xf8] sm:$0xff]  ;;  %v344_v56 = vpack.c.bf16 %v320_v53, %v319_v52  ;;  %363 = vst.msk [vmem:[#allocation2 + $0x40] sm:$0x3] %vm356_vm2, %v4887_v6  ;;  %357 = vst.msk [vmem:[#allocation2 + $0x10] sm:$0x3] %vm356_vm2, %v4887_v6 }
  0x22   : > { %v352_v57 = vpack.c.bf16 %v336_v55, %v335_v54  ;;  %360 = vst.msk [vmem:[#allocation2 + $0x28] sm:$0x3] %vm356_vm2, %v4887_v6  ;;  %366 = vst.msk [vmem:[#allocation2 + $0x58] sm:$0x3] %vm356_vm2, %v4887_v6  ;;  %v675_v3 = vld [vmem:[#allocation2] sm:$0xff]  ;;  %v3238_v13 = vld [vmem:[#allocation2 + $0x8] sm:$0xff] }
  0x23   : > { %369 = vst.msk [vmem:[#allocation2 + $0x70] sm:$0x3] %vm356_vm2, %v4887_v6  ;;  %372 = vst.msk [vmem:[#allocation2 + $0x88] sm:$0x3] %vm356_vm2, %v4887_v6  ;;  %v775_v4 = vld [vmem:[#allocation2 + $0x1] sm:$0xff]  ;;  %v3274_v14 = vmul.f32 %v5187_v0, %v3238_v13 }
  0x24   : > { %375 = vst.msk [vmem:[#allocation2 + $0xa0] sm:$0x3] %vm356_vm2, %v4887_v6  ;;  %378 = vst.msk [vmem:[#allocation2 + $0xb8] sm:$0x3] %vm356_vm2, %v4887_v6  ;;  %v4560_v5 = vld [vmem:[%s8391_s4 + $0x2] ss:$0 sm:$0xff]  ;;  %v3373_v7 = vmul.f32 %v5190_v1, %v775_v4 }
  0x25   : > { %381 = vst.msk [vmem:[#allocation2 + $0xd0] sm:$0x3] %vm356_vm2, %v4887_v6  ;;  %384 = vst.msk [vmem:[#allocation2 + $0xe8] sm:$0x3] %vm356_vm2, %v4887_v6  ;;  %v875_v8 = vld [vmem:[#allocation2 + $0x2] sm:$0xff] }
  0x26   : > { %387 = vst.msk [vmem:[#allocation2 + $0x100] sm:$0x3] %vm356_vm2, %v4887_v6  ;;  %390 = vst.msk [vmem:[#allocation2 + $0x118] sm:$0x3] %vm356_vm2, %v4887_v6  ;;  %v3473_v10 = vmul.f32 %v5193_v2, %v875_v8  ;;  %v664_v22 = vld [vmem:[%s8390_s3] sm:$0x7] }
  0x27   : > { %4757 = vmatmul.mubr.msk.bf16.gmra.mrb[8].mxu0 %vm353_vm1, %v342_v48  ;;  %393 = vst.msk [vmem:[#allocation2 + $0x130] sm:$0x3] %vm356_vm2, %v4887_v6  ;;  %396 = vst.msk [vmem:[#allocation2 + $0x148] sm:$0x3] %vm356_vm2, %v4887_v6  ;;  %v5212_v23 = vrot.slane %v664_v22, %v5177_v60  ;;  %v5218_v25 = vld [vmem:[%s8391_s4] ss:$0 sm:$0xff] }
  0x28   : > { %4773 = vmatmul.mubr.msk.bf16.gmra.mrb[8].mxu1 %vm353_vm1, %v350_v49  ;;  %4760 = vmatprep.mubr.msk.bf16.mxu0 %vm353_vm1, %v343_v50  ;;  %399 = vst.msk [vmem:[#allocation2 + $0x160] sm:$0x3] %vm356_vm2, %v4887_v6  ;;  %402 = vst.msk [vmem:[#allocation2 + $0x178] sm:$0x3] %vm356_vm2, %v4887_v6  ;;  %v876_v17 = vld [vmem:[#allocation2 + $0xa] sm:$0xff] }
  0x29   : > { %4776 = vmatprep.mubr.msk.bf16.mxu1 %vm353_vm1, %v351_v51  ;;  %405 = vst.msk [vmem:[#allocation2 + $0x190] sm:$0x3] %vm356_vm2, %v4887_v6  ;;  %408 = vst.msk [vmem:[#allocation2 + $0x1a8] sm:$0x3] %vm356_vm2, %v4887_v6  ;;  %v3273_v6 = vmul.f32 %v5187_v0, %v675_v3  ;;  %v3474_v19 = vmul.f32 %v5193_v2, %v876_v17  ;;  %v711_v24 = vmul.f32 %v5212_v23, %v675_v3 }
  0x2a   : > { %8486 = vst [vmem:[#allocation3_spill] sm:$0xff] %v5177_v60  ;;  %8487 = vst [vmem:[#allocation4_spill] sm:$0xff] %v5179_v61  ;;  %v712_v28 = vmul.f32 %v3238_v13, %v5212_v23 }
  0x2b   : > { %8488 = vst [vmem:[#allocation5_spill] sm:$0xff] %v5181_v62  ;;  %8489 = vst [vmem:[#allocation6_spill] sm:$0xff] %v5187_v0  ;;  %v3305_v9 = vadd.f32 %v4560_v5, %v3273_v6  ;;  %v743_v33 = vadd.f32 %v5218_v25, %v711_v24 }
  0x2c   : > { %8490 = vst [vmem:[#allocation7_spill] sm:$0xff] %v5190_v1  ;;  %8491 = vst [vmem:[#allocation8_spill] sm:$0xff] %v5193_v2  ;;  %v744_v44 = vadd.f32 %v5218_v25, %v712_v28 }
  0x2f   : > { %4761 = vmatmul.mubr.msk.bf16.gmra.mrb[12].mxu0 %vm353_vm1, %v344_v56 }
  0x30   : > { %4777 = vmatmul.mubr.msk.bf16.gmra.mrb[12].mxu1 %vm353_vm1, %v352_v57  ;;  %4816 = vmatprep.mubr.msk.bf16.mxu0 %vm353_vm1, %v5036_v11 }
  0x31   : > { %4782 = vmatprep.mubr.msk.bf16.mxu1 %vm353_vm1, %v5036_v11  ;;  %v3405_v11 = vadd.f32 %v3373_v7, %v3305_v9 }
  0x33   : > { %v5201_v12 = vadd.f32 %v3473_v10, %v3405_v11 }
  0x35   : > { %8492 = vst [vmem:[#allocation9_spill] sm:$0xff] %v5201_v12 }
  0x37   : > { %4817 = vmatmul.mubr.msk.bf16.vlgmr.msra.gmra.mrb[16].mxu0 %vm353_vm1, %v5043_v16 }
  0x38   : > { %4783 = vmatmul.mubr.msk.bf16.vlgmr.msra.gmra.mrb[16].mxu1 %vm353_vm1, %v5043_v16  ;;  %4820 = vmatprep.mubr.msk.bf16.mxu0 %vm353_vm1, %v339_v26  ;;  %v776_v16 = vld [vmem:[#allocation2 + $0x9] sm:$0xff] }
  0x39   : > { %4786 = vmatprep.mubr.msk.bf16.mxu1 %vm353_vm1, %v339_v26  ;;  %v3374_v18 = vmul.f32 %v5190_v1, %v776_v16  ;;  %v5221_v26 = vrot.slane %v664_v22, %v5179_v61 }
  0x3b   : > { %v812_v45 = vmul.f32 %v5221_v26, %v776_v16 }
  0x3d   : > { %v844_v54 = vadd.f32 %v812_v45, %v744_v44 }
  0x3f   : > { %4821 = vmatmul.mubr.msk.bf16.gmra.mrb[20].mxu0 %vm353_vm1, %v340_v36 }
  0x40   : > { %4787 = vmatmul.mubr.msk.bf16.gmra.mrb[20].mxu1 %vm353_vm1, %v340_v36  ;;  %4824 = vmatprep.mubr.msk.bf16.mxu0 %vm353_vm1, %v341_v38  ;;  %v811_v36 = vmul.f32 %v5221_v26, %v775_v4 }
  0x41   : > { %4790 = vmatprep.mubr.msk.bf16.mxu1 %vm353_vm1, %v341_v38 }
  0x42   : > { %v843_v52 = vadd.f32 %v811_v36, %v743_v33 }
  0x47   : > { %4825 = vmatmul.mubr.msk.bf16.gmra.mrb[24].mxu0 %vm353_vm1, %v342_v48 }
  0x48   : > { %4791 = vmatmul.mubr.msk.bf16.gmra.mrb[24].mxu1 %vm353_vm1, %v342_v48  ;;  %4828 = vmatprep.mubr.msk.bf16.mxu0 %vm353_vm1, %v343_v50 }
  0x49   : > { %4794 = vmatprep.mubr.msk.bf16.mxu1 %vm353_vm1, %v343_v50  ;;  %v665_v50 = vld [vmem:[%s8390_s3 + $0x4] sm:$0x7] }
  0x4a   : > { %v5264_v58 = vrot.slane %v665_v50, %v5179_v61 }
  0x4f   : > { %4829 = vmatmul.mubr.msk.bf16.gmra.mrb[28].mxu0 %vm353_vm1, %v344_v56 }
  0x50   : > { %4795 = vmatmul.mubr.msk.bf16.gmra.mrb[28].mxu1 %vm353_vm1, %v344_v56  ;;  %4832 = vmatprep.mubr.msk.bf16.mxu0 %vm353_vm1, %v5041_v15 }
  0x51   : > { %4798 = vmatprep.mubr.msk.bf16.mxu1 %vm353_vm1, %v5041_v15  ;;  %v3306_v15 = vadd.f32 %v4560_v5, %v3274_v14 }
  0x53   : > { %v3406_v20 = vadd.f32 %v3374_v18, %v3306_v15  ;;  %v5281_v18 = vrot.slane %v665_v50, %v5181_v62 }
  0x57   : > { %4833 = vmatmul.mubr.msk.bf16.gmra.mrb[32].mxu0 %vm353_vm1, %v5051_v21 }
  0x58   : > { %4799 = vmatmul.mubr.msk.bf16.gmra.mrb[32].mxu1 %vm353_vm1, %v5051_v21  ;;  %4836 = vmatprep.mubr.msk.bf16.mxu0 %vm353_vm1, %v5062_v27  ;;  %v5206_v21 = vadd.f32 %v3474_v19, %v3406_v20 }
  0x59   : > { %4802 = vmatprep.mubr.msk.bf16.mxu1 %vm353_vm1, %v5062_v27  ;;  %v5226_v27 = vld [vmem:[%s8389_s2] ss:$0 sm:$0xff] }
  0x5a   : > { %8493 = vst [vmem:[#allocation10_spill] sm:$0xff] %v5206_v21 }
  0x5f   : > { %4837 = vmatmul.mubr.msk.bf16.gmra.mrb[36].mxu0 %vm353_vm1, %v348_v37 }
  0x60   : > { %4803 = vmatmul.mubr.msk.bf16.gmra.mrb[36].mxu1 %vm353_vm1, %v348_v37  ;;  %4840 = vmatprep.mubr.msk.bf16.mxu0 %vm353_vm1, %v349_v39  ;;  %v5235_v37 = vrot.slane %v664_v22, %v5181_v62 }
  0x61   : > { %4806 = vmatprep.mubr.msk.bf16.mxu1 %vm353_vm1, %v349_v39 }
  0x62   : > { %v911_v53 = vmul.f32 %v5235_v37, %v875_v8  ;;  %v912_v55 = vmul.f32 %v5235_v37, %v876_v17 }
  0x64   : > { %v943_v8 = vadd.f32 %v911_v53, %v843_v52  ;;  %v5286_v20 = vadd.f32 %v912_v55, %v844_v54 }
  0x67   : > { %4841 = vmatmul.mubr.msk.bf16.gmra.mrb[40].mxu0 %vm353_vm1, %v350_v49 }
  0x68   : > { %4807 = vmatmul.mubr.msk.bf16.gmra.mrb[40].mxu1 %vm353_vm1, %v350_v49  ;;  %4844 = vmatprep.mubr.msk.bf16.mxu0 %vm353_vm1, %v351_v51 }
  0x69   : > { %4810 = vmatprep.mubr.msk.bf16.mxu1 %vm353_vm1, %v351_v51  ;;  %v666_v51 = vld [vmem:[%s8390_s3 + $0x8] sm:$0x7] }
  0x6a   : > { %v5267_v59 = vrot.slane %v666_v51, %v5177_v60  ;;  %v5271_v7 = vrot.slane %v666_v51, %v5179_v61  ;;  %v5284_v19 = vrot.slane %v666_v51, %v5181_v62 }
  0x6f   : > { %4845 = vmatmul.mubr.msk.bf16.gmra.mrb[44].mxu0 %vm353_vm1, %v352_v57 }
  0x70   : > { %4811 = vmatmul.mubr.msk.bf16.gmra.mrb[44].mxu1 %vm353_vm1, %v352_v57  ;;  %v5261_v57 = vrot.slane %v665_v50, %v5177_v60 }
  0xea   : > { %v4750_v29 = vpop.f32.mrb[0].mxu0 }
  0xeb   : > { %v513_v30 = vadd.f32 %v4750_v29, %v5226_v27  ;;  %v4766_v31 = vpop.f32.mrb[0].mxu1  ;;  %v504_v32 = vpop.f32.mrb[1].mxu0 }
  0xec   : > { %v577_v34 = vadd.f32 %v4766_v31, %v5226_v27  ;;  %v505_v35 = vadd.f32 %v5226_v27, %v504_v32  ;;  %v568_v38 = vpop.f32.mrb[1].mxu1  ;;  %v4751_v39 = vpop.f32.mrb[2].mxu0 }
  0xed   : > { %634 = vst.msk [vmem:[#allocation2 + $0x31] sm:$0xff] %vm353_vm1, %v513_v30  ;;  %v569_v40 = vadd.f32 %v5226_v27, %v568_v38  ;;  %v516_v41 = vadd.f32 %v4751_v39, %v5226_v27  ;;  %v4767_v42 = vpop.f32.mrb[2].mxu1  ;;  %v507_v43 = vpop.f32.mrb[3].mxu0 }
  0xee   : > { %650 = vst.msk [vmem:[#allocation2 + $0xf1] sm:$0xff] %vm353_vm1, %v577_v34  ;;  %632 = vst.msk [vmem:[#allocation2 + $0x19] sm:$0xff] %vm353_vm1, %v505_v35  ;;  %v580_v46 = vadd.f32 %v4767_v42, %v5226_v27  ;;  %v508_v47 = vadd.f32 %v5226_v27, %v507_v43  ;;  %v571_v48 = vpop.f32.mrb[3].mxu1 }
  0xef   : > { %648 = vst.msk [vmem:[#allocation2 + $0xd9] sm:$0xff] %vm353_vm1, %v569_v40  ;;  %635 = vst.msk [vmem:[#allocation2 + $0x39] sm:$0xff] %vm353_vm1, %v516_v41  ;;  %v572_v49 = vadd.f32 %v5226_v27, %v571_v48 }
  0xf0   : > { %651 = vst.msk [vmem:[#allocation2 + $0xf9] sm:$0xff] %vm353_vm1, %v580_v46  ;;  %633 = vst.msk [vmem:[#allocation2 + $0x21] sm:$0xff] %vm353_vm1, %v508_v47 }
  0xf1   : > { %649 = vst.msk [vmem:[#allocation2 + $0xe1] sm:$0xff] %vm353_vm1, %v572_v49 }
  0xf2   : > { %v4754_v56 = vpop.f32.mrb[4].mxu0 }
  0xf3   : > { %v529_v63 = vadd.f32 %v4754_v56, %v5226_v27  ;;  %v4770_v3 = vpop.f32.mrb[4].mxu1  ;;  %v520_v4 = vpop.f32.mrb[5].mxu0 }
  0xf4   : > { %v679_v5 = vld [vmem:[#allocation2 + $0x30] sm:$0xff]  ;;  %v593_v9 = vadd.f32 %v4770_v3, %v5226_v27  ;;  %v521_v10 = vadd.f32 %v5226_v27, %v520_v4  ;;  %v5275_v11 = vpop.f32.mrb[5].mxu1  ;;  %v5277_v13 = vpop.f32.mrb[6].mxu0 }
  0xf5   : > { %v779_v6 = vld [vmem:[#allocation2 + $0x31] sm:$0xff]  ;;  %v715_v14 = vmul.f32 %v5212_v23, %v679_v5  ;;  %638 = vst.msk [vmem:[#allocation2 + $0x61] sm:$0xff] %vm353_vm1, %v529_v63  ;;  %v5289_v22 = vpop.f32.mrb[6].mxu1  ;;  %v5291_v24 = vpop.f32.mrb[7].mxu0  ;;  %v5295_v29 = vmul.f32 %v5261_v57, %v679_v5  ;;  %v777_v32 = vld [vmem:[#allocation2 + $0x19] sm:$0xff]  ;;  %v5307_v36 = vmul.f32 %v5267_v59, %v679_v5 }
  0xf6   : > { %v695_v15 = vld [vmem:[#allocation2 + $0xf0] sm:$0xff]  ;;  %v677_v17 = vld [vmem:[#allocation2 + $0x18] sm:$0xff]  ;;  %v815_v28 = vmul.f32 %v5221_v26, %v779_v6  ;;  %v5298_v30 = vmul.f32 %v5264_v58, %v779_v6  ;;  %654 = vst.msk [vmem:[#allocation2 + $0x121] sm:$0xff] %vm353_vm1, %v593_v9  ;;  %636 = vst.msk [vmem:[#allocation2 + $0x49] sm:$0xff] %vm353_vm1, %v521_v10  ;;  %v5303_v34 = vpop.f32.mrb[7].mxu1  ;;  %v5310_v38 = vmul.f32 %v5271_v7, %v779_v6 }
  0xf7   : > { %v795_v16 = vld [vmem:[#allocation2 + $0xf1] sm:$0xff]  ;;  %v731_v31 = vmul.f32 %v5212_v23, %v695_v15  ;;  %v747_v35 = vadd.f32 %v5218_v25, %v715_v14  ;;  %v5315_v41 = vmul.f32 %v5261_v57, %v695_v15  ;;  %v713_v43 = vmul.f32 %v5212_v23, %v677_v17  ;;  %v793_v44 = vld [vmem:[#allocation2 + $0xd9] sm:$0xff] }
  0xf8   : > { %v693_v33 = vld [vmem:[#allocation2 + $0xd8] sm:$0xff]  ;;  %v831_v39 = vmul.f32 %v5221_v26, %v795_v16  ;;  %v5318_v42 = vmul.f32 %v5264_v58, %v795_v16  ;;  %v813_v45 = vmul.f32 %v5221_v26, %v777_v32  ;;  %v1011_v46 = vmul.f32 %v5261_v57, %v677_v17 }
  0xf9   : > { %v763_v40 = vadd.f32 %v5218_v25, %v731_v31  ;;  %v1111_v47 = vmul.f32 %v5264_v58, %v777_v32  ;;  %v729_v48 = vmul.f32 %v5212_v23, %v693_v33  ;;  %v680_v49 = vld [vmem:[#allocation2 + $0x38] sm:$0xff]  ;;  %v5325_v51 = vadd.f32 %v815_v28, %v747_v35 }
  0xfa   : > { %8494 = vst [vmem:[#allocation11_spill] sm:$0xff] %v5318_v42  ;;  %v780_v50 = vld [vmem:[#allocation2 + $0x39] sm:$0xff]  ;;  %v5328_v52 = vmul.f32 %v5267_v59, %v695_v15  ;;  %v5331_v53 = vmul.f32 %v5271_v7, %v795_v16  ;;  %v745_v54 = vadd.f32 %v5218_v25, %v713_v43  ;;  %v5334_v55 = vpop.f32.mrb[8].mxu0  ;;  %v1043_v63 = vadd.f32 %v1011_v46, %v943_v8 }
  0xfb   : > { %v5336_v56 = vadd.f32 %v831_v39, %v763_v40  ;;  %v761_v3 = vadd.f32 %v5218_v25, %v729_v48  ;;  %v829_v4 = vmul.f32 %v5221_v26, %v793_v44  ;;  %v879_v5 = vld [vmem:[#allocation2 + $0x32] sm:$0xff]  ;;  %v880_v6 = vld [vmem:[#allocation2 + $0x3a] sm:$0xff]  ;;  %v5340_v9 = vpop.f32.mrb[8].mxu1  ;;  %v5342_v10 = vpop.f32.mrb[9].mxu0  ;;  %v5345_v14 = vmul.f32 %v5261_v57, %v693_v33 }
  0xfc   : > { %8495 = vst [vmem:[#allocation12_spill] sm:$0xff] %v5328_v52  ;;  %8496 = vst [vmem:[#allocation13_spill] sm:$0xff] %v5331_v53  ;;  %v5348_v15 = vmul.f32 %v5264_v58, %v793_v44  ;;  %v716_v16 = vmul.f32 %v5212_v23, %v680_v49  ;;  %v816_v8 = vmul.f32 %v5221_v26, %v780_v50  ;;  %v5352_v17 = vpop.f32.mrb[9].mxu1  ;;  %v5354_v28 = vpop.f32.mrb[10].mxu0  ;;  %v696_v40 = vld [vmem:[#allocation2 + $0xf8] sm:$0xff] }
  0xfd   : > { %8497 = vst [vmem:[#allocation14_spill] sm:$0xff] %v5342_v10  ;;  %8498 = vst [vmem:[#allocation15_spill] sm:$0xff] %v5345_v14  ;;  %v5356_v31 = vadd.f32 %v813_v45, %v745_v54  ;;  %v5358_v32 = vadd.f32 %v1111_v47, %v1043_v63  ;;  %v5361_v35 = vmul.f32 %v5267_v59, %v693_v33  ;;  %v5366_v43 = vpop.f32.mrb[10].mxu1  ;;  %v5368_v46 = vpop.f32.mrb[11].mxu0  ;;  %v796_v54 = vld [vmem:[#allocation2 + $0xf9] sm:$0xff] }
  0xfe   : > { %8499 = vst [vmem:[#allocation16_spill] sm:$0xff] %v5348_v15  ;;  %8500 = vst [vmem:[#allocation17_spill] sm:$0xff] %v5352_v17  ;;  %v5364_v39 = vmul.f32 %v5271_v7, %v793_v44  ;;  %v5370_v48 = vadd.f32 %v829_v4, %v761_v3  ;;  %v748_v2 = vadd.f32 %v5218_v25, %v716_v16  ;;  %v895_v33 = vld [vmem:[#allocation2 + $0xf2] sm:$0xff]  ;;  %v5377_v63 = vpop.f32.mrb[11].mxu1  ;;  %v896_v16 = vld [vmem:[#allocation2 + $0xfa] sm:$0xff] }
  0xff   : > { %8501 = vst [vmem:[#allocation18_spill] sm:$0xff] %v5354_v28  ;;  %8502 = vst [vmem:[#allocation19_spill] sm:$0xff] %v5361_v35  ;;  %v5374_v45 = vmul.f32 %v5235_v37, %v879_v5  ;;  %v916_v47 = vmul.f32 %v5235_v37, %v880_v6  ;;  %v5380_v44 = vmul.f32 %v5261_v57, %v680_v49 }
 0x100   : > { %8503 = vst [vmem:[#allocation20_spill] sm:$0xff] %v5364_v39  ;;  %8504 = vst [vmem:[#allocation21_spill] sm:$0xff] %v5366_v43  ;;  %v5383_v21 = vmul.f32 %v5264_v58, %v780_v50  ;;  %v5386_v3 = vmul.f32 %v5281_v18, %v879_v5  ;;  %v5389_v4 = vmul.f32 %v5281_v18, %v880_v6 }
 0x101   : > { %8505 = vst [vmem:[#allocation22_spill] sm:$0xff] %v5368_v46  ;;  %8506 = vst [vmem:[#allocation23_spill] sm:$0xff] %v5377_v63  ;;  %v848_v1 = vadd.f32 %v816_v8, %v748_v2  ;;  %v5392_v12 = vmul.f32 %v5267_v59, %v680_v49  ;;  %v5395_v0 = vmul.f32 %v5271_v7, %v780_v50  ;;  %v678_v2 = vld [vmem:[#allocation2 + $0x20] sm:$0xff] }
 0x102   : > { %8507 = vst [vmem:[#allocation24_spill] sm:$0xff] %v5389_v4  ;;  %v732_v62 = vmul.f32 %v5212_v23, %v696_v40  ;;  %v5399_v61 = vmul.f32 %v5284_v19, %v879_v5  ;;  %v5402_v60 = vmul.f32 %v5284_v19, %v880_v6  ;;  %v832_v39 = vmul.f32 %v5221_v26, %v796_v54  ;;  %v778_v8 = vld [vmem:[#allocation2 + $0x21] sm:$0xff]  ;;  %v5416_v6 = vpop.f32.mrb[12].mxu0 }
 0x103   : > { %v5406_v35 = vmul.f32 %v5235_v37, %v895_v33  ;;  %v877_v49 = vld [vmem:[#allocation2 + $0x1a] sm:$0xff]  ;;  %v932_v50 = vmul.f32 %v5235_v37, %v896_v16  ;;  %v5411_v52 = vmul.f32 %v5261_v57, %v696_v40  ;;  %v5414_v5 = vmul.f32 %v5264_v58, %v796_v54  ;;  %8508 = vst [vmem:[#allocation25_spill] sm:$0xff] %v5416_v6  ;;  %v878_v63 = vld [vmem:[#allocation2 + $0x22] sm:$0xff]  ;;  %v5429_v46 = vpop.f32.mrb[12].mxu1  ;;  %v5431_v43 = vpop.f32.mrb[13].mxu0 }
 0x104   : > { %v764_v53 = vadd.f32 %v5218_v25, %v732_v62  ;;  %v5418_v15 = vadd.f32 %v916_v47, %v848_v1  ;;  %v5421_v14 = vmul.f32 %v5281_v18, %v895_v33  ;;  %v5424_v4 = vmul.f32 %v5281_v18, %v896_v16  ;;  %8513 = vst [vmem:[#allocation30_spill] sm:$0xff] %v5429_v46  ;;  %v5438_v6 = vpop.f32.mrb[14].mxu0 }
 0x105   : > { %v5427_v62 = vmul.f32 %v5267_v59, %v696_v40  ;;  %8514 = vst [vmem:[#allocation31_spill] sm:$0xff] %v5431_v43  ;;  %v714_v17 = vmul.f32 %v5212_v23, %v678_v2  ;;  %v814_v1 = vmul.f32 %v5221_v26, %v778_v8  ;;  %v913_v47 = vmul.f32 %v5235_v37, %v877_v49  ;;  %v5448_v46 = vpop.f32.mrb[15].mxu0 }
 0x106   : > { %8509 = vst [vmem:[#allocation26_spill] sm:$0xff] %v5418_v15  ;;  %8510 = vst [vmem:[#allocation27_spill] sm:$0xff] %v5421_v14  ;;  %v864_v28 = vadd.f32 %v832_v39, %v764_v53  ;;  %v694_v15 = vld [vmem:[#allocation2 + $0xe0] sm:$0xff]  ;;  %v5436_v14 = vpop.f32.mrb[13].mxu1  ;;  %v5441_v40 = vmul.f32 %v5271_v7, %v796_v54  ;;  %v1211_v53 = vmul.f32 %v5281_v18, %v877_v49 }
 0x107   : > { %8511 = vst [vmem:[#allocation28_spill] sm:$0xff] %v5424_v4  ;;  %8512 = vst [vmem:[#allocation29_spill] sm:$0xff] %v5427_v62  ;;  %v1012_v62 = vmul.f32 %v5261_v57, %v678_v2  ;;  %v1112_v4 = vmul.f32 %v5264_v58, %v778_v8  ;;  %v794_v39 = vld [vmem:[#allocation2 + $0xe1] sm:$0xff]  ;;  %v5446_v43 = vpop.f32.mrb[14].mxu1  ;;  %v5451_v10 = vmul.f32 %v5284_v19, %v895_v33 }
 0x108   : > { %8515 = vst [vmem:[#allocation32_spill] sm:$0xff] %v5436_v14  ;;  %8516 = vst [vmem:[#allocation33_spill] sm:$0xff] %v5438_v6  ;;  %v5454_v14 = vmul.f32 %v5284_v19, %v896_v16  ;;  %v746_v54 = vadd.f32 %v5218_v25, %v714_v17  ;;  %v893_v2 = vld [vmem:[#allocation2 + $0xda] sm:$0xff]  ;;  %v5458_v8 = vpop.f32.mrb[15].mxu1  ;;  %v730_v33 = vmul.f32 %v5212_v23, %v694_v15 }
 0x109   : > { %8517 = vst [vmem:[#allocation34_spill] sm:$0xff] %v5441_v40  ;;  %8518 = vst [vmem:[#allocation35_spill] sm:$0xff] %v5446_v43  ;;  %v914_v40 = vmul.f32 %v5235_v37, %v878_v63  ;;  %v1044_v49 = vadd.f32 %v1012_v62, %v5286_v20  ;;  %v1212_v43 = vmul.f32 %v5281_v18, %v878_v63 }
 0x10a   : > { %8519 = vst [vmem:[#allocation36_spill] sm:$0xff] %v5448_v46  ;;  %8520 = vst [vmem:[#allocation37_spill] sm:$0xff] %v5451_v10  ;;  %v1243_v46 = vadd.f32 %v1211_v53, %v5358_v32  ;;  %v894_v10 = vld [vmem:[#allocation2 + $0xe2] sm:$0xff]  ;;  %v5464_v16 = vadd.f32 %v932_v50, %v864_v28  ;;  %v945_v17 = vadd.f32 %v913_v47, %v5356_v31 }
 0x10b   : > { %8521 = vst [vmem:[#allocation38_spill] sm:$0xff] %v5454_v14  ;;  %8522 = vst [vmem:[#allocation39_spill] sm:$0xff] %v5458_v8  ;;  %v846_v14 = vadd.f32 %v814_v1, %v746_v54  ;;  %v830_v6 = vmul.f32 %v5221_v26, %v794_v39  ;;  %v1144_v42 = vadd.f32 %v1112_v4, %v1044_v49  ;;  %v683_v50 = vld [vmem:[#allocation2 + $0x60] sm:$0xff] }
 0x10c   : > { %v1344_v8 = vadd.f32 %v5307_v36, %v1243_v46  ;;  %v762_v20 = vadd.f32 %v5218_v25, %v730_v33  ;;  %v929_v63 = vmul.f32 %v5235_v37, %v893_v2  ;;  %v930_v32 = vmul.f32 %v5235_v37, %v894_v10  ;;  %v783_v1 = vld [vmem:[#allocation2 + $0x61] sm:$0xff] }
 0x10d   : > { %v946_v62 = vadd.f32 %v914_v40, %v846_v14  ;;  %v5473_v53 = vmul.f32 %v5261_v57, %v694_v15  ;;  %v5476_v28 = vmul.f32 %v5264_v58, %v794_v39  ;;  %v1244_v31 = vadd.f32 %v1212_v43, %v1144_v42  ;;  %v5483_v14 = vpop.f32.mrb[16].mxu1 }
 0x10e   : > { %v1444_v36 = vadd.f32 %v5310_v38, %v1344_v8  ;;  %v862_v46 = vadd.f32 %v830_v6, %v762_v20  ;;  %v961_v4 = vadd.f32 %v929_v63, %v5370_v48  ;;  %8525 = vst [vmem:[#allocation42_spill] sm:$0xff] %v5483_v14  ;;  %v5487_v40 = vmul.f32 %v5281_v18, %v893_v2  ;;  %v699_v6 = vld [vmem:[#allocation2 + $0x120] sm:$0xff] }
 0x10f   : > { %8523 = vst [vmem:[#allocation40_spill] sm:$0xff] %v5473_v53  ;;  %8524 = vst [vmem:[#allocation41_spill] sm:$0xff] %v5476_v28  ;;  %v1046_v47 = vadd.f32 %v5380_v44, %v946_v62  ;;  %v5490_v54 = vmul.f32 %v5281_v18, %v894_v10  ;;  %v5493_v49 = vmul.f32 %v5267_v59, %v694_v15  ;;  %v799_v8 = vld [vmem:[#allocation2 + $0x121] sm:$0xff] }
 0x110   : > { %8526 = vst [vmem:[#allocation43_spill] sm:$0xff] %v5487_v40  ;;  %v1345_v42 = vadd.f32 %v5392_v12, %v1244_v31  ;;  %v1544_v38 = vadd.f32 %v5399_v61, %v1444_v36  ;;  %v962_v43 = vadd.f32 %v930_v32, %v862_v46  ;;  %v719_v48 = vmul.f32 %v5212_v23, %v683_v50  ;;  %v681_v31 = vld [vmem:[#allocation2 + $0x48] sm:$0xff] }
 0x111   : > { %8527 = vst [vmem:[#allocation44_spill] sm:$0xff] %v5490_v54  ;;  %8528 = vst [vmem:[#allocation45_spill] sm:$0xff] %v5493_v49  ;;  %v5505_v44 = vmul.f32 %v5271_v7, %v794_v39  ;;  %v5508_v15 = vmul.f32 %v5284_v19, %v893_v2  ;;  %v5511_v12 = vmul.f32 %v5284_v19, %v894_v10  ;;  %v781_v46 = vld [vmem:[#allocation2 + $0x49] sm:$0xff] }
 0x112   : > { %v819_v61 = vmul.f32 %v5221_v26, %v783_v1  ;;  %v1445_v33 = vadd.f32 %v5395_v0, %v1345_v42  ;;  %v4599_v20 = vpack.c.bf16 %v1544_v38, %v1544_v38  ;;  %v1062_v63 = vadd.f32 %v5411_v52, %v962_v43 }
 0x113   : > { %8529 = vst [vmem:[#allocation46_spill] sm:$0xff] %v5505_v44  ;;  %8530 = vst [vmem:[#allocation47_spill] sm:$0xff] %v5508_v15  ;;  %v751_v62 = vadd.f32 %v5218_v25, %v719_v48  ;;  %v1146_v32 = vadd.f32 %v5383_v21, %v1046_v47  ;;  %v5519_v39 = vmul.f32 %v5261_v57, %v683_v50 }
 0x114   : > { %8531 = vst [vmem:[#allocation48_spill] sm:$0xff] %v5511_v12  ;;  %v5522_v2 = vmul.f32 %v5264_v58, %v783_v1  ;;  %v735_v10 = vmul.f32 %v5212_v23, %v699_v6  ;;  %v1545_v36 = vadd.f32 %v5402_v60, %v1445_v33  ;;  %1705 = vst.msk [vmem:[%s5502_s8] sm:$0xf] %vm1704_vm3, %v4599_v20  ;;  %v5550_v33 = vpop.f32.mrb[17].mxu1 }
 0x115   : > { %8532 = vst [vmem:[#allocation49_spill] sm:$0xff] %v5519_v39  ;;  %v5529_v0 = vmul.f32 %v5267_v59, %v683_v50  ;;  %v5532_v52 = vmul.f32 %v5271_v7, %v783_v1  ;;  %v835_v21 = vmul.f32 %v5221_v26, %v799_v8  ;;  %v5536_v47 = vadd.f32 %v5414_v5, %v1062_v63 }
 0x116   : > { %8533 = vst [vmem:[#allocation50_spill] sm:$0xff] %v5522_v2  ;;  %v5538_v42 = vadd.f32 %v819_v61, %v751_v62  ;;  %v767_v38 = vadd.f32 %v5218_v25, %v735_v10  ;;  %v5542_v60 = vmul.f32 %v5261_v57, %v699_v6  ;;  %v4600_v43 = vpack.c.bf16 %v1545_v36, %v1545_v36  ;;  %v5558_v62 = vpop.f32.mrb[18].mxu1 }
 0x117   : > { %v5545_v50 = vmul.f32 %v5264_v58, %v799_v8  ;;  %v717_v1 = vmul.f32 %v5212_v23, %v681_v31  ;;  %v947_v48 = vadd.f32 %v5374_v45, %v5325_v51  ;;  %8536 = vst [vmem:[#allocation53_spill] sm:$0xff] %v5550_v33  ;;  %v5553_v5 = vmul.f32 %v5267_v59, %v699_v6 }
 0x118   : > { %8534 = vst [vmem:[#allocation51_spill] sm:$0xff] %v5542_v60  ;;  %v817_v61 = vmul.f32 %v5221_v26, %v781_v46  ;;  %v1015_v20 = vmul.f32 %v5261_v57, %v681_v31  ;;  %v1045_v63 = vadd.f32 %v5295_v29, %v945_v17  ;;  %8537 = vst [vmem:[#allocation54_spill] sm:$0xff] %v5558_v62  ;;  %v5572_v17 = vpop.f32.mrb[19].mxu1 }
 0x119   : > { %8535 = vst [vmem:[#allocation52_spill] sm:$0xff] %v5545_v50  ;;  %1706 = vst.msk [vmem:[%s5502_s8 + $0x4] sm:$0xf] %vm1704_vm3, %v4600_v43  ;;  %v5563_v10 = vmul.f32 %v5271_v7, %v799_v8  ;;  %v749_v51 = vadd.f32 %v5218_v25, %v717_v1  ;;  %v1115_v45 = vmul.f32 %v5264_v58, %v781_v46 }
 0x11a   : > { %v585_v6 = vadd.f32 %v5226_v27, %v5275_v11  ;;  %v1047_v36 = vadd.f32 %v1015_v20, %v947_v48  ;;  %v1145_v33 = vadd.f32 %v5298_v30, %v1045_v63  ;;  %v1314_v14 = vmul.f32 %v5267_v59, %v681_v31  ;;  %8538 = vst [vmem:[#allocation55_spill] sm:$0xff] %v5572_v17  ;;  %v8542_v48 = vld [vmem:[#allocation17_spill] sm:$0xff]  ;;  %v8546_v63 = vld [vmem:[#allocation23_spill] sm:$0xff] }
 0x11b   : > { %v1061_v29 = vadd.f32 %v5315_v41, %v961_v4  ;;  %v5574_v43 = vadd.f32 %v835_v21, %v767_v38  ;;  %v532_v8 = vadd.f32 %v5277_v13, %v5226_v27  ;;  %v596_v1 = vadd.f32 %v5289_v22, %v5226_v27 }
 0x11c   : > { %652 = vst.msk [vmem:[#allocation2 + $0x109] sm:$0xff] %vm353_vm1, %v585_v6  ;;  %v524_v11 = vadd.f32 %v5226_v27, %v5291_v24  ;;  %v5583_v30 = vadd.f32 %v817_v61, %v749_v51  ;;  %v1245_v31 = vadd.f32 %v5386_v3, %v1145_v33  ;;  %v1414_v41 = vmul.f32 %v5271_v7, %v781_v46  ;;  %v8541_v46 = vld [vmem:[#allocation14_spill] sm:$0xff] }
 0x11d   : > { %8539 = vst [vmem:[#allocation56_spill] sm:$0xff] %v5574_v43  ;;  %v5589_v4 = vadd.f32 %v5406_v35, %v5336_v56  ;;  %v5591_v21 = vadd.f32 %v1115_v45, %v1047_v36  ;;  %639 = vst.msk [vmem:[#allocation2 + $0x69] sm:$0xff] %vm353_vm1, %v532_v8  ;;  %v588_v13 = vadd.f32 %v5226_v27, %v5303_v34  ;;  %v8540_v56 = vld [vmem:[#allocation11_spill] sm:$0xff]  ;;  %v8543_v34 = vld [vmem:[#allocation18_spill] sm:$0xff] }
 0x11e   : > { %655 = vst.msk [vmem:[#allocation2 + $0x129] sm:$0xff] %vm353_vm1, %v596_v1  ;;  %637 = vst.msk [vmem:[#allocation2 + $0x51] sm:$0xff] %vm353_vm1, %v524_v11  ;;  %v545_v22 = vadd.f32 %v5334_v55, %v5226_v27  ;;  %v609_v24 = vadd.f32 %v5340_v9, %v5226_v27  ;;  %v1346_v3 = vadd.f32 %v1314_v14, %v1245_v31  ;;  %v8544_v9 = vld [vmem:[#allocation21_spill] sm:$0xff]  ;;  %v8545_v61 = vld [vmem:[#allocation22_spill] sm:$0xff] }
 0x11f   : > { %v1161_v35 = vadd.f32 %v8540_v56, %v1061_v29  ;;  %v537_v38 = vadd.f32 %v5226_v27, %v8541_v46  ;;  %v601_v33 = vadd.f32 %v5226_v27, %v8542_v48  ;;  %653 = vst.msk [vmem:[#allocation2 + $0x111] sm:$0xff] %vm353_vm1, %v588_v13  ;;  %v548_v55 = vadd.f32 %v8543_v34, %v5226_v27  ;;  %v8547_v45 = vld [vmem:[#allocation24_spill] sm:$0xff]  ;;  %v8548_v36 = vld [vmem:[#allocation25_spill] sm:$0xff]  ;;  %v8549_v8 = vld [vmem:[#allocation30_spill] sm:$0xff] }
 0x120   : > { %642 = vst.msk [vmem:[#allocation2 + $0x91] sm:$0xff] %vm353_vm1, %v545_v22  ;;  %658 = vst.msk [vmem:[#allocation2 + $0x151] sm:$0xff] %vm353_vm1, %v609_v24  ;;  %v612_v14 = vadd.f32 %v8544_v9, %v5226_v27  ;;  %v540_v20 = vadd.f32 %v5226_v27, %v8545_v61  ;;  %v604_v51 = vadd.f32 %v5226_v27, %v8546_v63  ;;  %v8550_v11 = vld [vmem:[#allocation31_spill] sm:$0xff]  ;;  %v1306_v13 = vld [vmem:[#allocation2 + $0x198] sm:$0xff] }
 0x121   : > { %v5619_v6 = vadd.f32 %v8547_v45, %v1146_v32  ;;  %640 = vst.msk [vmem:[#allocation2 + $0x79] sm:$0xff] %vm353_vm1, %v537_v38  ;;  %656 = vst.msk [vmem:[#allocation2 + $0x139] sm:$0xff] %vm353_vm1, %v601_v33  ;;  %v561_v29 = vadd.f32 %v8548_v36, %v5226_v27  ;;  %v625_v1 = vadd.f32 %v8549_v8, %v5226_v27  ;;  %v1307_v22 = vld [vmem:[#allocation2 + $0x1a0] sm:$0xff]  ;;  %v8551_v32 = vld [vmem:[#allocation32_spill] sm:$0xff] }
 0x122   : > { %v553_v31 = vadd.f32 %v5226_v27, %v8550_v11  ;;  %643 = vst.msk [vmem:[#allocation2 + $0x99] sm:$0xff] %vm353_vm1, %v548_v55  ;;  %659 = vst.msk [vmem:[#allocation2 + $0x159] sm:$0xff] %vm353_vm1, %v612_v14  ;;  %v617_v24 = vadd.f32 %v5226_v27, %v8551_v32  ;;  %v8552_v56 = vld [vmem:[#allocation33_spill] sm:$0xff]  ;;  %v8553_v38 = vld [vmem:[#allocation35_spill] sm:$0xff]  ;;  %v5641_v55 = vadd.f32 %v1414_v41, %v1346_v3 }
 0x123   : > { %641 = vst.msk [vmem:[#allocation2 + $0x81] sm:$0xff] %vm353_vm1, %v540_v20  ;;  %657 = vst.msk [vmem:[#allocation2 + $0x141] sm:$0xff] %vm353_vm1, %v604_v51  ;;  %v564_v46 = vadd.f32 %v8552_v56, %v5226_v27  ;;  %v628_v48 = vadd.f32 %v8553_v38, %v5226_v27  ;;  %v8554_v33 = vld [vmem:[#allocation36_spill] sm:$0xff]  ;;  %v697_v14 = vld [vmem:[#allocation2 + $0x108] sm:$0xff] }
 0x124   : > { %v556_v34 = vadd.f32 %v5226_v27, %v8554_v33  ;;  %v1406_v9 = vld [vmem:[#allocation2 + $0x199] sm:$0xff]  ;;  %v797_v61 = vld [vmem:[#allocation2 + $0x109] sm:$0xff]  ;;  %646 = vst.msk [vmem:[#allocation2 + $0xc1] sm:$0xff] %vm353_vm1, %v561_v29  ;;  %662 = vst.msk [vmem:[#allocation2 + $0x181] sm:$0xff] %vm353_vm1, %v625_v1  ;;  %v733_v41 = vmul.f32 %v5212_v23, %v697_v14  ;;  %v1031_v3 = vmul.f32 %v5261_v57, %v697_v14 }
 0x125   : > { %v8555_v20 = vld [vmem:[#allocation27_spill] sm:$0xff]  ;;  %v8556_v51 = vld [vmem:[#allocation28_spill] sm:$0xff]  ;;  %644 = vst.msk [vmem:[#allocation2 + $0xa9] sm:$0xff] %vm353_vm1, %v553_v31  ;;  %660 = vst.msk [vmem:[#allocation2 + $0x169] sm:$0xff] %vm353_vm1, %v617_v24  ;;  %v1131_v1 = vmul.f32 %v5264_v58, %v797_v61  ;;  %v1330_v11 = vmul.f32 %v5267_v59, %v697_v14  ;;  %v5670_v56 = vmul.f32 %v5271_v7, %v1406_v9  ;;  %v5683_v9 = vpop.f32.mrb[16].mxu0 }
 0x126   : > { %v1261_v63 = vadd.f32 %v8555_v20, %v1161_v35  ;;  %v5646_v45 = vadd.f32 %v8556_v51, %v5536_v47  ;;  %v8557_v36 = vld [vmem:[#allocation39_spill] sm:$0xff]  ;;  %647 = vst.msk [vmem:[#allocation2 + $0xc9] sm:$0xff] %vm353_vm1, %v564_v46  ;;  %663 = vst.msk [vmem:[#allocation2 + $0x189] sm:$0xff] %vm353_vm1, %v628_v48  ;;  %v5660_v47 = vmul.f32 %v5267_v59, %v1306_v13  ;;  %v1407_v29 = vld [vmem:[#allocation2 + $0x1a1] sm:$0xff] }
 0x127   : > { %v620_v8 = vadd.f32 %v5226_v27, %v8557_v36  ;;  %645 = vst.msk [vmem:[#allocation2 + $0xb1] sm:$0xff] %vm353_vm1, %v556_v34  ;;  %v5663_v35 = vmul.f32 %v5267_v59, %v1307_v22  ;;  %v833_v27 = vmul.f32 %v5221_v26, %v797_v61  ;;  %v684_v31 = vld [vmem:[#allocation2 + $0x68] sm:$0xff]  ;;  %8560 = vst [vmem:[#allocation17_spill] sm:$0xff] %v5670_v56  ;;  %v882_v12 = vld [vmem:[#allocation2 + $0x52] sm:$0xff] }
 0x128   : > { %8558 = vst [vmem:[#allocation11_spill] sm:$0xff] %v5660_v47  ;;  %v784_v32 = vld [vmem:[#allocation2 + $0x69] sm:$0xff]  ;;  %v765_v13 = vadd.f32 %v5218_v25, %v733_v41  ;;  %v1063_v22 = vadd.f32 %v1031_v3, %v5589_v4  ;;  %v720_v46 = vmul.f32 %v5212_v23, %v684_v31  ;;  %v1362_v33 = vadd.f32 %v1330_v11, %v1261_v63 }
 0x129   : > { %8559 = vst [vmem:[#allocation14_spill] sm:$0xff] %v5663_v35  ;;  %v883_v24 = vld [vmem:[#allocation2 + $0x62] sm:$0xff]  ;;  %661 = vst.msk [vmem:[#allocation2 + $0x171] sm:$0xff] %vm353_vm1, %v620_v8  ;;  %v820_v38 = vmul.f32 %v5221_v26, %v784_v32  ;;  %v884_v48 = vld [vmem:[#allocation2 + $0x6a] sm:$0xff]  ;;  %v1430_v34 = vmul.f32 %v5271_v7, %v797_v61  ;;  %v5681_v20 = vmul.f32 %v5271_v7, %v1407_v29  ;;  %v5692_v61 = vpop.f32.mrb[17].mxu0 }
 0x12a   : > { %v5678_v14 = vmul.f32 %v5235_v37, %v883_v24  ;;  %8563 = vst [vmem:[#allocation22_spill] sm:$0xff] %v5683_v9  ;;  %v5685_v51 = vadd.f32 %v833_v27, %v765_v13  ;;  %v752_v4 = vadd.f32 %v5218_v25, %v720_v46  ;;  %v920_v36 = vmul.f32 %v5235_v37, %v884_v48  ;;  %v700_v63 = vld [vmem:[#allocation2 + $0x128] sm:$0xff]  ;;  %v5704_v9 = vpop.f32.mrb[18].mxu0 }
 0x12b   : > { %8562 = vst [vmem:[#allocation21_spill] sm:$0xff] %v5681_v20  ;;  %v5690_v8 = vmul.f32 %v5261_v57, %v684_v31  ;;  %v800_v41 = vld [vmem:[#allocation2 + $0x129] sm:$0xff]  ;;  %8564 = vst [vmem:[#allocation23_spill] sm:$0xff] %v5692_v61  ;;  %v5694_v3 = vadd.f32 %v1131_v1, %v1063_v22  ;;  %v5696_v11 = vadd.f32 %v1430_v34, %v1362_v33  ;;  %v5713_v22 = vpop.f32.mrb[20].mxu1 }
 0x12c   : > { %8561 = vst [vmem:[#allocation18_spill] sm:$0xff] %v5678_v14  ;;  %v5699_v29 = vmul.f32 %v5264_v58, %v784_v32  ;;  %v5702_v27 = vmul.f32 %v5281_v18, %v883_v24  ;;  %v899_v13 = vld [vmem:[#allocation2 + $0x122] sm:$0xff]  ;;  %v900_v46 = vld [vmem:[#allocation2 + $0x12a] sm:$0xff]  ;;  %8566 = vst [vmem:[#allocation25_spill] sm:$0xff] %v5704_v9  ;;  %v852_v17 = vadd.f32 %v820_v38, %v752_v4 }
 0x12d   : > { %v5707_v62 = vmul.f32 %v5281_v18, %v884_v48  ;;  %v1317_v61 = vmul.f32 %v5267_v59, %v684_v31  ;;  %v5711_v1 = vmul.f32 %v5271_v7, %v784_v32  ;;  %8568 = vst [vmem:[#allocation31_spill] sm:$0xff] %v5713_v22  ;;  %v5716_v33 = vmul.f32 %v5284_v19, %v883_v24  ;;  %v682_v4 = vld [vmem:[#allocation2 + $0x50] sm:$0xff]  ;;  %v5732_v24 = vpop.f32.mrb[19].mxu0 }
 0x12e   : > { %8565 = vst [vmem:[#allocation24_spill] sm:$0xff] %v5702_v27  ;;  %v5719_v34 = vmul.f32 %v5284_v19, %v884_v48  ;;  %v736_v20 = vmul.f32 %v5212_v23, %v700_v63  ;;  %v836_v38 = vmul.f32 %v5221_v26, %v800_v41  ;;  %v782_v9 = vld [vmem:[#allocation2 + $0x51] sm:$0xff]  ;;  %v5723_v56 = vadd.f32 %v920_v36, %v852_v17 }
 0x12f   : > { %8567 = vst [vmem:[#allocation30_spill] sm:$0xff] %v5707_v62  ;;  %v5726_v31 = vmul.f32 %v5235_v37, %v899_v13  ;;  %v936_v32 = vmul.f32 %v5235_v37, %v900_v46  ;;  %v5730_v22 = vmul.f32 %v5261_v57, %v700_v63  ;;  %8571 = vst [vmem:[#allocation35_spill] sm:$0xff] %v5732_v24  ;;  %v881_v36 = vld [vmem:[#allocation2 + $0x4a] sm:$0xff] }
 0x130   : > { %8569 = vst [vmem:[#allocation32_spill] sm:$0xff] %v5723_v56  ;;  %v768_v48 = vadd.f32 %v5218_v25, %v736_v20  ;;  %v5736_v35 = vmul.f32 %v5264_v58, %v800_v41  ;;  %v5739_v47 = vmul.f32 %v5281_v18, %v899_v13  ;;  %v5742_v17 = vmul.f32 %v5281_v18, %v900_v46  ;;  %v698_v62 = vld [vmem:[#allocation2 + $0x110] sm:$0xff] }
 0x131   : > { %8570 = vst [vmem:[#allocation33_spill] sm:$0xff] %v5726_v31  ;;  %v5745_v44 = vmul.f32 %v5267_v59, %v700_v63  ;;  %v5748_v15 = vmul.f32 %v5271_v7, %v800_v41  ;;  %v718_v24 = vmul.f32 %v5212_v23, %v682_v4  ;;  %v818_v20 = vmul.f32 %v5221_v26, %v782_v9  ;;  %v798_v27 = vld [vmem:[#allocation2 + $0x111] sm:$0xff] }
 0x132   : > { %8572 = vst [vmem:[#allocation36_spill] sm:$0xff] %v5739_v47  ;;  %8573 = vst [vmem:[#allocation27_spill] sm:$0xff] %v5742_v17  ;;  %v868_v49 = vadd.f32 %v836_v38, %v768_v48  ;;  %v5753_v54 = vmul.f32 %v5284_v19, %v899_v13  ;;  %v5756_v28 = vmul.f32 %v5284_v19, %v900_v46  ;;  %v8574_v38 = vld [vmem:[#allocation26_spill] sm:$0xff] }
 0x133   : > { %v1016_v40 = vmul.f32 %v5261_v57, %v682_v4  ;;  %v750_v53 = vadd.f32 %v5218_v25, %v718_v24  ;;  %v918_v63 = vmul.f32 %v5235_v37, %v882_v12  ;;  %v1116_v41 = vmul.f32 %v5264_v58, %v782_v9 }
 0x134   : > { %v1215_v17 = vmul.f32 %v5281_v18, %v881_v36  ;;  %v917_v56 = vmul.f32 %v5235_v37, %v881_v36  ;;  %v1216_v13 = vmul.f32 %v5281_v18, %v882_v12  ;;  %v1315_v46 = vmul.f32 %v5267_v59, %v682_v4  ;;  %v898_v4 = vld [vmem:[#allocation2 + $0x112] sm:$0xff] }
 0x135   : > { %v1048_v48 = vadd.f32 %v1016_v40, %v8574_v38  ;;  %v850_v47 = vadd.f32 %v818_v20, %v750_v53  ;;  %v1415_v24 = vmul.f32 %v5271_v7, %v782_v9  ;;  %v1514_v60 = vmul.f32 %v5284_v19, %v881_v36  ;;  %v897_v40 = vld [vmem:[#allocation2 + $0x10a] sm:$0xff]  ;;  %v5777_v9 = vpop.f32.mrb[21].mxu1 }
 0x136   : > { %v1247_v50 = vadd.f32 %v1215_v17, %v5591_v21  ;;  %v5770_v31 = vadd.f32 %v936_v32, %v868_v49  ;;  %v1347_v2 = vadd.f32 %v1315_v46, %v5619_v6  ;;  %v734_v39 = vmul.f32 %v5212_v23, %v698_v62  ;;  %8575 = vst [vmem:[#allocation28_spill] sm:$0xff] %v5777_v9 }
 0x137   : > { %v1148_v43 = vadd.f32 %v1116_v41, %v1048_v48  ;;  %v950_v38 = vadd.f32 %v918_v63, %v850_v47  ;;  %v1515_v53 = vmul.f32 %v5284_v19, %v882_v12  ;;  %v1546_v21 = vadd.f32 %v1514_v60, %v5641_v55  ;;  %v5797_v63 = vpop.f32.mrb[22].mxu1 }
 0x138   : > { %v1348_v14 = vadd.f32 %v5529_v0, %v1247_v50  ;;  %v1447_v49 = vadd.f32 %v1415_v24, %v1347_v2  ;;  %v766_v32 = vadd.f32 %v5218_v25, %v734_v39  ;;  %v834_v6 = vmul.f32 %v5221_v26, %v798_v27  ;;  %8576 = vst [vmem:[#allocation39_spill] sm:$0xff] %v5797_v63 }
 0x139   : > { %v1248_v17 = vadd.f32 %v1216_v13, %v1148_v43  ;;  %v5782_v36 = vadd.f32 %v917_v56, %v5583_v30  ;;  %v4601_v0 = vpack.c.bf16 %v1546_v21, %v1546_v21  ;;  %v933_v12 = vmul.f32 %v5235_v37, %v897_v40 }
 0x13a   : > { %v1448_v47 = vadd.f32 %v5532_v52, %v1348_v14  ;;  %v1547_v60 = vadd.f32 %v1515_v53, %v1447_v49  ;;  %v866_v55 = vadd.f32 %v834_v6, %v766_v32  ;;  %v934_v20 = vmul.f32 %v5235_v37, %v898_v4 }
 0x13b   : > { %v1349_v50 = vadd.f32 %v1317_v61, %v1248_v17  ;;  %v1050_v43 = vadd.f32 %v5690_v8, %v950_v38  ;;  %1707 = vst.msk [vmem:[%s5502_s8 + $0x8] sm:$0xf] %vm1704_vm3, %v4601_v0  ;;  %v5792_v2 = vadd.f32 %v933_v12, %v5685_v51  ;;  %v1032_v52 = vmul.f32 %v5261_v57, %v698_v62  ;;  %v687_v51 = vld [vmem:[#allocation2 + $0x90] sm:$0xff] }
 0x13c   : > { %v1548_v39 = vadd.f32 %v5716_v33, %v1448_v47  ;;  %v4602_v56 = vpack.c.bf16 %v1547_v60, %v1547_v60  ;;  %v966_v14 = vadd.f32 %v934_v20, %v866_v55  ;;  %v1231_v61 = vmul.f32 %v5281_v18, %v897_v40  ;;  %v787_v38 = vld [vmem:[#allocation2 + $0x91] sm:$0xff] }
 0x13d   : > { %v1449_v30 = vadd.f32 %v5711_v1, %v1349_v50  ;;  %v1064_v41 = vadd.f32 %v1032_v52, %v5464_v16  ;;  %v1132_v33 = vmul.f32 %v5264_v58, %v798_v27  ;;  %v1331_v48 = vmul.f32 %v5267_v59, %v698_v62  ;;  %v703_v0 = vld [vmem:[#allocation2 + $0x150] sm:$0xff] }
 0x13e   : > { %v4603_v8 = vpack.c.bf16 %v1548_v39, %v1548_v39  ;;  %1708 = vst.msk [vmem:[%s5502_s8 + $0xc] sm:$0xf] %vm1704_vm3, %v4602_v56  ;;  %v1066_v1 = vadd.f32 %v5730_v22, %v966_v14  ;;  %v1232_v46 = vmul.f32 %v5281_v18, %v898_v4  ;;  %v1263_v24 = vadd.f32 %v1231_v61, %v5694_v3 }
 0x13f   : > { %v1549_v13 = vadd.f32 %v5719_v34, %v1449_v30  ;;  %v1164_v16 = vadd.f32 %v1132_v33, %v1064_v41  ;;  %v1363_v53 = vadd.f32 %v1331_v48, %v5646_v45  ;;  %v1431_v62 = vmul.f32 %v5271_v7, %v798_v27  ;;  %v785_v30 = vld [vmem:[#allocation2 + $0x79] sm:$0xff] }
 0x140   : > { %1709 = vst.msk [vmem:[%s5502_s8 + $0x10] sm:$0xf] %vm1704_vm3, %v4603_v8  ;;  %v1530_v21 = vmul.f32 %v5284_v19, %v897_v40  ;;  %v1364_v17 = vadd.f32 %v5553_v5, %v1263_v24  ;;  %v1531_v22 = vmul.f32 %v5284_v19, %v898_v4  ;;  %v723_v49 = vmul.f32 %v5212_v23, %v687_v51  ;;  %v5828_v4 = vpop.f32.mrb[23].mxu1  ;;  %v8584_v24 = vld [vmem:[#allocation49_spill] sm:$0xff] }
 0x141   : > { %v4604_v34 = vpack.c.bf16 %v1549_v13, %v1549_v13  ;;  %v1264_v32 = vadd.f32 %v1232_v46, %v1164_v16  ;;  %v1463_v3 = vadd.f32 %v1431_v62, %v1363_v53  ;;  %v823_v47 = vmul.f32 %v5221_v26, %v787_v38  ;;  %8577 = vst [vmem:[#allocation26_spill] sm:$0xff] %v5828_v4  ;;  %v5873_v16 = vpop.f32.mrb[20].mxu0 }
 0x142   : > { %v1562_v6 = vadd.f32 %v1530_v21, %v5696_v11  ;;  %v5819_v45 = vadd.f32 %v5699_v29, %v1050_v43  ;;  %v5824_v27 = vadd.f32 %v5736_v35, %v1066_v1  ;;  %v1464_v5 = vadd.f32 %v5563_v10, %v1364_v17  ;;  %v803_v29 = vld [vmem:[#allocation2 + $0x151] sm:$0xff]  ;;  %v8583_v1 = vld [vmem:[#allocation18_spill] sm:$0xff]  ;;  %v5880_v17 = vpop.f32.mrb[21].mxu0 }
 0x143   : > { %1710 = vst.msk [vmem:[%s5502_s8 + $0x14] sm:$0xf] %vm1704_vm3, %v4604_v34  ;;  %v755_v40 = vadd.f32 %v5218_v25, %v723_v49  ;;  %v1365_v11 = vadd.f32 %v5745_v44, %v1264_v32  ;;  %v1563_v12 = vadd.f32 %v1531_v22, %v1463_v3  ;;  %v5832_v60 = vmul.f32 %v5261_v57, %v687_v51  ;;  %v685_v43 = vld [vmem:[#allocation2 + $0x78] sm:$0xff]  ;;  %v8587_v49 = vld [vmem:[#allocation50_spill] sm:$0xff] }
 0x144   : > { %v4617_v50 = vpack.c.bf16 %v1562_v6, %v1562_v6  ;;  %v1564_v55 = vadd.f32 %v5753_v54, %v1464_v5  ;;  %v5836_v35 = vmul.f32 %v5264_v58, %v787_v38  ;;  %v5839_v10 = vmul.f32 %v5267_v59, %v687_v51  ;;  %v701_v51 = vld [vmem:[#allocation2 + $0x138] sm:$0xff]  ;;  %8585 = vst [vmem:[#allocation18_spill] sm:$0xff] %v5873_v16  ;;  %v5885_v6 = vpop.f32.mrb[22].mxu0 }
 0x145   : > { %8578 = vst [vmem:[#allocation57_spill] sm:$0xff] %v5832_v60  ;;  %v739_v20 = vmul.f32 %v5212_v23, %v703_v0  ;;  %v1465_v44 = vadd.f32 %v5748_v15, %v1365_v11  ;;  %v4618_v39 = vpack.c.bf16 %v1563_v12, %v1563_v12  ;;  %v5845_v52 = vadd.f32 %v823_v47, %v755_v40  ;;  %v8590_v5 = vld [vmem:[#allocation56_spill] sm:$0xff]  ;;  %v8591_v40 = vld [vmem:[#allocation33_spill] sm:$0xff] }
 0x146   : > { %8579 = vst [vmem:[#allocation58_spill] sm:$0xff] %v5836_v35  ;;  %1723 = vst.msk [vmem:[%s5502_s8 + $0x48] sm:$0xf] %vm1704_vm3, %v4617_v50  ;;  %v5848_v54 = vmul.f32 %v5271_v7, %v787_v38  ;;  %v4619_v56 = vpack.c.bf16 %v1564_v55, %v1564_v55  ;;  %v839_v61 = vmul.f32 %v5221_v26, %v803_v29  ;;  %v688_v50 = vld [vmem:[#allocation2 + $0x98] sm:$0xff] }
 0x147   : > { %8580 = vst [vmem:[#allocation59_spill] sm:$0xff] %v5845_v52  ;;  %v771_v14 = vadd.f32 %v5218_v25, %v739_v20  ;;  %v5853_v8 = vmul.f32 %v5261_v57, %v703_v0  ;;  %v1565_v15 = vadd.f32 %v5756_v28, %v1465_v44  ;;  %1724 = vst.msk [vmem:[%s5502_s8 + $0x4c] sm:$0xf] %vm1704_vm3, %v4618_v39  ;;  %v8592_v55 = vld [vmem:[#allocation24_spill] sm:$0xff]  ;;  %v8593_v44 = vld [vmem:[#allocation51_spill] sm:$0xff] }
 0x148   : > { %v5859_v41 = vmul.f32 %v5264_v58, %v803_v29  ;;  %v5862_v33 = vmul.f32 %v5267_v59, %v703_v0  ;;  %v721_v48 = vmul.f32 %v5212_v23, %v685_v43  ;;  %1725 = vst.msk [vmem:[%s5502_s8 + $0x50] sm:$0xf] %vm1704_vm3, %v4619_v56  ;;  %v821_v13 = vmul.f32 %v5221_v26, %v785_v30  ;;  %v788_v56 = vld [vmem:[#allocation2 + $0x99] sm:$0xff] }
 0x149   : > { %8581 = vst [vmem:[#allocation60_spill] sm:$0xff] %v5853_v8  ;;  %v951_v46 = vadd.f32 %v8583_v1, %v5538_v42  ;;  %v1019_v28 = vmul.f32 %v5261_v57, %v685_v43  ;;  %v1049_v38 = vadd.f32 %v8584_v24, %v5782_v36  ;;  %v4620_v53 = vpack.c.bf16 %v1565_v15, %v1565_v15  ;;  %v801_v36 = vld [vmem:[#allocation2 + $0x139] sm:$0xff] }
 0x14a   : > { %8582 = vst [vmem:[#allocation61_spill] sm:$0xff] %v5859_v41  ;;  %v5876_v62 = vmul.f32 %v5271_v7, %v803_v29  ;;  %v753_v21 = vadd.f32 %v5218_v25, %v721_v48  ;;  %v1119_v34 = vmul.f32 %v5264_v58, %v785_v30  ;;  %8586 = vst [vmem:[#allocation49_spill] sm:$0xff] %v5880_v17  ;;  %v887_v48 = vld [vmem:[#allocation2 + $0x92] sm:$0xff]  ;;  %v888_v1 = vld [vmem:[#allocation2 + $0x9a] sm:$0xff] }
 0x14b   : > { %v1051_v22 = vadd.f32 %v1019_v28, %v951_v46  ;;  %v1149_v42 = vadd.f32 %v8587_v49, %v1049_v38  ;;  %v1318_v32 = vmul.f32 %v5267_v59, %v685_v43  ;;  %v737_v3 = vmul.f32 %v5212_v23, %v701_v51  ;;  %8588 = vst [vmem:[#allocation50_spill] sm:$0xff] %v5885_v6  ;;  %v5918_v49 = vld [vmem:[%s8391_s4] ss:$0 sm:$0xff]  ;;  %v886_v6 = vld [vmem:[#allocation2 + $0x82] sm:$0xff] }
 0x14c   : > { %1726 = vst.msk [vmem:[%s5502_s8 + $0x54] sm:$0xf] %vm1704_vm3, %v4620_v53  ;;  %v5889_v47 = vadd.f32 %v839_v61, %v771_v14  ;;  %v1418_v0 = vmul.f32 %v5271_v7, %v785_v30  ;;  %v967_v11 = vadd.f32 %v8591_v40, %v8590_v5  ;;  %v1035_v12 = vmul.f32 %v5261_v57, %v701_v51 }
 0x14d   : > { %v5895_v29 = vadd.f32 %v821_v13, %v753_v21  ;;  %v1249_v20 = vadd.f32 %v8592_v55, %v1149_v42  ;;  %v769_v43 = vadd.f32 %v5218_v25, %v737_v3  ;;  %v1065_v39 = vadd.f32 %v8593_v44, %v5792_v2  ;;  %v8594_v13 = vld [vmem:[#allocation52_spill] sm:$0xff] }
 0x14e   : > { %8589 = vst [vmem:[#allocation62_spill] sm:$0xff] %v5889_v47  ;;  %v5901_v14 = vadd.f32 %v1119_v34, %v1051_v22  ;;  %v837_v30 = vmul.f32 %v5221_v26, %v801_v36  ;;  %v1067_v61 = vadd.f32 %v1035_v12, %v967_v11  ;;  %v1135_v15 = vmul.f32 %v5264_v58, %v801_v36  ;;  %v8595_v34 = vld [vmem:[#allocation36_spill] sm:$0xff] }
 0x14f   : > { %v1350_v46 = vadd.f32 %v1318_v32, %v1249_v20  ;;  %v1165_v28 = vadd.f32 %v8594_v13, %v1065_v39  ;;  %v1334_v24 = vmul.f32 %v5267_v59, %v701_v51  ;;  %v724_v25 = vmul.f32 %v5212_v23, %v688_v50  ;;  %v704_v3 = vld [vmem:[#allocation2 + $0x158] sm:$0xff]  ;;  %v5936_v20 = vpop.f32.mrb[24].mxu1 }
 0x150   : > { %v5908_v38 = vadd.f32 %v837_v30, %v769_v43  ;;  %v5910_v2 = vadd.f32 %v1135_v15, %v1067_v61  ;;  %v1434_v53 = vmul.f32 %v5271_v7, %v801_v36  ;;  %v824_v21 = vmul.f32 %v5221_v26, %v788_v56  ;;  %v804_v12 = vld [vmem:[#allocation2 + $0x159] sm:$0xff]  ;;  %8598 = vst [vmem:[#allocation24_spill] sm:$0xff] %v5936_v20 }
 0x151   : > { %v1265_v22 = vadd.f32 %v8595_v34, %v1165_v28  ;;  %v756_v42 = vadd.f32 %v5918_v49, %v724_v25  ;;  %v5922_v51 = vmul.f32 %v5235_v37, %v887_v48  ;;  %v924_v32 = vmul.f32 %v5235_v37, %v888_v1  ;;  %v903_v55 = vld [vmem:[#allocation2 + $0x152] sm:$0xff]  ;;  %v904_v30 = vld [vmem:[#allocation2 + $0x15a] sm:$0xff] }
 0x152   : > { %v5925_v5 = vadd.f32 %v1418_v0, %v1350_v46  ;;  %v5928_v36 = vmul.f32 %v5261_v57, %v688_v50  ;;  %v5931_v40 = vmul.f32 %v5264_v58, %v788_v56  ;;  %v5934_v11 = vmul.f32 %v5281_v18, %v887_v48 }
 0x153   : > { %8596 = vst [vmem:[#allocation56_spill] sm:$0xff] %v5922_v51  ;;  %v1366_v43 = vadd.f32 %v1334_v24, %v1265_v22  ;;  %v856_v44 = vadd.f32 %v824_v21, %v756_v42  ;;  %v5939_v39 = vmul.f32 %v5281_v18, %v888_v1  ;;  %v5942_v0 = vmul.f32 %v5267_v59, %v688_v50  ;;  %v686_v21 = vld [vmem:[#allocation2 + $0x80] sm:$0xff]  ;;  %v5970_v42 = vpop.f32.mrb[23].mxu0 }
 0x154   : > { %8597 = vst [vmem:[#allocation33_spill] sm:$0xff] %v5934_v11  ;;  %v5945_v61 = vmul.f32 %v5271_v7, %v788_v56  ;;  %v5948_v15 = vmul.f32 %v5284_v19, %v887_v48  ;;  %v5951_v46 = vmul.f32 %v5284_v19, %v888_v1  ;;  %v740_v13 = vmul.f32 %v5212_v23, %v704_v3  ;;  %v786_v56 = vld [vmem:[#allocation2 + $0x81] sm:$0xff] }
 0x155   : > { %8599 = vst [vmem:[#allocation51_spill] sm:$0xff] %v5939_v39  ;;  %v5954_v28 = vadd.f32 %v1434_v53, %v1366_v43  ;;  %v5956_v24 = vadd.f32 %v924_v32, %v856_v44  ;;  %v840_v25 = vmul.f32 %v5221_v26, %v804_v12  ;;  %v5960_v50 = vmul.f32 %v5235_v37, %v903_v55  ;;  %v885_v53 = vld [vmem:[#allocation2 + $0x7a] sm:$0xff] }
 0x156   : > { %v772_v34 = vadd.f32 %v5918_v49, %v740_v13  ;;  %v940_v48 = vmul.f32 %v5235_v37, %v904_v30  ;;  %v5965_v1 = vmul.f32 %v5261_v57, %v704_v3  ;;  %v5968_v22 = vmul.f32 %v5264_v58, %v804_v12  ;;  %8602 = vst [vmem:[#allocation63_spill] sm:$0xff] %v5970_v42  ;;  %v702_v39 = vld [vmem:[#allocation2 + $0x140] sm:$0xff] }
 0x157   : > { %8600 = vst [vmem:[#allocation52_spill] sm:$0xff] %v5956_v24  ;;  %8601 = vst [vmem:[#allocation36_spill] sm:$0xff] %v5960_v50  ;;  %v5973_v32 = vmul.f32 %v5281_v18, %v903_v55  ;;  %v5976_v43 = vmul.f32 %v5281_v18, %v904_v30  ;;  %v5979_v44 = vmul.f32 %v5267_v59, %v704_v3  ;;  %v8606_v24 = vld [vmem:[#allocation32_spill] sm:$0xff]  ;;  %v802_v50 = vld [vmem:[#allocation2 + $0x141] sm:$0xff] }
 0x158   : > { %v5982_v13 = vmul.f32 %v5271_v7, %v804_v12  ;;  %v872_v17 = vadd.f32 %v840_v25, %v772_v34  ;;  %v5985_v16 = vmul.f32 %v5284_v19, %v903_v55  ;;  %v722_v20 = vmul.f32 %v5212_v23, %v686_v21  ;;  %v5995_v12 = vpop.f32.mrb[25].mxu1 }
 0x159   : > { %8603 = vst [vmem:[#allocation64_spill] sm:$0xff] %v5973_v32  ;;  %8604 = vst [vmem:[#allocation65_spill] sm:$0xff] %v5976_v43  ;;  %v822_v42 = vmul.f32 %v5221_v26, %v786_v56  ;;  %v5990_v4 = vmul.f32 %v5284_v19, %v904_v30  ;;  %v1020_v63 = vmul.f32 %v5261_v57, %v686_v21  ;;  %v8607_v32 = vld [vmem:[#allocation30_spill] sm:$0xff] }
 0x15a   : > { %v1120_v3 = vmul.f32 %v5264_v58, %v786_v56  ;;  %v1219_v9 = vmul.f32 %v5281_v18, %v885_v53  ;;  %8605 = vst [vmem:[#allocation66_spill] sm:$0xff] %v5995_v12  ;;  %v754_v25 = vadd.f32 %v5918_v49, %v722_v20  ;;  %v921_v55 = vmul.f32 %v5235_v37, %v885_v53 }
 0x15b   : > { %v922_v34 = vmul.f32 %v5235_v37, %v886_v6  ;;  %v1220_v43 = vmul.f32 %v5281_v18, %v886_v6  ;;  %v1052_v30 = vadd.f32 %v1020_v63, %v8606_v24  ;;  %v1250_v41 = vadd.f32 %v8607_v32, %v5819_v45  ;;  %v901_v24 = vld [vmem:[#allocation2 + $0x13a] sm:$0xff]  ;;  %v902_v45 = vld [vmem:[#allocation2 + $0x142] sm:$0xff] }
 0x15c   : > { %v1251_v8 = vadd.f32 %v1219_v9, %v5901_v14  ;;  %v1319_v11 = vmul.f32 %v5267_v59, %v686_v21  ;;  %v6006_v12 = vadd.f32 %v940_v48, %v872_v17  ;;  %v854_v20 = vadd.f32 %v822_v42, %v754_v25  ;;  %v8609_v25 = vld [vmem:[#allocation27_spill] sm:$0xff] }
 0x15d   : > { %v1419_v47 = vmul.f32 %v5271_v7, %v786_v56  ;;  %v1518_v35 = vmul.f32 %v5284_v19, %v885_v53  ;;  %v1152_v60 = vadd.f32 %v1120_v3, %v1052_v30  ;;  %v738_v63 = vmul.f32 %v5212_v23, %v702_v39 }
 0x15e   : > { %v1351_v51 = vadd.f32 %v1319_v11, %v1250_v41  ;;  %v1352_v52 = vadd.f32 %v5839_v10, %v1251_v8  ;;  %v954_v32 = vadd.f32 %v922_v34, %v854_v20  ;;  %v1519_v9 = vmul.f32 %v5284_v19, %v886_v6  ;;  %v691_v34 = vld [vmem:[#allocation2 + $0xc0] sm:$0xff] }
 0x15f   : > { %v1550_v17 = vadd.f32 %v1518_v35, %v5925_v5  ;;  %v838_v14 = vmul.f32 %v5221_v26, %v802_v50  ;;  %v1252_v21 = vadd.f32 %v1220_v43, %v1152_v60  ;;  %v770_v41 = vadd.f32 %v5918_v49, %v738_v63  ;;  %v791_v63 = vld [vmem:[#allocation2 + $0xc1] sm:$0xff] }
 0x160   : > { %v1451_v56 = vadd.f32 %v1419_v47, %v1351_v51  ;;  %v1452_v48 = vadd.f32 %v5848_v54, %v1352_v52  ;;  %v1054_v10 = vadd.f32 %v5928_v36, %v954_v32  ;;  %v937_v11 = vmul.f32 %v5235_v37, %v901_v24  ;;  %v6032_v51 = vpop.f32.mrb[26].mxu1 }
 0x161   : > { %v4605_v8 = vpack.c.bf16 %v1550_v17, %v1550_v17  ;;  %v938_v53 = vmul.f32 %v5235_v37, %v902_v45  ;;  %v1353_v6 = vadd.f32 %v5942_v0, %v1252_v21  ;;  %v870_v5 = vadd.f32 %v838_v14, %v770_v41  ;;  %8608 = vst [vmem:[#allocation32_spill] sm:$0xff] %v6032_v51  ;;  %v8638_v51 = vld [vmem:[#allocation44_spill] sm:$0xff] }
 0x162   : > { %v1551_v42 = vadd.f32 %v1519_v9, %v1451_v56  ;;  %v1552_v35 = vadd.f32 %v5948_v15, %v1452_v48  ;;  %v6023_v60 = vadd.f32 %v921_v55, %v5895_v29  ;;  %v6028_v52 = vadd.f32 %v937_v11, %v5908_v38  ;;  %v6058_v48 = vpop.f32.mrb[27].mxu1 }
 0x163   : > { %1711 = vst.msk [vmem:[%s5502_s8 + $0x18] sm:$0xf] %vm1704_vm3, %v4605_v8  ;;  %v1036_v54 = vmul.f32 %v5261_v57, %v702_v39  ;;  %v1235_v47 = vmul.f32 %v5281_v18, %v901_v24  ;;  %v1453_v36 = vadd.f32 %v5945_v61, %v1353_v6  ;;  %v970_v43 = vadd.f32 %v938_v53, %v870_v5  ;;  %v1105_v53 = vld [vmem:[#allocation2 + $0x181] sm:$0xff] }
 0x164   : > { %v4606_v0 = vpack.c.bf16 %v1551_v42, %v1551_v42  ;;  %v4607_v15 = vpack.c.bf16 %v1552_v35, %v1552_v35  ;;  %v1136_v3 = vmul.f32 %v5264_v58, %v802_v50  ;;  %v1266_v38 = vadd.f32 %v8609_v25, %v5824_v27  ;;  %8610 = vst [vmem:[#allocation30_spill] sm:$0xff] %v6058_v48  ;;  %v689_v6 = vld [vmem:[#allocation2 + $0xa8] sm:$0xff]  ;;  %v8612_v25 = vld [vmem:[#allocation56_spill] sm:$0xff] }
 0x165   : > { %v1068_v29 = vadd.f32 %v1036_v54, %v5770_v31  ;;  %v1267_v55 = vadd.f32 %v1235_v47, %v5910_v2  ;;  %v6041_v30 = vadd.f32 %v5931_v40, %v1054_v10  ;;  %v1553_v20 = vadd.f32 %v5951_v46, %v1453_v36  ;;  %v1005_v10 = vld [vmem:[#allocation2 + $0x180] sm:$0xff]  ;;  %v789_v42 = vld [vmem:[#allocation2 + $0xa9] sm:$0xff] }
 0x166   : > { %1712 = vst.msk [vmem:[%s5502_s8 + $0x1c] sm:$0xf] %vm1704_vm3, %v4606_v0  ;;  %1713 = vst.msk [vmem:[%s5502_s8 + $0x20] sm:$0xf] %vm1704_vm3, %v4607_v15  ;;  %v1070_v61 = vadd.f32 %v5965_v1, %v970_v43  ;;  %v1335_v31 = vmul.f32 %v5267_v59, %v702_v39  ;;  %v1236_v27 = vmul.f32 %v5281_v18, %v902_v45 }
 0x167   : > { %v1168_v32 = vadd.f32 %v1136_v3, %v1068_v29  ;;  %v1368_v2 = vadd.f32 %v5862_v33, %v1267_v55  ;;  %v1534_v40 = vmul.f32 %v5284_v19, %v901_v24  ;;  %v4608_v9 = vpack.c.bf16 %v1553_v20, %v1553_v20  ;;  %v705_v29 = vld [vmem:[#allocation2 + $0x168] sm:$0xff]  ;;  %v8611_v3 = vld [vmem:[#allocation59_spill] sm:$0xff] }
 0x168   : > { %v1367_v17 = vadd.f32 %v1335_v31, %v1266_v38  ;;  %v1435_v46 = vmul.f32 %v5271_v7, %v802_v50  ;;  %v727_v14 = vmul.f32 %v5212_v23, %v691_v34  ;;  %v827_v39 = vmul.f32 %v5221_v26, %v791_v63 }
 0x169   : > { %v1268_v21 = vadd.f32 %v1236_v27, %v1168_v32  ;;  %v1468_v1 = vadd.f32 %v5876_v62, %v1368_v2  ;;  %v1566_v56 = vadd.f32 %v1534_v40, %v5954_v28  ;;  %1714 = vst.msk [vmem:[%s5502_s8 + $0x24] sm:$0xf] %vm1704_vm3, %v4608_v9  ;;  %v6063_v33 = vadd.f32 %v5968_v22, %v1070_v61  ;;  %v8614_v2 = vld [vmem:[#allocation58_spill] sm:$0xff] }
 0x16a   : > { %v1467_v24 = vadd.f32 %v1435_v46, %v1367_v17  ;;  %v1535_v41 = vmul.f32 %v5284_v19, %v902_v45  ;;  %v759_v50 = vadd.f32 %v5918_v49, %v727_v14  ;;  %v6070_v11 = vmul.f32 %v5261_v57, %v691_v34  ;;  %v805_v17 = vld [vmem:[#allocation2 + $0x169] sm:$0xff] }
 0x16b   : > { %v1369_v62 = vadd.f32 %v5979_v44, %v1268_v21  ;;  %v1568_v28 = vadd.f32 %v5985_v16, %v1468_v1  ;;  %v4621_v8 = vpack.c.bf16 %v1566_v56, %v1566_v56  ;;  %v6073_v45 = vmul.f32 %v5264_v58, %v791_v63  ;;  %v8616_v14 = vld [vmem:[#allocation62_spill] sm:$0xff]  ;;  %v8617_v21 = vld [vmem:[#allocation36_spill] sm:$0xff] }
 0x16c   : > { %v1567_v22 = vadd.f32 %v1535_v41, %v1467_v24  ;;  %v859_v35 = vadd.f32 %v827_v39, %v759_v50  ;;  %v6076_v5 = vmul.f32 %v5267_v59, %v691_v34  ;;  %v6082_v54 = vmul.f32 %v5271_v7, %v791_v63  ;;  %v8613_v34 = vld [vmem:[#allocation57_spill] sm:$0xff]  ;;  %v692_v39 = vld [vmem:[#allocation2 + $0xc8] sm:$0xff] }
 0x16d   : > { %v1469_v44 = vadd.f32 %v5982_v13, %v1369_v62  ;;  %v4623_v16 = vpack.c.bf16 %v1568_v28, %v1568_v28  ;;  %1727 = vst.msk [vmem:[%s5502_s8 + $0x58] sm:$0xf] %vm1704_vm3, %v4621_v8  ;;  %v6085_v47 = vmul.f32 %v5261_v57, %v1005_v10  ;;  %v6088_v0 = vmul.f32 %v5264_v58, %v1105_v53  ;;  %v8618_v41 = vld [vmem:[#allocation33_spill] sm:$0xff]  ;;  %v8619_v62 = vld [vmem:[#allocation60_spill] sm:$0xff]  ;;  %v792_v8 = vld [vmem:[#allocation2 + $0xc9] sm:$0xff] }
 0x16e   : > { %v4622_v36 = vpack.c.bf16 %v1567_v22, %v1567_v22  ;;  %v725_v15 = vmul.f32 %v5212_v23, %v689_v6  ;;  %v825_v43 = vmul.f32 %v5221_v26, %v789_v42  ;;  %v955_v38 = vadd.f32 %v8612_v25, %v8611_v3 }
 0x16f   : > { %v1569_v13 = vadd.f32 %v5990_v4, %v1469_v44  ;;  %1729 = vst.msk [vmem:[%s5502_s8 + $0x60] sm:$0xf] %vm1704_vm3, %v4623_v16  ;;  %v1023_v55 = vmul.f32 %v5261_v57, %v689_v6  ;;  %v1053_v20 = vadd.f32 %v8613_v34, %v6023_v60  ;;  %v6103_v61 = vmul.f32 %v5267_v59, %v1005_v10  ;;  %v892_v16 = vld [vmem:[#allocation2 + $0xca] sm:$0xff] }
 0x170   : > { %1728 = vst.msk [vmem:[%s5502_s8 + $0x5c] sm:$0xf] %vm1704_vm3, %v4622_v36  ;;  %v757_v31 = vadd.f32 %v5918_v49, %v725_v15  ;;  %v1123_v4 = vmul.f32 %v5264_v58, %v789_v42  ;;  %v1322_v63 = vmul.f32 %v5267_v59, %v689_v6  ;;  %v741_v9 = vmul.f32 %v5212_v23, %v705_v29  ;;  %v8620_v15 = vld [vmem:[#allocation61_spill] sm:$0xff] }
 0x171   : > { %v4624_v32 = vpack.c.bf16 %v1569_v13, %v1569_v13  ;;  %v1055_v27 = vadd.f32 %v1023_v55, %v955_v38  ;;  %v1153_v40 = vadd.f32 %v8614_v2, %v1053_v20  ;;  %v6111_v60 = vmul.f32 %v5271_v7, %v1105_v53  ;;  %v891_v53 = vld [vmem:[#allocation2 + $0xc2] sm:$0xff]  ;;  %v8621_v20 = vld [vmem:[#allocation64_spill] sm:$0xff] }
 0x172   : > { %v1422_v46 = vmul.f32 %v5271_v7, %v789_v42  ;;  %v971_v1 = vadd.f32 %v8617_v21, %v8616_v14  ;;  %v1039_v56 = vmul.f32 %v5261_v57, %v705_v29  ;;  %v6119_v24 = vadd.f32 %v825_v43, %v757_v31 }
 0x173   : > { %8615 = vst [vmem:[#allocation27_spill] sm:$0xff] %v6111_v60  ;;  %1730 = vst.msk [vmem:[%s5502_s8 + $0x64] sm:$0xf] %vm1704_vm3, %v4624_v32  ;;  %v1253_v50 = vadd.f32 %v8618_v41, %v1153_v40  ;;  %v773_v10 = vadd.f32 %v5918_v49, %v741_v9  ;;  %v1069_v28 = vadd.f32 %v8619_v62, %v6028_v52  ;;  %v6142_v32 = vpop.f32.mrb[24].mxu0  ;;  %v1006_v9 = vld [vmem:[#allocation2 + $0x188] sm:$0xff] }
 0x174   : > { %v6125_v6 = vadd.f32 %v1123_v4, %v1055_v27  ;;  %v841_v42 = vmul.f32 %v5221_v26, %v805_v17  ;;  %v1071_v22 = vadd.f32 %v1039_v56, %v971_v1  ;;  %v1139_v44 = vmul.f32 %v5264_v58, %v805_v17  ;;  %8622 = vst [vmem:[#allocation59_spill] sm:$0xff] %v6142_v32  ;;  %v1106_v41 = vld [vmem:[#allocation2 + $0x189] sm:$0xff] }
 0x175   : > { %v1354_v36 = vadd.f32 %v1322_v63, %v1253_v50  ;;  %v1169_v43 = vadd.f32 %v8620_v15, %v1069_v28  ;;  %v1338_v13 = vmul.f32 %v5267_v59, %v705_v29  ;;  %v728_v3 = vmul.f32 %v5212_v23, %v692_v39  ;;  %v6156_v50 = vld [vmem:[#allocation2 + $0x182] sm:$0xff] }
 0x176   : > { %v6132_v25 = vadd.f32 %v841_v42, %v773_v10  ;;  %v1438_v52 = vmul.f32 %v5271_v7, %v805_v17  ;;  %v828_v38 = vmul.f32 %v5221_v26, %v792_v8  ;;  %v927_v55 = vmul.f32 %v5235_v37, %v891_v53  ;;  %v6150_v17 = vpop.f32.mrb[25].mxu0 }
 0x177   : > { %v6137_v34 = vadd.f32 %v1139_v44, %v1071_v22  ;;  %v1269_v31 = vadd.f32 %v8621_v20, %v1169_v43  ;;  %v760_v4 = vadd.f32 %v5918_v49, %v728_v3  ;;  %v928_v63 = vmul.f32 %v5235_v37, %v892_v16  ;;  %8623 = vst [vmem:[#allocation56_spill] sm:$0xff] %v6150_v17  ;;  %v690_v22 = vld [vmem:[#allocation2 + $0xb0] sm:$0xff]  ;;  %v6168_v44 = vpop.f32.mrb[26].mxu0  ;;  %v8636_v17 = vld [vmem:[#allocation41_spill] sm:$0xff] }
 0x178   : > { %v6144_v29 = vadd.f32 %v1422_v46, %v1354_v36  ;;  %v959_v27 = vadd.f32 %v927_v55, %v859_v35  ;;  %v1026_v2 = vmul.f32 %v5261_v57, %v692_v39  ;;  %v6148_v40 = vmul.f32 %v5264_v58, %v792_v8  ;;  %v6158_v46 = vld [vmem:[#allocation2 + $0x18a] sm:$0xff]  ;;  %8626 = vst [vmem:[#allocation58_spill] sm:$0xff] %v6168_v44 }
 0x179   : > { %v1370_v14 = vadd.f32 %v1338_v13, %v1269_v31  ;;  %v860_v21 = vadd.f32 %v828_v38, %v760_v4  ;;  %v1225_v1 = vmul.f32 %v5281_v18, %v891_v53  ;;  %v6154_v56 = vmul.f32 %v5281_v18, %v892_v16  ;;  %8624 = vst [vmem:[#allocation57_spill] sm:$0xff] %v6158_v46  ;;  %v8625_v35 = vld [vmem:[#allocation15_spill] sm:$0xff] }
 0x17a   : > { %v1059_v10 = vadd.f32 %v8625_v35, %v959_v27  ;;  %v1325_v62 = vmul.f32 %v5267_v59, %v692_v39  ;;  %v6163_v28 = vmul.f32 %v5271_v7, %v792_v8  ;;  %v6166_v42 = vmul.f32 %v5284_v19, %v891_v53  ;;  %v790_v3 = vld [vmem:[#allocation2 + $0xb1] sm:$0xff] }
 0x17b   : > { %v6170_v36 = vadd.f32 %v1438_v52, %v1370_v14  ;;  %v960_v15 = vadd.f32 %v928_v63, %v860_v21  ;;  %v6173_v43 = vmul.f32 %v5284_v19, %v892_v16  ;;  %v6176_v13 = vmul.f32 %v5261_v57, %v1006_v9  ;;  %v889_v39 = vld [vmem:[#allocation2 + $0xaa] sm:$0xff]  ;;  %v890_v38 = vld [vmem:[#allocation2 + $0xb2] sm:$0xff] }
 0x17c   : > { %v8628_v8 = vld [vmem:[#allocation16_spill] sm:$0xff]  ;;  %v6180_v53 = vmul.f32 %v5264_v58, %v1106_v41  ;;  %v6184_v20 = vmul.f32 %v5281_v18, %v6156_v50  ;;  %v6188_v52 = vmul.f32 %v5281_v18, %v6158_v46  ;;  %v6192_v4 = vmul.f32 %v5267_v59, %v1006_v9  ;;  %v8635_v14 = vld [vmem:[#allocation43_spill] sm:$0xff] }
 0x17d   : > { %8627 = vst [vmem:[#allocation62_spill] sm:$0xff] %v6170_v36  ;;  %v1159_v55 = vadd.f32 %v8628_v8, %v1059_v10  ;;  %v8632_v16 = vld [vmem:[#allocation40_spill] sm:$0xff]  ;;  %v6195_v63 = vmul.f32 %v5271_v7, %v1106_v41  ;;  %v726_v27 = vmul.f32 %v5212_v23, %v690_v22  ;;  %v826_v35 = vmul.f32 %v5221_v26, %v790_v3 }
 0x17e   : > { %8629 = vst [vmem:[#allocation36_spill] sm:$0xff] %v6180_v53  ;;  %8630 = vst [vmem:[#allocation33_spill] sm:$0xff] %v6184_v20  ;;  %v1060_v31 = vadd.f32 %v8632_v16, %v960_v15  ;;  %v925_v10 = vmul.f32 %v5235_v37, %v889_v39  ;;  %v926_v8 = vmul.f32 %v5235_v37, %v890_v38  ;;  %v8637_v41 = vld [vmem:[#allocation12_spill] sm:$0xff] }
 0x17f   : > { %8631 = vst [vmem:[#allocation60_spill] sm:$0xff] %v6188_v52  ;;  %8633 = vst [vmem:[#allocation61_spill] sm:$0xff] %v6192_v4  ;;  %v1259_v21 = vadd.f32 %v8635_v14, %v1159_v55  ;;  %v758_v15 = vadd.f32 %v5918_v49, %v726_v27  ;;  %v1024_v9 = vmul.f32 %v5261_v57, %v690_v22  ;;  %v8639_v46 = vld [vmem:[#allocation52_spill] sm:$0xff]  ;;  %v6214_v27 = vpop.f32.mrb[28].mxu1  ;;  %v8642_v4 = vld [vmem:[#allocation13_spill] sm:$0xff] }
 0x180   : > { %8634 = vst [vmem:[#allocation64_spill] sm:$0xff] %v6195_v63  ;;  %v1160_v44 = vadd.f32 %v8636_v17, %v1060_v31  ;;  %v1124_v16 = vmul.f32 %v5264_v58, %v790_v3  ;;  %v957_v48 = vadd.f32 %v925_v10, %v6119_v24  ;;  %v1223_v55 = vmul.f32 %v5281_v18, %v889_v39  ;;  %v8640_v17 = vld [vmem:[#allocation51_spill] sm:$0xff] }
 0x181   : > { %v1360_v32 = vadd.f32 %v8637_v41, %v1259_v21  ;;  %v1224_v14 = vmul.f32 %v5281_v18, %v890_v38  ;;  %v858_v52 = vadd.f32 %v826_v35, %v758_v15  ;;  %v1056_v60 = vadd.f32 %v1024_v9, %v8639_v46  ;;  %8641 = vst [vmem:[#allocation15_spill] sm:$0xff] %v6214_v27  ;;  %v8643_v41 = vld [vmem:[#allocation29_spill] sm:$0xff]  ;;  %v706_v9 = vld [vmem:[#allocation2 + $0x170] sm:$0xff] }
 0x182   : > { %v1260_v63 = vadd.f32 %v8638_v51, %v1160_v44  ;;  %v1254_v31 = vadd.f32 %v8640_v17, %v6041_v30  ;;  %v1057_v21 = vadd.f32 %v6070_v11, %v957_v48  ;;  %v1255_v24 = vadd.f32 %v1223_v55, %v6125_v6  ;;  %v8644_v46 = vld [vmem:[#allocation37_spill] sm:$0xff] }
 0x183   : > { %v1460_v20 = vadd.f32 %v8642_v4, %v1360_v32  ;;  %v1323_v10 = vmul.f32 %v5267_v59, %v690_v22  ;;  %v958_v53 = vadd.f32 %v926_v8, %v858_v52  ;;  %v1156_v51 = vadd.f32 %v1124_v16, %v1056_v60  ;;  %v8645_v4 = vld [vmem:[#allocation34_spill] sm:$0xff] }
 0x184   : > { %v1361_v36 = vadd.f32 %v8643_v41, %v1260_v63  ;;  %v1423_v44 = vmul.f32 %v5271_v7, %v790_v3  ;;  %v1157_v30 = vadd.f32 %v6073_v45, %v1057_v21  ;;  %v1356_v32 = vadd.f32 %v6076_v5, %v1255_v24  ;;  %v6227_v63 = vpop.f32.mrb[27].mxu0  ;;  %v8647_v8 = vld [vmem:[#allocation38_spill] sm:$0xff]  ;;  %v906_v21 = vld [vmem:[#allocation2 + $0x172] sm:$0xff]  ;;  %v8651_v41 = vld [vmem:[#allocation45_spill] sm:$0xff] }
 0x185   : > { %v1560_v35 = vadd.f32 %v8644_v46, %v1460_v20  ;;  %v1355_v15 = vadd.f32 %v1323_v10, %v1254_v31  ;;  %v1058_v11 = vadd.f32 %v1026_v2, %v958_v53  ;;  %v1256_v6 = vadd.f32 %v1224_v14, %v1156_v51  ;;  %8646 = vst [vmem:[#allocation16_spill] sm:$0xff] %v6227_v63  ;;  %v8648_v2 = vld [vmem:[#allocation19_spill] sm:$0xff]  ;;  %v8650_v24 = vld [vmem:[#allocation20_spill] sm:$0xff] }
 0x186   : > { %v1461_v48 = vadd.f32 %v8645_v4, %v1361_v36  ;;  %v1522_v22 = vmul.f32 %v5284_v19, %v889_v39  ;;  %v1257_v52 = vadd.f32 %v1225_v1, %v1157_v30  ;;  %v1456_v20 = vadd.f32 %v6082_v54, %v1356_v32  ;;  %v806_v14 = vld [vmem:[#allocation2 + $0x171] sm:$0xff]  ;;  %v6239_v54 = vpop.f32.mrb[29].mxu1  ;;  %v8653_v32 = vld [vmem:[#allocation46_spill] sm:$0xff] }
 0x187   : > { %v4615_v60 = vpack.c.bf16 %v1560_v35, %v1560_v35  ;;  %v1455_v3 = vadd.f32 %v1423_v44, %v1355_v15  ;;  %v1158_v16 = vadd.f32 %v6148_v40, %v1058_v11  ;;  %v1357_v55 = vadd.f32 %v1325_v62, %v1256_v6  ;;  %8649 = vst [vmem:[#allocation40_spill] sm:$0xff] %v6239_v54  ;;  %v905_v31 = vld [vmem:[#allocation2 + $0x16a] sm:$0xff] }
 0x188   : > { %v1561_v45 = vadd.f32 %v8647_v8, %v1461_v48  ;;  %v1523_v5 = vmul.f32 %v5284_v19, %v890_v38  ;;  %v1358_v36 = vadd.f32 %v8648_v2, %v1257_v52  ;;  %v1554_v39 = vadd.f32 %v1522_v22, %v6144_v29  ;;  %v8654_v52 = vld [vmem:[#allocation48_spill] sm:$0xff]  ;;  %v6279_v2 = vpop.f32.mrb[30].mxu1 }
 0x189   : > { %1721 = vst.msk [vmem:[%s5502_s8 + $0x40] sm:$0xf] %vm1704_vm3, %v4615_v60  ;;  %v1556_v53 = vadd.f32 %v6166_v42, %v1456_v20  ;;  %v742_v1 = vmul.f32 %v5212_v23, %v706_v9  ;;  %v1258_v40 = vadd.f32 %v6154_v56, %v1158_v16  ;;  %v1457_v62 = vadd.f32 %v6163_v28, %v1357_v55  ;;  %v8652_v28 = vld [vmem:[#allocation47_spill] sm:$0xff]  ;;  %v8655_v20 = vld [vmem:[#allocation65_spill] sm:$0xff] }
 0x18a   : > { %v4616_v17 = vpack.c.bf16 %v1561_v45, %v1561_v45  ;;  %v1555_v38 = vadd.f32 %v1523_v5, %v1455_v3  ;;  %v1458_v10 = vadd.f32 %v8650_v24, %v1358_v36  ;;  %v4609_v29 = vpack.c.bf16 %v1554_v39, %v1554_v39  ;;  %8656 = vst [vmem:[#allocation43_spill] sm:$0xff] %v6279_v2  ;;  %v8663_v24 = vld [vmem:[#allocation57_spill] sm:$0xff] }
 0x18b   : > { %v4611_v42 = vpack.c.bf16 %v1556_v53, %v1556_v53  ;;  %v774_v23 = vadd.f32 %v5918_v49, %v742_v1  ;;  %v1359_v51 = vadd.f32 %v8651_v41, %v1258_v40  ;;  %v1557_v44 = vadd.f32 %v6173_v43, %v1457_v62  ;;  %v6283_v53 = vld [vmem:[#allocation2 + $0x19a] sm:$0xff] }
 0x18c   : > { %1722 = vst.msk [vmem:[%s5502_s8 + $0x44] sm:$0xf] %vm1704_vm3, %v4616_v17  ;;  %v4610_v56 = vpack.c.bf16 %v1555_v38, %v1555_v38  ;;  %v842_v46 = vmul.f32 %v5221_v26, %v806_v14  ;;  %v1558_v35 = vadd.f32 %v8652_v28, %v1458_v10  ;;  %1715 = vst.msk [vmem:[%s5502_s8 + $0x28] sm:$0xf] %vm1704_vm3, %v4609_v29  ;;  %v8664_v10 = vld [vmem:[#allocation60_spill] sm:$0xff] }
 0x18d   : > { %1717 = vst.msk [vmem:[%s5502_s8 + $0x30] sm:$0xf] %vm1704_vm3, %v4611_v42  ;;  %v941_v30 = vmul.f32 %v5235_v37, %v905_v31  ;;  %v942_v49 = vmul.f32 %v5235_v37, %v906_v21  ;;  %v1040_v15 = vmul.f32 %v5261_v57, %v706_v9  ;;  %v1459_v4 = vadd.f32 %v8653_v32, %v1359_v51  ;;  %v8666_v51 = vld [vmem:[#allocation64_spill] sm:$0xff]  ;;  %v4500_v28 = vld [vmem:[%s8390_s3 + $0xc] sm:$0x7]  ;;  %v8669_v32 = vld [vmem:[#allocation17_spill] sm:$0xff] }
 0x18e   : > { %v4612_v43 = vpack.c.bf16 %v1557_v44, %v1557_v44  ;;  %1716 = vst.msk [vmem:[%s5502_s8 + $0x2c] sm:$0xf] %vm1704_vm3, %v4610_v56  ;;  %v874_v26 = vadd.f32 %v842_v46, %v774_v23  ;;  %v1140_v48 = vmul.f32 %v5264_v58, %v806_v14  ;;  %v4613_v11 = vpack.c.bf16 %v1558_v35, %v1558_v35  ;;  %v8665_v23 = vld [vmem:[#allocation11_spill] sm:$0xff]  ;;  %v8667_v35 = vld [vmem:[#allocation14_spill] sm:$0xff] }
 0x18f   : > { %v973_v6 = vadd.f32 %v941_v30, %v6132_v25  ;;  %v1072_v22 = vadd.f32 %v1040_v15, %v6006_v12  ;;  %v1239_v60 = vmul.f32 %v5281_v18, %v905_v31  ;;  %v1559_v37 = vadd.f32 %v8654_v52, %v1459_v4  ;;  %8657 = vst [vmem:[#allocation41_spill] sm:$0xff] %v6283_v53  ;;  %v6312_v15 = vpop.f32.mrb[31].mxu1 }
 0x190   : > { %1718 = vst.msk [vmem:[%s5502_s8 + $0x34] sm:$0xf] %vm1704_vm3, %v4612_v43  ;;  %v974_v57 = vadd.f32 %v942_v49, %v874_v26  ;;  %v1240_v3 = vmul.f32 %v5281_v18, %v906_v21  ;;  %v1270_v8 = vadd.f32 %v8655_v20, %v6063_v33  ;;  %1719 = vst.msk [vmem:[%s5502_s8 + $0x38] sm:$0xf] %vm1704_vm3, %v4613_v11  ;;  %v8670_v11 = vld [vmem:[#allocation21_spill] sm:$0xff] }
 0x191   : > { %v1073_v58 = vadd.f32 %v6085_v47, %v973_v6  ;;  %v1172_v25 = vadd.f32 %v1140_v48, %v1072_v22  ;;  %v1271_v12 = vadd.f32 %v1239_v60, %v6137_v34  ;;  %v1339_v45 = vmul.f32 %v5267_v59, %v706_v9  ;;  %v8658_v34 = vld [vmem:[#allocation36_spill] sm:$0xff]  ;;  %v8659_v9 = vld [vmem:[#allocation62_spill] sm:$0xff]  ;;  %8668 = vst [vmem:[#allocation12_spill] sm:$0xff] %v6312_v15  ;;  %v8671_v22 = vld [vmem:[#allocation3_spill] sm:$0xff] }
 0x192   : > { %v4614_v16 = vpack.c.bf16 %v1559_v37, %v1559_v37  ;;  %v1074_v55 = vadd.f32 %v6176_v13, %v974_v57  ;;  %v1439_v5 = vmul.f32 %v5271_v7, %v806_v14  ;;  %v1538_v18 = vmul.f32 %v5284_v19, %v905_v31  ;;  %v8660_v14 = vld [vmem:[#allocation33_spill] sm:$0xff]  ;;  %v8722_v15 = vld [vmem:[#allocation6_spill] sm:$0xff] }
 0x193   : > { %v1173_v33 = vadd.f32 %v6088_v0, %v1073_v58  ;;  %v1272_v36 = vadd.f32 %v1240_v3, %v1172_v25  ;;  %v1371_v39 = vadd.f32 %v1339_v45, %v1270_v8  ;;  %v1372_v47 = vadd.f32 %v6103_v61, %v1271_v12  ;;  %v8661_v0 = vld [vmem:[#allocation61_spill] sm:$0xff]  ;;  %v8662_v61 = vld [vmem:[#allocation27_spill] sm:$0xff]  ;;  %v8673_v25 = vld [vmem:[#allocation42_spill] sm:$0xff] }
 0x194   : > { %v1540_v59 = vmul.f32 %v5284_v19, %v6156_v50  ;;  %1720 = vst.msk [vmem:[%s5502_s8 + $0x3c] sm:$0xf] %vm1704_vm3, %v4614_v16  ;;  %v1174_v13 = vadd.f32 %v8658_v34, %v1074_v55  ;;  %v1539_v7 = vmul.f32 %v5284_v19, %v906_v21  ;;  %v1570_v1 = vadd.f32 %v1538_v18, %v8659_v9  ;;  %v6295_v31 = vld [vmem:[#allocation2 + $0x1a2] sm:$0xff]  ;;  %v4502_v8 = vld [vmem:[%s8390_s3 + $0x14] sm:$0x7] }
 0x195   : > { %v1273_v17 = vadd.f32 %v8660_v14, %v1173_v33  ;;  %v1373_v40 = vadd.f32 %v8661_v0, %v1272_v36  ;;  %v1471_v62 = vadd.f32 %v1439_v5, %v1371_v39  ;;  %v1472_v38 = vadd.f32 %v8662_v61, %v1372_v47  ;;  %v1957_v3 = vld [vmem:[#allocation2] sm:$0xff]  ;;  %v1958_v55 = vld [vmem:[#allocation2 + $0x8] sm:$0xff]  ;;  %v6340_v5 = vpop.f32.mrb[28].mxu0  ;;  %v6345_v18 = vld [vmem:[%s8390_s3 + $0x1c] sm:$0x7] }
 0x196   : > { %v1541_v50 = vmul.f32 %v5284_v19, %v8663_v24  ;;  %v1274_v29 = vadd.f32 %v8664_v10, %v1174_v13  ;;  %v1542_v21 = vmul.f32 %v5284_v19, %v6283_v53  ;;  %v4625_v42 = vpack.c.bf16 %v1570_v1, %v1570_v1  ;;  %v6338_v45 = vld [vmem:[%s8391_s4 + $0x1] ss:$0 sm:$0xff]  ;;  %8674 = vst [vmem:[#allocation52_spill] sm:$0xff] %v6340_v5  ;;  %v8675_v33 = vld [vmem:[#allocation4_spill] sm:$0xff]  ;;  %v2157_v9 = vld [vmem:[#allocation2 + $0x2] sm:$0xff] }
 0x197   : > { %v1374_v41 = vadd.f32 %v8665_v23, %v1273_v17  ;;  %v1473_v44 = vadd.f32 %v8666_v51, %v1373_v40  ;;  %v1571_v56 = vadd.f32 %v1539_v7, %v1471_v62  ;;  %v1572_v46 = vadd.f32 %v1540_v59, %v1472_v38  ;;  %v2057_v16 = vld [vmem:[#allocation2 + $0x1] sm:$0xff]  ;;  %v6358_v7 = vpop.f32.mrb[29].mxu0  ;;  %v8681_v17 = vld [vmem:[#allocation55_spill] sm:$0xff]  ;;  %v4864_v23 = vld [vmem:[#allocation2 + $0x198] sm:$0xff] }
 0x198   : > { %v1375_v30 = vadd.f32 %v8667_v35, %v1274_v29  ;;  %v1543_v49 = vmul.f32 %v5284_v19, %v6295_v31  ;;  %1731 = vst.msk [vmem:[%s5502_s8 + $0x68] sm:$0xf] %vm1704_vm3, %v4625_v42  ;;  %v6317_v60 = vrot.slane %v4500_v28, %v8671_v22  ;;  %v6326_v19 = vld [vmem:[%s8389_s2 + $0x1] ss:$0 sm:$0xff]  ;;  %v6350_v36 = vrot.slane %v4500_v28, %v8675_v33  ;;  %v8680_v1 = vld [vmem:[#allocation54_spill] sm:$0xff]  ;;  %v6367_v40 = vpop.f32.mrb[30].mxu0 }
 0x199   : > { %v1474_v4 = vadd.f32 %v8669_v32, %v1374_v41  ;;  %v1573_v43 = vadd.f32 %v1541_v50, %v1473_v44  ;;  %v4626_v26 = vpack.c.bf16 %v1571_v56, %v1571_v56  ;;  %v4627_v48 = vpack.c.bf16 %v1572_v46, %v1572_v46  ;;  %8672 = vst [vmem:[#allocation44_spill] sm:$0xff] %v6326_v19  ;;  %v8676_v39 = vld [vmem:[#allocation53_spill] sm:$0xff]  ;;  %v2058_v50 = vld [vmem:[#allocation2 + $0x9] sm:$0xff] }
 0x19a   : > { %v1475_v6 = vadd.f32 %v8670_v11, %v1375_v30  ;;  %v1794_v12 = vadd.f32 %v8673_v25, %v6326_v19  ;;  %v1786_v47 = vadd.f32 %v6326_v19, %v8676_v39  ;;  %v1993_v59 = vmul.f32 %v6317_v60, %v1957_v3  ;;  %v8677_v34 = vld [vmem:[#allocation5_spill] sm:$0xff]  ;;  %8679 = vst [vmem:[#allocation13_spill] sm:$0xff] %v6358_v7  ;;  %v6390_v42 = vld [vmem:[%s8390_s3 + $0x10] sm:$0x7]  ;;  %v8694_v3 = vld [vmem:[#allocation26_spill] sm:$0xff] }
 0x19b   : > { %v1574_v52 = vadd.f32 %v1542_v21, %v1474_v4  ;;  %v4628_v37 = vpack.c.bf16 %v1573_v43, %v1573_v43  ;;  %1732 = vst.msk [vmem:[%s5502_s8 + $0x6c] sm:$0xf] %vm1704_vm3, %v4626_v26  ;;  %1733 = vst.msk [vmem:[%s5502_s8 + $0x70] sm:$0xf] %vm1704_vm3, %v4627_v48  ;;  %v6356_v13 = vrot.slane %v4500_v28, %v8677_v34  ;;  %v6397_v51 = vld [vmem:[#allocation2 + $0x1a0] sm:$0xff]  ;;  %v8689_v4 = vld [vmem:[#allocation28_spill] sm:$0xff] }
 0x19c   : > { %v1575_v57 = vadd.f32 %v1543_v49, %v1475_v6  ;;  %1914 = vst.msk [vmem:[#allocation2 + $0x31] sm:$0xff] %vm353_vm1, %v1794_v12  ;;  %v1797_v14 = vadd.f32 %v8680_v1, %v6326_v19  ;;  %v1789_v0 = vadd.f32 %v6326_v19, %v8681_v17  ;;  %8682 = vst [vmem:[#allocation29_spill] sm:$0xff] %v6367_v40  ;;  %v4558_v56 = vld [vmem:[%s8390_s3 + $0x20] sm:$0x7]  ;;  %v8688_v49 = vld [vmem:[#allocation31_spill] sm:$0xff] }
 0x19d   : > { %v4629_v20 = vpack.c.bf16 %v1574_v52, %v1574_v52  ;;  %1734 = vst.msk [vmem:[%s5502_s8 + $0x74] sm:$0xf] %vm1704_vm3, %v4628_v37  ;;  %8678 = vst [vmem:[#allocation51_spill] sm:$0xff] %v6356_v13  ;;  %v6370_v62 = vrot.slane %v4502_v8, %v8671_v22  ;;  %v2025_v61 = vadd.f32 %v6338_v45, %v1993_v59  ;;  %v6413_v26 = vld [vmem:[#allocation2 + $0x199] sm:$0xff]  ;;  %v2158_v6 = vld [vmem:[#allocation2 + $0xa] sm:$0xff] }
 0x19e   : > { %v4630_v58 = vpack.c.bf16 %v1575_v57, %v1575_v57  ;;  %1912 = vst.msk [vmem:[#allocation2 + $0x19] sm:$0xff] %vm353_vm1, %v1786_v47  ;;  %v2093_v38 = vmul.f32 %v6350_v36, %v2057_v16  ;;  %v1994_v24 = vmul.f32 %v6317_v60, %v1958_v55  ;;  %v6378_v10 = vrot.slane %v6345_v18, %v8671_v22  ;;  %v6426_v52 = vld [vmem:[%s8389_s2 + $0x2] ss:$0 sm:$0xff]  ;;  %v8693_v37 = vld [vmem:[#allocation39_spill] sm:$0xff]  ;;  %v8698_v55 = vld [vmem:[#allocation24_spill] sm:$0xff] }
 0x19f   : > { %1735 = vst.msk [vmem:[%s5502_s8 + $0x78] sm:$0xf] %vm1704_vm3, %v4629_v20  ;;  %8683 = vst [vmem:[#allocation37_spill] sm:$0xff] %v6370_v62  ;;  %v6382_v29 = vrot.slane %v6345_v18, %v8677_v34  ;;  %v6385_v21 = vrot.slane %v4502_v8, %v8675_v33  ;;  %v6395_v41 = vmul.f32 %v4864_v23, %v6370_v62  ;;  %v8701_v1 = vld [vmem:[#allocation32_spill] sm:$0xff] }
 0x1a0   : > { %1736 = vst.msk [vmem:[%s5502_s8 + $0x7c] sm:$0xf] %vm1704_vm3, %v4630_v58  ;;  %8684 = vst [vmem:[#allocation34_spill] sm:$0xff] %v6378_v10  ;;  %v6401_v44 = vmul.f32 %v6397_v51, %v6370_v62  ;;  %v2125_v46 = vadd.f32 %v2093_v38, %v2025_v61  ;;  %v2193_v28 = vmul.f32 %v6356_v13, %v2157_v9  ;;  %v4867_v58 = vld [vmem:[#allocation2 + $0x1a1] sm:$0xff]  ;;  %s6609_s8 = scalar_lea.vmem %s8393_s6, %s5479_s29 }
 0x1a1   : > { %8685 = vst [vmem:[#allocation38_spill] sm:$0xff] %v6382_v29  ;;  %1915 = vst.msk [vmem:[#allocation2 + $0x39] sm:$0xff] %vm353_vm1, %v1797_v14  ;;  %v2026_v35 = vadd.f32 %v6338_v45, %v1994_v24  ;;  %v2094_v30 = vmul.f32 %v6350_v36, %v2058_v50  ;;  %v1810_v32 = vadd.f32 %v8688_v49, %v6326_v19  ;;  %v6466_v49 = vpop.f32.mrb[32].mxu1 }
 0x1a2   : > { %1913 = vst.msk [vmem:[#allocation2 + $0x21] sm:$0xff] %vm353_vm1, %v1789_v0  ;;  %8686 = vst [vmem:[#allocation19_spill] sm:$0xff] %v6395_v41  ;;  %v1802_v43 = vadd.f32 %v6326_v19, %v8689_v4  ;;  %v6417_v48 = vmul.f32 %v6413_v26, %v6385_v21  ;;  %v6421_v11 = vrot.slane %v6390_v42, %v8671_v22  ;;  %v6549_v7 = vpop.f32.mrb[33].mxu1 }
 0x1a3   : > { %8687 = vst [vmem:[#allocation20_spill] sm:$0xff] %v6401_v44  ;;  %8692 = vst [vmem:[#allocation46_spill] sm:$0xff] %v6426_v52  ;;  %v1813_v57 = vadd.f32 %v8693_v37, %v6326_v19  ;;  %v1805_v20 = vadd.f32 %v6326_v19, %v8694_v3  ;;  %v6433_v25 = vmul.f32 %v4867_v58, %v6385_v21  ;;  %v6448_v59 = vld [vmem:[#allocation2 + $0x30] sm:$0xff] }
 0x1a4   : > { %8690 = vst [vmem:[#allocation45_spill] sm:$0xff] %v6417_v48  ;;  %8691 = vst [vmem:[#allocation47_spill] sm:$0xff] %v6421_v11  ;;  %v6436_v12 = vrot.slane %v4502_v8, %v8677_v34  ;;  %v6439_v16 = vrot.slane %v4558_v56, %v8671_v22  ;;  %v1826_v39 = vadd.f32 %v8698_v55, %v6326_v19  ;;  %v8700_v8 = vld [vmem:[#allocation66_spill] sm:$0xff]  ;;  %v6456_v17 = vld [vmem:[#allocation2 + $0x31] sm:$0xff] }
 0x1a5   : > { %8695 = vst [vmem:[#allocation48_spill] sm:$0xff] %v6433_v25  ;;  %1918 = vst.msk [vmem:[#allocation2 + $0x61] sm:$0xff] %vm353_vm1, %v1810_v32  ;;  %v6446_v47 = vrot.slane %v4558_v56, %v8675_v33  ;;  %v2225_v9 = vadd.f32 %v2193_v28, %v2125_v46  ;;  %v1818_v22 = vadd.f32 %v6326_v19, %v8700_v8  ;;  %v1959_v0 = vld [vmem:[#allocation2 + $0x18] sm:$0xff]  ;;  %v8703_v46 = vld [vmem:[#allocation22_spill] sm:$0xff] }
 0x1a6   : > { %8696 = vst [vmem:[#allocation65_spill] sm:$0xff] %v6436_v12  ;;  %8697 = vst [vmem:[#allocation36_spill] sm:$0xff] %v6439_v16  ;;  %v1829_v14 = vadd.f32 %v8701_v1, %v6326_v19  ;;  %v2059_v61 = vld [vmem:[#allocation2 + $0x19] sm:$0xff]  ;;  %v6460_v38 = vrot.slane %v6390_v42, %v8675_v33  ;;  %v2126_v24 = vadd.f32 %v2094_v30, %v2026_v35 }
 0x1a7   : > { %1916 = vst.msk [vmem:[#allocation2 + $0x49] sm:$0xff] %vm353_vm1, %v1802_v43  ;;  %8699 = vst [vmem:[#allocation62_spill] sm:$0xff] %v6446_v47  ;;  %v2194_v50 = vmul.f32 %v6356_v13, %v2158_v6  ;;  %v3074_v28 = vadd.f32 %v8703_v46, %v6426_v52  ;;  %v6469_v32 = vrot.slane %v4558_v56, %v8677_v34  ;;  %v8706_v30 = vld [vmem:[#allocation25_spill] sm:$0xff] }
 0x1a8   : > { %1919 = vst.msk [vmem:[#allocation2 + $0x69] sm:$0xff] %vm353_vm1, %v1813_v57  ;;  %1917 = vst.msk [vmem:[#allocation2 + $0x51] sm:$0xff] %vm353_vm1, %v1805_v20  ;;  %v1995_v4 = vmul.f32 %v6317_v60, %v1959_v0  ;;  %v2293_v43 = vmul.f32 %v6421_v11, %v1959_v0  ;;  %v6473_v37 = vld [vmem:[#allocation2 + $0x38] sm:$0xff]  ;;  %v3077_v6 = vadd.f32 %v8706_v30, %v6426_v52 }
 0x1a9   : > { %8702 = vst [vmem:[#allocation33_spill] sm:$0xff] %v6460_v38  ;;  %1922 = vst.msk [vmem:[#allocation2 + $0x91] sm:$0xff] %vm353_vm1, %v1826_v39  ;;  %v6475_v57 = vld [vmem:[#allocation2 + $0x39] sm:$0xff]  ;;  %v6485_v56 = vmul.f32 %v6436_v12, %v6283_v53  ;;  %v6489_v3 = vmul.f32 %v6436_v12, %v6295_v31  ;;  %v2060_v55 = vld [vmem:[#allocation2 + $0x21] sm:$0xff]  ;;  %v2226_v25 = vadd.f32 %v2194_v50, %v2126_v24 }
 0x1aa   : > { %8704 = vst [vmem:[#allocation61_spill] sm:$0xff] %v6466_v49  ;;  %8705 = vst [vmem:[#allocation27_spill] sm:$0xff] %v6469_v32  ;;  %v6477_v35 = vld [vmem:[#allocation2 + $0x32] sm:$0xff]  ;;  %v6491_v20 = vld [vmem:[#allocation2 + $0x3a] sm:$0xff]  ;;  %v2027_v0 = vadd.f32 %v6338_v45, %v1995_v4  ;;  %v2325_v46 = vadd.f32 %v2293_v43, %v2225_v9  ;;  %v6515_v9 = vpop.f32.mrb[31].mxu0  ;;  %v2095_v4 = vmul.f32 %v6350_v36, %v2059_v61 }
 0x1ab   : > { %1920 = vst.msk [vmem:[#allocation2 + $0x79] sm:$0xff] %vm353_vm1, %v1818_v22  ;;  %1923 = vst.msk [vmem:[#allocation2 + $0x99] sm:$0xff] %vm353_vm1, %v1829_v14  ;;  %v1960_v58 = vld [vmem:[#allocation2 + $0x20] sm:$0xff]  ;;  %v8709_v39 = vld [vmem:[#allocation23_spill] sm:$0xff]  ;;  %v6499_v14 = vmul.f32 %v4864_v23, %v6439_v16  ;;  %v6511_v23 = vrot.slane %v6390_v42, %v8677_v34  ;;  %v2394_v5 = vmul.f32 %v6460_v38, %v2060_v55 }
 0x1ac   : > { %8707 = vst [vmem:[#allocation57_spill] sm:$0xff] %v6485_v56  ;;  %8708 = vst [vmem:[#allocation60_spill] sm:$0xff] %v6489_v3  ;;  %v3066_v8 = vadd.f32 %v6426_v52, %v8709_v39  ;;  %v8710_v22 = vld [vmem:[#allocation35_spill] sm:$0xff]  ;;  %v1996_v31 = vmul.f32 %v6317_v60, %v1960_v58  ;;  %v2159_v30 = vld [vmem:[#allocation2 + $0x1a] sm:$0xff]  ;;  %v2393_v39 = vmul.f32 %v6460_v38, %v2059_v61 }
 0x1ad   : > { %3194 = vst.msk [vmem:[#allocation2 + $0x31] sm:$0xff] %vm353_vm1, %v3074_v28  ;;  %v3069_v1 = vadd.f32 %v6426_v52, %v8710_v22  ;;  %8711 = vst [vmem:[#allocation11_spill] sm:$0xff] %v6499_v14  ;;  %v2160_v3 = vld [vmem:[#allocation2 + $0x22] sm:$0xff]  ;;  %v6506_v28 = vmul.f32 %v6397_v51, %v6439_v16  ;;  %v2096_v51 = vmul.f32 %v6350_v36, %v2060_v55 }
 0x1ae   : > { %3195 = vst.msk [vmem:[#allocation2 + $0x39] sm:$0xff] %vm353_vm1, %v3077_v6  ;;  %3192 = vst.msk [vmem:[#allocation2 + $0x19] sm:$0xff] %vm353_vm1, %v3066_v8  ;;  %v2028_v43 = vadd.f32 %v6338_v45, %v1996_v31  ;;  %v6520_v6 = vld [vmem:[#allocation2 + $0x60] sm:$0xff]  ;;  %v8715_v24 = vld [vmem:[#allocation18_spill] sm:$0xff]  ;;  %v2425_v42 = vadd.f32 %v2393_v39, %v2325_v46  ;;  %v2294_v50 = vmul.f32 %v6421_v11, %v1960_v58 }
 0x1af   : > { %8712 = vst [vmem:[#allocation64_spill] sm:$0xff] %v6506_v28  ;;  %3193 = vst.msk [vmem:[#allocation2 + $0x21] sm:$0xff] %vm353_vm1, %v3069_v1  ;;  %v6522_v22 = vld [vmem:[#allocation2 + $0x61] sm:$0xff]  ;;  %v3090_v34 = vadd.f32 %v8715_v24, %v6426_v52  ;;  %v6529_v1 = vld [vmem:[#allocation2 + $0x49] sm:$0xff]  ;;  %v1997_v24 = vmul.f32 %v6317_v60, %v6448_v59  ;;  %v2127_v46 = vadd.f32 %v2095_v4, %v2027_v0 }
 0x1b0   : > { %8713 = vst [vmem:[#allocation14_spill] sm:$0xff] %v6515_v9  ;;  %8714 = vst [vmem:[#allocation17_spill] sm:$0xff] %v6522_v22  ;;  %v6527_v8 = vld [vmem:[#allocation2 + $0x48] sm:$0xff]  ;;  %v8716_v31 = vld [vmem:[#allocation49_spill] sm:$0xff]  ;;  %v2128_v39 = vadd.f32 %v2096_v51, %v2028_v43  ;;  %v2493_v0 = vmul.f32 %v6511_v23, %v2159_v30  ;;  %v6571_v55 = vrot.slane %v6345_v18, %v8675_v33 }
 0x1b1   : > { %v6531_v28 = vld [vmem:[#allocation2 + $0x68] sm:$0xff]  ;;  %v3082_v14 = vadd.f32 %v6426_v52, %v8716_v31  ;;  %v6545_v41 = vld [vmem:[#allocation2 + $0x50] sm:$0xff]  ;;  %8719 = vst [vmem:[#allocation21_spill] sm:$0xff] %v6549_v7  ;;  %v6553_v31 = vmul.f32 %v6413_v26, %v6446_v47  ;;  %v2195_v26 = vmul.f32 %v6356_v13, %v2159_v30  ;;  %v2029_v63 = vadd.f32 %v6338_v45, %v1997_v24 }
 0x1b2   : > { %v6533_v61 = vld [vmem:[#allocation2 + $0x69] sm:$0xff]  ;;  %v6557_v4 = vld [vmem:[#allocation2 + $0x51] sm:$0xff]  ;;  %8721 = vst [vmem:[#allocation42_spill] sm:$0xff] %v6571_v55  ;;  %v2097_v30 = vmul.f32 %v6350_v36, %v6456_v17  ;;  %v2594_v33 = vmul.f32 %v6370_v62, %v6473_v37  ;;  %v2295_v24 = vmul.f32 %v6421_v11, %v6448_v59 }
 0x1b3   : > { %v8717_v56 = vld [vmem:[#allocation50_spill] sm:$0xff]  ;;  %v8718_v9 = vld [vmem:[#allocation63_spill] sm:$0xff]  ;;  %8720 = vst [vmem:[#allocation3_spill] sm:$0xff] %v6553_v31  ;;  %v2525_v31 = vadd.f32 %v2493_v0, %v2425_v42  ;;  %v2227_v7 = vadd.f32 %v2195_v26, %v2127_v46  ;;  %v2098_v42 = vmul.f32 %v6350_v36, %v6475_v57  ;;  %v2296_v46 = vmul.f32 %v6421_v11, %v6473_v37 }
 0x1b4   : > { %v3093_v44 = vadd.f32 %v8717_v56, %v6426_v52  ;;  %v6541_v58 = vld [vmem:[#allocation2 + $0x62] sm:$0xff]  ;;  %v6543_v48 = vld [vmem:[#allocation2 + $0x6a] sm:$0xff]  ;;  %v3085_v40 = vadd.f32 %v6426_v52, %v8718_v9  ;;  %v2326_v56 = vadd.f32 %v2294_v50, %v2226_v25  ;;  %v6561_v51 = vld [vmem:[#allocation2 + $0x52] sm:$0xff]  ;;  %v1998_v9 = vmul.f32 %v6317_v60, %v6473_v37 }
 0x1b5   : > { %v6559_v43 = vld [vmem:[#allocation2 + $0x4a] sm:$0xff]  ;;  %3198 = vst.msk [vmem:[#allocation2 + $0x61] sm:$0xff] %vm353_vm1, %v3090_v34  ;;  %v2196_v25 = vmul.f32 %v6356_v13, %v2160_v3  ;;  %v2494_v34 = vmul.f32 %v6511_v23, %v2160_v3  ;;  %v2129_v26 = vadd.f32 %v2097_v30, %v2029_v63  ;;  %v2395_v30 = vmul.f32 %v6460_v38, %v6456_v17 }
 0x1b6   : > { %3199 = vst.msk [vmem:[#allocation2 + $0x69] sm:$0xff] %vm353_vm1, %v3093_v44  ;;  %3196 = vst.msk [vmem:[#allocation2 + $0x49] sm:$0xff] %vm353_vm1, %v3082_v14  ;;  %v2426_v50 = vadd.f32 %v2394_v5, %v2326_v56  ;;  %v2593_v44 = vmul.f32 %v6370_v62, %v6448_v59  ;;  %v2693_v5 = vmul.f32 %v6385_v21, %v6456_v17  ;;  %v6627_v17 = vld [vmem:[#allocation2 + $0x38] sm:$0xff] }
 0x1b7   : > { %3197 = vst.msk [vmem:[#allocation2 + $0x51] sm:$0xff] %vm353_vm1, %v3085_v40  ;;  %v2228_v49 = vadd.f32 %v2196_v25, %v2128_v39  ;;  %v3239_v40 = vld [vmem:[#allocation2 + $0x18] sm:$0xff]  ;;  %v2030_v3 = vadd.f32 %v6338_v45, %v1998_v9  ;;  %v6592_v39 = vld [vmem:[#allocation2 + $0x30] sm:$0xff]  ;;  %v2793_v9 = vmul.f32 %v6436_v12, %v6477_v35  ;;  %v2327_v25 = vadd.f32 %v2295_v24, %v2227_v7 }
 0x1b8   : > { %v2526_v18 = vadd.f32 %v2494_v34, %v2426_v50  ;;  %v2625_v14 = vadd.f32 %v2593_v44, %v2525_v31  ;;  %v2694_v31 = vmul.f32 %v6385_v21, %v6475_v57  ;;  %v3573_v34 = vmul.f32 %v6378_v10, %v3239_v40 }
 0x1b9   : > { %v2328_v50 = vadd.f32 %v2296_v46, %v2228_v49  ;;  %v2794_v44 = vmul.f32 %v6436_v12, %v6491_v20  ;;  %v2130_v63 = vadd.f32 %v2098_v42, %v2030_v3  ;;  %v2197_v7 = vmul.f32 %v6356_v13, %v6477_v35  ;;  %v6624_v42 = vld [vmem:[#allocation2 + $0x31] sm:$0xff]  ;;  %v3440_v12 = vld [vmem:[#allocation2 + $0x22] sm:$0xff] }
 0x1ba   : > { %v2626_v56 = vadd.f32 %v2594_v33, %v2526_v18  ;;  %v2725_v0 = vadd.f32 %v2693_v5, %v2625_v14  ;;  %v3277_v18 = vmul.f32 %v8722_v15, %v6592_v39  ;;  %v6603_v33 = vpop.f32.mrb[34].mxu1  ;;  %v2198_v49 = vmul.f32 %v6356_v13, %v6491_v20 }
 0x1bb   : > { %8723 = vst [vmem:[#allocation4_spill] sm:$0xff] %v6603_v33  ;;  %v2396_v14 = vmul.f32 %v6460_v38, %v6475_v57  ;;  %v3275_v46 = vmul.f32 %v8722_v15, %v3239_v40  ;;  %v2495_v3 = vmul.f32 %v6511_v23, %v6477_v35  ;;  %v2001_v57 = vmul.f32 %v6317_v60, %v6520_v6  ;;  %v6636_v35 = vld [vmem:[%s8391_s4 + $0x2] ss:$0 sm:$0xff]  ;;  %v3439_v33 = vld [vmem:[#allocation2 + $0x1a] sm:$0xff] }
 0x1bc   : > { %v2726_v59 = vadd.f32 %v2694_v31, %v2626_v56  ;;  %v2825_v37 = vadd.f32 %v2793_v9, %v2725_v0  ;;  %v3339_v56 = vld [vmem:[#allocation2 + $0x19] sm:$0xff]  ;;  %v6620_v31 = vadd.f32 %v2197_v7, %v2129_v26  ;;  %v3309_v26 = vadd.f32 %v6636_v35, %v3277_v18 }
 0x1bd   : > { %v8724_v0 = vld [vmem:[#allocation9_spill] sm:$0xff]  ;;  %v3673_v7 = vmul.f32 %v6571_v55, %v3339_v56  ;;  %v3278_v18 = vmul.f32 %v8722_v15, %v6627_v17  ;;  %v6657_v2 = vadd.f32 %v2198_v49, %v2130_v63  ;;  %v8727_v63 = vld [vmem:[#allocation10_spill] sm:$0xff] }
 0x1be   : > { %v2826_v5 = vadd.f32 %v2794_v44, %v2726_v59  ;;  %v4631_v24 = vpack.c.bf16 %v2825_v37, %v2825_v37  ;;  %v3605_v9 = vadd.f32 %v3573_v34, %v8724_v0  ;;  %v3240_v59 = vld [vmem:[#allocation2 + $0x20] sm:$0xff]  ;;  %v2427_v44 = vadd.f32 %v2395_v30, %v2327_v25 }
 0x1bf   : > { %v2428_v37 = vadd.f32 %v2396_v14, %v2328_v50  ;;  %v2496_v34 = vmul.f32 %v6511_v23, %v6491_v20  ;;  %v2033_v0 = vadd.f32 %v6338_v45, %v2001_v57  ;;  %v2101_v25 = vmul.f32 %v6350_v36, %v6522_v22  ;;  %v8725_v50 = vld [vmem:[#allocation7_spill] sm:$0xff]  ;;  %v6655_v57 = vpop.f32.mrb[35].mxu1 }
 0x1c0   : > { %v4632_v40 = vpack.c.bf16 %v2826_v5, %v2826_v5  ;;  %2985 = vst.msk [vmem:[%s6609_s8] sm:$0xf] %vm1704_vm3, %v4631_v24  ;;  %v3377_v30 = vmul.f32 %v8725_v50, %v6624_v42  ;;  %v3307_v14 = vadd.f32 %v6636_v35, %v3275_v46  ;;  %v6652_v5 = vld [vmem:[#allocation2 + $0x39] sm:$0xff]  ;;  %v3276_v20 = vmul.f32 %v8722_v15, %v3240_v59  ;;  %v3340_v24 = vld [vmem:[#allocation2 + $0x21] sm:$0xff] }
 0x1c1   : > { %8726 = vst [vmem:[#allocation53_spill] sm:$0xff] %v6655_v57  ;;  %v3705_v54 = vadd.f32 %v3673_v7, %v3605_v9  ;;  %v6661_v27 = vadd.f32 %v2101_v25, %v2033_v0  ;;  %v3574_v46 = vmul.f32 %v6378_v10, %v3240_v59  ;;  %v2527_v52 = vadd.f32 %v2495_v3, %v2427_v44  ;;  %v8728_v59 = vld [vmem:[#allocation8_spill] sm:$0xff] }
 0x1c2   : > { %2986 = vst.msk [vmem:[%s6609_s8 + $0x4] sm:$0xf] %vm1704_vm3, %v4632_v40  ;;  %v6659_v40 = vld [vmem:[#allocation2 + $0x32] sm:$0xff]  ;;  %v6664_v19 = vadd.f32 %v2496_v34, %v2428_v37  ;;  %v6666_v53 = vadd.f32 %v3377_v30, %v3309_v26  ;;  %v3375_v15 = vmul.f32 %v8725_v50, %v3339_v56  ;;  %v6671_v57 = vmul.f32 %v8725_v50, %v6652_v5 }
 0x1c3   : > { %v3606_v49 = vadd.f32 %v3574_v46, %v8727_v63  ;;  %v3674_v9 = vmul.f32 %v6571_v55, %v3340_v24  ;;  %v3773_v7 = vmul.f32 %v6382_v29, %v3439_v33  ;;  %v6677_v3 = vadd.f32 %v6636_v35, %v3278_v18 }
 0x1c4   : > { %v3407_v0 = vadd.f32 %v3375_v15, %v3307_v14  ;;  %v6681_v44 = vmul.f32 %v8728_v59, %v6659_v40  ;;  %v3308_v56 = vadd.f32 %v6636_v35, %v3276_v20  ;;  %v3774_v26 = vmul.f32 %v6382_v29, %v3440_v12  ;;  %v6700_v20 = vpop.f32.mrb[32].mxu0 }
 0x1c5   : > { %v3706_v37 = vadd.f32 %v3674_v9, %v3606_v49  ;;  %v3805_v34 = vadd.f32 %v3773_v7, %v3705_v54  ;;  %v3873_v25 = vmul.f32 %v6439_v16, %v6592_v39  ;;  %v6689_v30 = vmul.f32 %v6421_v11, %v6520_v6  ;;  %8729 = vst [vmem:[#allocation5_spill] sm:$0xff] %v6700_v20  ;;  %v6706_v9 = vpop.f32.mrb[33].mxu0 }
 0x1c6   : > { %v6693_v15 = vmul.f32 %v6370_v62, %v6520_v6  ;;  %v6697_v14 = vmul.f32 %v6385_v21, %v6522_v22  ;;  %v3376_v18 = vmul.f32 %v8725_v50, %v3340_v24  ;;  %v3874_v46 = vmul.f32 %v6439_v16, %v6627_v17  ;;  %8730 = vst [vmem:[#allocation54_spill] sm:$0xff] %v6706_v9  ;;  %v6708_v6 = vld [vmem:[#allocation2 + $0x3a] sm:$0xff] }
 0x1c7   : > { %v3806_v54 = vadd.f32 %v3774_v26, %v3706_v37  ;;  %v3905_v63 = vadd.f32 %v3873_v25, %v3805_v34  ;;  %v3973_v49 = vmul.f32 %v6446_v47, %v6624_v42  ;;  %v3475_v22 = vmul.f32 %v8728_v59, %v3439_v33  ;;  %v6715_v26 = vpop.f32.mrb[34].mxu0 }
 0x1c8   : > { %v3408_v7 = vadd.f32 %v3376_v18, %v3308_v56  ;;  %v3974_v24 = vmul.f32 %v6446_v47, %v6652_v5  ;;  %v1999_v37 = vmul.f32 %v6317_v60, %v6527_v8  ;;  %8731 = vst [vmem:[#allocation55_spill] sm:$0xff] %v6715_v26  ;;  %v4073_v20 = vmul.f32 %v6469_v32, %v6659_v40 }
 0x1c9   : > { %v3906_v34 = vadd.f32 %v3874_v46, %v3806_v54  ;;  %v4005_v25 = vadd.f32 %v3973_v49, %v3905_v63  ;;  %v2297_v9 = vmul.f32 %v6421_v11, %v6527_v8  ;;  %v3476_v56 = vmul.f32 %v8728_v59, %v3440_v12 }
 0x1ca   : > { %v3575_v33 = vmul.f32 %v6378_v10, %v6592_v39  ;;  %v2031_v18 = vadd.f32 %v6338_v45, %v1999_v37  ;;  %v2099_v47 = vmul.f32 %v6350_v36, %v6529_v1  ;;  %v4074_v54 = vmul.f32 %v6469_v32, %v6708_v6 }
 0x1cb   : > { %v4006_v50 = vadd.f32 %v3974_v24, %v3906_v34  ;;  %v4105_v46 = vadd.f32 %v4073_v20, %v4005_v25  ;;  %v2595_v63 = vmul.f32 %v6370_v62, %v6527_v8  ;;  %v3507_v12 = vadd.f32 %v3475_v22, %v3407_v0 }
 0x1cc   : > { %v3508_v39 = vadd.f32 %v3476_v56, %v3408_v7  ;;  %v2131_v49 = vadd.f32 %v2099_v47, %v2031_v18  ;;  %v2002_v37 = vmul.f32 %v6317_v60, %v6531_v28  ;;  %v2329_v26 = vadd.f32 %v2297_v9, %v6620_v31  ;;  %v6760_v56 = vpop.f32.mrb[36].mxu1 }
 0x1cd   : > { %v4106_v24 = vadd.f32 %v4074_v54, %v4006_v50  ;;  %v4663_v34 = vpack.c.bf16 %v4105_v46, %v4105_v46  ;;  %v2627_v20 = vadd.f32 %v2595_v63, %v2527_v52  ;;  %v3576_v8 = vmul.f32 %v6378_v10, %v6627_v17 }
 0x1ce   : > { %v2034_v25 = vadd.f32 %v6338_v45, %v2002_v37  ;;  %v2102_v16 = vmul.f32 %v6350_v36, %v6533_v61  ;;  %v2201_v47 = vmul.f32 %v6356_v13, %v6541_v58  ;;  %v3675_v22 = vmul.f32 %v6571_v55, %v6624_v42 }
 0x1cf   : > { %v4664_v50 = vpack.c.bf16 %v4106_v24, %v4106_v24  ;;  %4265 = vst.msk [vmem:[%s6735_s13] sm:$0xf] %vm1704_vm3, %v4663_v34  ;;  %v2397_v52 = vmul.f32 %v6460_v38, %v6529_v1  ;;  %v2695_v31 = vmul.f32 %v6385_v21, %v6529_v1  ;;  %v3607_v17 = vadd.f32 %v3575_v33, %v3507_v12 }
 0x1d0   : > { %v2134_v0 = vadd.f32 %v2102_v16, %v2034_v25  ;;  %v2202_v9 = vmul.f32 %v6356_v13, %v6543_v48  ;;  %v6758_v7 = vadd.f32 %v2201_v47, %v6661_v27  ;;  %v3608_v42 = vadd.f32 %v3576_v8, %v3508_v39  ;;  %v6787_v8 = vpop.f32.mrb[35].mxu0 }
 0x1d1   : > { %4266 = vst.msk [vmem:[%s6735_s13 + $0x4] sm:$0xf] %vm1704_vm3, %v4664_v50  ;;  %v2429_v18 = vadd.f32 %v2397_v52, %v2329_v26  ;;  %v2727_v54 = vadd.f32 %v2695_v31, %v2627_v20  ;;  %v2000_v46 = vmul.f32 %v6317_v60, %v6545_v41  ;;  %v2300_v16 = vmul.f32 %v6421_v11, %v6531_v28  ;;  %v8734_v52 = vld [vmem:[#allocation65_spill] sm:$0xff] }
 0x1d2   : > { %v6766_v63 = vadd.f32 %v2202_v9, %v2134_v0  ;;  %v2400_v1 = vmul.f32 %v6460_v38, %v6533_v61  ;;  %v2199_v27 = vmul.f32 %v6356_v13, %v6559_v43  ;;  %v2100_v26 = vmul.f32 %v6350_v36, %v6557_v4  ;;  %8733 = vst [vmem:[#allocation28_spill] sm:$0xff] %v6787_v8  ;;  %v1969_v8 = vld [vmem:[#allocation2 + $0x90] sm:$0xff] }
 0x1d3   : > { %v2032_v33 = vadd.f32 %v6338_v45, %v2000_v46  ;;  %v2298_v12 = vmul.f32 %v6421_v11, %v6545_v41  ;;  %v2497_v39 = vmul.f32 %v6511_v23, %v6559_v43  ;;  %v2200_v37 = vmul.f32 %v6356_v13, %v6561_v51 }
 0x1d4   : > { %8732 = vst [vmem:[#allocation31_spill] sm:$0xff] %v6766_v63  ;;  %v2231_v24 = vadd.f32 %v2199_v27, %v2131_v49  ;;  %v2398_v34 = vmul.f32 %v6460_v38, %v6557_v4  ;;  %v2596_v20 = vmul.f32 %v6370_v62, %v6545_v41  ;;  %v2795_v31 = vmul.f32 %v8734_v52, %v6559_v43  ;;  %v6904_v63 = vld [vmem:[#allocation2 + $0x78] sm:$0xff] }
 0x1d5   : > { %v2132_v25 = vadd.f32 %v2100_v26, %v2032_v33  ;;  %v2330_v47 = vadd.f32 %v2298_v12, %v6657_v2  ;;  %v2529_v50 = vadd.f32 %v2497_v39, %v2429_v18  ;;  %v2498_v49 = vmul.f32 %v6511_v23, %v6561_v51  ;;  %v6801_v18 = vpop.f32.mrb[37].mxu1  ;;  %v3245_v12 = vld [vmem:[#allocation2 + $0x60] sm:$0xff] }
 0x1d6   : > { %v6793_v0 = vadd.f32 %v6689_v30, %v2231_v24  ;;  %v2628_v9 = vadd.f32 %v2596_v20, %v6664_v19  ;;  %v2696_v41 = vmul.f32 %v6385_v21, %v6557_v4  ;;  %v2827_v2 = vadd.f32 %v2795_v31, %v2727_v54  ;;  %v3243_v20 = vld [vmem:[#allocation2 + $0x48] sm:$0xff] }
 0x1d7   : > { %v2232_v46 = vadd.f32 %v2200_v37, %v2132_v25  ;;  %v2430_v27 = vadd.f32 %v2398_v34, %v2330_v47  ;;  %v2629_v33 = vadd.f32 %v6693_v15, %v2529_v50  ;;  %v2598_v43 = vmul.f32 %v6370_v62, %v6531_v28 }
 0x1d8   : > { %v2797_v30 = vmul.f32 %v8734_v52, %v6541_v58  ;;  %v2728_v26 = vadd.f32 %v2696_v41, %v2628_v9  ;;  %v2796_v19 = vmul.f32 %v8734_v52, %v6561_v51  ;;  %v4633_v15 = vpack.c.bf16 %v2827_v2, %v2827_v2  ;;  %v3246_v9 = vld [vmem:[#allocation2 + $0x68] sm:$0xff]  ;;  %v8736_v41 = vld [vmem:[#allocation41_spill] sm:$0xff] }
 0x1d9   : > { %v2332_v4 = vadd.f32 %v2300_v16, %v2232_v46  ;;  %v2530_v39 = vadd.f32 %v2498_v49, %v2430_v27  ;;  %v2729_v37 = vadd.f32 %v6697_v14, %v2629_v33  ;;  %v3676_v54 = vmul.f32 %v6571_v55, %v6652_v5  ;;  %v8735_v16 = vld [vmem:[#allocation6_spill] sm:$0xff] }
 0x1da   : > { %v3707_v24 = vadd.f32 %v3675_v22, %v3607_v17  ;;  %v2698_v28 = vmul.f32 %v6385_v21, %v6533_v61  ;;  %v2828_v34 = vadd.f32 %v2796_v19, %v2728_v26  ;;  %2987 = vst.msk [vmem:[%s6609_s8 + $0x8] sm:$0xf] %vm1704_vm3, %v4633_v15  ;;  %v3281_v50 = vmul.f32 %v8735_v16, %v3245_v12  ;;  %v8738_v26 = vld [vmem:[#allocation17_spill] sm:$0xff] }
 0x1db   : > { %v6814_v25 = vadd.f32 %v2400_v1, %v2332_v4  ;;  %v2630_v47 = vadd.f32 %v2598_v43, %v2530_v39  ;;  %v2829_v51 = vadd.f32 %v2797_v30, %v2729_v37  ;;  %v3410_v14 = vadd.f32 %v6671_v57, %v6677_v3  ;;  %v3343_v4 = vld [vmem:[#allocation2 + $0x49] sm:$0xff]  ;;  %v8739_v39 = vld [vmem:[#allocation36_spill] sm:$0xff] }
 0x1dc   : > { %v3708_v31 = vadd.f32 %v3676_v54, %v3608_v42  ;;  %v3775_v5 = vmul.f32 %v6382_v29, %v6659_v40  ;;  %v4634_v61 = vpack.c.bf16 %v2828_v34, %v2828_v34  ;;  %v2798_v22 = vmul.f32 %v8734_v52, %v6543_v48  ;;  %v3345_v40 = vld [vmem:[#allocation2 + $0x61] sm:$0xff]  ;;  %v8740_v54 = vld [vmem:[#allocation7_spill] sm:$0xff] }
 0x1dd   : > { %v2730_v17 = vadd.f32 %v2698_v28, %v2630_v47  ;;  %v4635_v1 = vpack.c.bf16 %v2829_v51, %v2829_v51  ;;  %v3577_v49 = vmul.f32 %v6378_v10, %v3243_v20  ;;  %v6828_v46 = vmul.f32 %v6469_v32, %v8736_v41 }
 0x1de   : > { %v3478_v57 = vmul.f32 %v8728_v59, %v6708_v6  ;;  %v3807_v3 = vadd.f32 %v3775_v5, %v3707_v24  ;;  %2988 = vst.msk [vmem:[%s6609_s8 + $0xc] sm:$0xf] %vm1704_vm3, %v4634_v61  ;;  %v3279_v42 = vmul.f32 %v8735_v16, %v3243_v20  ;;  %v3509_v27 = vadd.f32 %v6681_v44, %v6666_v53  ;;  %v6848_v53 = vpop.f32.mrb[38].mxu1 }
 0x1df   : > { %8737 = vst [vmem:[#allocation39_spill] sm:$0xff] %v6828_v46  ;;  %v3776_v33 = vmul.f32 %v6382_v29, %v6708_v6  ;;  %v2830_v2 = vadd.f32 %v2798_v22, %v2730_v17  ;;  %2989 = vst.msk [vmem:[%s6609_s8 + $0x10] sm:$0xf] %vm1704_vm3, %v4635_v1  ;;  %v3313_v43 = vadd.f32 %v6636_v35, %v3281_v50  ;;  %v3346_v50 = vld [vmem:[#allocation2 + $0x69] sm:$0xff] }
 0x1e0   : > { %v3510_v30 = vadd.f32 %v3478_v57, %v3410_v14  ;;  %v6844_v19 = vmul.f32 %v6460_v38, %v8738_v26  ;;  %v3875_v37 = vmul.f32 %v8739_v39, %v3243_v20  ;;  %v3282_v15 = vmul.f32 %v8735_v16, %v3246_v9  ;;  %v3445_v14 = vld [vmem:[#allocation2 + $0x62] sm:$0xff]  ;;  %v6869_v22 = vld [vmem:[#allocation2 + $0x6a] sm:$0xff] }
 0x1e1   : > { %v3808_v44 = vadd.f32 %v3776_v33, %v3708_v31  ;;  %v4636_v6 = vpack.c.bf16 %v2830_v2, %v2830_v2  ;;  %v3381_v24 = vmul.f32 %v8740_v54, %v3345_v40  ;;  %v3609_v28 = vadd.f32 %v3577_v49, %v3509_v27  ;;  %v8742_v49 = vld [vmem:[#allocation62_spill] sm:$0xff] }
 0x1e2   : > { %v6853_v34 = vmul.f32 %v6511_v23, %v6541_v58  ;;  %v6857_v47 = vmul.f32 %v6511_v23, %v6543_v48  ;;  %v3311_v51 = vadd.f32 %v6636_v35, %v3279_v42  ;;  %v3907_v20 = vadd.f32 %v3875_v37, %v3807_v3  ;;  %v3244_v48 = vld [vmem:[#allocation2 + $0x50] sm:$0xff] }
 0x1e3   : > { %2990 = vst.msk [vmem:[%s6609_s8 + $0x14] sm:$0xf] %vm1704_vm3, %v4636_v6  ;;  %v3413_v31 = vadd.f32 %v3381_v24, %v3313_v43  ;;  %v6863_v5 = vmul.f32 %v6378_v10, %v3245_v12  ;;  %v6866_v61 = vmul.f32 %v6571_v55, %v3345_v40  ;;  %v3677_v58 = vmul.f32 %v6571_v55, %v3343_v4  ;;  %v3443_v3 = vld [vmem:[#allocation2 + $0x4a] sm:$0xff]  ;;  %v6881_v24 = vpop.f32.mrb[39].mxu1 }
 0x1e4   : > { %v3877_v17 = vmul.f32 %v8739_v39, %v3245_v12  ;;  %v3379_v1 = vmul.f32 %v8740_v54, %v3343_v4  ;;  %v3975_v41 = vmul.f32 %v8742_v49, %v3343_v4  ;;  %v3314_v57 = vadd.f32 %v6636_v35, %v3282_v15  ;;  %v3344_v6 = vld [vmem:[#allocation2 + $0x51] sm:$0xff] }
 0x1e5   : > { %8741 = vst [vmem:[#allocation26_spill] sm:$0xff] %v6866_v61  ;;  %v3977_v42 = vmul.f32 %v8742_v49, %v3345_v40  ;;  %v3709_v27 = vadd.f32 %v3677_v58, %v3609_v28  ;;  %v3382_v33 = vmul.f32 %v8740_v54, %v3346_v50  ;;  %v3481_v2 = vmul.f32 %v8728_v59, %v3445_v14 }
 0x1e6   : > { %v3411_v43 = vadd.f32 %v3379_v1, %v3311_v51  ;;  %v4007_v26 = vadd.f32 %v3975_v41, %v3907_v20  ;;  %v3482_v37 = vmul.f32 %v8728_v59, %v6869_v22  ;;  %v3280_v12 = vmul.f32 %v8735_v16, %v3244_v48  ;;  %v3444_v1 = vld [vmem:[#allocation2 + $0x52] sm:$0xff] }
 0x1e7   : > { %v6883_v4 = vadd.f32 %v3481_v2, %v3413_v31  ;;  %v6886_v15 = vmul.f32 %v6378_v10, %v3246_v9  ;;  %v3578_v40 = vmul.f32 %v6378_v10, %v3244_v48  ;;  %v3777_v28 = vmul.f32 %v6382_v29, %v3443_v3 }
 0x1e8   : > { %v3414_v58 = vadd.f32 %v3382_v33, %v3314_v57  ;;  %v6891_v51 = vmul.f32 %v6571_v55, %v3346_v50  ;;  %v6894_v20 = vmul.f32 %v6382_v29, %v3445_v14  ;;  %v3876_v41 = vmul.f32 %v8739_v39, %v3244_v48 }
 0x1e9   : > { %8743 = vst [vmem:[#allocation24_spill] sm:$0xff] %v6883_v4  ;;  %v3878_v31 = vmul.f32 %v8739_v39, %v3246_v9  ;;  %v3610_v2 = vadd.f32 %v3578_v40, %v3510_v30  ;;  %v3678_v46 = vmul.f32 %v6571_v55, %v3344_v6  ;;  %v3809_v4 = vadd.f32 %v3777_v28, %v3709_v27 }
 0x1ea   : > { %8744 = vst [vmem:[#allocation66_spill] sm:$0xff] %v6891_v51  ;;  %8745 = vst [vmem:[#allocation32_spill] sm:$0xff] %v6894_v20  ;;  %v3312_v10 = vadd.f32 %v6636_v35, %v3280_v12  ;;  %v3908_v16 = vadd.f32 %v3876_v41, %v3808_v44  ;;  %v3976_v57 = vmul.f32 %v8742_v49, %v3344_v6  ;;  %v6908_v12 = vpop.f32.mrb[36].mxu0 }
 0x1eb   : > { %v4075_v33 = vmul.f32 %v6469_v32, %v3443_v3  ;;  %v3978_v51 = vmul.f32 %v8742_v49, %v3346_v50  ;;  %v3710_v20 = vadd.f32 %v3678_v46, %v3610_v2  ;;  %v3778_v61 = vmul.f32 %v6382_v29, %v3444_v1  ;;  %v6912_v46 = vpop.f32.mrb[37].mxu0 }
 0x1ec   : > { %v3909_v48 = vadd.f32 %v3877_v17, %v3809_v4  ;;  %v3380_v9 = vmul.f32 %v8740_v54, %v3344_v6  ;;  %v4008_v30 = vadd.f32 %v3976_v57, %v3908_v16  ;;  %v4076_v27 = vmul.f32 %v6469_v32, %v3444_v1  ;;  %v6916_v6 = vpop.f32.mrb[38].mxu0 }
 0x1ed   : > { %v4107_v40 = vadd.f32 %v4075_v33, %v4007_v26  ;;  %v4077_v44 = vmul.f32 %v6469_v32, %v3445_v14  ;;  %v2005_v28 = vmul.f32 %v6317_v60, %v1969_v8  ;;  %v3810_v41 = vadd.f32 %v3778_v61, %v3710_v20 }
 0x1ee   : > { %v4009_v50 = vadd.f32 %v3977_v42, %v3909_v48  ;;  %v3412_v17 = vadd.f32 %v3380_v9, %v3312_v10  ;;  %v4108_v4 = vadd.f32 %v4076_v27, %v4008_v30  ;;  %v2003_v16 = vmul.f32 %v6317_v60, %v6904_v63  ;;  %v2069_v10 = vld [vmem:[#allocation2 + $0x91] sm:$0xff] }
 0x1ef   : > { %v4665_v2 = vpack.c.bf16 %v4107_v40, %v4107_v40  ;;  %v3910_v26 = vadd.f32 %v3878_v31, %v3810_v41  ;;  %v2301_v14 = vmul.f32 %v6421_v11, %v6904_v63  ;;  %v2431_v61 = vadd.f32 %v6844_v19, %v6793_v0 }
 0x1f0   : > { %v4109_v57 = vadd.f32 %v4077_v44, %v4009_v50  ;;  %v4078_v42 = vmul.f32 %v6469_v32, %v6869_v22  ;;  %v3479_v20 = vmul.f32 %v8728_v59, %v3443_v3  ;;  %v3480_v33 = vmul.f32 %v8728_v59, %v3444_v1  ;;  %v2067_v1 = vld [vmem:[#allocation2 + $0x79] sm:$0xff] }
 0x1f1   : > { %v4666_v48 = vpack.c.bf16 %v4108_v4, %v4108_v4  ;;  %4267 = vst.msk [vmem:[%s6735_s13 + $0x8] sm:$0xf] %vm1704_vm3, %v4665_v2  ;;  %v2037_v31 = vadd.f32 %v6338_v45, %v2005_v28  ;;  %v4010_v9 = vadd.f32 %v3978_v51, %v3910_v26  ;;  %v2531_v27 = vadd.f32 %v6853_v34, %v2431_v61  ;;  %v1970_v28 = vld [vmem:[#allocation2 + $0x98] sm:$0xff] }
 0x1f2   : > { %v4667_v30 = vpack.c.bf16 %v4109_v57, %v4109_v57  ;;  %v6930_v40 = vadd.f32 %v3482_v37, %v3414_v58  ;;  %v6934_v0 = vmul.f32 %v6382_v29, %v6869_v22  ;;  %v3511_v19 = vadd.f32 %v3479_v20, %v3411_v43  ;;  %v6963_v26 = vld [vmem:[#allocation2 + $0x99] sm:$0xff]  ;;  %v8747_v57 = vld [vmem:[#allocation30_spill] sm:$0xff] }
 0x1f3   : > { %v3512_v3 = vadd.f32 %v3480_v33, %v3412_v17  ;;  %4268 = vst.msk [vmem:[%s6735_s13 + $0xc] sm:$0xf] %vm1704_vm3, %v4666_v48  ;;  %v2105_v44 = vmul.f32 %v6350_v36, %v2069_v10  ;;  %v4110_v41 = vadd.f32 %v4078_v42, %v4010_v9  ;;  %v2035_v51 = vadd.f32 %v6338_v45, %v2003_v16  ;;  %v2170_v33 = vld [vmem:[#allocation2 + $0x9a] sm:$0xff]  ;;  %v8749_v48 = vld [vmem:[#allocation46_spill] sm:$0xff] }
 0x1f4   : > { %4269 = vst.msk [vmem:[%s6735_s13 + $0x10] sm:$0xf] %vm1704_vm3, %v4667_v30  ;;  %v2333_v34 = vadd.f32 %v2301_v14, %v6758_v7  ;;  %v6944_v37 = vmul.f32 %v6421_v11, %v1969_v8  ;;  %v6947_v22 = vmul.f32 %v6460_v38, %v2069_v10  ;;  %v6950_v43 = vmul.f32 %v6370_v62, %v1969_v8  ;;  %v6965_v8 = vld [vmem:[#allocation2 + $0x92] sm:$0xff] }
 0x1f5   : > { %v6953_v58 = vmul.f32 %v6385_v21, %v2069_v10  ;;  %v2137_v50 = vadd.f32 %v2105_v44, %v2037_v31  ;;  %v4668_v17 = vpack.c.bf16 %v4110_v41, %v4110_v41  ;;  %v2103_v4 = vmul.f32 %v6350_v36, %v2067_v1  ;;  %v8748_v14 = vld [vmem:[#allocation44_spill] sm:$0xff]  ;;  %v4808_v10 = vpop.f32.mrb[40].mxu1  ;;  %v8750_v31 = vld [vmem:[#allocation59_spill] sm:$0xff] }
 0x1f6   : > { %8746 = vst [vmem:[#allocation22_spill] sm:$0xff] %v6947_v22  ;;  %v2401_v7 = vmul.f32 %v6460_v38, %v2067_v1  ;;  %v6958_v2 = vadd.f32 %v6863_v5, %v3511_v19  ;;  %v6961_v16 = vadd.f32 %v6886_v15, %v3512_v3  ;;  %v1821_v61 = vadd.f32 %v8748_v14, %v8747_v57  ;;  %v8752_v3 = vld [vmem:[#allocation15_spill] sm:$0xff] }
 0x1f7   : > { %v6971_v42 = vadd.f32 %v6857_v47, %v6814_v25  ;;  %4270 = vst.msk [vmem:[%s6735_s13 + $0x14] sm:$0xf] %vm1704_vm3, %v4668_v17  ;;  %v6975_v20 = vadd.f32 %v2103_v4, %v2035_v51  ;;  %v2006_v15 = vmul.f32 %v6317_v60, %v1970_v28  ;;  %v3106_v9 = vadd.f32 %v8750_v31, %v8749_v48  ;;  %v8751_v25 = vld [vmem:[#allocation58_spill] sm:$0xff]  ;;  %v8753_v51 = vld [vmem:[#allocation40_spill] sm:$0xff] }
 0x1f8   : > { %v6977_v5 = vadd.f32 %v2401_v7, %v2333_v34  ;;  %v2599_v30 = vmul.f32 %v6370_v62, %v6904_v63  ;;  %v2699_v19 = vmul.f32 %v6385_v21, %v2067_v1  ;;  %1921 = vst.msk [vmem:[#allocation2 + $0x81] sm:$0xff] %vm353_vm1, %v1821_v61  ;;  %v3109_v47 = vadd.f32 %v8751_v25, %v8749_v48  ;;  %v8754_v63 = vld [vmem:[#allocation43_spill] sm:$0xff]  ;;  %v8755_v1 = vld [vmem:[#allocation12_spill] sm:$0xff] }
 0x1f9   : > { %v1842_v44 = vadd.f32 %v8752_v3, %v8748_v14  ;;  %v2106_v41 = vmul.f32 %v6350_v36, %v6963_v26  ;;  %3202 = vst.msk [vmem:[#allocation2 + $0x91] sm:$0xff] %vm353_vm1, %v3106_v9  ;;  %v1834_v34 = vadd.f32 %v8748_v14, %v8753_v51  ;;  %v1845_v17 = vadd.f32 %v8754_v63, %v8748_v14  ;;  %v7009_v9 = vpop.f32.mrb[39].mxu0  ;;  %v8757_v3 = vld [vmem:[#allocation21_spill] sm:$0xff] }
 0x1fa   : > { %v1837_v4 = vadd.f32 %v8748_v14, %v8755_v1  ;;  %v2631_v7 = vadd.f32 %v2599_v30, %v2531_v27  ;;  %v2205_v57 = vmul.f32 %v6356_v13, %v6965_v8  ;;  %v7002_v61 = vmul.f32 %v6356_v13, %v2170_v33  ;;  %3203 = vst.msk [vmem:[#allocation2 + $0x99] sm:$0xff] %vm353_vm1, %v3109_v47  ;;  %v8756_v27 = vld [vmem:[#allocation61_spill] sm:$0xff]  ;;  %v8758_v47 = vld [vmem:[#allocation4_spill] sm:$0xff] }
 0x1fb   : > { %v7005_v31 = vmul.f32 %v6421_v11, %v1970_v28  ;;  %1926 = vst.msk [vmem:[#allocation2 + $0xc1] sm:$0xff] %vm353_vm1, %v1842_v44  ;;  %v2038_v25 = vadd.f32 %v6338_v45, %v2006_v15  ;;  %1924 = vst.msk [vmem:[#allocation2 + $0xa9] sm:$0xff] %vm353_vm1, %v1834_v34  ;;  %v1858_v30 = vadd.f32 %v8756_v27, %v8748_v14  ;;  %v8761_v34 = vld [vmem:[#allocation53_spill] sm:$0xff]  ;;  %v1881_v27 = vpop.f32.mrb[41].mxu1 }
 0x1fc   : > { %1927 = vst.msk [vmem:[#allocation2 + $0xc9] sm:$0xff] %vm353_vm1, %v1845_v17  ;;  %1925 = vst.msk [vmem:[#allocation2 + $0xb1] sm:$0xff] %vm353_vm1, %v1837_v4  ;;  %v1850_v51 = vadd.f32 %v8748_v14, %v8757_v3  ;;  %v1861_v63 = vadd.f32 %v8758_v47, %v8748_v14  ;;  %v7021_v44 = vadd.f32 %v2205_v57, %v2137_v50 }
 0x1fd   : > { %v7025_v45 = vmul.f32 %v6460_v38, %v6963_v26  ;;  %v7029_v15 = vmul.f32 %v6511_v23, %v6965_v8  ;;  %v1853_v17 = vadd.f32 %v8748_v14, %v8761_v34  ;;  %v7034_v1 = vmul.f32 %v6511_v23, %v2170_v33  ;;  %1930 = vst.msk [vmem:[#allocation2 + $0xf1] sm:$0xff] %vm353_vm1, %v1858_v30  ;;  %v8763_v34 = vld [vmem:[#allocation56_spill] sm:$0xff] }
 0x1fe   : > { %8759 = vst [vmem:[#allocation25_spill] sm:$0xff] %v7021_v44  ;;  %1928 = vst.msk [vmem:[#allocation2 + $0xd9] sm:$0xff] %vm353_vm1, %v1850_v51  ;;  %v1874_v50 = vadd.f32 %v6760_v56, %v8748_v14  ;;  %v1866_v4 = vadd.f32 %v8748_v14, %v6801_v18  ;;  %v1877_v57 = vadd.f32 %v6848_v53, %v8748_v14  ;;  %v4869_v56 = vld [vmem:[%s8389_s2 + $0x1] ss:$0 sm:$0xff]  ;;  %v8764_v14 = vld [vmem:[#allocation16_spill] sm:$0xff] }
 0x1ff   : > { %8760 = vst [vmem:[#allocation23_spill] sm:$0xff] %v7029_v15  ;;  %8762 = vst [vmem:[#allocation35_spill] sm:$0xff] %v7034_v1  ;;  %v2731_v3 = vadd.f32 %v2699_v19, %v2631_v7  ;;  %v7046_v47 = vmul.f32 %v6370_v62, %v1970_v28  ;;  %v3098_v30 = vadd.f32 %v8749_v48, %v8763_v34  ;;  %v2068_v1 = vld [vmem:[#allocation2 + $0x81] sm:$0xff] }
 0x200   : > { %1931 = vst.msk [vmem:[#allocation2 + $0xf9] sm:$0xff] %vm353_vm1, %v1861_v63  ;;  %1929 = vst.msk [vmem:[#allocation2 + $0xe1] sm:$0xff] %vm353_vm1, %v1853_v17  ;;  %v1869_v51 = vadd.f32 %v4869_v56, %v6881_v24  ;;  %v2138_v18 = vadd.f32 %v2106_v41, %v2038_v25  ;;  %v1968_v63 = vld [vmem:[#allocation2 + $0x80] sm:$0xff]  ;;  %v3101_v28 = vadd.f32 %v8749_v48, %v8764_v14  ;;  %v7103_v44 = vld [vmem:[#allocation2 + $0x90] sm:$0xff] }
 0x201   : > { %v7055_v53 = vld [vmem:[#allocation2 + $0x7a] sm:$0xff]  ;;  %1934 = vst.msk [vmem:[#allocation2 + $0x121] sm:$0xff] %vm353_vm1, %v1874_v50  ;;  %1932 = vst.msk [vmem:[#allocation2 + $0x109] sm:$0xff] %vm353_vm1, %v1866_v4  ;;  %v1890_v19 = vadd.f32 %v4869_v56, %v4808_v10  ;;  %v1882_v7 = vadd.f32 %v4869_v56, %v1881_v27  ;;  %v7064_v17 = vmul.f32 %v6385_v21, %v6963_v26  ;;  %v2168_v25 = vld [vmem:[#allocation2 + $0x82] sm:$0xff] }
 0x202   : > { %1935 = vst.msk [vmem:[#allocation2 + $0x129] sm:$0xff] %vm353_vm1, %v1877_v57  ;;  %v7068_v24 = vmul.f32 %v8734_v52, %v6965_v8  ;;  %v2004_v41 = vmul.f32 %v6317_v60, %v1968_v63  ;;  %v2302_v34 = vmul.f32 %v6421_v11, %v1968_v63  ;;  %3200 = vst.msk [vmem:[#allocation2 + $0x79] sm:$0xff] %vm353_vm1, %v3098_v30  ;;  %v8765_v8 = vld [vmem:[#allocation52_spill] sm:$0xff]  ;;  %v8766_v4 = vld [vmem:[#allocation13_spill] sm:$0xff] }
 0x203   : > { %1933 = vst.msk [vmem:[#allocation2 + $0x111] sm:$0xff] %vm353_vm1, %v1869_v51  ;;  %v7075_v10 = vmul.f32 %v8734_v52, %v2170_v33  ;;  %v2501_v26 = vmul.f32 %v6511_v23, %v7055_v53  ;;  %3201 = vst.msk [vmem:[#allocation2 + $0x81] sm:$0xff] %vm353_vm1, %v3101_v28  ;;  %v3122_v50 = vadd.f32 %v8765_v8, %v8749_v48  ;;  %v7089_v33 = vld [vmem:[%s8391_s4 + $0x1] ss:$0 sm:$0xff]  ;;  %v8768_v30 = vld [vmem:[#allocation31_spill] sm:$0xff] }
 0x204   : > { %v3114_v57 = vadd.f32 %v8749_v48, %v8766_v4  ;;  %1938 = vst.msk [vmem:[#allocation2 + $0x151] sm:$0xff] %vm353_vm1, %v1890_v19  ;;  %1936 = vst.msk [vmem:[#allocation2 + $0x139] sm:$0xff] %vm353_vm1, %v1882_v7  ;;  %v2036_v27 = vadd.f32 %v7089_v33, %v2004_v41  ;;  %v2334_v56 = vadd.f32 %v2302_v34, %v8768_v30  ;;  %v7095_v28 = vld [vmem:[#allocation2 + $0xc0] sm:$0xff]  ;;  %v7105_v41 = vld [vmem:[#allocation2 + $0xa8] sm:$0xff] }
 0x205   : > { %8767 = vst [vmem:[#allocation18_spill] sm:$0xff] %v7089_v33  ;;  %v2402_v51 = vmul.f32 %v6460_v38, %v2068_v1  ;;  %v2600_v14 = vmul.f32 %v6370_v62, %v1968_v63  ;;  %v7097_v8 = vld [vmem:[#allocation2 + $0xc1] sm:$0xff]  ;;  %v2104_v19 = vmul.f32 %v6350_v36, %v2068_v1  ;;  %v2533_v7 = vadd.f32 %v2501_v26, %v6977_v5  ;;  %v7107_v34 = vld [vmem:[#allocation2 + $0xa9] sm:$0xff] }
 0x206   : > { %v2799_v4 = vmul.f32 %v8734_v52, %v7055_v53  ;;  %8769 = vst [vmem:[#allocation49_spill] sm:$0xff] %v7105_v41  ;;  %8770 = vst [vmem:[#allocation50_spill] sm:$0xff] %v7107_v34  ;;  %v7109_v30 = vld [vmem:[#allocation2 + $0xc8] sm:$0xff]  ;;  %v8772_v63 = vld [vmem:[#allocation29_spill] sm:$0xff]  ;;  %v2502_v33 = vmul.f32 %v6511_v23, %v2168_v25  ;;  %v2700_v5 = vmul.f32 %v6385_v21, %v2068_v1 }
 0x207   : > { %8771 = vst [vmem:[#allocation63_spill] sm:$0xff] %v7109_v30  ;;  %v3125_v38 = vadd.f32 %v8772_v63, %v8749_v48  ;;  %v2434_v15 = vadd.f32 %v2402_v51, %v2334_v56  ;;  %v2632_v22 = vadd.f32 %v2600_v14, %v6971_v42  ;;  %v7116_v26 = vld [vmem:[#allocation2 + $0xc9] sm:$0xff]  ;;  %v7123_v34 = vadd.f32 %v7002_v61, %v2138_v18  ;;  %v7128_v56 = vld [vmem:[#allocation2 + $0xb1] sm:$0xff]  ;;  %v7137_v42 = vld [vmem:[%s8389_s2 + $0x2] ss:$0 sm:$0xff] }
 0x208   : > { %v7118_v11 = vld [vmem:[#allocation2 + $0xc2] sm:$0xff]  ;;  %v7120_v62 = vld [vmem:[#allocation2 + $0xca] sm:$0xff]  ;;  %v2633_v30 = vadd.f32 %v6950_v43, %v2533_v7  ;;  %v2831_v41 = vadd.f32 %v2799_v4, %v2731_v3  ;;  %v2136_v43 = vadd.f32 %v2104_v19, %v2036_v27  ;;  %v2800_v14 = vmul.f32 %v8734_v52, %v2168_v25  ;;  %v7142_v7 = vld [vmem:[#allocation2 + $0xb2] sm:$0xff] }
 0x209   : > { %8773 = vst [vmem:[#allocation9_spill] sm:$0xff] %v7118_v11  ;;  %v7126_v48 = vld [vmem:[#allocation2 + $0xb0] sm:$0xff]  ;;  %3206 = vst.msk [vmem:[#allocation2 + $0xc1] sm:$0xff] %vm353_vm1, %v3122_v50  ;;  %v8774_v61 = vld [vmem:[#allocation14_spill] sm:$0xff]  ;;  %v2534_v3 = vadd.f32 %v2502_v33, %v2434_v15  ;;  %v2732_v18 = vadd.f32 %v2700_v5, %v2632_v22  ;;  %v7145_v50 = vpop.f32.mrb[42].mxu1  ;;  %v2204_v22 = vmul.f32 %v6356_v13, %v2168_v25 }
 0x20a   : > { %v7130_v51 = vld [vmem:[#allocation2 + $0xaa] sm:$0xff]  ;;  %3207 = vst.msk [vmem:[#allocation2 + $0xc9] sm:$0xff] %vm353_vm1, %v3125_v38  ;;  %v3117_v1 = vadd.f32 %v7137_v42, %v8774_v61  ;;  %8775 = vst [vmem:[#allocation10_spill] sm:$0xff] %v7142_v7  ;;  %v2733_v38 = vadd.f32 %v6953_v58, %v2633_v30  ;;  %v4637_v4 = vpack.c.bf16 %v2831_v41, %v2831_v41  ;;  %v3247_v5 = vld [vmem:[#allocation2 + $0x78] sm:$0xff] }
 0x20b   : > { %3204 = vst.msk [vmem:[#allocation2 + $0xa9] sm:$0xff] %vm353_vm1, %v3114_v57  ;;  %8776 = vst [vmem:[#allocation8_spill] sm:$0xff] %v7145_v50  ;;  %v8777_v63 = vld [vmem:[#allocation26_spill] sm:$0xff]  ;;  %v2634_v15 = vadd.f32 %v7046_v47, %v2534_v3  ;;  %v2832_v33 = vadd.f32 %v2800_v14, %v2732_v18  ;;  %v7157_v50 = vld [vmem:[#allocation2 + $0x98] sm:$0xff] }
 0x20c   : > { %v3711_v11 = vadd.f32 %v8777_v63, %v6958_v2  ;;  %v8778_v61 = vld [vmem:[#allocation66_spill] sm:$0xff]  ;;  %3205 = vst.msk [vmem:[#allocation2 + $0xb1] sm:$0xff] %vm353_vm1, %v3117_v1  ;;  %v7159_v58 = vld [vmem:[#allocation2 + $0xf0] sm:$0xff]  ;;  %v2833_v2 = vadd.f32 %v7068_v24, %v2733_v38  ;;  %v7166_v30 = vld [vmem:[#allocation2 + $0xd8] sm:$0xff]  ;;  %v2203_v24 = vmul.f32 %v6356_v13, %v7055_v53  ;;  %v2236_v38 = vadd.f32 %v2204_v22, %v2136_v43 }
 0x20d   : > { %v3712_v27 = vadd.f32 %v8778_v61, %v6961_v16  ;;  %v8779_v57 = vld [vmem:[#allocation6_spill] sm:$0xff]  ;;  %8780 = vst [vmem:[#allocation41_spill] sm:$0xff] %v7159_v58  ;;  %2991 = vst.msk [vmem:[%s6609_s8 + $0x18] sm:$0xf] %vm1704_vm3, %v4637_v4  ;;  %v3349_v16 = vld [vmem:[#allocation2 + $0x91] sm:$0xff]  ;;  %v2734_v4 = vadd.f32 %v7064_v17, %v2634_v15  ;;  %v4638_v61 = vpack.c.bf16 %v2832_v33, %v2832_v33 }
 0x20e   : > { %v3285_v19 = vmul.f32 %v8779_v57, %v7103_v44  ;;  %v7164_v41 = vld [vmem:[#allocation2 + $0xf1] sm:$0xff]  ;;  %8782 = vst [vmem:[#allocation30_spill] sm:$0xff] %v7166_v30  ;;  %v8784_v47 = vld [vmem:[#allocation5_spill] sm:$0xff]  ;;  %v8785_v3 = vld [vmem:[#allocation54_spill] sm:$0xff]  ;;  %v2235_v22 = vadd.f32 %v2203_v24, %v6975_v20  ;;  %v3157_v24 = vadd.f32 %v7137_v42, %v6916_v6  ;;  %v7240_v6 = vmul.f32 %v6571_v55, %v3349_v16 }
 0x20f   : > { %8781 = vst [vmem:[#allocation17_spill] sm:$0xff] %v7164_v41  ;;  %v7168_v25 = vld [vmem:[#allocation2 + $0xf8] sm:$0xff]  ;;  %v3138_v1 = vadd.f32 %v7137_v42, %v8784_v47  ;;  %v3130_v18 = vadd.f32 %v7137_v42, %v8785_v3  ;;  %v8786_v14 = vld [vmem:[#allocation55_spill] sm:$0xff]  ;;  %v4639_v47 = vpack.c.bf16 %v2833_v2, %v2833_v2  ;;  %v3283_v3 = vmul.f32 %v8779_v57, %v3247_v5  ;;  %v8790_v58 = vld [vmem:[#allocation34_spill] sm:$0xff] }
 0x210   : > { %8783 = vst [vmem:[#allocation44_spill] sm:$0xff] %v7168_v25  ;;  %v3141_v63 = vadd.f32 %v7137_v42, %v8786_v14  ;;  %v7179_v30 = vld [vmem:[#allocation2 + $0xf9] sm:$0xff]  ;;  %v3581_v14 = vmul.f32 %v8790_v58, %v3247_v5  ;;  %v2834_v15 = vadd.f32 %v7075_v10, %v2734_v4  ;;  %2992 = vst.msk [vmem:[%s6609_s8 + $0x1c] sm:$0xf] %vm1704_vm3, %v4638_v61 }
 0x211   : > { %8787 = vst [vmem:[#allocation46_spill] sm:$0xff] %v7179_v30  ;;  %v7181_v25 = vld [vmem:[#allocation2 + $0xf2] sm:$0xff]  ;;  %v7183_v41 = vld [vmem:[#allocation2 + $0xfa] sm:$0xff]  ;;  %v3317_v33 = vadd.f32 %v6636_v35, %v3285_v19  ;;  %2993 = vst.msk [vmem:[%s6609_s8 + $0x20] sm:$0xf] %vm1704_vm3, %v4639_v47  ;;  %v7213_v10 = vadd.f32 %v7137_v42, %v6908_v12  ;;  %v7217_v19 = vadd.f32 %v7137_v42, %v6912_v46 }
 0x212   : > { %8788 = vst [vmem:[#allocation59_spill] sm:$0xff] %v7181_v25  ;;  %8789 = vst [vmem:[#allocation58_spill] sm:$0xff] %v7183_v41  ;;  %v8791_v52 = vld [vmem:[#allocation32_spill] sm:$0xff]  ;;  %v7190_v43 = vld [vmem:[#allocation2 + $0xe0] sm:$0xff]  ;;  %v3315_v4 = vadd.f32 %v6636_v35, %v3283_v3  ;;  %v3879_v47 = vmul.f32 %v8739_v39, %v3247_v5  ;;  %v3149_v46 = vadd.f32 %v7137_v42, %v7009_v9 }
 0x213   : > { %v3811_v7 = vadd.f32 %v8791_v52, %v3711_v11  ;;  %v7188_v53 = vld [vmem:[#allocation2 + $0xd9] sm:$0xff]  ;;  %8793 = vst [vmem:[#allocation40_spill] sm:$0xff] %v7190_v43  ;;  %3210 = vst.msk [vmem:[#allocation2 + $0xf1] sm:$0xff] %vm353_vm1, %v3138_v1  ;;  %v7202_v11 = vadd.f32 %v6934_v0, %v3712_v27  ;;  %v3286_v52 = vmul.f32 %v8779_v57, %v7157_v50  ;;  %v7296_v41 = vld [vmem:[#allocation2 + $0x122] sm:$0xff] }
 0x214   : > { %8792 = vst [vmem:[#allocation15_spill] sm:$0xff] %v7188_v53  ;;  %v7192_v17 = vld [vmem:[#allocation2 + $0xda] sm:$0xff]  ;;  %3211 = vst.msk [vmem:[#allocation2 + $0xf9] sm:$0xff] %vm353_vm1, %v3141_v63  ;;  %v2336_v0 = vadd.f32 %v7005_v31, %v2236_v38  ;;  %v4640_v27 = vpack.c.bf16 %v2834_v15, %v2834_v15  ;;  %v3385_v1 = vmul.f32 %v8740_v54, %v3349_v16  ;;  %v7298_v30 = vld [vmem:[#allocation2 + $0x12a] sm:$0xff] }
 0x215   : > { %8794 = vst [vmem:[#allocation43_spill] sm:$0xff] %v7192_v17  ;;  %3208 = vst.msk [vmem:[#allocation2 + $0xd9] sm:$0xff] %vm353_vm1, %v3130_v18  ;;  %v8795_v2 = vld [vmem:[#allocation28_spill] sm:$0xff]  ;;  %v7221_v63 = vld [vmem:[#allocation2 + $0xe1] sm:$0xff]  ;;  %v7231_v31 = vadd.f32 %v6944_v37, %v2235_v22  ;;  %v7237_v15 = vmul.f32 %v8790_v58, %v7103_v44  ;;  %v3318_v37 = vadd.f32 %v6636_v35, %v3286_v52 }
 0x216   : > { %v3133_v20 = vadd.f32 %v7137_v42, %v8795_v2  ;;  %v3347_v18 = vld [vmem:[#allocation2 + $0x79] sm:$0xff]  ;;  %8796 = vst [vmem:[#allocation12_spill] sm:$0xff] %v7221_v63  ;;  %2994 = vst.msk [vmem:[%s6609_s8 + $0x24] sm:$0xf] %vm1704_vm3, %v4640_v27  ;;  %v3417_v38 = vadd.f32 %v3385_v1, %v3317_v33  ;;  %v3911_v42 = vadd.f32 %v3879_v47, %v3811_v7  ;;  %v7257_v17 = vld [vmem:[#allocation2 + $0x81] sm:$0xff] }
 0x217   : > { %v8797_v61 = vld [vmem:[#allocation24_spill] sm:$0xff]  ;;  %v3383_v5 = vmul.f32 %v8740_v54, %v3347_v18  ;;  %v3681_v9 = vmul.f32 %v6571_v55, %v3347_v18  ;;  %v7251_v33 = vadd.f32 %v7025_v45, %v2336_v0  ;;  %v3881_v27 = vmul.f32 %v8739_v39, %v7103_v44  ;;  %v7263_v45 = vld [vmem:[#allocation2 + $0x120] sm:$0xff]  ;;  %v7267_v44 = vld [vmem:[#allocation2 + $0x128] sm:$0xff]  ;;  %8807 = vst [vmem:[#allocation29_spill] sm:$0xff] %v7296_v41 }
 0x218   : > { %v3613_v12 = vadd.f32 %v3581_v14, %v8797_v61  ;;  %v3449_v2 = vld [vmem:[#allocation2 + $0x92] sm:$0xff]  ;;  %v7242_v14 = vld [vmem:[#allocation2 + $0xe2] sm:$0xff]  ;;  %v7247_v22 = vld [vmem:[#allocation2 + $0x9a] sm:$0xff]  ;;  %v3981_v1 = vmul.f32 %v8742_v49, %v3349_v16  ;;  %v3979_v52 = vmul.f32 %v8742_v49, %v3347_v18  ;;  %8799 = vst [vmem:[#allocation21_spill] sm:$0xff] %v7263_v45  ;;  %v7355_v53 = vmul.f32 %v6385_v21, %v7097_v8 }
 0x219   : > { %v3350_v3 = vld [vmem:[#allocation2 + $0x99] sm:$0xff]  ;;  %8798 = vst [vmem:[#allocation61_spill] sm:$0xff] %v7242_v14  ;;  %3209 = vst.msk [vmem:[#allocation2 + $0xe1] sm:$0xff] %vm353_vm1, %v3133_v20  ;;  %v3485_v61 = vmul.f32 %v8728_v59, %v3449_v2  ;;  %v7259_v47 = vadd.f32 %v3383_v5, %v3315_v4  ;;  %v7265_v0 = vld [vmem:[#allocation2 + $0x121] sm:$0xff]  ;;  %v7271_v16 = vmul.f32 %v8728_v59, %v7247_v22 }
 0x21a   : > { %v3248_v14 = vld [vmem:[#allocation2 + $0x80] sm:$0xff]  ;;  %v3713_v35 = vadd.f32 %v3681_v9, %v3613_v12  ;;  %v3386_v20 = vmul.f32 %v8740_v54, %v3350_v3  ;;  %8800 = vst [vmem:[#allocation4_spill] sm:$0xff] %v7265_v0  ;;  %8801 = vst [vmem:[#allocation53_spill] sm:$0xff] %v7267_v44  ;;  %v7277_v4 = vmul.f32 %v8790_v58, %v7157_v50  ;;  %v7284_v5 = vld [vmem:[#allocation2 + $0x108] sm:$0xff]  ;;  %v7290_v0 = vpop.f32.mrb[43].mxu1 }
 0x21b   : > { %v3447_v7 = vld [vmem:[#allocation2 + $0x7a] sm:$0xff]  ;;  %v7273_v63 = vadd.f32 %v3485_v61, %v3417_v38  ;;  %v7280_v18 = vmul.f32 %v6571_v55, %v3350_v3  ;;  %v7282_v12 = vld [vmem:[#allocation2 + $0x82] sm:$0xff]  ;;  %8803 = vst [vmem:[#allocation16_spill] sm:$0xff] %v7284_v5  ;;  %8806 = vst [vmem:[#allocation31_spill] sm:$0xff] %v7290_v0  ;;  %v4011_v45 = vadd.f32 %v3979_v52, %v3911_v42 }
 0x21c   : > { %v7286_v9 = vld [vmem:[#allocation2 + $0x109] sm:$0xff]  ;;  %v7292_v38 = vadd.f32 %v3386_v20, %v3318_v37  ;;  %v3582_v61 = vmul.f32 %v8790_v58, %v3248_v14  ;;  %v3781_v43 = vmul.f32 %v6382_v29, %v3447_v7  ;;  %8808 = vst [vmem:[#allocation14_spill] sm:$0xff] %v7298_v30  ;;  %v7303_v5 = vmul.f32 %v6382_v29, %v3449_v2  ;;  %v7309_v52 = vld [vmem:[#allocation2 + $0x111] sm:$0xff] }
 0x21d   : > { %8802 = vst [vmem:[#allocation56_spill] sm:$0xff] %v7280_v18  ;;  %8804 = vst [vmem:[#allocation52_spill] sm:$0xff] %v7286_v9  ;;  %v7288_v44 = vld [vmem:[#allocation2 + $0x129] sm:$0xff]  ;;  %v3982_v42 = vmul.f32 %v8742_v49, %v3350_v3  ;;  %v3880_v37 = vmul.f32 %v8739_v39, %v3248_v14  ;;  %v7313_v0 = vld [vmem:[#allocation2 + $0x112] sm:$0xff]  ;;  %v4081_v30 = vmul.f32 %v6469_v32, %v3449_v2 }
 0x21e   : > { %8805 = vst [vmem:[#allocation13_spill] sm:$0xff] %v7288_v44  ;;  %v7300_v25 = vld [vmem:[#allocation2 + $0x110] sm:$0xff]  ;;  %v3882_v44 = vmul.f32 %v8739_v39, %v7157_v50  ;;  %8810 = vst [vmem:[#allocation66_spill] sm:$0xff] %v7309_v52  ;;  %v3614_v41 = vadd.f32 %v3582_v61, %v6930_v40  ;;  %v3682_v50 = vmul.f32 %v6571_v55, %v7257_v17 }
 0x21f   : > { %8809 = vst [vmem:[#allocation26_spill] sm:$0xff] %v7300_v25  ;;  %v7311_v20 = vld [vmem:[#allocation2 + $0x10a] sm:$0xff]  ;;  %8812 = vst [vmem:[#allocation54_spill] sm:$0xff] %v7313_v0  ;;  %v3813_v3 = vadd.f32 %v3781_v43, %v3713_v35  ;;  %v4082_v0 = vmul.f32 %v6469_v32, %v7247_v22  ;;  %v4079_v2 = vmul.f32 %v6469_v32, %v3447_v7  ;;  %v8814_v25 = vld [vmem:[#allocation37_spill] sm:$0xff] }
 0x220   : > { %8811 = vst [vmem:[#allocation5_spill] sm:$0xff] %v7311_v20  ;;  %3214 = vst.msk [vmem:[#allocation2 + $0x121] sm:$0xff] %vm353_vm1, %v7213_v10  ;;  %v3912_v10 = vadd.f32 %v3880_v37, %v7202_v11  ;;  %v2009_v40 = vmul.f32 %v6317_v60, %v7095_v28  ;;  %v3714_v61 = vadd.f32 %v3682_v50, %v3614_v41  ;;  %v7338_v37 = vpop.f32.mrb[40].mxu0 }
 0x221   : > { %3215 = vst.msk [vmem:[#allocation2 + $0x129] sm:$0xff] %vm353_vm1, %v3157_v24  ;;  %3212 = vst.msk [vmem:[#allocation2 + $0x109] sm:$0xff] %vm353_vm1, %v7217_v19  ;;  %v3980_v24 = vmul.f32 %v8742_v49, %v7257_v17  ;;  %v3782_v43 = vmul.f32 %v6382_v29, %v7282_v12  ;;  %v3913_v19 = vadd.f32 %v3881_v27, %v3813_v3  ;;  %v7346_v27 = vpop.f32.mrb[41].mxu0 }
 0x222   : > { %3213 = vst.msk [vmem:[#allocation2 + $0x111] sm:$0xff] %vm353_vm1, %v3149_v46  ;;  %v3284_v46 = vmul.f32 %v8779_v57, %v3248_v14  ;;  %v4080_v52 = vmul.f32 %v6469_v32, %v7282_v12  ;;  %v4111_v11 = vadd.f32 %v4079_v2, %v4011_v45  ;;  %8813 = vst [vmem:[#allocation55_spill] sm:$0xff] %v7338_v37  ;;  %v8817_v45 = vld [vmem:[#allocation47_spill] sm:$0xff]  ;;  %v7351_v37 = vpop.f32.mrb[42].mxu0 }
 0x223   : > { %v4012_v35 = vadd.f32 %v3980_v24, %v3912_v10  ;;  %v2109_v20 = vmul.f32 %v6350_v36, %v7097_v8  ;;  %v7344_v9 = vmul.f32 %v8814_v25, %v7095_v28  ;;  %v3814_v41 = vadd.f32 %v3782_v43, %v3714_v61  ;;  %8815 = vst [vmem:[#allocation32_spill] sm:$0xff] %v7346_v27  ;;  %v8816_v24 = vld [vmem:[#allocation49_spill] sm:$0xff] }
 0x224   : > { %v4013_v50 = vadd.f32 %v3981_v1, %v3913_v19  ;;  %v3483_v14 = vmul.f32 %v8728_v59, %v3447_v7  ;;  %v4669_v10 = vpack.c.bf16 %v4111_v11, %v4111_v11  ;;  %v2305_v2 = vmul.f32 %v8817_v45, %v8816_v24  ;;  %8818 = vst [vmem:[#allocation28_spill] sm:$0xff] %v7351_v37  ;;  %v8819_v1 = vld [vmem:[#allocation22_spill] sm:$0xff]  ;;  %v7363_v7 = vld [vmem:[%s8391_s4 + $0x2] ss:$0 sm:$0xff] }
 0x225   : > { %v4112_v3 = vadd.f32 %v4080_v52, %v4012_v35  ;;  %v3914_v32 = vadd.f32 %v3882_v44, %v3814_v41  ;;  %v2435_v43 = vadd.f32 %v8819_v1, %v7231_v31  ;;  %v8820_v19 = vld [vmem:[#allocation18_spill] sm:$0xff]  ;;  %v3316_v52 = vadd.f32 %v7363_v7, %v3284_v46  ;;  %v8821_v41 = vld [vmem:[#allocation23_spill] sm:$0xff] }
 0x226   : > { %v4113_v61 = vadd.f32 %v4081_v30, %v4013_v50  ;;  %v2041_v27 = vadd.f32 %v8820_v19, %v2009_v40  ;;  %v3515_v35 = vadd.f32 %v3483_v14, %v7259_v47  ;;  %4271 = vst.msk [vmem:[%s6735_s13 + $0x18] sm:$0xf] %vm1704_vm3, %v4669_v10  ;;  %v8822_v31 = vld [vmem:[#allocation63_spill] sm:$0xff]  ;;  %v3384_v1 = vmul.f32 %v8740_v54, %v7257_v17  ;;  %v8823_v47 = vld [vmem:[#allocation25_spill] sm:$0xff] }
 0x227   : > { %v4670_v11 = vpack.c.bf16 %v4112_v3, %v4112_v3  ;;  %v4014_v44 = vadd.f32 %v3982_v42, %v3914_v32  ;;  %v2535_v50 = vadd.f32 %v8821_v41, %v2435_v43  ;;  %v2010_v40 = vmul.f32 %v6317_v60, %v8822_v31  ;;  %v7397_v41 = vpop.f32.mrb[44].mxu1 }
 0x228   : > { %v4671_v30 = vpack.c.bf16 %v4113_v61, %v4113_v61  ;;  %v7376_v37 = vmul.f32 %v8728_v59, %v7282_v12  ;;  %v2337_v46 = vadd.f32 %v2305_v2, %v8823_v47  ;;  %v2603_v32 = vmul.f32 %v8814_v25, %v8816_v24  ;;  %v8824_v61 = vld [vmem:[#allocation50_spill] sm:$0xff]  ;;  %v8825_v2 = vld [vmem:[#allocation33_spill] sm:$0xff]  ;;  %8826 = vst [vmem:[#allocation24_spill] sm:$0xff] %v7397_v41 }
 0x229   : > { %4272 = vst.msk [vmem:[%s6735_s13 + $0x1c] sm:$0xf] %vm1704_vm3, %v4670_v11  ;;  %v4114_v42 = vadd.f32 %v4082_v0, %v4014_v44  ;;  %v2007_v14 = vmul.f32 %v6317_v60, %v8816_v24  ;;  %v2042_v17 = vadd.f32 %v8820_v19, %v2010_v40  ;;  %v2110_v12 = vmul.f32 %v6350_v36, %v7116_v26 }
 0x22a   : > { %4273 = vst.msk [vmem:[%s6735_s13 + $0x20] sm:$0xf] %vm1704_vm3, %v4671_v30  ;;  %v7390_v3 = vadd.f32 %v2109_v20, %v2041_v27  ;;  %v3416_v10 = vadd.f32 %v3384_v1, %v3316_v52  ;;  %v2405_v43 = vmul.f32 %v8825_v2, %v8824_v61  ;;  %v2635_v11 = vadd.f32 %v2603_v32, %v2535_v50 }
 0x22b   : > { %v3615_v0 = vadd.f32 %v7237_v15, %v3515_v35  ;;  %v4672_v44 = vpack.c.bf16 %v4114_v42, %v4114_v42  ;;  %v2142_v30 = vadd.f32 %v2110_v12, %v2042_v17  ;;  %v2210_v24 = vmul.f32 %v6356_v13, %v7120_v62  ;;  %v8828_v12 = vld [vmem:[#allocation35_spill] sm:$0xff] }
 0x22c   : > { %v2107_v40 = vmul.f32 %v6350_v36, %v8824_v61  ;;  %v2437_v47 = vadd.f32 %v2405_v43, %v2337_v46  ;;  %v2703_v20 = vmul.f32 %v6385_v21, %v8824_v61  ;;  %v2008_v27 = vmul.f32 %v6317_v60, %v7126_v48 }
 0x22d   : > { %4274 = vst.msk [vmem:[%s6735_s13 + $0x24] sm:$0xf] %vm1704_vm3, %v4672_v44  ;;  %v2039_v15 = vadd.f32 %v8820_v19, %v2007_v14  ;;  %v7408_v52 = vadd.f32 %v2210_v24, %v2142_v30  ;;  %v2308_v35 = vmul.f32 %v8817_v45, %v8822_v31  ;;  %v2306_v50 = vmul.f32 %v8817_v45, %v7126_v48  ;;  %v8830_v30 = vld [vmem:[#allocation10_spill] sm:$0xff] }
 0x22e   : > { %v2735_v1 = vadd.f32 %v2703_v20, %v2635_v11  ;;  %v2040_v46 = vadd.f32 %v8820_v19, %v2008_v27  ;;  %v2108_v32 = vmul.f32 %v6350_v36, %v7128_v56  ;;  %v2505_v42 = vmul.f32 %v6511_v23, %v7130_v51  ;;  %v7426_v11 = vpop.f32.mrb[43].mxu0  ;;  %v8831_v27 = vld [vmem:[#allocation65_spill] sm:$0xff] }
 0x22f   : > { %8827 = vst [vmem:[#allocation37_spill] sm:$0xff] %v7408_v52  ;;  %v2338_v17 = vadd.f32 %v2306_v50, %v7123_v34  ;;  %v2406_v14 = vmul.f32 %v8825_v2, %v7128_v56  ;;  %v2536_v61 = vadd.f32 %v8828_v12, %v7251_v33  ;;  %v2604_v43 = vmul.f32 %v8814_v25, %v7126_v48  ;;  %v7436_v12 = vpop.f32.mrb[45].mxu1 }
 0x230   : > { %8829 = vst [vmem:[#allocation49_spill] sm:$0xff] %v7426_v11  ;;  %v2140_v44 = vadd.f32 %v2108_v32, %v2040_v46  ;;  %v2208_v24 = vmul.f32 %v6356_v13, %v8830_v30  ;;  %v2537_v20 = vadd.f32 %v2505_v42, %v2437_v47  ;;  %v2803_v41 = vmul.f32 %v8831_v27, %v7130_v51 }
 0x231   : > { %v2438_v34 = vadd.f32 %v2406_v14, %v2338_v17  ;;  %v2506_v50 = vmul.f32 %v6511_v23, %v8830_v30  ;;  %v2636_v52 = vadd.f32 %v2604_v43, %v2536_v61  ;;  %v2704_v33 = vmul.f32 %v6385_v21, %v7128_v56  ;;  %8832 = vst [vmem:[#allocation47_spill] sm:$0xff] %v7436_v12  ;;  %v8833_v43 = vld [vmem:[#allocation9_spill] sm:$0xff] }
 0x232   : > { %v2408_v48 = vmul.f32 %v8825_v2, %v7116_v26  ;;  %v2240_v46 = vadd.f32 %v2208_v24, %v2140_v44  ;;  %v2637_v32 = vadd.f32 %v7344_v9, %v2537_v20  ;;  %v2835_v47 = vadd.f32 %v2803_v41, %v2735_v1  ;;  %v3253_v44 = vld [vmem:[#allocation2 + $0xc0] sm:$0xff]  ;;  %v3251_v1 = vld [vmem:[#allocation2 + $0xa8] sm:$0xff] }
 0x233   : > { %v2606_v42 = vmul.f32 %v8814_v25, %v8822_v31  ;;  %v2538_v17 = vadd.f32 %v2506_v50, %v2438_v34  ;;  %v2736_v14 = vadd.f32 %v2704_v33, %v2636_v52  ;;  %v2804_v61 = vmul.f32 %v8831_v27, %v8830_v30 }
 0x234   : > { %v2805_v56 = vmul.f32 %v8831_v27, %v8833_v43  ;;  %v2340_v11 = vadd.f32 %v2308_v35, %v2240_v46  ;;  %v2737_v12 = vadd.f32 %v7355_v53, %v2637_v32  ;;  %v4641_v18 = vpack.c.bf16 %v2835_v47, %v2835_v47  ;;  %v7482_v46 = vpop.f32.mrb[46].mxu1 }
 0x235   : > { %v2139_v24 = vadd.f32 %v2107_v40, %v2039_v15  ;;  %v2706_v9 = vmul.f32 %v6385_v21, %v7116_v26  ;;  %v2638_v41 = vadd.f32 %v2606_v42, %v2538_v17  ;;  %v2836_v31 = vadd.f32 %v2804_v61, %v2736_v14  ;;  %8834 = vst [vmem:[#allocation22_spill] sm:$0xff] %v7482_v46  ;;  %v7489_v42 = vld [vmem:[#allocation2 + $0xc8] sm:$0xff]  ;;  %v7562_v46 = vpop.f32.mrb[44].mxu0 }
 0x236   : > { %v3516_v52 = vadd.f32 %v7376_v37, %v3416_v10  ;;  %v2806_v30 = vmul.f32 %v8831_v27, %v7120_v62  ;;  %v7453_v20 = vadd.f32 %v2408_v48, %v2340_v11  ;;  %v2837_v35 = vadd.f32 %v2805_v56, %v2737_v12  ;;  %2995 = vst.msk [vmem:[%s6609_s8 + $0x28] sm:$0xf] %vm1704_vm3, %v4641_v18  ;;  %v7510_v56 = vld [vmem:[#allocation2 + $0xc9] sm:$0xff] }
 0x237   : > { %v2207_v53 = vmul.f32 %v6356_v13, %v7130_v51  ;;  %v2738_v40 = vadd.f32 %v2706_v9, %v2638_v41  ;;  %v4642_v26 = vpack.c.bf16 %v2836_v31, %v2836_v31  ;;  %v3289_v15 = vmul.f32 %v8779_v57, %v3253_v44  ;;  %8835 = vst [vmem:[#allocation18_spill] sm:$0xff] %v7510_v56  ;;  %v7518_v31 = vld [vmem:[#allocation2 + $0xc2] sm:$0xff] }
 0x238   : > { %v7462_v37 = vmul.f32 %v6382_v29, %v7247_v22  ;;  %v4643_v10 = vpack.c.bf16 %v2837_v35, %v2837_v35  ;;  %v3287_v34 = vmul.f32 %v8779_v57, %v3251_v1  ;;  %v3715_v11 = vadd.f32 %v7240_v6, %v3615_v0  ;;  %v3353_v6 = vld [vmem:[#allocation2 + $0xc1] sm:$0xff]  ;;  %8836 = vst [vmem:[#allocation23_spill] sm:$0xff] %v7518_v31 }
 0x239   : > { %v2209_v18 = vmul.f32 %v6356_v13, %v8833_v43  ;;  %v2239_v50 = vadd.f32 %v2207_v53, %v2139_v24  ;;  %v2838_v33 = vadd.f32 %v2806_v30, %v2738_v40  ;;  %2996 = vst.msk [vmem:[%s6609_s8 + $0x2c] sm:$0xf] %vm1704_vm3, %v4642_v26  ;;  %v3585_v51 = vmul.f32 %v8790_v58, %v3251_v1  ;;  %v8839_v35 = vld [vmem:[#allocation41_spill] sm:$0xff]  ;;  %v3252_v40 = vld [vmem:[#allocation2 + $0xb0] sm:$0xff] }
 0x23a   : > { %v3518_v12 = vadd.f32 %v7271_v16, %v7292_v38  ;;  %v2307_v22 = vmul.f32 %v8817_v45, %v7095_v28  ;;  %v7477_v48 = vmul.f32 %v8825_v2, %v7097_v8  ;;  %2997 = vst.msk [vmem:[%s6609_s8 + $0x30] sm:$0xf] %vm1704_vm3, %v4643_v10  ;;  %v3815_v0 = vadd.f32 %v7303_v5, %v3715_v11  ;;  %v3351_v38 = vld [vmem:[#allocation2 + $0xa9] sm:$0xff] }
 0x23b   : > { %v3616_v32 = vadd.f32 %v7277_v4, %v3516_v52  ;;  %v7486_v47 = vadd.f32 %v2209_v18, %v7390_v3  ;;  %v4644_v16 = vpack.c.bf16 %v2838_v33, %v2838_v33  ;;  %v3321_v28 = vadd.f32 %v7363_v7, %v3289_v15  ;;  %v3451_v11 = vld [vmem:[#allocation2 + $0xaa] sm:$0xff]  ;;  %8844 = vst [vmem:[#allocation33_spill] sm:$0xff] %v7562_v46 }
 0x23c   : > { %v7493_v8 = vmul.f32 %v6511_v23, %v8833_v43  ;;  %v7497_v5 = vmul.f32 %v6511_v23, %v7120_v62  ;;  %v3319_v17 = vadd.f32 %v7363_v7, %v3287_v34  ;;  %v3883_v4 = vmul.f32 %v8739_v39, %v3251_v1  ;;  %v7520_v1 = vpop.f32.mrb[47].mxu1 }
 0x23d   : > { %v7501_v3 = vadd.f32 %v2307_v22, %v2239_v50  ;;  %2998 = vst.msk [vmem:[%s6609_s8 + $0x34] sm:$0xf] %vm1704_vm3, %v4644_v16  ;;  %v3389_v14 = vmul.f32 %v8740_v54, %v3353_v6  ;;  %v7507_v61 = vmul.f32 %v8790_v58, %v3253_v44  ;;  %v3617_v43 = vadd.f32 %v3585_v51, %v7273_v63  ;;  %v7536_v50 = vld [vmem:[#allocation2 + $0xca] sm:$0xff]  ;;  %v8841_v51 = vld [vmem:[#allocation17_spill] sm:$0xff] }
 0x23e   : > { %v7513_v62 = vmul.f32 %v6571_v55, %v3353_v6  ;;  %v3387_v24 = vmul.f32 %v8740_v54, %v3351_v38  ;;  %v3915_v9 = vadd.f32 %v3883_v4, %v3815_v0  ;;  %v3290_v41 = vmul.f32 %v8779_v57, %v7489_v42  ;;  %8837 = vst [vmem:[#allocation63_spill] sm:$0xff] %v7520_v1 }
 0x23f   : > { %v7522_v52 = vadd.f32 %v3389_v14, %v3321_v28  ;;  %v3885_v30 = vmul.f32 %v8739_v39, %v3253_v44  ;;  %v3685_v63 = vmul.f32 %v6571_v55, %v3351_v38  ;;  %v2013_v53 = vmul.f32 %v6317_v60, %v8839_v35  ;;  %v7553_v14 = vld [vmem:[#allocation2 + $0xb2] sm:$0xff] }
 0x240   : > { %v3985_v26 = vmul.f32 %v8742_v49, %v3353_v6  ;;  %v7529_v15 = vadd.f32 %v3387_v24, %v3319_v17  ;;  %v3983_v10 = vmul.f32 %v8742_v49, %v3351_v38  ;;  %v7534_v34 = vmul.f32 %v8740_v54, %v7510_v56  ;;  %v3352_v6 = vld [vmem:[#allocation2 + $0xb1] sm:$0xff] }
 0x241   : > { %8838 = vst [vmem:[#allocation25_spill] sm:$0xff] %v7522_v52  ;;  %v3717_v18 = vadd.f32 %v3685_v63, %v3617_v43  ;;  %v7540_v44 = vmul.f32 %v8728_v59, %v7518_v31  ;;  %v2045_v33 = vadd.f32 %v8820_v19, %v2013_v53  ;;  %v2113_v22 = vmul.f32 %v6350_v36, %v8841_v51  ;;  %v8842_v43 = vld [vmem:[#allocation56_spill] sm:$0xff] }
 0x242   : > { %v4015_v0 = vadd.f32 %v3983_v10, %v3915_v9  ;;  %v7546_v16 = vadd.f32 %v7363_v7, %v3290_v41  ;;  %v3886_v28 = vmul.f32 %v8739_v39, %v7489_v42  ;;  %v3586_v38 = vmul.f32 %v8790_v58, %v3252_v40  ;;  %v8843_v9 = vld [vmem:[#allocation27_spill] sm:$0xff] }
 0x243   : > { %8840 = vst [vmem:[#allocation50_spill] sm:$0xff] %v7540_v44  ;;  %v3986_v17 = vmul.f32 %v8742_v49, %v7510_v56  ;;  %v2145_v4 = vadd.f32 %v2113_v22, %v2045_v33  ;;  %v3716_v24 = vadd.f32 %v8842_v43, %v3616_v32  ;;  %v3785_v63 = vmul.f32 %v6382_v29, %v3451_v11  ;;  %v7570_v56 = vpop.f32.mrb[45].mxu0 }
 0x244   : > { %v4085_v53 = vmul.f32 %v8843_v9, %v7518_v31  ;;  %v4086_v41 = vmul.f32 %v8843_v9, %v7536_v50  ;;  %v3618_v10 = vadd.f32 %v3586_v38, %v3518_v12  ;;  %v3686_v1 = vmul.f32 %v6571_v55, %v3352_v6  ;;  %8845 = vst [vmem:[#allocation35_spill] sm:$0xff] %v7570_v56 }
 0x245   : > { %v7566_v33 = vmul.f32 %v8817_v45, %v8839_v35  ;;  %v3816_v22 = vadd.f32 %v7462_v37, %v3716_v24  ;;  %v3817_v32 = vadd.f32 %v3785_v63, %v3717_v18  ;;  %v3884_v43 = vmul.f32 %v8739_v39, %v3252_v40  ;;  %v8846_v37 = vld [vmem:[#allocation30_spill] sm:$0xff] }
 0x246   : > { %v7574_v31 = vmul.f32 %v8814_v25, %v8839_v35  ;;  %v3718_v12 = vadd.f32 %v3686_v1, %v3618_v10  ;;  %v3786_v38 = vmul.f32 %v6382_v29, %v7553_v14  ;;  %v4083_v46 = vmul.f32 %v8843_v9, %v3451_v11  ;;  %v7585_v1 = vpop.f32.mrb[46].mxu0 }
 0x247   : > { %v3916_v55 = vadd.f32 %v3884_v43, %v3816_v22  ;;  %v3917_v44 = vadd.f32 %v3885_v30, %v3817_v32  ;;  %v3984_v52 = vmul.f32 %v8742_v49, %v3352_v6  ;;  %v2011_v18 = vmul.f32 %v6317_v60, %v8846_v37  ;;  %8847 = vst [vmem:[#allocation10_spill] sm:$0xff] %v7585_v1  ;;  %v8848_v30 = vld [vmem:[#allocation15_spill] sm:$0xff] }
 0x248   : > { %v3288_v24 = vmul.f32 %v8779_v57, %v3252_v40  ;;  %v3818_v63 = vadd.f32 %v3786_v38, %v3718_v12  ;;  %v4084_v35 = vmul.f32 %v8843_v9, %v7553_v14  ;;  %v4115_v56 = vadd.f32 %v4083_v46, %v4015_v0 }
 0x249   : > { %v4016_v10 = vadd.f32 %v3984_v52, %v3916_v55  ;;  %v4017_v39 = vadd.f32 %v3985_v26, %v3917_v44  ;;  %v2043_v22 = vadd.f32 %v8820_v19, %v2011_v18  ;;  %v2111_v32 = vmul.f32 %v6350_v36, %v8848_v30  ;;  %v7604_v18 = vpop.f32.mrb[47].mxu0 }
 0x24a   : > { %v3388_v43 = vmul.f32 %v8740_v54, %v3352_v6  ;;  %v3918_v49 = vadd.f32 %v3886_v28, %v3818_v63  ;;  %v4673_v29 = vpack.c.bf16 %v4115_v56, %v4115_v56  ;;  %v2309_v40 = vmul.f32 %v8817_v45, %v8846_v37  ;;  %v8849_v28 = vld [vmem:[#allocation44_spill] sm:$0xff]  ;;  %8850 = vst [vmem:[#allocation65_spill] sm:$0xff] %v7604_v18 }
 0x24b   : > { %v4116_v12 = vadd.f32 %v4084_v35, %v4016_v10  ;;  %v4117_v38 = vadd.f32 %v4085_v53, %v4017_v39  ;;  %v2143_v46 = vadd.f32 %v2111_v32, %v2043_v22  ;;  %v2439_v55 = vadd.f32 %v7477_v48, %v7501_v3 }
 0x24c   : > { %v3320_v52 = vadd.f32 %v7363_v7, %v3288_v24  ;;  %v3487_v26 = vmul.f32 %v8728_v59, %v3451_v11  ;;  %v4018_v44 = vadd.f32 %v3986_v17, %v3918_v49  ;;  %4275 = vst.msk [vmem:[%s6735_s13 + $0x28] sm:$0xf] %vm1704_vm3, %v4673_v29  ;;  %v2607_v56 = vmul.f32 %v8814_v25, %v8846_v37  ;;  %v8851_v49 = vld [vmem:[#allocation59_spill] sm:$0xff]  ;;  %v8852_v24 = vld [vmem:[#allocation46_spill] sm:$0xff] }
 0x24d   : > { %v4674_v6 = vpack.c.bf16 %v4116_v12, %v4116_v12  ;;  %v4675_v0 = vpack.c.bf16 %v4117_v38, %v4117_v38  ;;  %v2539_v39 = vadd.f32 %v7493_v8, %v2439_v55  ;;  %v2014_v53 = vmul.f32 %v6317_v60, %v8849_v28 }
 0x24e   : > { %v3519_v48 = vadd.f32 %v3487_v26, %v7529_v15  ;;  %v4118_v3 = vadd.f32 %v4086_v41, %v4018_v44  ;;  %v2341_v11 = vadd.f32 %v2309_v40, %v7486_v47  ;;  %v2213_v29 = vmul.f32 %v6356_v13, %v8851_v49  ;;  %v8853_v40 = vld [vmem:[#allocation58_spill] sm:$0xff]  ;;  %v8854_v44 = vld [vmem:[#allocation40_spill] sm:$0xff] }
 0x24f   : > { %4276 = vst.msk [vmem:[%s6735_s13 + $0x2c] sm:$0xf] %vm1704_vm3, %v4674_v6  ;;  %4277 = vst.msk [vmem:[%s6735_s13 + $0x30] sm:$0xf] %vm1704_vm3, %v4675_v0  ;;  %v2639_v17 = vadd.f32 %v2607_v56, %v2539_v39  ;;  %v2707_v8 = vmul.f32 %v6385_v21, %v8848_v30  ;;  %v2046_v37 = vadd.f32 %v8820_v19, %v2014_v53  ;;  %v8857_v39 = vld [vmem:[#allocation61_spill] sm:$0xff] }
 0x250   : > { %v2114_v15 = vmul.f32 %v6350_v36, %v8852_v24  ;;  %v2709_v47 = vmul.f32 %v6385_v21, %v8841_v51  ;;  %v4676_v41 = vpack.c.bf16 %v4118_v3, %v4118_v3  ;;  %v2409_v63 = vmul.f32 %v8825_v2, %v8848_v30 }
 0x251   : > { %v7623_v35 = vadd.f32 %v2213_v29, %v2145_v4  ;;  %v3420_v10 = vadd.f32 %v3388_v43, %v3320_v52  ;;  %v2739_v22 = vadd.f32 %v2707_v8, %v2639_v17  ;;  %v2214_v12 = vmul.f32 %v6356_v13, %v8853_v40  ;;  %v8855_v4 = vld [vmem:[#allocation12_spill] sm:$0xff]  ;;  %v8856_v52 = vld [vmem:[#allocation43_spill] sm:$0xff]  ;;  %v8858_v29 = vld [vmem:[#allocation37_spill] sm:$0xff] }
 0x252   : > { %v2146_v32 = vadd.f32 %v2114_v15, %v2046_v37  ;;  %v3619_v38 = vadd.f32 %v7507_v61, %v3519_v48  ;;  %4278 = vst.msk [vmem:[%s6735_s13 + $0x34] sm:$0xf] %vm1704_vm3, %v4676_v41  ;;  %v2441_v55 = vadd.f32 %v2409_v63, %v2341_v11  ;;  %v2312_v26 = vmul.f32 %v8817_v45, %v8849_v28 }
 0x253   : > { %v2012_v56 = vmul.f32 %v6317_v60, %v8854_v44  ;;  %v2112_v43 = vmul.f32 %v6350_v36, %v8855_v4  ;;  %v2211_v6 = vmul.f32 %v6356_v13, %v8856_v52  ;;  %v2310_v61 = vmul.f32 %v8817_v45, %v8854_v44 }
 0x254   : > { %v7634_v30 = vadd.f32 %v2214_v12, %v2146_v32  ;;  %v2212_v53 = vmul.f32 %v6356_v13, %v8857_v39  ;;  %v2410_v48 = vmul.f32 %v8825_v2, %v8855_v4  ;;  %v2509_v3 = vmul.f32 %v6511_v23, %v8856_v52 }
 0x255   : > { %v2044_v0 = vadd.f32 %v8820_v19, %v2012_v56  ;;  %v2243_v11 = vadd.f32 %v2211_v6, %v2143_v46  ;;  %v2342_v17 = vadd.f32 %v2310_v61, %v8858_v29  ;;  %v2540_v8 = vadd.f32 %v7497_v5, %v7453_v20  ;;  %v3257_v61 = vld [vmem:[#allocation2 + $0xf0] sm:$0xff] }
 0x256   : > { %v2608_v37 = vmul.f32 %v8814_v25, %v8854_v44  ;;  %v2510_v19 = vmul.f32 %v6511_v23, %v8857_v39  ;;  %v2541_v41 = vadd.f32 %v2509_v3, %v2441_v55  ;;  %v2807_v63 = vmul.f32 %v8831_v27, %v8856_v52 }
 0x257   : > { %v2144_v15 = vadd.f32 %v2112_v43, %v2044_v0  ;;  %v7659_v32 = vadd.f32 %v7566_v33, %v2243_v11  ;;  %v2442_v46 = vadd.f32 %v2410_v48, %v2342_v17  ;;  %v2708_v56 = vmul.f32 %v6385_v21, %v8855_v4 }
 0x258   : > { %v2640_v12 = vadd.f32 %v2608_v37, %v2540_v8  ;;  %v2412_v20 = vmul.f32 %v8825_v2, %v8852_v24  ;;  %v2641_v44 = vadd.f32 %v7574_v31, %v2541_v41  ;;  %v2839_v43 = vadd.f32 %v2807_v63, %v2739_v22  ;;  %v8860_v41 = vld [vmem:[#allocation50_spill] sm:$0xff] }
 0x259   : > { %v2244_v5 = vadd.f32 %v2212_v53, %v2144_v15  ;;  %v2610_v55 = vmul.f32 %v8814_v25, %v8849_v28  ;;  %v2542_v52 = vadd.f32 %v2510_v19, %v2442_v46  ;;  %v2808_v33 = vmul.f32 %v8831_v27, %v8857_v39  ;;  %v8859_v19 = vld [vmem:[#allocation25_spill] sm:$0xff] }
 0x25a   : > { %v2740_v6 = vadd.f32 %v2708_v56, %v2640_v12  ;;  %v2809_v4 = vmul.f32 %v8831_v27, %v8851_v49  ;;  %v2741_v48 = vadd.f32 %v2709_v47, %v2641_v44  ;;  %v4645_v3 = vpack.c.bf16 %v2839_v43, %v2839_v43  ;;  %v8862_v44 = vld [vmem:[#allocation42_spill] sm:$0xff] }
 0x25b   : > { %v2344_v0 = vadd.f32 %v2312_v26, %v2244_v5  ;;  %v3488_v31 = vmul.f32 %v8728_v59, %v7553_v14  ;;  %v2710_v22 = vmul.f32 %v6385_v21, %v8852_v24  ;;  %v2642_v28 = vadd.f32 %v2610_v55, %v2542_v52  ;;  %v3255_v26 = vld [vmem:[#allocation2 + $0xd8] sm:$0xff]  ;;  %v8861_v5 = vld [vmem:[#allocation18_spill] sm:$0xff] }
 0x25c   : > { %v2840_v53 = vadd.f32 %v2808_v33, %v2740_v6  ;;  %v3422_v11 = vadd.f32 %v7534_v34, %v7546_v16  ;;  %v2841_v29 = vadd.f32 %v2809_v4, %v2741_v48  ;;  %2999 = vst.msk [vmem:[%s6609_s8 + $0x38] sm:$0xf] %vm1704_vm3, %v4645_v3  ;;  %v3293_v47 = vmul.f32 %v8779_v57, %v3257_v61  ;;  %v8864_v55 = vld [vmem:[#allocation38_spill] sm:$0xff] }
 0x25d   : > { %v7678_v39 = vadd.f32 %v2412_v20, %v2344_v0  ;;  %v3520_v17 = vadd.f32 %v3488_v31, %v3420_v10  ;;  %v2810_v14 = vmul.f32 %v8831_v27, %v8853_v40  ;;  %v2742_v8 = vadd.f32 %v2710_v22, %v2642_v28  ;;  %v3357_v10 = vld [vmem:[#allocation2 + $0xf1] sm:$0xff]  ;;  %v3355_v31 = vld [vmem:[#allocation2 + $0xd9] sm:$0xff] }
 0x25e   : > { %v4646_v24 = vpack.c.bf16 %v2840_v53, %v2840_v53  ;;  %v3490_v37 = vmul.f32 %v8728_v59, %v7536_v50  ;;  %v3588_v34 = vmul.f32 %v8790_v58, %v7489_v42  ;;  %v4647_v16 = vpack.c.bf16 %v2841_v29, %v2841_v29  ;;  %v3258_v20 = vld [vmem:[#allocation2 + $0xf8] sm:$0xff]  ;;  %v8863_v42 = vld [vmem:[#allocation23_spill] sm:$0xff] }
 0x25f   : > { %v3719_v15 = vadd.f32 %v7513_v62, %v3619_v38  ;;  %v3521_v63 = vadd.f32 %v8860_v41, %v8859_v19  ;;  %v2842_v46 = vadd.f32 %v2810_v14, %v2742_v8  ;;  %v3291_v12 = vmul.f32 %v8779_v57, %v3255_v26  ;;  %v3457_v29 = vld [vmem:[#allocation2 + $0xf2] sm:$0xff]  ;;  %v3256_v41 = vld [vmem:[#allocation2 + $0xe0] sm:$0xff] }
 0x260   : > { %3000 = vst.msk [vmem:[%s6609_s8 + $0x3c] sm:$0xf] %vm1704_vm3, %v4646_v24  ;;  %v3589_v56 = vmul.f32 %v8790_v58, %v3255_v26  ;;  %v3688_v43 = vmul.f32 %v8862_v44, %v8861_v5  ;;  %v3787_v52 = vmul.f32 %v8864_v55, %v8863_v42  ;;  %v3788_v62 = vmul.f32 %v8864_v55, %v7536_v50  ;;  %v8865_v14 = vld [vmem:[#allocation36_spill] sm:$0xff] }
 0x261   : > { %3001 = vst.msk [vmem:[%s6609_s8 + $0x40] sm:$0xf] %vm1704_vm3, %v4647_v16  ;;  %v3325_v38 = vadd.f32 %v7363_v7, %v3293_v47  ;;  %v3522_v6 = vadd.f32 %v3490_v37, %v3422_v11  ;;  %v7707_v33 = vmul.f32 %v8825_v2, %v8841_v51  ;;  %v3620_v4 = vadd.f32 %v3588_v34, %v3520_v17  ;;  %v8866_v37 = vld [vmem:[#allocation62_spill] sm:$0xff] }
 0x262   : > { %v4648_v0 = vpack.c.bf16 %v2842_v46, %v2842_v46  ;;  %v7711_v48 = vmul.f32 %v6511_v23, %v8851_v49  ;;  %v3393_v3 = vmul.f32 %v8740_v54, %v3357_v10  ;;  %v3819_v22 = vadd.f32 %v3787_v52, %v3719_v15  ;;  %v3358_v49 = vld [vmem:[#allocation2 + $0xf9] sm:$0xff]  ;;  %v3356_v52 = vld [vmem:[#allocation2 + $0xe1] sm:$0xff] }
 0x263   : > { %v3294_v50 = vmul.f32 %v8779_v57, %v3258_v20  ;;  %v7717_v28 = vmul.f32 %v6511_v23, %v8853_v40  ;;  %v7722_v51 = vmul.f32 %v8790_v58, %v3257_v61  ;;  %v3323_v53 = vadd.f32 %v7363_v7, %v3291_v12  ;;  %v3458_v40 = vld [vmem:[#allocation2 + $0xfa] sm:$0xff] }
 0x264   : > { %3002 = vst.msk [vmem:[%s6609_s8 + $0x44] sm:$0xf] %vm1704_vm3, %v4648_v0  ;;  %v3621_v11 = vadd.f32 %v3589_v56, %v3521_v63  ;;  %v3425_v47 = vadd.f32 %v3393_v3, %v3325_v38  ;;  %v7726_v17 = vmul.f32 %v8862_v44, %v3357_v10  ;;  %v3889_v8 = vmul.f32 %v8865_v14, %v3257_v61  ;;  %v3455_v61 = vld [vmem:[#allocation2 + $0xda] sm:$0xff] }
 0x265   : > { %v3887_v24 = vmul.f32 %v8865_v14, %v3255_v26  ;;  %v3989_v34 = vmul.f32 %v8866_v37, %v3357_v10  ;;  %v3391_v16 = vmul.f32 %v8740_v54, %v3355_v31  ;;  %v3689_v15 = vmul.f32 %v8862_v44, %v3355_v31 }
 0x266   : > { %v3987_v19 = vmul.f32 %v8866_v37, %v3355_v31  ;;  %v3326_v46 = vadd.f32 %v7363_v7, %v3294_v50  ;;  %v3394_v12 = vmul.f32 %v8740_v54, %v3358_v49  ;;  %v3493_v56 = vmul.f32 %v8728_v59, %v3457_v29 }
 0x267   : > { %v3919_v63 = vadd.f32 %v3887_v24, %v3819_v22  ;;  %v3423_v5 = vadd.f32 %v3391_v16, %v3323_v53  ;;  %v3721_v26 = vadd.f32 %v3689_v15, %v3621_v11  ;;  %v3494_v42 = vmul.f32 %v8728_v59, %v3458_v40  ;;  %v3456_v53 = vld [vmem:[#allocation2 + $0xe2] sm:$0xff] }
 0x268   : > { %v7739_v10 = vmul.f32 %v8790_v58, %v3258_v20  ;;  %v7741_v38 = vadd.f32 %v3493_v56, %v3425_v47  ;;  %v7744_v0 = vmul.f32 %v8862_v44, %v3358_v49  ;;  %v3292_v3 = vmul.f32 %v8779_v57, %v3256_v41 }
 0x269   : > { %v3590_v31 = vmul.f32 %v8790_v58, %v3256_v41  ;;  %v7749_v22 = vmul.f32 %v8864_v55, %v3457_v29  ;;  %v7752_v50 = vmul.f32 %v8864_v55, %v3458_v40  ;;  %v3720_v11 = vadd.f32 %v3688_v43, %v3620_v4 }
 0x26a   : > { %8867 = vst [vmem:[#allocation9_spill] sm:$0xff] %v7741_v38  ;;  %8868 = vst [vmem:[#allocation41_spill] sm:$0xff] %v7744_v0  ;;  %v3789_v24 = vmul.f32 %v8864_v55, %v3455_v61  ;;  %v4019_v16 = vadd.f32 %v3987_v19, %v3919_v63  ;;  %v3426_v47 = vadd.f32 %v3394_v12, %v3326_v46 }
 0x26b   : > { %8869 = vst [vmem:[#allocation17_spill] sm:$0xff] %v7749_v22  ;;  %8870 = vst [vmem:[#allocation56_spill] sm:$0xff] %v7752_v50  ;;  %v3622_v15 = vadd.f32 %v3590_v31, %v3522_v6  ;;  %v3690_v56 = vmul.f32 %v8862_v44, %v3356_v52  ;;  %v3890_v18 = vmul.f32 %v8865_v14, %v3258_v20 }
 0x26c   : > { %v3820_v1 = vadd.f32 %v3788_v62, %v3720_v11  ;;  %v3821_v0 = vadd.f32 %v3789_v24, %v3721_v26  ;;  %v3888_v38 = vmul.f32 %v8865_v14, %v3256_v41  ;;  %v3324_v22 = vadd.f32 %v7363_v7, %v3292_v3  ;;  %v8871_v41 = vld [vmem:[#allocation21_spill] sm:$0xff] }
 0x26d   : > { %v3722_v58 = vadd.f32 %v3690_v56, %v3622_v15  ;;  %v3790_v50 = vmul.f32 %v8864_v55, %v3456_v53  ;;  %v4087_v43 = vmul.f32 %v8843_v9, %v3455_v61  ;;  %v3990_v4 = vmul.f32 %v8866_v37, %v3358_v49 }
 0x26e   : > { %v3920_v19 = vadd.f32 %v3888_v38, %v3820_v1  ;;  %v3921_v63 = vadd.f32 %v3889_v8, %v3821_v0  ;;  %v3988_v6 = vmul.f32 %v8866_v37, %v3356_v52  ;;  %v4089_v46 = vmul.f32 %v8843_v9, %v3457_v29  ;;  %v8872_v8 = vld [vmem:[#allocation16_spill] sm:$0xff] }
 0x26f   : > { %v3392_v20 = vmul.f32 %v8740_v54, %v3356_v52  ;;  %v3822_v62 = vadd.f32 %v3790_v50, %v3722_v58  ;;  %v4119_v12 = vadd.f32 %v4087_v43, %v4019_v16  ;;  %v2017_v26 = vmul.f32 %v6317_v60, %v8871_v41  ;;  %v8873_v16 = vld [vmem:[#allocation4_spill] sm:$0xff] }
 0x270   : > { %v4020_v3 = vadd.f32 %v3988_v6, %v3920_v19  ;;  %v4021_v31 = vadd.f32 %v3989_v34, %v3921_v63  ;;  %v4088_v11 = vmul.f32 %v8843_v9, %v3456_v53  ;;  %v2313_v38 = vmul.f32 %v8817_v45, %v8872_v8 }
 0x271   : > { %v3424_v24 = vadd.f32 %v3392_v20, %v3324_v22  ;;  %v3922_v49 = vadd.f32 %v3890_v18, %v3822_v62  ;;  %v4677_v1 = vpack.c.bf16 %v4119_v12, %v4119_v12  ;;  %v2015_v58 = vmul.f32 %v6317_v60, %v8872_v8 }
 0x272   : > { %v4120_v0 = vadd.f32 %v4088_v11, %v4020_v3  ;;  %v4121_v29 = vadd.f32 %v4089_v46, %v4021_v31  ;;  %v2443_v52 = vadd.f32 %v7707_v33, %v7659_v32  ;;  %v4090_v50 = vmul.f32 %v8843_v9, %v3458_v40  ;;  %v7785_v32 = vld [vmem:[%s8391_s4 + $0x1] ss:$0 sm:$0xff] }
 0x273   : > { %v2117_v34 = vmul.f32 %v6350_v36, %v8873_v16  ;;  %v3491_v18 = vmul.f32 %v8728_v59, %v3455_v61  ;;  %v4022_v22 = vadd.f32 %v3990_v4, %v3922_v49  ;;  %4279 = vst.msk [vmem:[%s6735_s13 + $0x38] sm:$0xf] %vm1704_vm3, %v4677_v1  ;;  %v3492_v15 = vmul.f32 %v8728_v59, %v3456_v53 }
 0x274   : > { %v4678_v56 = vpack.c.bf16 %v4120_v0, %v4120_v0  ;;  %v4679_v43 = vpack.c.bf16 %v4121_v29, %v4121_v29  ;;  %v2543_v19 = vadd.f32 %v7711_v48, %v2443_v52  ;;  %v2049_v33 = vadd.f32 %v7785_v32, %v2017_v26  ;;  %v8876_v29 = vld [vmem:[#allocation53_spill] sm:$0xff] }
 0x275   : > { %v4122_v40 = vadd.f32 %v4090_v50, %v4022_v22  ;;  %v2345_v61 = vadd.f32 %v2313_v38, %v7623_v35  ;;  %v2611_v4 = vmul.f32 %v8814_v25, %v8872_v8  ;;  %v7791_v63 = vadd.f32 %v3494_v42, %v3426_v47  ;;  %v8874_v35 = vld [vmem:[#allocation52_spill] sm:$0xff]  ;;  %v8877_v50 = vld [vmem:[#allocation5_spill] sm:$0xff] }
 0x276   : > { %v3523_v53 = vadd.f32 %v3491_v18, %v3423_v5  ;;  %v3524_v6 = vadd.f32 %v3492_v15, %v3424_v24  ;;  %4280 = vst.msk [vmem:[%s6735_s13 + $0x3c] sm:$0xf] %vm1704_vm3, %v4678_v56  ;;  %4281 = vst.msk [vmem:[%s6735_s13 + $0x40] sm:$0xf] %vm1704_vm3, %v4679_v43  ;;  %v2047_v48 = vadd.f32 %v7785_v32, %v2015_v58  ;;  %v8875_v24 = vld [vmem:[#allocation26_spill] sm:$0xff]  ;;  %v8879_v15 = vld [vmem:[#allocation13_spill] sm:$0xff] }
 0x277   : > { %v7800_v46 = vmul.f32 %v8817_v45, %v8871_v41  ;;  %v4680_v20 = vpack.c.bf16 %v4122_v40, %v4122_v40  ;;  %v2413_v62 = vmul.f32 %v8825_v2, %v8874_v35  ;;  %v2643_v12 = vadd.f32 %v2611_v4, %v2543_v19  ;;  %v8878_v18 = vld [vmem:[#allocation66_spill] sm:$0xff] }
 0x278   : > { %v7806_v42 = vmul.f32 %v8825_v2, %v8873_v16  ;;  %v2613_v5 = vmul.f32 %v8814_v25, %v8871_v41  ;;  %v2713_v47 = vmul.f32 %v6385_v21, %v8873_v16  ;;  %v2115_v26 = vmul.f32 %v6350_v36, %v8874_v35  ;;  %v8880_v40 = vld [vmem:[#allocation54_spill] sm:$0xff] }
 0x279   : > { %v7814_v3 = vadd.f32 %v2117_v34, %v2049_v33  ;;  %4282 = vst.msk [vmem:[%s6735_s13 + $0x44] sm:$0xf] %vm1704_vm3, %v4680_v20  ;;  %v2445_v31 = vadd.f32 %v2413_v62, %v2345_v61  ;;  %v2711_v11 = vmul.f32 %v6385_v21, %v8874_v35  ;;  %v2016_v49 = vmul.f32 %v6317_v60, %v8875_v24 }
 0x27a   : > { %v3623_v1 = vadd.f32 %v7722_v51, %v3523_v53  ;;  %v7824_v41 = vadd.f32 %v7739_v10, %v3524_v6  ;;  %v2147_v8 = vadd.f32 %v2115_v26, %v2047_v48  ;;  %v2314_v38 = vmul.f32 %v8817_v45, %v8875_v24  ;;  %v3261_v26 = vld [vmem:[#allocation2 + $0x120] sm:$0xff] }
 0x27b   : > { %v2743_v0 = vadd.f32 %v2711_v11, %v2643_v12  ;;  %v2018_v58 = vmul.f32 %v6317_v60, %v8876_v29  ;;  %v2048_v52 = vadd.f32 %v7785_v32, %v2016_v49  ;;  %v2513_v16 = vmul.f32 %v6511_v23, %v8877_v50 }
 0x27c   : > { %v2346_v34 = vadd.f32 %v2314_v38, %v7634_v30  ;;  %v2414_v51 = vmul.f32 %v8825_v2, %v8878_v18  ;;  %v2544_v10 = vadd.f32 %v7717_v28, %v7678_v39  ;;  %v2612_v22 = vmul.f32 %v8814_v25, %v8875_v24 }
 0x27d   : > { %v2118_v56 = vmul.f32 %v6350_v36, %v8879_v15  ;;  %v2116_v43 = vmul.f32 %v6350_v36, %v8878_v18  ;;  %v2545_v19 = vadd.f32 %v2513_v16, %v2445_v31  ;;  %v2811_v33 = vmul.f32 %v8831_v27, %v8877_v50  ;;  %v8881_v31 = vld [vmem:[#allocation29_spill] sm:$0xff] }
 0x27e   : > { %v2446_v30 = vadd.f32 %v2414_v51, %v2346_v34  ;;  %v2514_v61 = vmul.f32 %v6511_v23, %v8880_v40  ;;  %v2644_v4 = vadd.f32 %v2612_v22, %v2544_v10  ;;  %v2712_v39 = vmul.f32 %v6385_v21, %v8878_v18  ;;  %v8882_v22 = vld [vmem:[#allocation14_spill] sm:$0xff] }
 0x27f   : > { %v2050_v28 = vadd.f32 %v7785_v32, %v2018_v58  ;;  %v2148_v53 = vadd.f32 %v2116_v43, %v2048_v52  ;;  %v2645_v6 = vadd.f32 %v2613_v5, %v2545_v19  ;;  %v2843_v48 = vadd.f32 %v2811_v33, %v2743_v0 }
 0x280   : > { %v2614_v20 = vmul.f32 %v8814_v25, %v8876_v29  ;;  %v2546_v35 = vadd.f32 %v2514_v61, %v2446_v30  ;;  %v2744_v62 = vadd.f32 %v2712_v39, %v2644_v4  ;;  %v2812_v12 = vmul.f32 %v8831_v27, %v8880_v40 }
 0x281   : > { %v2813_v11 = vmul.f32 %v8831_v27, %v8881_v31  ;;  %v2216_v24 = vmul.f32 %v6356_v13, %v8880_v40  ;;  %v2745_v49 = vadd.f32 %v2713_v47, %v2645_v6  ;;  %v4649_v38 = vpack.c.bf16 %v2843_v48, %v2843_v48  ;;  %v3259_v47 = vld [vmem:[#allocation2 + $0x108] sm:$0xff] }
 0x282   : > { %v2217_v5 = vmul.f32 %v6356_v13, %v8881_v31  ;;  %v2714_v0 = vmul.f32 %v6385_v21, %v8879_v15  ;;  %v2646_v58 = vadd.f32 %v2614_v20, %v2546_v35  ;;  %v2844_v52 = vadd.f32 %v2812_v12, %v2744_v62  ;;  %v3262_v48 = vld [vmem:[#allocation2 + $0x128] sm:$0xff] }
 0x283   : > { %v2215_v16 = vmul.f32 %v6356_v13, %v8877_v50  ;;  %v2248_v34 = vadd.f32 %v2216_v24, %v2148_v53  ;;  %v2845_v18 = vadd.f32 %v2813_v11, %v2745_v49  ;;  %3003 = vst.msk [vmem:[%s6609_s8 + $0x48] sm:$0xf] %vm1704_vm3, %v4649_v38  ;;  %v3297_v51 = vmul.f32 %v8779_v57, %v3261_v26  ;;  %v8883_v53 = vld [vmem:[#allocation34_spill] sm:$0xff]  ;;  %v8884_v24 = vld [vmem:[#allocation17_spill] sm:$0xff] }
 0x284   : > { %v2150_v10 = vadd.f32 %v2118_v56, %v2050_v28  ;;  %v2814_v43 = vmul.f32 %v8831_v27, %v8882_v22  ;;  %v2746_v19 = vadd.f32 %v2714_v0, %v2646_v58  ;;  %v4650_v33 = vpack.c.bf16 %v2844_v52, %v2844_v52  ;;  %v3361_v56 = vld [vmem:[#allocation2 + $0x121] sm:$0xff]  ;;  %v3359_v11 = vld [vmem:[#allocation2 + $0x109] sm:$0xff] }
 0x285   : > { %v2316_v30 = vmul.f32 %v8817_v45, %v8876_v29  ;;  %v2247_v40 = vadd.f32 %v2215_v16, %v2147_v8  ;;  %v4651_v50 = vpack.c.bf16 %v2845_v18, %v2845_v18  ;;  %v3723_v61 = vadd.f32 %v7726_v17, %v3623_v1  ;;  %v8885_v58 = vld [vmem:[#allocation9_spill] sm:$0xff]  ;;  %v3362_v52 = vld [vmem:[#allocation2 + $0x129] sm:$0xff] }
 0x286   : > { %v2218_v4 = vmul.f32 %v6356_v13, %v8882_v22  ;;  %v2846_v39 = vadd.f32 %v2814_v43, %v2746_v19  ;;  %3004 = vst.msk [vmem:[%s6609_s8 + $0x4c] sm:$0xf] %vm1704_vm3, %v4650_v33  ;;  %v3295_v28 = vmul.f32 %v8779_v57, %v3259_v47  ;;  %v3593_v6 = vmul.f32 %v8883_v53, %v3259_v47  ;;  %v3461_v16 = vld [vmem:[#allocation2 + $0x122] sm:$0xff]  ;;  %v3260_v43 = vld [vmem:[#allocation2 + $0x110] sm:$0xff] }
 0x287   : > { %v7880_v20 = vadd.f32 %v2217_v5, %v7814_v3  ;;  %v2416_v8 = vmul.f32 %v8825_v2, %v8879_v15  ;;  %v2348_v17 = vadd.f32 %v2316_v30, %v2248_v34  ;;  %3005 = vst.msk [vmem:[%s6609_s8 + $0x50] sm:$0xf] %vm1704_vm3, %v4651_v50  ;;  %v3329_v1 = vadd.f32 %v7363_v7, %v3297_v51 }
 0x288   : > { %v7887_v29 = vadd.f32 %v2218_v4, %v2150_v10  ;;  %v7891_v35 = vmul.f32 %v6511_v23, %v8881_v31  ;;  %v7895_v62 = vmul.f32 %v6511_v23, %v8882_v22  ;;  %v4652_v3 = vpack.c.bf16 %v2846_v39, %v2846_v39  ;;  %v7917_v22 = vld [vmem:[#allocation2 + $0x12a] sm:$0xff] }
 0x289   : > { %v7898_v12 = vadd.f32 %v7800_v46, %v2247_v40  ;;  %v3397_v15 = vmul.f32 %v8740_v54, %v3361_v56  ;;  %v3823_v49 = vadd.f32 %v8884_v24, %v3723_v61  ;;  %v3298_v38 = vmul.f32 %v8779_v57, %v3262_v48  ;;  %v3459_v39 = vld [vmem:[#allocation2 + $0x10a] sm:$0xff] }
 0x28a   : > { %3006 = vst.msk [vmem:[%s6609_s8 + $0x54] sm:$0xf] %vm1704_vm3, %v4652_v3  ;;  %v7906_v31 = vmul.f32 %v8883_v53, %v3261_v26  ;;  %v7909_v5 = vmul.f32 %v8862_v44, %v3361_v56  ;;  %v3327_v0 = vadd.f32 %v7363_v7, %v3295_v28  ;;  %v3625_v46 = vadd.f32 %v3593_v6, %v8885_v58 }
 0x28b   : > { %v7913_v34 = vadd.f32 %v2416_v8, %v2348_v17  ;;  %v3429_v18 = vadd.f32 %v3397_v15, %v3329_v1  ;;  %v3893_v51 = vmul.f32 %v8865_v14, %v3261_v26  ;;  %v3891_v10 = vmul.f32 %v8865_v14, %v3259_v47  ;;  %v3360_v8 = vld [vmem:[#allocation2 + $0x111] sm:$0xff] }
 0x28c   : > { %v3993_v19 = vmul.f32 %v8866_v37, %v3361_v56  ;;  %v3395_v33 = vmul.f32 %v8740_v54, %v3359_v11  ;;  %v3693_v30 = vmul.f32 %v8862_v44, %v3359_v11  ;;  %v3991_v40 = vmul.f32 %v8866_v37, %v3359_v11 }
 0x28d   : > { %v3923_v50 = vadd.f32 %v3891_v10, %v3823_v49  ;;  %v3330_v61 = vadd.f32 %v7363_v7, %v3298_v38  ;;  %v3398_v4 = vmul.f32 %v8740_v54, %v3362_v52  ;;  %v3497_v26 = vmul.f32 %v8728_v59, %v3461_v16  ;;  %v3460_v49 = vld [vmem:[#allocation2 + $0x112] sm:$0xff]  ;;  %v8887_v38 = vld [vmem:[#allocation41_spill] sm:$0xff] }
 0x28e   : > { %v3427_v47 = vadd.f32 %v3395_v33, %v3327_v0  ;;  %v3725_v28 = vadd.f32 %v3693_v30, %v3625_v46  ;;  %v3498_v6 = vmul.f32 %v8728_v59, %v7917_v22  ;;  %v3296_v56 = vmul.f32 %v8779_v57, %v3260_v43 }
 0x28f   : > { %v7929_v17 = vadd.f32 %v3497_v26, %v3429_v18  ;;  %v3596_v1 = vmul.f32 %v8883_v53, %v3262_v48  ;;  %v7933_v3 = vmul.f32 %v8862_v44, %v3362_v52  ;;  %v3594_v15 = vmul.f32 %v8883_v53, %v3260_v43  ;;  %v8888_v26 = vld [vmem:[#allocation56_spill] sm:$0xff] }
 0x290   : > { %v7937_v11 = vmul.f32 %v8864_v55, %v3461_v16  ;;  %v3328_v24 = vadd.f32 %v7363_v7, %v3296_v56  ;;  %v3724_v0 = vadd.f32 %v8887_v38, %v7824_v41  ;;  %v3793_v58 = vmul.f32 %v8864_v55, %v3459_v39 }
 0x291   : > { %8886 = vst [vmem:[#allocation27_spill] sm:$0xff] %v7929_v17  ;;  %v4023_v46 = vadd.f32 %v3991_v40, %v3923_v50  ;;  %v3430_v18 = vadd.f32 %v3398_v4, %v3330_v61  ;;  %v3626_v10 = vadd.f32 %v3594_v15, %v7791_v63  ;;  %v3694_v33 = vmul.f32 %v8862_v44, %v3360_v8 }
 0x292   : > { %v3396_v30 = vmul.f32 %v8740_v54, %v3360_v8  ;;  %v3824_v17 = vadd.f32 %v8888_v26, %v3724_v0  ;;  %v3825_v53 = vadd.f32 %v3793_v58, %v3725_v28  ;;  %v3892_v57 = vmul.f32 %v8865_v14, %v3260_v43  ;;  %v1985_v58 = vld [vmem:[#allocation2 + $0x150] sm:$0xff]  ;;  %v1983_v26 = vld [vmem:[#allocation2 + $0x138] sm:$0xff] }
 0x293   : > { %v3894_v7 = vmul.f32 %v8865_v14, %v3262_v48  ;;  %v3726_v56 = vadd.f32 %v3694_v33, %v3626_v10  ;;  %v3794_v41 = vmul.f32 %v8864_v55, %v3460_v49  ;;  %v4091_v38 = vmul.f32 %v8843_v9, %v3459_v39 }
 0x294   : > { %v3428_v40 = vadd.f32 %v3396_v30, %v3328_v24  ;;  %v3924_v50 = vadd.f32 %v3892_v57, %v3824_v17  ;;  %v3925_v61 = vadd.f32 %v3893_v51, %v3825_v53  ;;  %v3992_v63 = vmul.f32 %v8866_v37, %v3360_v8 }
 0x295   : > { %v4093_v4 = vmul.f32 %v8843_v9, %v3461_v16  ;;  %v3495_v15 = vmul.f32 %v8728_v59, %v3459_v39  ;;  %v3826_v0 = vadd.f32 %v3794_v41, %v3726_v56  ;;  %v4123_v28 = vadd.f32 %v4091_v38, %v4023_v46 }
 0x296   : > { %v3496_v43 = vmul.f32 %v8728_v59, %v3460_v49  ;;  %v4024_v48 = vadd.f32 %v3992_v63, %v3924_v50  ;;  %v4025_v10 = vadd.f32 %v3993_v19, %v3925_v61  ;;  %v4092_v33 = vmul.f32 %v8843_v9, %v3460_v49  ;;  %v2085_v19 = vld [vmem:[#allocation2 + $0x151] sm:$0xff] }
 0x297   : > { %v3994_v57 = vmul.f32 %v8866_v37, %v3362_v52  ;;  %v3527_v53 = vadd.f32 %v3495_v15, %v3427_v47  ;;  %v3926_v51 = vadd.f32 %v3894_v7, %v3826_v0  ;;  %v4681_v8 = vpack.c.bf16 %v4123_v28, %v4123_v28  ;;  %v8890_v61 = vld [vmem:[#allocation31_spill] sm:$0xff] }
 0x298   : > { %v3528_v17 = vadd.f32 %v3496_v43, %v3428_v40  ;;  %v4124_v16 = vadd.f32 %v4092_v33, %v4024_v48  ;;  %v4125_v24 = vadd.f32 %v4093_v4, %v4025_v10  ;;  %v2447_v39 = vadd.f32 %v7806_v42, %v7898_v12  ;;  %v4874_v42 = vld [vmem:[%s8389_s2 + $0x1] ss:$0 sm:$0xff]  ;;  %v8889_v12 = vld [vmem:[#allocation8_spill] sm:$0xff]  ;;  %v8892_v10 = vld [vmem:[#allocation47_spill] sm:$0xff] }
 0x299   : > { %v4094_v46 = vmul.f32 %v8843_v9, %v7917_v22  ;;  %v2021_v30 = vmul.f32 %v6317_v60, %v1985_v58  ;;  %v4026_v56 = vadd.f32 %v3994_v57, %v3926_v51  ;;  %4283 = vst.msk [vmem:[%s6735_s13 + $0x48] sm:$0xf] %vm1704_vm3, %v4681_v8  ;;  %v2019_v52 = vmul.f32 %v6317_v60, %v1983_v26  ;;  %v8893_v57 = vld [vmem:[#allocation22_spill] sm:$0xff] }
 0x29a   : > { %v4682_v47 = vpack.c.bf16 %v4124_v16, %v4124_v16  ;;  %v4683_v49 = vpack.c.bf16 %v4125_v24, %v4125_v24  ;;  %v2317_v7 = vmul.f32 %v8817_v45, %v1983_v26  ;;  %v1893_v41 = vadd.f32 %v4874_v42, %v8889_v12 }
 0x29b   : > { %v3796_v38 = vmul.f32 %v8864_v55, %v7917_v22  ;;  %v4126_v40 = vadd.f32 %v4094_v46, %v4026_v56  ;;  %v2547_v50 = vadd.f32 %v7891_v35, %v2447_v39  ;;  %v1885_v63 = vadd.f32 %v4874_v42, %v8890_v61  ;;  %v2083_v35 = vld [vmem:[#allocation2 + $0x139] sm:$0xff] }
 0x29c   : > { %v7974_v4 = vadd.f32 %v3498_v6, %v3430_v18  ;;  %v2121_v15 = vmul.f32 %v6350_v36, %v2085_v19  ;;  %v3627_v0 = vadd.f32 %v7906_v31, %v3527_v53  ;;  %v3628_v28 = vadd.f32 %v3596_v1, %v3528_v17  ;;  %4284 = vst.msk [vmem:[%s6735_s13 + $0x4c] sm:$0xf] %vm1704_vm3, %v4682_v47  ;;  %v8891_v6 = vld [vmem:[#allocation24_spill] sm:$0xff]  ;;  %v8894_v17 = vld [vmem:[#allocation63_spill] sm:$0xff] }
 0x29d   : > { %4285 = vst.msk [vmem:[%s6735_s13 + $0x50] sm:$0xf] %vm1704_vm3, %v4683_v49  ;;  %v2053_v22 = vadd.f32 %v7785_v32, %v2021_v30  ;;  %v4684_v43 = vpack.c.bf16 %v4126_v40, %v4126_v40  ;;  %v2615_v48 = vmul.f32 %v8814_v25, %v1983_v26  ;;  %v1906_v18 = vadd.f32 %v4874_v42, %v8891_v6  ;;  %v8899_v6 = vld [vmem:[#allocation33_spill] sm:$0xff] }
 0x29e   : > { %1939 = vst.msk [vmem:[#allocation2 + $0x159] sm:$0xff] %vm353_vm1, %v1893_v41  ;;  %1937 = vst.msk [vmem:[#allocation2 + $0x141] sm:$0xff] %vm353_vm1, %v1885_v63  ;;  %v2051_v31 = vadd.f32 %v7785_v32, %v2019_v52  ;;  %v2349_v1 = vadd.f32 %v2317_v7, %v7880_v20  ;;  %v1898_v33 = vadd.f32 %v4874_v42, %v8892_v10  ;;  %v8895_v7 = vld [vmem:[#allocation55_spill] sm:$0xff]  ;;  %v8897_v63 = vld [vmem:[#allocation28_spill] sm:$0xff] }
 0x29f   : > { %v1909_v53 = vadd.f32 %v4874_v42, %v8893_v57  ;;  %v7992_v51 = vmul.f32 %v8817_v45, %v1985_v58  ;;  %v7995_v8 = vmul.f32 %v8825_v2, %v2085_v19  ;;  %4286 = vst.msk [vmem:[%s6735_s13 + $0x54] sm:$0xf] %vm1704_vm3, %v4684_v43  ;;  %v2647_v26 = vadd.f32 %v2615_v48, %v2547_v50  ;;  %v8896_v50 = vld [vmem:[#allocation32_spill] sm:$0xff] }
 0x2a0   : > { %1942 = vst.msk [vmem:[#allocation2 + $0x181] sm:$0xff] %vm353_vm1, %v1906_v18  ;;  %v1901_v16 = vadd.f32 %v4874_v42, %v8894_v17  ;;  %v2119_v24 = vmul.f32 %v6350_v36, %v2083_v35  ;;  %v2417_v20 = vmul.f32 %v8825_v2, %v2083_v35  ;;  %v3727_v39 = vadd.f32 %v7909_v5, %v3627_v0  ;;  %v8898_v0 = vld [vmem:[#allocation49_spill] sm:$0xff] }
 0x2a1   : > { %v3728_v46 = vadd.f32 %v7933_v3, %v3628_v28  ;;  %1940 = vst.msk [vmem:[#allocation2 + $0x169] sm:$0xff] %vm353_vm1, %v1898_v33  ;;  %1943 = vst.msk [vmem:[#allocation2 + $0x189] sm:$0xff] %vm353_vm1, %v1909_v53  ;;  %v2153_v30 = vadd.f32 %v2121_v15, %v2053_v22  ;;  %v8008_v56 = vmul.f32 %v8814_v25, %v1985_v58  ;;  %v4875_v58 = vld [vmem:[%s8389_s2 + $0x2] ss:$0 sm:$0xff]  ;;  %v8900_v33 = vld [vmem:[#allocation35_spill] sm:$0xff] }
 0x2a2   : > { %v8011_v52 = vmul.f32 %v6385_v21, %v2085_v19  ;;  %v2715_v47 = vmul.f32 %v6385_v21, %v2083_v35  ;;  %1941 = vst.msk [vmem:[#allocation2 + $0x171] sm:$0xff] %vm353_vm1, %v1901_v16  ;;  %v8015_v49 = vadd.f32 %v2119_v24, %v2051_v31  ;;  %v8017_v5 = vadd.f32 %v2417_v20, %v2349_v1  ;;  %v8901_v53 = vld [vmem:[#allocation10_spill] sm:$0xff]  ;;  %v8902_v17 = vld [vmem:[#allocation65_spill] sm:$0xff] }
 0x2a3   : > { %v8021_v3 = vadd.f32 %v7895_v62, %v7913_v34  ;;  %v3170_v42 = vadd.f32 %v4875_v58, %v8895_v7  ;;  %v3162_v61 = vadd.f32 %v4875_v58, %v8896_v50  ;;  %v3173_v15 = vadd.f32 %v4875_v58, %v8897_v63 }
 0x2a4   : > { %v8027_v19 = vadd.f32 %v2715_v47, %v2647_v26  ;;  %v3165_v62 = vadd.f32 %v4875_v58, %v8898_v0  ;;  %v8041_v35 = vadd.f32 %v7937_v11, %v3727_v39  ;;  %v8043_v48 = vadd.f32 %v3796_v38, %v3728_v46 }
 0x2a5   : > { %v1986_v12 = vld [vmem:[#allocation2 + $0x158] sm:$0xff]  ;;  %v1984_v22 = vld [vmem:[#allocation2 + $0x140] sm:$0xff]  ;;  %v3186_v18 = vadd.f32 %v4875_v58, %v8899_v6  ;;  %v3178_v57 = vadd.f32 %v4875_v58, %v8900_v33  ;;  %v3189_v26 = vadd.f32 %v4875_v58, %v8901_v53  ;;  %v3181_v16 = vadd.f32 %v4875_v58, %v8902_v17 }
 0x2a6   : > { %v8029_v41 = vld [vmem:[#allocation2 + $0x159] sm:$0xff]  ;;  %v2022_v34 = vmul.f32 %v6317_v60, %v1986_v12  ;;  %v2084_v43 = vld [vmem:[#allocation2 + $0x141] sm:$0xff]  ;;  %v8058_v20 = vmul.f32 %v8817_v45, %v1986_v12  ;;  %v2618_v0 = vmul.f32 %v8814_v25, %v1986_v12 }
 0x2a7   : > { %v8031_v40 = vld [vmem:[#allocation2 + $0x152] sm:$0xff]  ;;  %v8037_v28 = vld [vmem:[#allocation2 + $0x15a] sm:$0xff]  ;;  %v2122_v31 = vmul.f32 %v6350_v36, %v8029_v41  ;;  %v2184_v10 = vld [vmem:[#allocation2 + $0x142] sm:$0xff]  ;;  %v8068_v47 = vmul.f32 %v8825_v2, %v8029_v41 }
 0x2a8   : > { %3218 = vst.msk [vmem:[#allocation2 + $0x151] sm:$0xff] %vm353_vm1, %v3170_v42  ;;  %v2183_v1 = vld [vmem:[#allocation2 + $0x13a] sm:$0xff]  ;;  %3219 = vst.msk [vmem:[#allocation2 + $0x159] sm:$0xff] %vm353_vm1, %v3173_v15  ;;  %v2054_v11 = vadd.f32 %v7785_v32, %v2022_v34  ;;  %v2221_v38 = vmul.f32 %v6356_v13, %v8031_v40  ;;  %v2222_v24 = vmul.f32 %v6356_v13, %v8037_v28  ;;  %v8079_v50 = vld [vmem:[#allocation2 + $0x168] sm:$0xff] }
 0x2a9   : > { %3216 = vst.msk [vmem:[#allocation2 + $0x139] sm:$0xff] %vm353_vm1, %v3162_v61  ;;  %v8061_v39 = vld [vmem:[#allocation2 + $0x180] sm:$0xff]  ;;  %3217 = vst.msk [vmem:[#allocation2 + $0x141] sm:$0xff] %vm353_vm1, %v3165_v62  ;;  %v8072_v58 = vmul.f32 %v6511_v23, %v8031_v40  ;;  %v8076_v7 = vmul.f32 %v6511_v23, %v8037_v28  ;;  %v2020_v42 = vmul.f32 %v6317_v60, %v1984_v22  ;;  %v8081_v61 = vld [vmem:[#allocation2 + $0x169] sm:$0xff] }
 0x2aa   : > { %v8063_v46 = vld [vmem:[#allocation2 + $0x181] sm:$0xff]  ;;  %v8085_v15 = vadd.f32 %v2221_v38, %v2153_v30  ;;  %v2120_v62 = vmul.f32 %v6350_v36, %v2084_v43  ;;  %v2318_v34 = vmul.f32 %v8817_v45, %v1984_v22  ;;  %v8090_v6 = vld [vmem:[#allocation2 + $0x189] sm:$0xff]  ;;  %v2154_v17 = vadd.f32 %v2122_v31, %v2054_v11  ;;  %v8101_v12 = vld [vmem:[#allocation2 + $0x171] sm:$0xff] }
 0x2ab   : > { %8903 = vst [vmem:[#allocation30_spill] sm:$0xff] %v8072_v58  ;;  %8904 = vst [vmem:[#allocation15_spill] sm:$0xff] %v8076_v7  ;;  %v8083_v63 = vld [vmem:[#allocation2 + $0x188] sm:$0xff]  ;;  %v2052_v7 = vadd.f32 %v7785_v32, %v2020_v42  ;;  %v2219_v58 = vmul.f32 %v6356_v13, %v2183_v1  ;;  %v2517_v30 = vmul.f32 %v6511_v23, %v2183_v1  ;;  %v8099_v38 = vld [vmem:[#allocation2 + $0x170] sm:$0xff] }
 0x2ac   : > { %8905 = vst [vmem:[#allocation44_spill] sm:$0xff] %v8083_v63  ;;  %v8092_v33 = vld [vmem:[#allocation2 + $0x182] sm:$0xff]  ;;  %v8094_v53 = vld [vmem:[#allocation2 + $0x18a] sm:$0xff]  ;;  %8908 = vst [vmem:[#allocation58_spill] sm:$0xff] %v8099_v38  ;;  %v2350_v31 = vadd.f32 %v2318_v34, %v7887_v29  ;;  %v2418_v11 = vmul.f32 %v8825_v2, %v2084_v43  ;;  %v2616_v42 = vmul.f32 %v8814_v25, %v1984_v22 }
 0x2ad   : > { %8906 = vst [vmem:[#allocation59_spill] sm:$0xff] %v8092_v33  ;;  %8907 = vst [vmem:[#allocation46_spill] sm:$0xff] %v8094_v53  ;;  %v8103_v63 = vld [vmem:[#allocation2 + $0x16a] sm:$0xff]  ;;  %v2220_v33 = vmul.f32 %v6356_v13, %v2184_v10  ;;  %v8111_v53 = vld [vmem:[#allocation2 + $0x172] sm:$0xff]  ;;  %v2152_v38 = vadd.f32 %v2120_v62, %v2052_v7  ;;  %v2251_v29 = vadd.f32 %v2219_v58, %v8015_v49 }
 0x2ae   : > { %8909 = vst [vmem:[#allocation40_spill] sm:$0xff] %v8101_v12  ;;  %8910 = vst [vmem:[#allocation12_spill] sm:$0xff] %v8103_v63  ;;  %v2518_v12 = vmul.f32 %v6511_v23, %v2184_v10  ;;  %v2549_v63 = vadd.f32 %v2517_v30, %v8017_v5  ;;  %v2450_v34 = vadd.f32 %v2418_v11, %v2350_v31  ;;  %v8912_v5 = vld [vmem:[#allocation6_spill] sm:$0xff] }
 0x2af   : > { %3222 = vst.msk [vmem:[#allocation2 + $0x181] sm:$0xff] %vm353_vm1, %v3186_v18  ;;  %3223 = vst.msk [vmem:[#allocation2 + $0x189] sm:$0xff] %vm353_vm1, %v3189_v26  ;;  %v2815_v18 = vmul.f32 %v8831_v27, %v2183_v1  ;;  %v3265_v26 = vld [vmem:[#allocation2 + $0x150] sm:$0xff]  ;;  %v2648_v13 = vadd.f32 %v2616_v42, %v8021_v3  ;;  %v2716_v22 = vmul.f32 %v6385_v21, %v2084_v43 }
 0x2b0   : > { %8911 = vst [vmem:[#allocation43_spill] sm:$0xff] %v8111_v53  ;;  %3220 = vst.msk [vmem:[#allocation2 + $0x169] sm:$0xff] %vm353_vm1, %v3178_v57  ;;  %v2718_v57 = vmul.f32 %v6385_v21, %v8029_v41  ;;  %v2649_v7 = vadd.f32 %v8008_v56, %v2549_v63  ;;  %v3301_v30 = vmul.f32 %v8912_v5, %v3265_v26  ;;  %v3365_v58 = vld [vmem:[#allocation2 + $0x151] sm:$0xff]  ;;  %v3363_v11 = vld [vmem:[#allocation2 + $0x139] sm:$0xff] }
 0x2b1   : > { %3221 = vst.msk [vmem:[#allocation2 + $0x171] sm:$0xff] %vm353_vm1, %v3181_v16  ;;  %v2847_v62 = vadd.f32 %v2815_v18, %v8027_v19  ;;  %v2252_v1 = vadd.f32 %v2220_v33, %v2152_v38  ;;  %v2550_v53 = vadd.f32 %v2518_v12, %v2450_v34  ;;  %v2748_v16 = vadd.f32 %v2716_v22, %v2648_v13  ;;  %v3263_v63 = vld [vmem:[#allocation2 + $0x138] sm:$0xff] }
 0x2b2   : > { %v2816_v49 = vmul.f32 %v8831_v27, %v2184_v10  ;;  %v2817_v3 = vmul.f32 %v8831_v27, %v8031_v40  ;;  %v2818_v43 = vmul.f32 %v8831_v27, %v8037_v28  ;;  %v2749_v41 = vadd.f32 %v8011_v52, %v2649_v7  ;;  %v8142_v40 = vld [vmem:[%s8391_s4 + $0x2] ss:$0 sm:$0xff]  ;;  %v8913_v10 = vld [vmem:[#allocation34_spill] sm:$0xff]  ;;  %v3366_v22 = vld [vmem:[#allocation2 + $0x159] sm:$0xff] }
 0x2b3   : > { %v4653_v56 = vpack.c.bf16 %v2847_v62, %v2847_v62  ;;  %v8132_v19 = vadd.f32 %v2222_v24, %v2154_v17  ;;  %v8135_v31 = vadd.f32 %v7992_v51, %v2251_v29  ;;  %v2650_v33 = vadd.f32 %v2618_v0, %v2550_v53  ;;  %v3266_v51 = vld [vmem:[#allocation2 + $0x158] sm:$0xff] }
 0x2b4   : > { %v2848_v13 = vadd.f32 %v2816_v49, %v2748_v16  ;;  %v2849_v38 = vadd.f32 %v2817_v3, %v2749_v41  ;;  %v3333_v52 = vadd.f32 %v8142_v40, %v3301_v30  ;;  %v3401_v28 = vmul.f32 %v8740_v54, %v3365_v58  ;;  %v3465_v30 = vld [vmem:[#allocation2 + $0x152] sm:$0xff] }
 0x2b5   : > { %3007 = vst.msk [vmem:[%s6609_s8 + $0x58] sm:$0xf] %vm1704_vm3, %v4653_v56  ;;  %v8147_v24 = vmul.f32 %v8913_v10, %v3265_v26  ;;  %v2352_v0 = vadd.f32 %v8058_v20, %v2252_v1  ;;  %v2750_v53 = vadd.f32 %v2718_v57, %v2650_v33  ;;  %v3299_v12 = vmul.f32 %v8912_v5, %v3263_v63  ;;  %v8915_v49 = vld [vmem:[#allocation27_spill] sm:$0xff] }
 0x2b6   : > { %v4654_v17 = vpack.c.bf16 %v2848_v13, %v2848_v13  ;;  %v4655_v42 = vpack.c.bf16 %v2849_v38, %v2849_v38  ;;  %v8152_v18 = vmul.f32 %v8862_v44, %v3365_v58  ;;  %v3597_v29 = vmul.f32 %v8913_v10, %v3263_v63 }
 0x2b7   : > { %v3895_v34 = vmul.f32 %v8865_v14, %v3263_v63  ;;  %v2850_v7 = vadd.f32 %v2818_v43, %v2750_v53  ;;  %v3897_v20 = vmul.f32 %v8865_v14, %v3265_v26  ;;  %v3331_v57 = vadd.f32 %v8142_v40, %v3299_v12  ;;  %v3466_v43 = vld [vmem:[#allocation2 + $0x15a] sm:$0xff] }
 0x2b8   : > { %8914 = vst [vmem:[#allocation61_spill] sm:$0xff] %v8152_v18  ;;  %3008 = vst.msk [vmem:[%s6609_s8 + $0x5c] sm:$0xf] %vm1704_vm3, %v4654_v17  ;;  %v3302_v62 = vmul.f32 %v8912_v5, %v3266_v51  ;;  %v3433_v1 = vadd.f32 %v3401_v28, %v3333_v52  ;;  %v3399_v16 = vmul.f32 %v8740_v54, %v3363_v11 }
 0x2b9   : > { %3009 = vst.msk [vmem:[%s6609_s8 + $0x60] sm:$0xf] %vm1704_vm3, %v4655_v42  ;;  %v3629_v3 = vadd.f32 %v3597_v29, %v8915_v49  ;;  %v3927_v41 = vadd.f32 %v3895_v34, %v8041_v35  ;;  %v4656_v56 = vpack.c.bf16 %v2850_v7, %v2850_v7  ;;  %v3697_v63 = vmul.f32 %v8862_v44, %v3363_v11  ;;  %v3264_v42 = vld [vmem:[#allocation2 + $0x140] sm:$0xff] }
 0x2ba   : > { %v3334_v26 = vadd.f32 %v8142_v40, %v3302_v62  ;;  %v3402_v33 = vmul.f32 %v8740_v54, %v3366_v22  ;;  %v8170_v13 = vadd.f32 %v8068_v47, %v2352_v0  ;;  %v3997_v38 = vmul.f32 %v8866_v37, %v3365_v58  ;;  %v3463_v0 = vld [vmem:[#allocation2 + $0x13a] sm:$0xff] }
 0x2bb   : > { %v3995_v52 = vmul.f32 %v8866_v37, %v3363_v11  ;;  %v3501_v28 = vmul.f32 %v8728_v59, %v3465_v30  ;;  %3010 = vst.msk [vmem:[%s6609_s8 + $0x64] sm:$0xf] %vm1704_vm3, %v4656_v56  ;;  %v3431_v35 = vadd.f32 %v3399_v16, %v3331_v57  ;;  %v3729_v53 = vadd.f32 %v3697_v63, %v3629_v3  ;;  %v3364_v16 = vld [vmem:[#allocation2 + $0x141] sm:$0xff] }
 0x2bc   : > { %v3434_v17 = vadd.f32 %v3402_v33, %v3334_v26  ;;  %v3502_v12 = vmul.f32 %v8728_v59, %v3466_v43  ;;  %v8181_v47 = vmul.f32 %v8913_v10, %v3266_v51  ;;  %v8184_v58 = vmul.f32 %v8862_v44, %v3366_v22 }
 0x2bd   : > { %v4027_v29 = vadd.f32 %v3995_v52, %v3927_v41  ;;  %v8178_v34 = vadd.f32 %v3501_v28, %v3433_v1  ;;  %v8187_v11 = vmul.f32 %v8864_v55, %v3465_v30  ;;  %v8190_v7 = vmul.f32 %v8864_v55, %v3466_v43 }
 0x2be   : > { %8917 = vst [vmem:[#allocation25_spill] sm:$0xff] %v8184_v58  ;;  %v3898_v57 = vmul.f32 %v8865_v14, %v3266_v51  ;;  %v3998_v62 = vmul.f32 %v8866_v37, %v3366_v22  ;;  %v8194_v1 = vadd.f32 %v3502_v12, %v3434_v17  ;;  %v4097_v49 = vmul.f32 %v8843_v9, %v3465_v30  ;;  %v3464_v51 = vld [vmem:[#allocation2 + $0x142] sm:$0xff] }
 0x2bf   : > { %8916 = vst [vmem:[#allocation37_spill] sm:$0xff] %v8178_v34  ;;  %8918 = vst [vmem:[#allocation50_spill] sm:$0xff] %v8187_v11  ;;  %v4098_v3 = vmul.f32 %v8843_v9, %v3466_v43  ;;  %v3300_v41 = vmul.f32 %v8912_v5, %v3264_v42  ;;  %v8201_v56 = vmul.f32 %v8817_v45, %v8061_v39 }
 0x2c0   : > { %8919 = vst [vmem:[#allocation18_spill] sm:$0xff] %v8190_v7  ;;  %8920 = vst [vmem:[#allocation42_spill] sm:$0xff] %v8194_v1  ;;  %v8205_v63 = vmul.f32 %v8825_v2, %v8063_v46  ;;  %v3598_v22 = vmul.f32 %v8913_v10, %v3264_v42  ;;  %v3797_v26 = vmul.f32 %v8864_v55, %v3463_v0 }
 0x2c1   : > { %v8211_v30 = vmul.f32 %v8814_v25, %v8061_v39  ;;  %v3400_v43 = vmul.f32 %v8740_v54, %v3364_v16  ;;  %v3499_v33 = vmul.f32 %v8728_v59, %v3463_v0  ;;  %v3896_v52 = vmul.f32 %v8865_v14, %v3264_v42 }
 0x2c2   : > { %v3630_v28 = vadd.f32 %v3598_v22, %v7974_v4  ;;  %v3698_v17 = vmul.f32 %v8862_v44, %v3364_v16  ;;  %v3829_v12 = vadd.f32 %v3797_v26, %v3729_v53  ;;  %v4095_v7 = vmul.f32 %v8843_v9, %v3463_v0 }
 0x2c3   : > { %v3332_v1 = vadd.f32 %v8142_v40, %v3300_v41  ;;  %v3798_v58 = vmul.f32 %v8864_v55, %v3464_v51  ;;  %v3928_v39 = vadd.f32 %v3896_v52, %v8043_v48  ;;  %v3996_v11 = vmul.f32 %v8866_v37, %v3364_v16 }
 0x2c4   : > { %v3730_v54 = vadd.f32 %v3698_v17, %v3630_v28  ;;  %v3929_v18 = vadd.f32 %v3897_v20, %v3829_v12  ;;  %v4127_v34 = vadd.f32 %v4095_v7, %v4027_v29  ;;  %v2023_v42 = vmul.f32 %v6317_v60, %v8079_v50  ;;  %v8922_v28 = vld [vmem:[#allocation44_spill] sm:$0xff]  ;;  %v8923_v12 = vld [vmem:[#allocation59_spill] sm:$0xff] }
 0x2c5   : > { %v3531_v4 = vadd.f32 %v3499_v33, %v3431_v35  ;;  %v4028_v22 = vadd.f32 %v3996_v11, %v3928_v39  ;;  %v4096_v53 = vmul.f32 %v8843_v9, %v3464_v51  ;;  %v2321_v0 = vmul.f32 %v8817_v45, %v8079_v50 }
 0x2c6   : > { %v8230_v41 = vmul.f32 %v6385_v21, %v8063_v46  ;;  %v3830_v48 = vadd.f32 %v3798_v58, %v3730_v54  ;;  %v4029_v16 = vadd.f32 %v3997_v38, %v3929_v18  ;;  %v4685_v26 = vpack.c.bf16 %v4127_v34, %v4127_v34 }
 0x2c7   : > { %v3432_v20 = vadd.f32 %v3400_v43, %v3332_v1  ;;  %v4128_v29 = vadd.f32 %v4096_v53, %v4028_v22  ;;  %v2055_v7 = vadd.f32 %v7785_v32, %v2023_v42  ;;  %v2353_v35 = vadd.f32 %v2321_v0, %v8085_v15  ;;  %v8924_v42 = vld [vmem:[#allocation46_spill] sm:$0xff]  ;;  %v8927_v53 = vld [vmem:[#allocation51_spill] sm:$0xff] }
 0x2c8   : > { %v3500_v11 = vmul.f32 %v8728_v59, %v3464_v51  ;;  %v3930_v33 = vadd.f32 %v3898_v57, %v3830_v48  ;;  %v4129_v52 = vadd.f32 %v4097_v49, %v4029_v16  ;;  %4287 = vst.msk [vmem:[%s6735_s13 + $0x58] sm:$0xf] %vm1704_vm3, %v4685_v26  ;;  %v2451_v46 = vadd.f32 %v7995_v8, %v8135_v31  ;;  %v8921_v57 = vld [vmem:[#allocation30_spill] sm:$0xff]  ;;  %v8928_v26 = vld [vmem:[#allocation40_spill] sm:$0xff] }
 0x2c9   : > { %v8240_v54 = vadd.f32 %v8147_v24, %v3531_v4  ;;  %v4686_v18 = vpack.c.bf16 %v4128_v29, %v4128_v29  ;;  %v2123_v38 = vmul.f32 %v6350_v36, %v8081_v61  ;;  %v2421_v15 = vmul.f32 %v8825_v2, %v8081_v61  ;;  %v8925_v22 = vld [vmem:[#allocation58_spill] sm:$0xff] }
 0x2ca   : > { %v4030_v34 = vadd.f32 %v3998_v62, %v3930_v33  ;;  %v4687_v58 = vpack.c.bf16 %v4129_v52, %v4129_v52  ;;  %v2551_v1 = vadd.f32 %v8921_v57, %v2451_v46  ;;  %v2619_v49 = vmul.f32 %v8814_v25, %v8079_v50 }
 0x2cb   : > { %v8249_v51 = vadd.f32 %v3500_v11, %v3432_v20  ;;  %4288 = vst.msk [vmem:[%s6735_s13 + $0x5c] sm:$0xf] %vm1704_vm3, %v4686_v18  ;;  %v2155_v8 = vadd.f32 %v2123_v38, %v2055_v7  ;;  %v2453_v31 = vadd.f32 %v2421_v15, %v2353_v35  ;;  %v2719_v24 = vmul.f32 %v6385_v21, %v8081_v61  ;;  %v8929_v35 = vld [vmem:[#allocation43_spill] sm:$0xff] }
 0x2cc   : > { %v4130_v43 = vadd.f32 %v4098_v3, %v4030_v34  ;;  %4289 = vst.msk [vmem:[%s6735_s13 + $0x60] sm:$0xf] %vm1704_vm3, %v4687_v58  ;;  %v2651_v62 = vadd.f32 %v2619_v49, %v2551_v1  ;;  %v2324_v17 = vmul.f32 %v8817_v45, %v8922_v28  ;;  %v2424_v50 = vmul.f32 %v8825_v2, %v8090_v6  ;;  %v8926_v3 = vld [vmem:[#allocation12_spill] sm:$0xff] }
 0x2cd   : > { %v2523_v39 = vmul.f32 %v6511_v23, %v8923_v12  ;;  %v2524_v4 = vmul.f32 %v6511_v23, %v8924_v42  ;;  %v2024_v61 = vmul.f32 %v6317_v60, %v8925_v22  ;;  %v2223_v0 = vmul.f32 %v8927_v53, %v8926_v3 }
 0x2ce   : > { %v4688_v48 = vpack.c.bf16 %v4130_v43, %v4130_v43  ;;  %v2751_v16 = vadd.f32 %v2719_v24, %v2651_v62  ;;  %v2124_v20 = vmul.f32 %v6350_v36, %v8928_v26  ;;  %v2322_v29 = vmul.f32 %v8817_v45, %v8925_v22  ;;  %v8930_v36 = vld [vmem:[#allocation15_spill] sm:$0xff]  ;;  %v3267_v43 = vld [vmem:[#allocation2 + $0x168] sm:$0xff] }
 0x2cf   : > { %v2056_v7 = vadd.f32 %v7785_v32, %v2024_v61  ;;  %v2224_v11 = vmul.f32 %v8927_v53, %v8929_v35  ;;  %v2255_v33 = vadd.f32 %v2223_v0, %v2155_v8  ;;  %v2521_v60 = vmul.f32 %v6511_v23, %v8926_v3  ;;  %v8931_v0 = vld [vmem:[#allocation19_spill] sm:$0xff] }
 0x2d0   : > { %4290 = vst.msk [vmem:[%s6735_s13 + $0x64] sm:$0xf] %vm1704_vm3, %v4688_v48  ;;  %v2354_v52 = vadd.f32 %v2322_v29, %v8132_v19  ;;  %v2422_v46 = vmul.f32 %v8825_v2, %v8928_v26  ;;  %v2552_v18 = vadd.f32 %v8930_v36, %v8170_v13  ;;  %v2620_v45 = vmul.f32 %v8814_v25, %v8925_v22  ;;  %v8932_v29 = vld [vmem:[#allocation45_spill] sm:$0xff]  ;;  %v8935_v36 = vld [vmem:[#allocation20_spill] sm:$0xff] }
 0x2d1   : > { %v2156_v32 = vadd.f32 %v2124_v20, %v2056_v7  ;;  %v2355_v38 = vadd.f32 %v8201_v56, %v2255_v33  ;;  %v2522_v15 = vmul.f32 %v6511_v23, %v8929_v35  ;;  %v2553_v34 = vadd.f32 %v2521_v60, %v2453_v31  ;;  %v8933_v33 = vld [vmem:[#allocation37_spill] sm:$0xff] }
 0x2d2   : > { %v2454_v58 = vadd.f32 %v2422_v46, %v2354_v52  ;;  %v2652_v57 = vadd.f32 %v2620_v45, %v2552_v18  ;;  %v2720_v19 = vmul.f32 %v6385_v21, %v8928_v26  ;;  %v2819_v2 = vmul.f32 %v8831_v27, %v8926_v3  ;;  %v8934_v52 = vld [vmem:[#allocation61_spill] sm:$0xff] }
 0x2d3   : > { %v2622_v13 = vmul.f32 %v8814_v25, %v8922_v28  ;;  %v2256_v1 = vadd.f32 %v2224_v11, %v2156_v32  ;;  %v2455_v49 = vadd.f32 %v8205_v63, %v2355_v38  ;;  %v2653_v56 = vadd.f32 %v8211_v30, %v2553_v34  ;;  %v8936_v45 = vld [vmem:[#allocation57_spill] sm:$0xff]  ;;  %v8938_v34 = vld [vmem:[#allocation50_spill] sm:$0xff] }
 0x2d4   : > { %v2554_v8 = vadd.f32 %v2522_v15, %v2454_v58  ;;  %v2752_v24 = vadd.f32 %v2720_v19, %v2652_v57  ;;  %v2820_v23 = vmul.f32 %v8831_v27, %v8929_v35  ;;  %v2851_v31 = vadd.f32 %v2819_v2, %v2751_v16  ;;  %v3568_v19 = vld [vmem:[#allocation2 + $0x188] sm:$0xff]  ;;  %v8939_v2 = vld [vmem:[#allocation48_spill] sm:$0xff] }
 0x2d5   : > { %v2821_v62 = vmul.f32 %v8831_v27, %v8923_v12  ;;  %v2356_v22 = vadd.f32 %v2324_v17, %v2256_v1  ;;  %v2555_v61 = vadd.f32 %v2523_v39, %v2455_v49  ;;  %v2753_v25 = vadd.f32 %v8230_v41, %v2653_v56  ;;  %v3567_v41 = vld [vmem:[#allocation2 + $0x180] sm:$0xff] }
 0x2d6   : > { %v2722_v63 = vmul.f32 %v6385_v21, %v8090_v6  ;;  %v2654_v28 = vadd.f32 %v2622_v13, %v2554_v8  ;;  %v2852_v30 = vadd.f32 %v2820_v23, %v2752_v24  ;;  %v4657_v3 = vpack.c.bf16 %v2851_v31, %v2851_v31  ;;  %v3367_v21 = vld [vmem:[#allocation2 + $0x169] sm:$0xff] }
 0x2d7   : > { %v2456_v53 = vadd.f32 %v2424_v50, %v2356_v22  ;;  %v2655_v48 = vadd.f32 %v8931_v0, %v2555_v61  ;;  %v2853_v16 = vadd.f32 %v2821_v62, %v2753_v25  ;;  %v3303_v26 = vmul.f32 %v8912_v5, %v3267_v43  ;;  %v3767_v8 = vld [vmem:[#allocation2 + $0x182] sm:$0xff]  ;;  %v3268_v24 = vld [vmem:[#allocation2 + $0x170] sm:$0xff]  ;;  %v8940_v25 = vld [vmem:[#allocation60_spill] sm:$0xff] }
 0x2d8   : > { %v2822_v12 = vmul.f32 %v8831_v27, %v8924_v42  ;;  %v2754_v17 = vadd.f32 %v2722_v63, %v2654_v28  ;;  %v4658_v39 = vpack.c.bf16 %v2852_v30, %v2852_v30  ;;  %3011 = vst.msk [vmem:[%s6609_s8 + $0x68] sm:$0xf] %vm1704_vm3, %v4657_v3  ;;  %v3601_v6 = vmul.f32 %v8913_v10, %v3267_v43  ;;  %v3667_v27 = vld [vmem:[#allocation2 + $0x181] sm:$0xff]  ;;  %v3467_v23 = vld [vmem:[#allocation2 + $0x16a] sm:$0xff] }
 0x2d9   : > { %v3632_v50 = vadd.f32 %v8181_v47, %v8249_v51  ;;  %v2556_v20 = vadd.f32 %v2524_v4, %v2456_v53  ;;  %v2755_v7 = vadd.f32 %v8932_v29, %v2655_v48  ;;  %v4659_v35 = vpack.c.bf16 %v2853_v16, %v2853_v16  ;;  %v8937_v51 = vld [vmem:[#allocation7_spill] sm:$0xff] }
 0x2da   : > { %v2854_v11 = vadd.f32 %v2822_v12, %v2754_v17  ;;  %3012 = vst.msk [vmem:[%s6609_s8 + $0x6c] sm:$0xf] %vm1704_vm3, %v4658_v39  ;;  %v3335_v42 = vadd.f32 %v8142_v40, %v3303_v26  ;;  %v3633_v60 = vadd.f32 %v3601_v6, %v8933_v33  ;;  %v3731_v46 = vadd.f32 %v8934_v52, %v8240_v54  ;;  %v3668_v54 = vld [vmem:[#allocation2 + $0x189] sm:$0xff]  ;;  %v3368_v61 = vld [vmem:[#allocation2 + $0x171] sm:$0xff] }
 0x2db   : > { %v2656_v18 = vadd.f32 %v8935_v36, %v2556_v20  ;;  %v2855_v32 = vadd.f32 %v8936_v45, %v2755_v7  ;;  %3013 = vst.msk [vmem:[%s6609_s8 + $0x70] sm:$0xf] %vm1704_vm3, %v4659_v35  ;;  %v3603_v47 = vmul.f32 %v8913_v10, %v3567_v41  ;;  %v3403_v4 = vmul.f32 %v8937_v51, %v3367_v21  ;;  %v3468_v16 = vld [vmem:[#allocation2 + $0x172] sm:$0xff]  ;;  %v8941_v20 = vld [vmem:[#allocation25_spill] sm:$0xff]  ;;  %v8942_v35 = vld [vmem:[#allocation42_spill] sm:$0xff] }
 0x2dc   : > { %v4660_v38 = vpack.c.bf16 %v2854_v11, %v2854_v11  ;;  %v3701_v15 = vmul.f32 %v8862_v44, %v3367_v21  ;;  %v3831_v58 = vadd.f32 %v8938_v34, %v3731_v46  ;;  %v3899_v57 = vmul.f32 %v8865_v14, %v3267_v43  ;;  %v3768_v45 = vld [vmem:[#allocation2 + $0x18a] sm:$0xff] }
 0x2dd   : > { %v2756_v13 = vadd.f32 %v8939_v2, %v2656_v18  ;;  %v4661_v1 = vpack.c.bf16 %v2855_v32, %v2855_v32  ;;  %v3703_v49 = vmul.f32 %v8862_v44, %v3667_v27  ;;  %v3901_v56 = vmul.f32 %v8865_v14, %v3567_v41 }
 0x2de   : > { %3014 = vst.msk [vmem:[%s6609_s8 + $0x74] sm:$0xf] %vm1704_vm3, %v4660_v38  ;;  %v4001_v31 = vmul.f32 %v8866_v37, %v3667_v27  ;;  %v3435_v62 = vadd.f32 %v3403_v4, %v3335_v42  ;;  %v3733_v22 = vadd.f32 %v3701_v15, %v3633_v60  ;;  %v3931_v43 = vadd.f32 %v3899_v57, %v3831_v58 }
 0x2df   : > { %v2856_v63 = vadd.f32 %v8940_v25, %v2756_v13  ;;  %3015 = vst.msk [vmem:[%s6609_s8 + $0x78] sm:$0xf] %vm1704_vm3, %v4661_v1  ;;  %v3999_v28 = vmul.f32 %v8866_v37, %v3367_v21  ;;  %v3604_v30 = vmul.f32 %v8913_v10, %v3568_v19  ;;  %v3704_v3 = vmul.f32 %v8862_v44, %v3668_v54 }
 0x2e0   : > { %v3803_v53 = vmul.f32 %v8864_v55, %v3767_v8  ;;  %v3902_v0 = vmul.f32 %v8865_v14, %v3568_v19  ;;  %v3304_v48 = vmul.f32 %v8912_v5, %v3268_v24  ;;  %v3503_v26 = vmul.f32 %v8728_v59, %v3467_v23 }
 0x2e1   : > { %v4662_v12 = vpack.c.bf16 %v2856_v63, %v2856_v63  ;;  %v4031_v17 = vadd.f32 %v3999_v28, %v3931_v43  ;;  %v3404_v39 = vmul.f32 %v8937_v51, %v3368_v61  ;;  %v3602_v41 = vmul.f32 %v8913_v10, %v3268_v24  ;;  %v8943_v10 = vld [vmem:[#allocation18_spill] sm:$0xff] }
 0x2e2   : > { %v3336_v21 = vadd.f32 %v8142_v40, %v3304_v48  ;;  %v3535_v6 = vadd.f32 %v3503_v26, %v3435_v62  ;;  %v3732_v29 = vadd.f32 %v8941_v20, %v3632_v50  ;;  %v3801_v7 = vmul.f32 %v8864_v55, %v3467_v23  ;;  %v4877_v62 = vld [vmem:[#allocation2 + $0x1a1] sm:$0xff] }
 0x2e3   : > { %3016 = vst.msk [vmem:[%s6609_s8 + $0x7c] sm:$0xf] %vm1704_vm3, %v4662_v12  ;;  %v3504_v5 = vmul.f32 %v8728_v59, %v3468_v16  ;;  %v3634_v11 = vadd.f32 %v3602_v41, %v8942_v35  ;;  %v3702_v27 = vmul.f32 %v8862_v44, %v3368_v61  ;;  %v3900_v42 = vmul.f32 %v8865_v14, %v3268_v24  ;;  %v8944_v24 = vld [vmem:[#allocation11_spill] sm:$0xff] }
 0x2e4   : > { %v3436_v33 = vadd.f32 %v3404_v39, %v3336_v21  ;;  %v3635_v60 = vadd.f32 %v3603_v47, %v3535_v6  ;;  %v3832_v52 = vadd.f32 %v8943_v10, %v3732_v29  ;;  %v3833_v40 = vadd.f32 %v3801_v7, %v3733_v22 }
 0x2e5   : > { %v3734_v46 = vadd.f32 %v3702_v27, %v3634_v11  ;;  %v3802_v50 = vmul.f32 %v8864_v55, %v3468_v16  ;;  %v4000_v36 = vmul.f32 %v8866_v37, %v3368_v61  ;;  %v4099_v18 = vmul.f32 %v8843_v9, %v3467_v23 }
 0x2e6   : > { %v3536_v59 = vadd.f32 %v3504_v5, %v3436_v33  ;;  %v3735_v32 = vadd.f32 %v3703_v49, %v3635_v60  ;;  %v3932_v51 = vadd.f32 %v3900_v42, %v3832_v52  ;;  %v3933_v4 = vadd.f32 %v3901_v56, %v3833_v40 }
 0x2e7   : > { %v4101_v44 = vmul.f32 %v8843_v9, %v3767_v8  ;;  %v3834_v14 = vadd.f32 %v3802_v50, %v3734_v46  ;;  %v4100_v47 = vmul.f32 %v8843_v9, %v3468_v16  ;;  %v4131_v38 = vadd.f32 %v4099_v18, %v4031_v17 }
 0x2e8   : > { %v3636_v15 = vadd.f32 %v3604_v30, %v3536_v59  ;;  %v3835_v34 = vadd.f32 %v3803_v53, %v3735_v32  ;;  %v4032_v58 = vadd.f32 %v4000_v36, %v3932_v51  ;;  %v4033_v57 = vadd.f32 %v4001_v31, %v3933_v4  ;;  %v4878_v30 = vld [vmem:[#allocation2 + $0x1a2] sm:$0xff]  ;;  %v8946_v53 = vld [vmem:[#allocation64_spill] sm:$0xff] }
 0x2e9   : > { %v3804_v19 = vmul.f32 %v8864_v55, %v3768_v45  ;;  %v4002_v2 = vmul.f32 %v8866_v37, %v3668_v54  ;;  %v3934_v13 = vadd.f32 %v3902_v0, %v3834_v14  ;;  %v4689_v1 = vpack.c.bf16 %v4131_v38, %v4131_v38  ;;  %v8945_v54 = vld [vmem:[#allocation3_spill] sm:$0xff] }
 0x2ea   : > { %v3736_v49 = vadd.f32 %v3704_v3, %v3636_v15  ;;  %v3935_v56 = vadd.f32 %v8944_v24, %v3835_v34  ;;  %v4132_v23 = vadd.f32 %v4100_v47, %v4032_v58  ;;  %v4133_v8 = vadd.f32 %v4101_v44, %v4033_v57 }
 0x2eb   : > { %v4004_v22 = vmul.f32 %v4877_v62, %v8866_v37  ;;  %v4102_v43 = vmul.f32 %v8843_v9, %v3768_v45  ;;  %v4034_v61 = vadd.f32 %v4002_v2, %v3934_v13  ;;  %4291 = vst.msk [vmem:[%s6735_s13 + $0x68] sm:$0xf] %vm1704_vm3, %v4689_v1  ;;  %v4104_v3 = vmul.f32 %v4878_v30, %v8843_v9  ;;  %v8947_v37 = vld [vmem:[#allocation39_spill] sm:$0xff] }
 0x2ec   : > { %v3836_v55 = vadd.f32 %v3804_v19, %v3736_v49  ;;  %v4035_v31 = vadd.f32 %v8945_v54, %v3935_v56  ;;  %v4690_v25 = vpack.c.bf16 %v4132_v23, %v4132_v23  ;;  %v4691_v63 = vpack.c.bf16 %v4133_v8, %v4133_v8 }
 0x2ed   : > { %v4134_v28 = vadd.f32 %v4102_v43, %v4034_v61 }
 0x2ee   : > { %v3936_v0 = vadd.f32 %v8946_v53, %v3836_v55  ;;  %v4135_v48 = vadd.f32 %v8947_v37, %v4035_v31  ;;  %4292 = vst.msk [vmem:[%s6735_s13 + $0x6c] sm:$0xf] %vm1704_vm3, %v4690_v25  ;;  %4293 = vst.msk [vmem:[%s6735_s13 + $0x70] sm:$0xf] %vm1704_vm3, %v4691_v63 }
 0x2ef   : > { %v4692_v16 = vpack.c.bf16 %v4134_v28, %v4134_v28 }
 0x2f0   : > { %v4036_v26 = vadd.f32 %v4004_v22, %v3936_v0  ;;  %v4693_v12 = vpack.c.bf16 %v4135_v48, %v4135_v48 }
 0x2f1   : > { %4294 = vst.msk [vmem:[%s6735_s13 + $0x74] sm:$0xf] %vm1704_vm3, %v4692_v16 }
 0x2f2   : > { %v4136_v17 = vadd.f32 %v4104_v3, %v4036_v26  ;;  %4295 = vst.msk [vmem:[%s6735_s13 + $0x78] sm:$0xf] %vm1704_vm3, %v4693_v12 }
 0x2f4   : > { %v4694_v39 = vpack.c.bf16 %v4136_v17, %v4136_v17 }
 0x2f6   : > { %4296 = vst.msk [vmem:[%s6735_s13 + $0x7c] sm:$0xf] %vm1704_vm3, %v4694_v39 }
 0x2f7 PF: > { %s18_s24 = sadd.s32 1, %s4885_s24  }
 0x2f8   : > { %p15_p4 = scmp.ge.s32.totalorder %s18_s24, 4  }
 0x2fa   :  { %17 = sbr.rel (!%p15_p4) target bundleno = 1 (0x1), region = 104 }

</bundles_post_ra>
